<compile_context>
chip_gen: v7x
topology: tpu7x:2x2x1
jax: 0.10.0
libtpu: 0.0.40
codegen_flags: <defaults>
</compile_context>

<pallas_src>
import jax
import jax.numpy as jnp
from jax.experimental import pallas as pl
from jax.experimental.pallas import tpu as pltpu

# ---- static configuration (mirrors WeatherGen.__init__) --------------------
IN_FEATURES = 64
UF_C, UF_H, UF_W = 8, 16, 256            # nn.Unflatten(1, (8, 16, 256)) -> NCHW
LIN_OUT = UF_C * UF_H * UF_W             # 32768
NUM_RES = 5                              # 5x ResConvGen (BatchNorm2d + ReLU)
BN_EPS = 1e-5

KH = KW = 3
C_IN = UF_C                              # see TODO(synk) about declared 128
C_OUT = 82
PAD_H, PAD_W = 0, 1                      # padding=(0, 1), padding_mode='circular'
H_OUT = UF_H - (KH - 1) + 2 * PAD_H      # 14
W_OUT = UF_W - (KW - 1) + 2 * PAD_W      # 256

CHW_FLAT = UF_H * UF_W                   # 4096 = one channel's flattened map
N_OUT_FLAT = H_OUT * UF_W                # 3584 (lane-dense conv output width)
K_IM2COL = KH * KW * C_IN                # 72
K_STACK = UF_C * IN_FEATURES             # 512 (block-diagonal linear contraction)


# ---------------------------------------------------------------------------
# Fused kernel: Linear + 5x(BN+ReLU) + circular taps + 3x3 conv, per batch item
# ---------------------------------------------------------------------------
def _weather_gen_kernel(xc_ref, wlin_ref, blin_ref, scale_ref, shift_ref,
                        wconv_ref, bconv_ref, o_ref):
    # Linear: (8, 512)bf16 @ (512, 4096)bf16 -> (8, 4096) f32, channel-per-row.
    y = jnp.dot(xc_ref[0], wlin_ref[...], preferred_element_type=jnp.float32)
    y = y + blin_ref[...]

    # 5x (BatchNorm2d eval + ReLU): per-channel (sublane-row) scale/shift.
    for l in range(NUM_RES):
        y = jnp.maximum(y * scale_ref[l] + shift_ref[l], 0.0)

    # Circular W taps (padding=(0,1), 'circular'), built in-kernel on the flat
    # (8, 4096) map.  np.roll semantics; wrap columns (w == 0 / 255) fixed via
    # a lane mask selecting from the complementary +/-255 roll.
    wcol = jax.lax.broadcasted_iota(jnp.int32, (C_IN, CHW_FLAT), 1) & (UF_W - 1)
    y_m1 = jnp.where(wcol == 0,                                   # kw = 0 tap
                     pltpu.roll(y, CHW_FLAT - (UF_W - 1), axis=1),
                     pltpu.roll(y, 1, axis=1))
    y_p1 = jnp.where(wcol == UF_W - 1,                            # kw = 2 tap
                     pltpu.roll(y, UF_W - 1, axis=1),
                     pltpu.roll(y, CHW_FLAT - 1, axis=1))

    # im2col (72, 3584): rows ordered kw-major, then kh, then input channel —
    # matches the (0, 3, 2, 1) weight transpose done at prep time.
    cols = []
    for tap in (y_m1, y, y_p1):                                   # kw = 0, 1, 2
        for kh in range(KH):
            cols.append(tap[:, kh * UF_W: kh * UF_W + N_OUT_FLAT])  # (8, 3584)
    im2col = jnp.concatenate(cols, axis=0)                        # (72, 3584)

    out = jnp.dot(wconv_ref[...], im2col, preferred_element_type=jnp.float32)
    o_ref[0] = (out + bconv_ref[...]).astype(o_ref.dtype)         # (82, 3584)


def weather_gen_forward(x, prep):
    B = x.shape[0]

    # Block-diagonal view of x: xc[b, c, c*64 + k] = x[b, k], zeros elsewhere,
    # so one (8, 512) @ (512, 4096) matmul yields the activation directly in
    # (channel, H*W) row layout.  Tiny (B * 8 KiB) host-side-free XLA op.
    eye = jnp.eye(UF_C, dtype=x.dtype)
    xc = (eye[None, :, :, None] * x[:, None, None, :]).reshape(B, UF_C, K_STACK)
    xc = xc.astype(jnp.bfloat16)

    out = pl.pallas_call(
        _weather_gen_kernel,
        out_shape=jax.ShapeDtypeStruct((B, C_OUT, N_OUT_FLAT), jnp.float32),
        grid=(B,),
        in_specs=[
            pl.BlockSpec((1, UF_C, K_STACK), lambda b: (b, 0, 0)),    # xc (bf16)
            pl.BlockSpec((K_STACK, CHW_FLAT), lambda b: (0, 0)),      # w_lin bf16, resident
            pl.BlockSpec((UF_C, CHW_FLAT), lambda b: (0, 0)),         # b_lin rows
            pl.BlockSpec((NUM_RES, UF_C, 1), lambda b: (0, 0, 0)),    # BN scale
            pl.BlockSpec((NUM_RES, UF_C, 1), lambda b: (0, 0, 0)),    # BN shift
            pl.BlockSpec((C_OUT, K_IM2COL), lambda b: (0, 0)),        # conv weight
            pl.BlockSpec((C_OUT, 1), lambda b: (0, 0)),               # conv bias
        ],
        out_specs=pl.BlockSpec((1, C_OUT, N_OUT_FLAT), lambda b: (b, 0, 0)),
        compiler_params=pltpu.CompilerParams(
            dimension_semantics=("parallel",),
            vmem_limit_bytes=32 * 1024 * 1024,
        ),
    )(xc, prep["w_lin"], prep["b_lin"], prep["scale"], prep["shift"],
      prep["w_conv"], prep["b_conv"])

    return out.reshape(B, C_OUT, H_OUT, W_OUT)                    # NCHW (B,82,14,256)


# ---------------------------------------------------------------------------
# One-time parameter preparation (bf16 cast + layout; NOT in the per-call path)
# ---------------------------------------------------------------------------
def prepare_params(p):
    # Eval-mode BN affine per layer/channel: y = x * scale + shift.
    scale = p["bn_gamma"] / jnp.sqrt(p["bn_var"] + BN_EPS)        # (5, 8)
    shift = p["bn_beta"] - p["bn_mean"] * scale                   # (5, 8)
    # Channel-stacked linear weight: row c*64 + k holds w_lin[k, c*4096 : ...].
    w_lin = (p["w_lin"].reshape(IN_FEATURES, UF_C, CHW_FLAT)
             .transpose(1, 0, 2)
             .reshape(K_STACK, CHW_FLAT)
             .astype(jnp.bfloat16))                               # (512, 4096) bf16
    b_lin = p["b_lin"].reshape(UF_C, CHW_FLAT)                    # (8, 4096) f32
    # Conv weight as (C_OUT, kw-major * kh * ci) im2col matrix; bias as column.
    w_conv = jnp.transpose(p["w_conv"], (0, 3, 2, 1)).reshape(C_OUT, K_IM2COL)
    b_conv = p["b_conv"].reshape(C_OUT, 1)
    return {
        "w_lin": w_lin,
        "b_lin": b_lin,
        "scale": scale.reshape(NUM_RES, UF_C, 1),
        "shift": shift.reshape(NUM_RES, UF_C, 1),
        "w_conv": w_conv,
        "b_conv": b_conv,
    }


# ---------------------------------------------------------------------------
# Pure-JAX reference (true f32 module semantics, for correctness check)
# ---------------------------------------------------------------------------
def reference_forward(x, p):
    y = x @ p["w_lin"] + p["b_lin"]
    y = y.reshape(x.shape[0], UF_C, UF_H, UF_W)
    for l in range(NUM_RES):
        g, b = p["bn_gamma"][l], p["bn_beta"][l]
        m, v = p["bn_mean"][l], p["bn_var"][l]
        y = (y - m[None, :, None, None]) / jnp.sqrt(v + BN_EPS)[None, :, None, None]
        y = y * g[None, :, None, None] + b[None, :, None, None]
        y = jnp.maximum(y, 0.0)
    y = jnp.transpose(y, (0, 2, 3, 1))
    y = jnp.concatenate([y[:, :, -PAD_W:, :], y, y[:, :, :PAD_W, :]], axis=2)
    w_hwio = jnp.transpose(p["w_conv"], (2, 3, 1, 0))
    out = jax.lax.conv_general_dilated(
        y, w_hwio, window_strides=(1, 1), padding="VALID",
        dimension_numbers=("NHWC", "HWIO", "NHWC"))
    out = out + p["b_conv"][None, None, None, :]
    return jnp.transpose(out, (0, 3, 1, 2))


def init_params(key):
    ks = jax.random.split(key, 8)
    lin_s = 1.0 / jnp.sqrt(jnp.float32(IN_FEATURES))
    conv_s = 1.0 / jnp.sqrt(jnp.float32(C_IN * KH * KW))
    return {
        "w_lin": jax.random.uniform(ks[0], (IN_FEATURES, LIN_OUT), jnp.float32,
                                    -lin_s, lin_s),
        "b_lin": jax.random.uniform(ks[1], (LIN_OUT,), jnp.float32, -lin_s, lin_s),
        "bn_gamma": jax.random.uniform(ks[2], (NUM_RES, C_IN), jnp.float32, 0.5, 1.5),
        "bn_beta": jax.random.normal(ks[3], (NUM_RES, C_IN), jnp.float32) * 0.1,
        "bn_mean": jax.random.normal(ks[4], (NUM_RES, C_IN), jnp.float32) * 0.1,
        "bn_var": jax.random.uniform(ks[5], (NUM_RES, C_IN), jnp.float32, 0.5, 1.5),
        "w_conv": jax.random.uniform(ks[6], (C_OUT, C_IN, KH, KW), jnp.float32,
                                     -conv_s, conv_s),
        "b_conv": jax.random.uniform(ks[7], (C_OUT,), jnp.float32, -conv_s, conv_s),
    }


if __name__ == "__main__":
    key = jax.random.PRNGKey(0)
    k_x, k_p = jax.random.split(key)
    B = 2
    x = jax.random.normal(k_x, (B, IN_FEATURES), jnp.float32)
    params = init_params(k_p)

    prep = prepare_params(params)            # one-time weight prep (bf16 cast)
    fwd = jax.jit(weather_gen_forward)
    out = jax.block_until_ready(fwd(x, prep))

    assert out.shape == (B, C_OUT, H_OUT, W_OUT), out.shape
    assert bool(jnp.all(jnp.isfinite(out)))

    # Tolerance covers the bf16 weight streaming (f32 MXU accumulation).
    ref = reference_forward(x, params)
    assert bool(jnp.allclose(out, ref, rtol=2e-2, atol=2e-2)), float(
        jnp.max(jnp.abs(out - ref))
    )

    print("KERNEL_OK")
</pallas_src>

<mosaic_0001>
module attributes {stable_mosaic.version = 11 : i64} {
  func.func @_weather_gen_kernel(%arg0: i32, %arg1: memref<1x8x512xbf16, #tpu.memory_space<vmem>>, %arg2: memref<512x4096xbf16, #tpu.memory_space<vmem>>, %arg3: memref<8x4096xf32, #tpu.memory_space<vmem>>, %arg4: memref<5x8x1xf32, #tpu.memory_space<vmem>>, %arg5: memref<5x8x1xf32, #tpu.memory_space<vmem>>, %arg6: memref<82x72xf32, #tpu.memory_space<vmem>>, %arg7: memref<82x1xf32, #tpu.memory_space<vmem>>, %arg8: memref<1x82x3584xf32, #tpu.memory_space<vmem>>) attributes {dimension_semantics = [#tpu.dimension_semantics<parallel>], iteration_bounds = array<i64: 2>, scalar_prefetch = 0 : i64, scratch_operands = 0 : i64, tpu.core_type = #tpu.core_type<tc>, window_params = [{transform_indices = @transform_0, window_bounds = array<i64: 1, 8, 512>}, {pipeline_mode = #tpu.pipeline_mode<synchronous>, transform_indices = @transform_1, window_bounds = array<i64: 512, 4096>}, {pipeline_mode = #tpu.pipeline_mode<synchronous>, transform_indices = @transform_2, window_bounds = array<i64: 8, 4096>}, {pipeline_mode = #tpu.pipeline_mode<synchronous>, transform_indices = @transform_3, window_bounds = array<i64: 5, 8, 1>}, {pipeline_mode = #tpu.pipeline_mode<synchronous>, transform_indices = @transform_4, window_bounds = array<i64: 5, 8, 1>}, {pipeline_mode = #tpu.pipeline_mode<synchronous>, transform_indices = @transform_5, window_bounds = array<i64: 82, 72>}, {pipeline_mode = #tpu.pipeline_mode<synchronous>, transform_indices = @transform_6, window_bounds = array<i64: 82, 1>}, {transform_indices = @transform_7, window_bounds = array<i64: 1, 82, 3584>}]} {
    %c0 = arith.constant 0 : index
    %c0_0 = arith.constant 0 : index
    %c0_1 = arith.constant 0 : index
    %0 = vector.load %arg1[%c0, %c0_0, %c0_1] : memref<1x8x512xbf16, #tpu.memory_space<vmem>>, vector<1x8x512xbf16>
    %1 = vector.shape_cast %0 : vector<1x8x512xbf16> to vector<8x512xbf16>
    %c0_2 = arith.constant 0 : index
    %c0_3 = arith.constant 0 : index
    %2 = vector.load %arg2[%c0_2, %c0_3] : memref<512x4096xbf16, #tpu.memory_space<vmem>>, vector<512x4096xbf16>
    %cst = arith.constant dense<0.000000e+00> : vector<8x4096xf32>
    %3 = tpu.matmul %1, %2, %cst {dimension_numbers = #tpu.dot_dimension_numbers<[1], [0], [0], [1], [0, 0, 1, 1], [], []>} : vector<8x512xbf16>, vector<512x4096xbf16>, vector<8x4096xf32> -> vector<8x4096xf32>
    %c0_4 = arith.constant 0 : index
    %c0_5 = arith.constant 0 : index
    %4 = vector.load %arg3[%c0_4, %c0_5] : memref<8x4096xf32, #tpu.memory_space<vmem>>, vector<8x4096xf32>
    %5 = arith.addf %3, %4 : vector<8x4096xf32>
    %c0_6 = arith.constant 0 : index
    %c0_7 = arith.constant 0 : index
    %c0_8 = arith.constant 0 : index
    %6 = vector.load %arg4[%c0_6, %c0_7, %c0_8] : memref<5x8x1xf32, #tpu.memory_space<vmem>>, vector<1x8x1xf32>
    %7 = vector.shape_cast %6 : vector<1x8x1xf32> to vector<8x1xf32>
    %8 = vector.broadcast %7 : vector<8x1xf32> to vector<8x4096xf32>
    %9 = arith.mulf %5, %8 : vector<8x4096xf32>
    %c0_9 = arith.constant 0 : index
    %c0_10 = arith.constant 0 : index
    %c0_11 = arith.constant 0 : index
    %10 = vector.load %arg5[%c0_9, %c0_10, %c0_11] : memref<5x8x1xf32, #tpu.memory_space<vmem>>, vector<1x8x1xf32>
    %11 = vector.shape_cast %10 : vector<1x8x1xf32> to vector<8x1xf32>
    %12 = vector.broadcast %11 : vector<8x1xf32> to vector<8x4096xf32>
    %13 = arith.addf %9, %12 : vector<8x4096xf32>
    %cst_12 = arith.constant 0.000000e+00 : f32
    %14 = vector.broadcast %cst_12 : f32 to vector<8x4096xf32>
    %15 = arith.maximumf %13, %14 : vector<8x4096xf32>
    %c1 = arith.constant 1 : index
    %c0_13 = arith.constant 0 : index
    %c0_14 = arith.constant 0 : index
    %16 = vector.load %arg4[%c1, %c0_13, %c0_14] : memref<5x8x1xf32, #tpu.memory_space<vmem>>, vector<1x8x1xf32>
    %17 = vector.shape_cast %16 : vector<1x8x1xf32> to vector<8x1xf32>
    %18 = vector.broadcast %17 : vector<8x1xf32> to vector<8x4096xf32>
    %19 = arith.mulf %15, %18 : vector<8x4096xf32>
    %c1_15 = arith.constant 1 : index
    %c0_16 = arith.constant 0 : index
    %c0_17 = arith.constant 0 : index
    %20 = vector.load %arg5[%c1_15, %c0_16, %c0_17] : memref<5x8x1xf32, #tpu.memory_space<vmem>>, vector<1x8x1xf32>
    %21 = vector.shape_cast %20 : vector<1x8x1xf32> to vector<8x1xf32>
    %22 = vector.broadcast %21 : vector<8x1xf32> to vector<8x4096xf32>
    %23 = arith.addf %19, %22 : vector<8x4096xf32>
    %cst_18 = arith.constant 0.000000e+00 : f32
    %24 = vector.broadcast %cst_18 : f32 to vector<8x4096xf32>
    %25 = arith.maximumf %23, %24 : vector<8x4096xf32>
    %c2 = arith.constant 2 : index
    %c0_19 = arith.constant 0 : index
    %c0_20 = arith.constant 0 : index
    %26 = vector.load %arg4[%c2, %c0_19, %c0_20] : memref<5x8x1xf32, #tpu.memory_space<vmem>>, vector<1x8x1xf32>
    %27 = vector.shape_cast %26 : vector<1x8x1xf32> to vector<8x1xf32>
    %28 = vector.broadcast %27 : vector<8x1xf32> to vector<8x4096xf32>
    %29 = arith.mulf %25, %28 : vector<8x4096xf32>
    %c2_21 = arith.constant 2 : index
    %c0_22 = arith.constant 0 : index
    %c0_23 = arith.constant 0 : index
    %30 = vector.load %arg5[%c2_21, %c0_22, %c0_23] : memref<5x8x1xf32, #tpu.memory_space<vmem>>, vector<1x8x1xf32>
    %31 = vector.shape_cast %30 : vector<1x8x1xf32> to vector<8x1xf32>
    %32 = vector.broadcast %31 : vector<8x1xf32> to vector<8x4096xf32>
    %33 = arith.addf %29, %32 : vector<8x4096xf32>
    %cst_24 = arith.constant 0.000000e+00 : f32
    %34 = vector.broadcast %cst_24 : f32 to vector<8x4096xf32>
    %35 = arith.maximumf %33, %34 : vector<8x4096xf32>
    %c3 = arith.constant 3 : index
    %c0_25 = arith.constant 0 : index
    %c0_26 = arith.constant 0 : index
    %36 = vector.load %arg4[%c3, %c0_25, %c0_26] : memref<5x8x1xf32, #tpu.memory_space<vmem>>, vector<1x8x1xf32>
    %37 = vector.shape_cast %36 : vector<1x8x1xf32> to vector<8x1xf32>
    %38 = vector.broadcast %37 : vector<8x1xf32> to vector<8x4096xf32>
    %39 = arith.mulf %35, %38 : vector<8x4096xf32>
    %c3_27 = arith.constant 3 : index
    %c0_28 = arith.constant 0 : index
    %c0_29 = arith.constant 0 : index
    %40 = vector.load %arg5[%c3_27, %c0_28, %c0_29] : memref<5x8x1xf32, #tpu.memory_space<vmem>>, vector<1x8x1xf32>
    %41 = vector.shape_cast %40 : vector<1x8x1xf32> to vector<8x1xf32>
    %42 = vector.broadcast %41 : vector<8x1xf32> to vector<8x4096xf32>
    %43 = arith.addf %39, %42 : vector<8x4096xf32>
    %cst_30 = arith.constant 0.000000e+00 : f32
    %44 = vector.broadcast %cst_30 : f32 to vector<8x4096xf32>
    %45 = arith.maximumf %43, %44 : vector<8x4096xf32>
    %c4 = arith.constant 4 : index
    %c0_31 = arith.constant 0 : index
    %c0_32 = arith.constant 0 : index
    %46 = vector.load %arg4[%c4, %c0_31, %c0_32] : memref<5x8x1xf32, #tpu.memory_space<vmem>>, vector<1x8x1xf32>
    %47 = vector.shape_cast %46 : vector<1x8x1xf32> to vector<8x1xf32>
    %48 = vector.broadcast %47 : vector<8x1xf32> to vector<8x4096xf32>
    %49 = arith.mulf %45, %48 : vector<8x4096xf32>
    %c4_33 = arith.constant 4 : index
    %c0_34 = arith.constant 0 : index
    %c0_35 = arith.constant 0 : index
    %50 = vector.load %arg5[%c4_33, %c0_34, %c0_35] : memref<5x8x1xf32, #tpu.memory_space<vmem>>, vector<1x8x1xf32>
    %51 = vector.shape_cast %50 : vector<1x8x1xf32> to vector<8x1xf32>
    %52 = vector.broadcast %51 : vector<8x1xf32> to vector<8x4096xf32>
    %53 = arith.addf %49, %52 : vector<8x4096xf32>
    %cst_36 = arith.constant 0.000000e+00 : f32
    %54 = vector.broadcast %cst_36 : f32 to vector<8x4096xf32>
    %55 = arith.maximumf %53, %54 : vector<8x4096xf32>
    %56 = tpu.iota {dimensions = array<i32: 1>} : vector<8x4096xi32>
    %c255_i32 = arith.constant 255 : i32
    %57 = vector.broadcast %c255_i32 : i32 to vector<8x4096xi32>
    %58 = arith.andi %56, %57 : vector<8x4096xi32>
    %c0_i32 = arith.constant 0 : i32
    %59 = vector.broadcast %c0_i32 : i32 to vector<8x4096xi32>
    %60 = arith.cmpi eq, %58, %59 : vector<8x4096xi32>
    %c3841_i32 = arith.constant 3841 : i32
    %61 = tpu.dynamic_rotate %55 by %c3841_i32 dim 1 : vector<8x4096xf32>, i32 -> vector<8x4096xf32>
    %c1_i32 = arith.constant 1 : i32
    %62 = tpu.dynamic_rotate %55 by %c1_i32 dim 1 : vector<8x4096xf32>, i32 -> vector<8x4096xf32>
    %63 = arith.select %60, %61, %62 : vector<8x4096xi1>, vector<8x4096xf32>
    %c255_i32_37 = arith.constant 255 : i32
    %64 = vector.broadcast %c255_i32_37 : i32 to vector<8x4096xi32>
    %65 = arith.cmpi eq, %58, %64 : vector<8x4096xi32>
    %c255_i32_38 = arith.constant 255 : i32
    %66 = tpu.dynamic_rotate %55 by %c255_i32_38 dim 1 : vector<8x4096xf32>, i32 -> vector<8x4096xf32>
    %c4095_i32 = arith.constant 4095 : i32
    %67 = tpu.dynamic_rotate %55 by %c4095_i32 dim 1 : vector<8x4096xf32>, i32 -> vector<8x4096xf32>
    %68 = arith.select %65, %66, %67 : vector<8x4096xi1>, vector<8x4096xf32>
    %69 = vector.extract_strided_slice %63 {offsets = [0, 0], sizes = [8, 3584], strides = [1, 1]} : vector<8x4096xf32> to vector<8x3584xf32>
    %70 = vector.extract_strided_slice %63 {offsets = [0, 256], sizes = [8, 3584], strides = [1, 1]} : vector<8x4096xf32> to vector<8x3584xf32>
    %71 = vector.extract_strided_slice %63 {offsets = [0, 512], sizes = [8, 3584], strides = [1, 1]} : vector<8x4096xf32> to vector<8x3584xf32>
    %72 = vector.extract_strided_slice %55 {offsets = [0, 0], sizes = [8, 3584], strides = [1, 1]} : vector<8x4096xf32> to vector<8x3584xf32>
    %73 = vector.extract_strided_slice %55 {offsets = [0, 256], sizes = [8, 3584], strides = [1, 1]} : vector<8x4096xf32> to vector<8x3584xf32>
    %74 = vector.extract_strided_slice %55 {offsets = [0, 512], sizes = [8, 3584], strides = [1, 1]} : vector<8x4096xf32> to vector<8x3584xf32>
    %75 = vector.extract_strided_slice %68 {offsets = [0, 0], sizes = [8, 3584], strides = [1, 1]} : vector<8x4096xf32> to vector<8x3584xf32>
    %76 = vector.extract_strided_slice %68 {offsets = [0, 256], sizes = [8, 3584], strides = [1, 1]} : vector<8x4096xf32> to vector<8x3584xf32>
    %77 = vector.extract_strided_slice %68 {offsets = [0, 512], sizes = [8, 3584], strides = [1, 1]} : vector<8x4096xf32> to vector<8x3584xf32>
    %78 = tpu.concatenate %69, %70, %71, %72, %73, %74, %75, %76, %77 in 0 : vector<8x3584xf32>, vector<8x3584xf32>, vector<8x3584xf32>, vector<8x3584xf32>, vector<8x3584xf32>, vector<8x3584xf32>, vector<8x3584xf32>, vector<8x3584xf32>, vector<8x3584xf32> -> vector<72x3584xf32>
    %c0_39 = arith.constant 0 : index
    %c0_40 = arith.constant 0 : index
    %79 = vector.load %arg6[%c0_39, %c0_40] : memref<82x72xf32, #tpu.memory_space<vmem>>, vector<82x72xf32>
    %cst_41 = arith.constant dense<0.000000e+00> : vector<82x3584xf32>
    %80 = tpu.matmul %79, %78, %cst_41 {dimension_numbers = #tpu.dot_dimension_numbers<[1], [0], [0], [1], [0, 0, 1, 1], [], []>} : vector<82x72xf32>, vector<72x3584xf32>, vector<82x3584xf32> -> vector<82x3584xf32>
    %c0_42 = arith.constant 0 : index
    %c0_43 = arith.constant 0 : index
    %81 = vector.load %arg7[%c0_42, %c0_43] : memref<82x1xf32, #tpu.memory_space<vmem>>, vector<82x1xf32>
    %82 = vector.broadcast %81 : vector<82x1xf32> to vector<82x3584xf32>
    %83 = arith.addf %80, %82 : vector<82x3584xf32>
    %c0_44 = arith.constant 0 : index
    %c0_45 = arith.constant 0 : index
    %c0_46 = arith.constant 0 : index
    %84 = vector.load %arg8[%c0_44, %c0_45, %c0_46] : memref<1x82x3584xf32, #tpu.memory_space<vmem>>, vector<1x82x3584xf32>
    %85 = vector.shape_cast %84 : vector<1x82x3584xf32> to vector<82x3584xf32>
    %86 = vector.shape_cast %83 : vector<82x3584xf32> to vector<1x82x3584xf32>
    tpu.vector_store %arg8[%c0_44, %c0_45, %c0_46], %86 {strides = array<i32>} : memref<1x82x3584xf32, #tpu.memory_space<vmem>>, vector<1x82x3584xf32>,
    return
  }
  func.func @transform_0(%arg0: i32) -> (i32, i32, i32) {
    %c0_i32 = arith.constant 0 : i32
    %c0_i32_0 = arith.constant 0 : i32
    %c0_i32_1 = arith.constant 0 : i32
    return %arg0, %c0_i32, %c0_i32_0 : i32, i32, i32
  }
  func.func @transform_1(%arg0: i32) -> (i32, i32) {
    %c0_i32 = arith.constant 0 : i32
    %c0_i32_0 = arith.constant 0 : i32
    %c0_i32_1 = arith.constant 0 : i32
    return %c0_i32, %c0_i32_0 : i32, i32
  }
  func.func @transform_2(%arg0: i32) -> (i32, i32) {
    %c0_i32 = arith.constant 0 : i32
    %c0_i32_0 = arith.constant 0 : i32
    %c0_i32_1 = arith.constant 0 : i32
    return %c0_i32, %c0_i32_0 : i32, i32
  }
  func.func @transform_3(%arg0: i32) -> (i32, i32, i32) {
    %c0_i32 = arith.constant 0 : i32
    %c0_i32_0 = arith.constant 0 : i32
    %c0_i32_1 = arith.constant 0 : i32
    %c0_i32_2 = arith.constant 0 : i32
    return %c0_i32, %c0_i32_0, %c0_i32_1 : i32, i32, i32
  }
  func.func @transform_4(%arg0: i32) -> (i32, i32, i32) {
    %c0_i32 = arith.constant 0 : i32
    %c0_i32_0 = arith.constant 0 : i32
    %c0_i32_1 = arith.constant 0 : i32
    %c0_i32_2 = arith.constant 0 : i32
    return %c0_i32, %c0_i32_0, %c0_i32_1 : i32, i32, i32
  }
  func.func @transform_5(%arg0: i32) -> (i32, i32) {
    %c0_i32 = arith.constant 0 : i32
    %c0_i32_0 = arith.constant 0 : i32
    %c0_i32_1 = arith.constant 0 : i32
    return %c0_i32, %c0_i32_0 : i32, i32
  }
  func.func @transform_6(%arg0: i32) -> (i32, i32) {
    %c0_i32 = arith.constant 0 : i32
    %c0_i32_0 = arith.constant 0 : i32
    %c0_i32_1 = arith.constant 0 : i32
    return %c0_i32, %c0_i32_0 : i32, i32
  }
  func.func @transform_7(%arg0: i32) -> (i32, i32, i32) {
    %c0_i32 = arith.constant 0 : i32
    %c0_i32_0 = arith.constant 0 : i32
    %c0_i32_1 = arith.constant 0 : i32
    return %arg0, %c0_i32, %c0_i32_0 : i32, i32, i32
  }
}

</mosaic_0001>

<bundles_post_ra>
// kernel: weather_gen_forward.1
= control target key start
LH: loop header
LB: loop body
LE: loop exit
PB: predicated region body
PF: predicated region fallthrough
CT: control target
= control target key end

     0   :  { %12 = vsyncpa [#allocation3], 0  ;;  %s15651_s0 = inlined_call_operand.vmem [shape: bf16[2,8,512], index: 0, kind: input, shape index: {}]   ;;  %s15652_s1 = inlined_call_operand.hbm [shape: bf16[512,4096], index: 1, kind: input, shape index: {}]   ;;  %s15653_s2 = inlined_call_operand.hbm [shape: f32[8,4096], index: 2, kind: input, shape index: {}]   ;;  %s15654_s3 = inlined_call_operand.vmem [shape: f32[5,8,1], index: 3, kind: input, shape index: {}]   ;;  %s15655_s4 = inlined_call_operand.vmem [shape: f32[5,8,1], index: 4, kind: input, shape index: {}]   ;;  %s15656_s5 = inlined_call_operand.vmem [shape: f32[82,72], index: 5, kind: input, shape index: {}]   ;;  %s15657_s6 = inlined_call_operand.vmem [shape: f32[82,1], index: 6, kind: input, shape index: {}]   ;;  %s15658_s7 = inlined_call_operand.vmem [shape: f32[2,82,3584], index: 7, kind: output, shape index: {}]  }
   0x1   :  { %13 = vsyncpa [#allocation5], 0  ;;  %s12859_s24 = smov 0  }
   0x2 LB: > { %s12865_s25 = sadd.s32 4294967295, %s12809_s24   ;;  %p11078_p0 = scmp.ge.s32.totalorder %s12809_s24, 1  ;;  %s12809_s24 = sphi %s12859_s24, %s19_s24  }
   0x3   : > { %p202_p1 = scmp.lt.s32.totalorder %s12809_s24, 3  ;;  %s12811_s26 = smov [#allocation2]  }
   0x4   : > { %s214_s27 = sshll.u32 %s12811_s26, 4  ;;  %p15659_p3 = scmp.eq.s32.totalorder %s12865_s25, 0  ;;  %s215_s27 = int_to_ptr.vmem [resolvable:$true] %s214_s27 }
   0x5   : > { %p12869_p2 = pnand %p11078_p0, %p202_p1  ;;  %s12812_s29 = smov [#allocation4]  }
   0x6   : > { %s228_s30 = sshll.u32 %s12812_s29, 4  ;;  %s12739_s11 = scalar_lea.hbm %s15652_s1, 131072  ;;  %s12882_s30 = int_to_ptr.vmem [resolvable:$true] %s228_s30 }
   0x7   : > { %s15681_s28 = scalar_select %p12869_p2, 1, 0 }
   0x8   : > { %p12610_p4 = pneg %p12869_p2  ;;  %p12740_p6 = scmp.ne.s32.totalorder %s15652_s1, %s12739_s11 }
   0x9   : > { %p12746_p10 = scmp.lt.u32.totalorder %s12739_s11, %s15652_s1 }
   0xa   : > { %p12878_p5 = pnand %p15659_p3, %p12610_p4 }
   0xc   : > { %p12741_p7 = pneg %p12878_p5 }
   0xe   : > { %p12742_p8 = pnand %p12741_p7, %p12740_p6 }
  0x10   : > { %p12743_p9 = pneg %p12742_p8 }
  0x12   : > { %p12748_p11 = pnand %p12746_p10, %p12743_p9 }
  0x14   : > { %12751 = shalt.err (!%p12748_p11)
}
  0x15   : > { %s12752_s16 = scalar_lea.vmem %s215_s27, 131072  ;;  %p12760_p1 = scmp.lt.s32.totalorder %s215_s27, %s215_s27 }
  0x16   : > { %p12753_p12 = scmp.ne.s32.totalorder %s215_s27, %s12752_s16  ;;  %p12761_p4 = scmp.lt.s32.totalorder %s12752_s16, %s12752_s16 }
  0x18   : > { %p12755_p13 = pnand %p12753_p12, %p12741_p7  ;;  %p12762_p3 = por %p12761_p4, %p12760_p1 }
  0x1a   : > { %p12756_p0 = pneg %p12755_p13 }
  0x1c   : > { %p12763_p2 = pnand %p12762_p3, %p12756_p0 }
  0x1e   : > { %12766 = shalt.err (!%p12763_p2)
}
  0x1f   : > { %s12813_s17 = smov 2048   ;;  %s12814_s18 = smov 128  }
  0x20   : > { %12613 = dma.hbm_to_vmem [thread:$0]  (!%p12878_p5), %s15652_s1, 131072, %s215_s27, [#allocation3], %s12813_s17, %s12813_s17, %s12814_s18  }
  0x21   : > { %s12767_s23 = scalar_lea.hbm %s15653_s2, 4096 }
  0x22   : > { %p12768_p6 = scmp.ne.s32.totalorder %s15653_s2, %s12767_s23  ;;  %p12774_p8 = scmp.lt.u32.totalorder %s12767_s23, %s15653_s2 }
  0x24   : > { %p12770_p2 = pnand %p12768_p6, %p12741_p7 }
  0x26   : > { %p12771_p3 = pneg %p12770_p2 }
  0x28   : > { %p12776_p9 = pnand %p12774_p8, %p12771_p3 }
  0x2a   : > { %12779 = shalt.err (!%p12776_p9)
}
  0x2b   : > { %s12780_s27 = scalar_lea.vmem %s12882_s30, 4096  ;;  %p12788_p13 = scmp.lt.s32.totalorder %s12882_s30, %s12882_s30 }
  0x2c   : > { %p12781_p10 = scmp.ne.s32.totalorder %s12882_s30, %s12780_s27  ;;  %p12789_p0 = scmp.lt.s32.totalorder %s12780_s27, %s12780_s27 }
  0x2e   : > { %p12783_p11 = pnand %p12781_p10, %p12741_p7  ;;  %p12790_p1 = por %p12789_p0, %p12788_p13 }
  0x30   : > { %p12784_p12 = pneg %p12783_p11 }
  0x32   : > { %p12791_p4 = pnand %p12790_p1, %p12784_p12 }
  0x34   : > { %12794 = shalt.err (!%p12791_p4)
}
  0x35   : > { %12616 = dma.hbm_to_vmem [thread:$0]  (!%p12878_p5), %s15653_s2, 4096, %s12882_s30, [#allocation5]  }
  0x36   : > { %p15683_p6 = scmp.ne.s32.totalorder %s15681_s28, 0 }
  0x38   : > { %261 = sbr.rel (%p15683_p6) target bundleno = 2003 (0x7d3), region = 48 }
  0x3f   : > { %p15684_p2 = scmp.eq.s32.totalorder %s12865_s25, 0 }
  0x41   : > { %12800 = dma.done.wait (%p15684_p2), [#allocation3], 131072   ;;  %p15685_p7 = pmov %p15684_p2 }
  0x42   : > { %p15686_p3 = pmov %p15684_p2 }
  0x43   : > { %12802 = vsyncadd (%p15685_p7), [#allocation3], 4294836224 }
  0x44   : > { %12804 = dma.done.wait (%p15686_p3), [#allocation5], 4096   ;;  %p15687_p8 = pmov %p15684_p2 }
  0x45   : > { %v309_v0 = vld [vmem:[#allocation2] sm:$0xff]  ;;  %v310_v2 = vld [vmem:[#allocation2 + $0x8] sm:$0xff]  ;;  %p297_p5 = scmp.lt.s32.totalorder %s12865_s25, 1  ;;  %s12817_s14 = smov 1   ;;  %vm8823_vm11 = vcmask 588800  }
  0x46   : > { %12806 = vsyncadd (%p15687_p8), [#allocation5], 4294963200  ;;  %v325_v1 = vld [vmem:[#allocation2 + $0x80] sm:$0xff]  ;;  %v326_v4 = vld [vmem:[#allocation2 + $0x88] sm:$0xff] }
  0x47   : > { %v11093_v3 = vcombine.high %v309_v0, %v325_v1  ;;  %v11092_v5 = vcombine.low %v309_v0, %v325_v1  ;;  %v341_v6 = vld [vmem:[#allocation2 + $0x100] sm:$0xff]  ;;  %v11095_v8 = vcombine.high %v310_v2, %v326_v4  ;;  %v11094_v9 = vcombine.low %v310_v2, %v326_v4  ;;  %v342_v11 = vld [vmem:[#allocation2 + $0x108] sm:$0xff]  ;;  %s15723_s25 = smov (!%p297_p5, %s12865_s25), 1 }
  0x48   : > { %v357_v7 = vld [vmem:[#allocation2 + $0x180] sm:$0xff]  ;;  %v358_v12 = vld [vmem:[#allocation2 + $0x188] sm:$0xff]  ;;  %s12280_s28 = sshll.u32 %s15723_s25, 4  ;;  %s12601_s17 = smul.u32 2464, %s15723_s25 }
  0x49   : > { %v11125_v10 = vcombine.high %v341_v6, %v357_v7  ;;  %v373_v13 = vld [vmem:[#allocation2 + $0x200] sm:$0xff]  ;;  %6499 = vmatprep.subr.bf16.mxu0 %v11093_v3  ;;  %v11127_v14 = vcombine.high %v342_v11, %v358_v12  ;;  %v374_v16 = vld [vmem:[#allocation2 + $0x208] sm:$0xff]  ;;  %6581 = vmatprep.subr.bf16.mxu1 %v11095_v8  ;;  %v11124_v18 = vcombine.low %v341_v6, %v357_v7  ;;  %s12949_s13 = scalar_lea.vmem %s15651_s0, %s12280_s28 }
  0x4a   : > { %v389_v15 = vld [vmem:[#allocation2 + $0x280] sm:$0xff]  ;;  %v390_v17 = vld [vmem:[#allocation2 + $0x288] sm:$0xff]  ;;  %6500 = vmatpush1.bf16.msra.mxu0 %v11092_v5  ;;  %6582 = vmatpush1.bf16.msra.mxu1 %v11094_v9  ;;  %v11126_v19 = vcombine.low %v342_v11, %v358_v12  ;;  %s14738_s25 = scalar_lea.vmem %s15658_s7, %s12601_s17 }
  0x4b   : > { %6501 = vmatprep.subr.bf16.mxu0 %v11125_v10  ;;  %v11157_v20 = vcombine.high %v373_v13, %v389_v15  ;;  %6583 = vmatprep.subr.bf16.mxu1 %v11127_v14  ;;  %v11159_v21 = vcombine.high %v374_v16, %v390_v17  ;;  %v405_v22 = vld [vmem:[#allocation2 + $0x300] sm:$0xff]  ;;  %v406_v24 = vld [vmem:[#allocation2 + $0x308] sm:$0xff]  ;;  %v11156_v26 = vcombine.low %v373_v13, %v389_v15 }
  0x4c   : > { %v421_v23 = vld [vmem:[#allocation2 + $0x380] sm:$0xff]  ;;  %v422_v25 = vld [vmem:[#allocation2 + $0x388] sm:$0xff]  ;;  %v11158_v27 = vcombine.low %v374_v16, %v390_v17 }
  0x4d   : > { %v11189_v28 = vcombine.high %v405_v22, %v421_v23  ;;  %v11191_v29 = vcombine.high %v406_v24, %v422_v25  ;;  %v437_v30 = vld [vmem:[#allocation2 + $0x400] sm:$0xff]  ;;  %v438_v32 = vld [vmem:[#allocation2 + $0x408] sm:$0xff]  ;;  %v11188_v34 = vcombine.low %v405_v22, %v421_v23  ;;  %v11190_v35 = vcombine.low %v406_v24, %v422_v25 }
  0x4e   : > { %6502 = vmatpush1.bf16.msra.mxu0 %v11124_v18  ;;  %6584 = vmatpush1.bf16.msra.mxu1 %v11126_v19  ;;  %v453_v31 = vld [vmem:[#allocation2 + $0x480] sm:$0xff]  ;;  %v454_v33 = vld [vmem:[#allocation2 + $0x488] sm:$0xff] }
  0x4f   : > { %6503 = vmatprep.subr.bf16.mxu0 %v11157_v20  ;;  %6585 = vmatprep.subr.bf16.mxu1 %v11159_v21  ;;  %v11221_v36 = vcombine.high %v437_v30, %v453_v31  ;;  %v11223_v37 = vcombine.high %v438_v32, %v454_v33  ;;  %v469_v38 = vld [vmem:[#allocation2 + $0x500] sm:$0xff]  ;;  %v470_v40 = vld [vmem:[#allocation2 + $0x508] sm:$0xff]  ;;  %v11220_v42 = vcombine.low %v437_v30, %v453_v31 }
  0x50   : > { %v485_v39 = vld [vmem:[#allocation2 + $0x580] sm:$0xff]  ;;  %v486_v41 = vld [vmem:[#allocation2 + $0x588] sm:$0xff]  ;;  %v11222_v43 = vcombine.low %v438_v32, %v454_v33 }
  0x51   : > { %v11253_v44 = vcombine.high %v469_v38, %v485_v39  ;;  %v11255_v45 = vcombine.high %v470_v40, %v486_v41  ;;  %v501_v46 = vld [vmem:[#allocation2 + $0x600] sm:$0xff]  ;;  %v502_v48 = vld [vmem:[#allocation2 + $0x608] sm:$0xff]  ;;  %v11252_v50 = vcombine.low %v469_v38, %v485_v39  ;;  %v11254_v51 = vcombine.low %v470_v40, %v486_v41 }
  0x52   : > { %6504 = vmatpush1.bf16.msra.mxu0 %v11156_v26  ;;  %6586 = vmatpush1.bf16.msra.mxu1 %v11158_v27  ;;  %v517_v47 = vld [vmem:[#allocation2 + $0x680] sm:$0xff]  ;;  %v518_v49 = vld [vmem:[#allocation2 + $0x688] sm:$0xff] }
  0x53   : > { %6505 = vmatprep.subr.bf16.mxu0 %v11189_v28  ;;  %6587 = vmatprep.subr.bf16.mxu1 %v11191_v29  ;;  %v11285_v52 = vcombine.high %v501_v46, %v517_v47  ;;  %v12952_v53 = vld [vmem:[%s12949_s13] sm:$0xff]  ;;  %v11287_v54 = vcombine.high %v502_v48, %v518_v49  ;;  %v534_v58 = vld [vmem:[#allocation2 + $0x708] sm:$0xff]  ;;  %v11284_v60 = vcombine.low %v501_v46, %v517_v47 }
  0x54   : > { %v533_v55 = vld [vmem:[#allocation2 + $0x700] sm:$0xff]  ;;  %v12956_v57 = vcombine.high %v12952_v53, %v12952_v53  ;;  %v550_v59 = vld [vmem:[#allocation2 + $0x788] sm:$0xff]  ;;  %v11286_v61 = vcombine.low %v502_v48, %v518_v49 }
  0x55   : > { %v549_v56 = vld [vmem:[#allocation2 + $0x780] sm:$0xff]  ;;  %v11319_v63 = vcombine.high %v534_v58, %v550_v59  ;;  %v566_v2 = vld [vmem:[#allocation2 + $0x808] sm:$0xff]  ;;  %v11318_v5 = vcombine.low %v534_v58, %v550_v59 }
  0x56   : > { %6506 = vmatpush1.bf16.msra.mxu0 %v11188_v34  ;;  %6588 = vmatpush1.bf16.msra.mxu1 %v11190_v35  ;;  %v11317_v62 = vcombine.high %v533_v55, %v549_v56  ;;  %v565_v0 = vld [vmem:[#allocation2 + $0x800] sm:$0xff]  ;;  %v582_v3 = vld [vmem:[#allocation2 + $0x888] sm:$0xff]  ;;  %v11316_v4 = vcombine.low %v533_v55, %v549_v56 }
  0x57   : > { %6507 = vmatprep.subr.bf16.mxu0 %v11221_v36  ;;  %6589 = vmatprep.subr.bf16.mxu1 %v11223_v37  ;;  %v581_v1 = vld [vmem:[#allocation2 + $0x880] sm:$0xff]  ;;  %v11351_v7 = vcombine.high %v566_v2, %v582_v3  ;;  %v598_v10 = vld [vmem:[#allocation2 + $0x908] sm:$0xff]  ;;  %v11350_v13 = vcombine.low %v566_v2, %v582_v3 }
  0x58   : > { %6531 = vmatprep.mubr.bf16.mxu0 %v12956_v57  ;;  %6613 = vmatprep.mubr.bf16.mxu1 %v12956_v57  ;;  %v11349_v6 = vcombine.high %v565_v0, %v581_v1  ;;  %v597_v8 = vld [vmem:[#allocation2 + $0x900] sm:$0xff]  ;;  %v614_v11 = vld [vmem:[#allocation2 + $0x988] sm:$0xff]  ;;  %v11348_v12 = vcombine.low %v565_v0, %v581_v1 }
  0x59   : > { %v613_v9 = vld [vmem:[#allocation2 + $0x980] sm:$0xff]  ;;  %v11383_v15 = vcombine.high %v598_v10, %v614_v11  ;;  %v630_v18 = vld [vmem:[#allocation2 + $0xa08] sm:$0xff]  ;;  %v11382_v21 = vcombine.low %v598_v10, %v614_v11 }
  0x5a   : > { %6508 = vmatpush1.bf16.msra.mxu0 %v11220_v42  ;;  %6590 = vmatpush1.bf16.msra.mxu1 %v11222_v43  ;;  %v11381_v14 = vcombine.high %v597_v8, %v613_v9  ;;  %v629_v16 = vld [vmem:[#allocation2 + $0xa00] sm:$0xff]  ;;  %v646_v19 = vld [vmem:[#allocation2 + $0xa88] sm:$0xff]  ;;  %v11380_v20 = vcombine.low %v597_v8, %v613_v9 }
  0x5b   : > { %6509 = vmatprep.subr.bf16.mxu0 %v11253_v44  ;;  %6591 = vmatprep.subr.bf16.mxu1 %v11255_v45  ;;  %v645_v17 = vld [vmem:[#allocation2 + $0xa80] sm:$0xff]  ;;  %v11415_v23 = vcombine.high %v630_v18, %v646_v19  ;;  %v662_v26 = vld [vmem:[#allocation2 + $0xb08] sm:$0xff]  ;;  %v11414_v29 = vcombine.low %v630_v18, %v646_v19 }
  0x5c   : > { %v11413_v22 = vcombine.high %v629_v16, %v645_v17  ;;  %v661_v24 = vld [vmem:[#allocation2 + $0xb00] sm:$0xff]  ;;  %v678_v27 = vld [vmem:[#allocation2 + $0xb88] sm:$0xff]  ;;  %v11412_v28 = vcombine.low %v629_v16, %v645_v17 }
  0x5d   : > { %v677_v25 = vld [vmem:[#allocation2 + $0xb80] sm:$0xff]  ;;  %v11447_v31 = vcombine.high %v662_v26, %v678_v27  ;;  %v694_v34 = vld [vmem:[#allocation2 + $0xc08] sm:$0xff]  ;;  %v11446_v37 = vcombine.low %v662_v26, %v678_v27 }
  0x5e   : > { %6510 = vmatpush1.bf16.msra.mxu0 %v11252_v50  ;;  %6592 = vmatpush1.bf16.msra.mxu1 %v11254_v51  ;;  %v11445_v30 = vcombine.high %v661_v24, %v677_v25  ;;  %v693_v32 = vld [vmem:[#allocation2 + $0xc00] sm:$0xff]  ;;  %v710_v35 = vld [vmem:[#allocation2 + $0xc88] sm:$0xff]  ;;  %v11444_v36 = vcombine.low %v661_v24, %v677_v25 }
  0x5f   : > { %6511 = vmatprep.subr.bf16.mxu0 %v11285_v52  ;;  %6593 = vmatprep.subr.bf16.mxu1 %v11287_v54  ;;  %v709_v33 = vld [vmem:[#allocation2 + $0xc80] sm:$0xff]  ;;  %v11479_v39 = vcombine.high %v694_v34, %v710_v35  ;;  %v726_v42 = vld [vmem:[#allocation2 + $0xd08] sm:$0xff]  ;;  %v11478_v45 = vcombine.low %v694_v34, %v710_v35 }
  0x60   : > { %v11477_v38 = vcombine.high %v693_v32, %v709_v33  ;;  %v725_v40 = vld [vmem:[#allocation2 + $0xd00] sm:$0xff]  ;;  %v742_v43 = vld [vmem:[#allocation2 + $0xd88] sm:$0xff]  ;;  %v11476_v44 = vcombine.low %v693_v32, %v709_v33 }
  0x61   : > { %v741_v41 = vld [vmem:[#allocation2 + $0xd80] sm:$0xff]  ;;  %v11511_v47 = vcombine.high %v726_v42, %v742_v43  ;;  %v758_v50 = vld [vmem:[#allocation2 + $0xe08] sm:$0xff]  ;;  %v11510_v54 = vcombine.low %v726_v42, %v742_v43 }
  0x62   : > { %6512 = vmatpush1.bf16.msra.mxu0 %v11284_v60  ;;  %6594 = vmatpush1.bf16.msra.mxu1 %v11286_v61  ;;  %v11509_v46 = vcombine.high %v725_v40, %v741_v41  ;;  %v757_v48 = vld [vmem:[#allocation2 + $0xe00] sm:$0xff]  ;;  %v774_v51 = vld [vmem:[#allocation2 + $0xe88] sm:$0xff]  ;;  %v11508_v52 = vcombine.low %v725_v40, %v741_v41 }
  0x63   : > { %6513 = vmatprep.subr.bf16.mxu0 %v11317_v62  ;;  %6595 = vmatprep.subr.bf16.mxu1 %v11319_v63  ;;  %v773_v49 = vld [vmem:[#allocation2 + $0xe80] sm:$0xff]  ;;  %v11543_v56 = vcombine.high %v758_v50, %v774_v51  ;;  %v790_v60 = vld [vmem:[#allocation2 + $0xf08] sm:$0xff]  ;;  %v11542_v63 = vcombine.low %v758_v50, %v774_v51 }
  0x64   : > { %v11541_v55 = vcombine.high %v757_v48, %v773_v49  ;;  %v789_v58 = vld [vmem:[#allocation2 + $0xf00] sm:$0xff]  ;;  %v806_v61 = vld [vmem:[#allocation2 + $0xf88] sm:$0xff]  ;;  %v11540_v62 = vcombine.low %v757_v48, %v773_v49 }
  0x65   : > { %v805_v59 = vld [vmem:[#allocation2 + $0xf80] sm:$0xff]  ;;  %v11575_v1 = vcombine.high %v790_v60, %v806_v61 }
  0x66   : > { %6514 = vmatpush1.bf16.msra.mxu0 %v11316_v4  ;;  %6596 = vmatpush1.bf16.msra.mxu1 %v11318_v5  ;;  %v11573_v0 = vcombine.high %v789_v58, %v805_v59  ;;  %v821_v2 = vld [vmem:[#allocation2 + $0x1000] sm:$0xff]  ;;  %v822_v4 = vld [vmem:[#allocation2 + $0x1008] sm:$0xff] }
  0x67   : > { %6515 = vmatprep.subr.bf16.mxu0 %v11349_v6  ;;  %6597 = vmatprep.subr.bf16.mxu1 %v11351_v7  ;;  %v837_v3 = vld [vmem:[#allocation2 + $0x1080] sm:$0xff]  ;;  %v838_v5 = vld [vmem:[#allocation2 + $0x1088] sm:$0xff]  ;;  %v11572_v6 = vcombine.low %v789_v58, %v805_v59  ;;  %v11574_v7 = vcombine.low %v790_v60, %v806_v61 }
  0x68   : > { %v11605_v8 = vcombine.high %v821_v2, %v837_v3  ;;  %v11607_v9 = vcombine.high %v822_v4, %v838_v5  ;;  %v853_v10 = vld [vmem:[#allocation2 + $0x1100] sm:$0xff]  ;;  %v11604_v16 = vcombine.low %v821_v2, %v837_v3  ;;  %v11606_v17 = vcombine.low %v822_v4, %v838_v5  ;;  %v1046_v2 = vld [vmem:[#allocation2 + $0x1708] sm:$0xff] }
  0x69   : > { %v869_v11 = vld [vmem:[#allocation2 + $0x1180] sm:$0xff]  ;;  %v1062_v3 = vld [vmem:[#allocation2 + $0x1788] sm:$0xff] }
  0x6a   : > { %6516 = vmatpush1.bf16.msra.mxu0 %v11348_v12  ;;  %6598 = vmatpush1.bf16.msra.mxu1 %v11350_v13  ;;  %v12962_v12 = vcombine.low %v12952_v53, %v12952_v53  ;;  %v854_v13 = vld [vmem:[#allocation2 + $0x1108] sm:$0xff]  ;;  %v11637_v18 = vcombine.high %v853_v10, %v869_v11  ;;  %v11636_v24 = vcombine.low %v853_v10, %v869_v11  ;;  %v7811_v61 = vld [vmem:[%s15654_s3] sm:$0xff] }
  0x6b   : > { %6517 = vmatprep.subr.bf16.mxu0 %v11381_v14  ;;  %6599 = vmatprep.subr.bf16.mxu1 %v11383_v15  ;;  %v870_v14 = vld [vmem:[#allocation2 + $0x1188] sm:$0xff]  ;;  %v1093_v10 = vld [vmem:[#allocation2 + $0x1880] sm:$0xff] }
  0x6c   : > { %v12965_v15 = vld [vmem:[%s12949_s13 + $0x8] sm:$0xff]  ;;  %v11639_v19 = vcombine.high %v854_v13, %v870_v14  ;;  %v11638_v25 = vcombine.low %v854_v13, %v870_v14  ;;  %s12816_s13 = smov 127  }
  0x6d   : > { %v886_v53 = vld [vmem:[#allocation2 + $0x1208] sm:$0xff] }
  0x6e   : > { %6518 = vmatpush1.bf16.msra.mxu0 %v11380_v20  ;;  %6600 = vmatpush1.bf16.msra.mxu1 %v11382_v21  ;;  %v885_v20 = vld [vmem:[#allocation2 + $0x1200] sm:$0xff]  ;;  %v1078_v11 = vld [vmem:[#allocation2 + $0x1808] sm:$0xff] }
  0x6f   : > { %6519 = vmatprep.subr.bf16.mxu0 %v11413_v22  ;;  %6601 = vmatprep.subr.bf16.mxu1 %v11415_v23  ;;  %v901_v21 = vld [vmem:[#allocation2 + $0x1280] sm:$0xff]  ;;  %v12969_v22 = vcombine.high %v12965_v15, %v12965_v15  ;;  %v902_v23 = vld [vmem:[#allocation2 + $0x1288] sm:$0xff] }
  0x70   : > { %v11669_v26 = vcombine.high %v885_v20, %v901_v21  ;;  %v11671_v27 = vcombine.high %v886_v53, %v902_v23  ;;  %v11668_v32 = vcombine.low %v885_v20, %v901_v21  ;;  %v11670_v33 = vcombine.low %v886_v53, %v902_v23  ;;  %v1094_v13 = vld [vmem:[#allocation2 + $0x1888] sm:$0xff]  ;;  %v1109_v20 = vld [vmem:[#allocation2 + $0x1900] sm:$0xff] }
  0x71   : > { %v1125_v21 = vld [vmem:[#allocation2 + $0x1980] sm:$0xff]  ;;  %v1110_v53 = vld [vmem:[#allocation2 + $0x1908] sm:$0xff] }
  0x72   : > { %6520 = vmatpush1.bf16.msra.mxu0 %v11412_v28  ;;  %6602 = vmatpush1.bf16.msra.mxu1 %v11414_v29  ;;  %v917_v28 = vld [vmem:[#allocation2 + $0x1300] sm:$0xff]  ;;  %v1126_v23 = vld [vmem:[#allocation2 + $0x1988] sm:$0xff] }
  0x73   : > { %6521 = vmatprep.subr.bf16.mxu0 %v11445_v30  ;;  %6603 = vmatprep.subr.bf16.mxu1 %v11447_v31  ;;  %v933_v29 = vld [vmem:[#allocation2 + $0x1380] sm:$0xff]  ;;  %v918_v30 = vld [vmem:[#allocation2 + $0x1308] sm:$0xff] }
  0x74   : > { %v934_v31 = vld [vmem:[#allocation2 + $0x1388] sm:$0xff]  ;;  %v11701_v34 = vcombine.high %v917_v28, %v933_v29  ;;  %v11700_v40 = vcombine.low %v917_v28, %v933_v29  ;;  %v11895_v28 = vcombine.high %v1110_v53, %v1126_v23  ;;  %v1141_v29 = vld [vmem:[#allocation2 + $0x1a00] sm:$0xff] }
  0x75   : > { %v11703_v35 = vcombine.high %v918_v30, %v934_v31  ;;  %v11702_v41 = vcombine.low %v918_v30, %v934_v31  ;;  %v1157_v30 = vld [vmem:[#allocation2 + $0x1a80] sm:$0xff]  ;;  %v1142_v31 = vld [vmem:[#allocation2 + $0x1a08] sm:$0xff] }
  0x76   : > { %6522 = vmatpush1.bf16.msra.mxu0 %v11444_v36  ;;  %6604 = vmatpush1.bf16.msra.mxu1 %v11446_v37  ;;  %v949_v36 = vld [vmem:[#allocation2 + $0x1400] sm:$0xff] }
  0x77   : > { %6523 = vmatprep.subr.bf16.mxu0 %v11477_v38  ;;  %6605 = vmatprep.subr.bf16.mxu1 %v11479_v39  ;;  %v965_v37 = vld [vmem:[#allocation2 + $0x1480] sm:$0xff]  ;;  %v950_v38 = vld [vmem:[#allocation2 + $0x1408] sm:$0xff] }
  0x78   : > { %v966_v39 = vld [vmem:[#allocation2 + $0x1488] sm:$0xff]  ;;  %v11733_v42 = vcombine.high %v949_v36, %v965_v37  ;;  %v11732_v48 = vcombine.low %v949_v36, %v965_v37  ;;  %v12118_v36 = vld [vmem:[%s15654_s3 + $0x10] sm:$0xff] }
  0x79   : > { %v11735_v43 = vcombine.high %v950_v38, %v966_v39  ;;  %v11734_v49 = vcombine.low %v950_v38, %v966_v39  ;;  %v12119_v37 = vld [vmem:[%s15655_s4 + $0x10] sm:$0xff]  ;;  %v1173_v39 = vld [vmem:[#allocation2 + $0x1b00] sm:$0xff] }
  0x7a   : > { %6524 = vmatpush1.bf16.msra.mxu0 %v11476_v44  ;;  %6606 = vmatpush1.bf16.msra.mxu1 %v11478_v45  ;;  %v981_v44 = vld [vmem:[#allocation2 + $0x1500] sm:$0xff] }
  0x7b   : > { %6525 = vmatprep.subr.bf16.mxu0 %v11509_v46  ;;  %6607 = vmatprep.subr.bf16.mxu1 %v11511_v47  ;;  %v997_v45 = vld [vmem:[#allocation2 + $0x1580] sm:$0xff]  ;;  %v982_v46 = vld [vmem:[#allocation2 + $0x1508] sm:$0xff] }
  0x7c   : > { %v998_v47 = vld [vmem:[#allocation2 + $0x1588] sm:$0xff]  ;;  %v11765_v50 = vcombine.high %v981_v44, %v997_v45  ;;  %v11764_v58 = vcombine.low %v981_v44, %v997_v45 }
  0x7d   : > { %v11767_v51 = vcombine.high %v982_v46, %v998_v47  ;;  %v11766_v59 = vcombine.low %v982_v46, %v998_v47  ;;  %v12120_v46 = vld [vmem:[%s15654_s3 + $0x18] sm:$0xff] }
  0x7e   : > { %6526 = vmatpush1.bf16.msra.mxu0 %v11508_v52  ;;  %6608 = vmatpush1.bf16.msra.mxu1 %v11510_v54  ;;  %v1013_v52 = vld [vmem:[#allocation2 + $0x1600] sm:$0xff] }
  0x7f   : > { %6527 = vmatprep.subr.bf16.mxu0 %v11541_v55  ;;  %6609 = vmatprep.subr.bf16.mxu1 %v11543_v56  ;;  %v1029_v54 = vld [vmem:[#allocation2 + $0x1680] sm:$0xff]  ;;  %v1014_v55 = vld [vmem:[#allocation2 + $0x1608] sm:$0xff] }
  0x80   : > { %v1030_v56 = vld [vmem:[#allocation2 + $0x1688] sm:$0xff]  ;;  %v11797_v60 = vcombine.high %v1013_v52, %v1029_v54  ;;  %v11796_v4 = vcombine.low %v1013_v52, %v1029_v54 }
  0x81   : > { %v11798_v5 = vcombine.low %v1014_v55, %v1030_v56 }
  0x82   : > { %6528 = vmatpush1.bf16.msra.mxu0 %v11540_v62  ;;  %6610 = vmatpush1.bf16.msra.mxu1 %v11542_v63  ;;  %v11799_v62 = vcombine.high %v1014_v55, %v1030_v56  ;;  %v1045_v63 = vld [vmem:[#allocation2 + $0x1700] sm:$0xff]  ;;  %v12121_v56 = vld [vmem:[%s15655_s4 + $0x18] sm:$0xff] }
  0x83   : > { %6529 = vmatprep.subr.bf16.mxu0 %v11573_v0  ;;  %6611 = vmatprep.subr.bf16.mxu1 %v11575_v1  ;;  %v1061_v0 = vld [vmem:[#allocation2 + $0x1780] sm:$0xff]  ;;  %v12815_v1 = vmov 0  }
  0x84   : > { %12637 = vset.pattern.permute.xlu0 %v12815_v1  ;;  %12638 = vset.pattern.permute.xlu1 %v12815_v1  ;;  %v11828_v14 = vcombine.low %v1045_v63, %v1061_v0 }
  0x85   : > { %7814 = vperm.xlu0 %12637, %v7811_v61   ;;  %v1238_v61 = vld [vmem:[#allocation2 + $0x1d08] sm:$0xff] }
  0x86   : > { %6530 = vmatpush1.bf16.msra.mxu0 %v11572_v6  ;;  %6612 = vmatpush1.bf16.msra.mxu1 %v11574_v7  ;;  %v11829_v6 = vcombine.high %v1045_v63, %v1061_v0  ;;  %v7849_v7 = vld [vmem:[%s15655_s4] sm:$0xff] }
  0x87   : > { %6540 = vmatprep.subr.bf16.mxu0 %v11605_v8  ;;  %6622 = vmatprep.subr.bf16.mxu1 %v11607_v9  ;;  %v11831_v8 = vcombine.high %v1046_v2, %v1062_v3  ;;  %v1077_v9 = vld [vmem:[#allocation2 + $0x1800] sm:$0xff] }
  0x89   : > { %6532 = vmatmul.mubr.bf16.vlgmr.msra.gmra.mrb[0].mxu0 %v12962_v12  ;;  %6614 = vmatmul.mubr.bf16.vlgmr.msra.gmra.mrb[0].mxu1 %v12962_v12 }
  0x8a   : > { %6541 = vmatpush1.bf16.msra.mxu0 %v11604_v16  ;;  %6623 = vmatpush1.bf16.msra.mxu1 %v11606_v17  ;;  %v11830_v16 = vcombine.low %v1046_v2, %v1062_v3  ;;  %v11861_v17 = vcombine.high %v1077_v9, %v1093_v10  ;;  %v12122_v2 = vld [vmem:[%s15654_s3 + $0x20] sm:$0xff] }
  0x8b   : > { %6542 = vmatprep.subr.bf16.mxu0 %v11637_v18  ;;  %6624 = vmatprep.subr.bf16.mxu1 %v11639_v19  ;;  %v12116_v18 = vld [vmem:[%s15654_s3 + $0x8] sm:$0xff]  ;;  %v11863_v19 = vcombine.high %v1078_v11, %v1094_v13  ;;  %v12123_v3 = vld [vmem:[%s15655_s4 + $0x20] sm:$0xff] }
  0x8c   : > { %6572 = vmatprep.mubr.bf16.mxu0 %v12969_v22  ;;  %6654 = vmatprep.mubr.bf16.mxu1 %v12969_v22 }
  0x8d   : > { %7852 = vperm.xlu0 %12637, %v7849_v7   ;;  %7923 = vperm.xlu1 %12638, %v12116_v18   ;;  %v1270_v7 = vld [vmem:[#allocation2 + $0x1e08] sm:$0xff] }
  0x8e   : > { %6543 = vmatpush1.bf16.msra.mxu0 %v11636_v24  ;;  %6625 = vmatpush1.bf16.msra.mxu1 %v11638_v25  ;;  %v11860_v24 = vcombine.low %v1077_v9, %v1093_v10  ;;  %v11862_v25 = vcombine.low %v1078_v11, %v1094_v13  ;;  %v1318_v18 = vld [vmem:[#allocation2 + $0x1f88] sm:$0xff] }
  0x8f   : > { %6544 = vmatprep.subr.bf16.mxu0 %v11669_v26  ;;  %6626 = vmatprep.subr.bf16.mxu1 %v11671_v27  ;;  %v11893_v26 = vcombine.high %v1109_v20, %v1125_v21  ;;  %v12117_v27 = vld [vmem:[%s15655_s4 + $0x8] sm:$0xff] }
  0x91   : > { %7962 = vperm.xlu1 %12638, %v12117_v27   ;;  %8033 = vperm.xlu0 %12637, %v12118_v36  }
  0x92   : > { %6545 = vmatpush1.bf16.msra.mxu0 %v11668_v32  ;;  %6627 = vmatpush1.bf16.msra.mxu1 %v11670_v33  ;;  %v1158_v32 = vld [vmem:[#allocation2 + $0x1a88] sm:$0xff]  ;;  %v11892_v33 = vcombine.low %v1109_v20, %v1125_v21 }
  0x93   : > { %6546 = vmatprep.subr.bf16.mxu0 %v11701_v34  ;;  %6628 = vmatprep.subr.bf16.mxu1 %v11703_v35  ;;  %v11894_v34 = vcombine.low %v1110_v53, %v1126_v23  ;;  %v11925_v35 = vcombine.high %v1141_v29, %v1157_v30  ;;  %v11927_v38 = vcombine.high %v1142_v31, %v1158_v32  ;;  %v311_v23 = vld [vmem:[#allocation2 + $0x10] sm:$0xff] }
  0x94   : > { %v11926_v44 = vcombine.low %v1142_v31, %v1158_v32  ;;  %v343_v31 = vld [vmem:[#allocation2 + $0x110] sm:$0xff] }
  0x95   : > { %8072 = vperm.xlu1 %12638, %v12119_v37   ;;  %8143 = vperm.xlu0 %12637, %v12120_v46   ;;  %v359_v32 = vld [vmem:[#allocation2 + $0x190] sm:$0xff] }
  0x96   : > { %6547 = vmatpush1.bf16.msra.mxu0 %v11700_v40  ;;  %6629 = vmatpush1.bf16.msra.mxu1 %v11702_v41  ;;  %v1189_v40 = vld [vmem:[#allocation2 + $0x1b80] sm:$0xff]  ;;  %v1174_v41 = vld [vmem:[#allocation2 + $0x1b08] sm:$0xff] }
  0x97   : > { %6548 = vmatprep.subr.bf16.mxu0 %v11733_v42  ;;  %6630 = vmatprep.subr.bf16.mxu1 %v11735_v43  ;;  %v1190_v42 = vld [vmem:[#allocation2 + $0x1b88] sm:$0xff]  ;;  %v11924_v43 = vcombine.low %v1141_v29, %v1157_v30  ;;  %v11957_v45 = vcombine.high %v1173_v39, %v1189_v40  ;;  %v11956_v52 = vcombine.low %v1173_v39, %v1189_v40  ;;  %v375_v40 = vld [vmem:[#allocation2 + $0x210] sm:$0xff] }
  0x98   : > { %v11959_v47 = vcombine.high %v1174_v41, %v1190_v42  ;;  %v11958_v54 = vcombine.low %v1174_v41, %v1190_v42  ;;  %v391_v41 = vld [vmem:[#allocation2 + $0x290] sm:$0xff]  ;;  %v376_v42 = vld [vmem:[#allocation2 + $0x218] sm:$0xff] }
  0x99   : > { %8182 = vperm.xlu1 %12638, %v12121_v56   ;;  %8253 = vperm.xlu0 %12637, %v12122_v2   ;;  %v439_v56 = vld [vmem:[#allocation2 + $0x410] sm:$0xff] }
  0x9a   : > { %6549 = vmatpush1.bf16.msra.mxu0 %v11732_v48  ;;  %6631 = vmatpush1.bf16.msra.mxu1 %v11734_v49  ;;  %v1205_v48 = vld [vmem:[#allocation2 + $0x1c00] sm:$0xff]  ;;  %v487_v2 = vld [vmem:[#allocation2 + $0x590] sm:$0xff] }
  0x9b   : > { %6550 = vmatprep.subr.bf16.mxu0 %v11765_v50  ;;  %6632 = vmatprep.subr.bf16.mxu1 %v11767_v51  ;;  %v1221_v49 = vld [vmem:[#allocation2 + $0x1c80] sm:$0xff]  ;;  %v1206_v50 = vld [vmem:[#allocation2 + $0x1c08] sm:$0xff] }
  0x9c   : > { %v1222_v51 = vld [vmem:[#allocation2 + $0x1c88] sm:$0xff]  ;;  %v11989_v55 = vcombine.high %v1205_v48, %v1221_v49  ;;  %v11988_v63 = vcombine.low %v1205_v48, %v1221_v49  ;;  %v423_v48 = vld [vmem:[#allocation2 + $0x390] sm:$0xff]  ;;  %v408_v49 = vld [vmem:[#allocation2 + $0x318] sm:$0xff] }
  0x9d   : > { %v11990_v0 = vcombine.low %v1206_v50, %v1222_v51  ;;  %8292 = vperm.xlu1 %12638, %v12123_v3   ;;  %v472_v3 = vld [vmem:[#allocation2 + $0x518] sm:$0xff] }
  0x9e   : > { %6551 = vmatpush1.bf16.msra.mxu0 %v11764_v58  ;;  %6633 = vmatpush1.bf16.msra.mxu1 %v11766_v59  ;;  %v11991_v58 = vcombine.high %v1206_v50, %v1222_v51  ;;  %v1237_v59 = vld [vmem:[#allocation2 + $0x1d00] sm:$0xff]  ;;  %v424_v50 = vld [vmem:[#allocation2 + $0x398] sm:$0xff]  ;;  %v11160_v51 = vcombine.low %v375_v40, %v391_v41 }
  0x9f   : > { %6552 = vmatprep.subr.bf16.mxu0 %v11797_v60  ;;  %6634 = vmatprep.subr.bf16.mxu1 %v11799_v62  ;;  %v1253_v60 = vld [vmem:[#allocation2 + $0x1d80] sm:$0xff]  ;;  %v1254_v62 = vld [vmem:[#allocation2 + $0x1d88] sm:$0xff] }
  0xa0   : > { %v12021_v1 = vcombine.high %v1237_v59, %v1253_v60  ;;  %v12020_v9 = vcombine.low %v1237_v59, %v1253_v60  ;;  %v12022_v10 = vcombine.low %v1238_v61, %v1254_v62  ;;  %v440_v59 = vld [vmem:[#allocation2 + $0x418] sm:$0xff] }
  0xa1   : > { %v456_v60 = vld [vmem:[#allocation2 + $0x498] sm:$0xff] }
  0xa2   : > { %6553 = vmatpush1.bf16.msra.mxu0 %v11796_v4  ;;  %6635 = vmatpush1.bf16.msra.mxu1 %v11798_v5  ;;  %v12023_v4 = vcombine.high %v1238_v61, %v1254_v62  ;;  %v1269_v5 = vld [vmem:[#allocation2 + $0x1e00] sm:$0xff]  ;;  %v11194_v62 = vcombine.low %v408_v49, %v424_v50 }
  0xa3   : > { %6554 = vmatprep.subr.bf16.mxu0 %v11829_v6  ;;  %6636 = vmatprep.subr.bf16.mxu1 %v11831_v8  ;;  %v1285_v6 = vld [vmem:[#allocation2 + $0x1e80] sm:$0xff]  ;;  %v1286_v8 = vld [vmem:[#allocation2 + $0x1e88] sm:$0xff] }
  0xa4   : > { %v12053_v11 = vcombine.high %v1269_v5, %v1285_v6  ;;  %v12055_v13 = vcombine.high %v1270_v7, %v1286_v8  ;;  %v12054_v20 = vcombine.low %v1270_v7, %v1286_v8 }
  0xa6   : > { %6555 = vmatpush1.bf16.msra.mxu0 %v11828_v14  ;;  %6637 = vmatpush1.bf16.msra.mxu1 %v11830_v16  ;;  %v1301_v14 = vld [vmem:[#allocation2 + $0x1f00] sm:$0xff] }
  0xa7   : > { %6556 = vmatprep.subr.bf16.mxu0 %v11861_v17  ;;  %6638 = vmatprep.subr.bf16.mxu1 %v11863_v19  ;;  %v1317_v16 = vld [vmem:[#allocation2 + $0x1f80] sm:$0xff]  ;;  %v1302_v17 = vld [vmem:[#allocation2 + $0x1f08] sm:$0xff]  ;;  %v12052_v19 = vcombine.low %v1269_v5, %v1285_v6  ;;  %v11226_v6 = vcombine.low %v440_v59, %v456_v60 }
  0xa8   : > { %v12085_v21 = vcombine.high %v1301_v14, %v1317_v16  ;;  %v12087_v53 = vcombine.high %v1302_v17, %v1318_v18  ;;  %v12084_v27 = vcombine.low %v1301_v14, %v1317_v16 }
  0xaa   : > { %6557 = vmatpush1.bf16.msra.mxu0 %v11860_v24  ;;  %6639 = vmatpush1.bf16.msra.mxu1 %v11862_v25  ;;  %v327_v24 = vld [vmem:[#allocation2 + $0x90] sm:$0xff]  ;;  %v312_v25 = vld [vmem:[#allocation2 + $0x18] sm:$0xff] }
  0xab   : > { %6558 = vmatprep.subr.bf16.mxu0 %v11893_v26  ;;  %6640 = vmatprep.subr.bf16.mxu1 %v11895_v28  ;;  %v328_v26 = vld [vmem:[#allocation2 + $0x98] sm:$0xff]  ;;  %v12086_v28 = vcombine.low %v1302_v17, %v1318_v18  ;;  %v11097_v29 = vcombine.high %v311_v23, %v327_v24  ;;  %v11096_v36 = vcombine.low %v311_v23, %v327_v24 }
  0xac   : > { %v11099_v30 = vcombine.high %v312_v25, %v328_v26  ;;  %v11098_v37 = vcombine.low %v312_v25, %v328_v26 }
  0xae   : > { %6559 = vmatpush1.bf16.msra.mxu0 %v11892_v33  ;;  %6641 = vmatpush1.bf16.msra.mxu1 %v11894_v34  ;;  %v13007_v33 = vcombine.low %v12965_v15, %v12965_v15  ;;  %v344_v34 = vld [vmem:[#allocation2 + $0x118] sm:$0xff]  ;;  %v11128_v15 = vcombine.low %v343_v31, %v359_v32 }
  0xaf   : > { %6560 = vmatprep.subr.bf16.mxu0 %v11925_v35  ;;  %6642 = vmatprep.subr.bf16.mxu1 %v11927_v38  ;;  %v360_v35 = vld [vmem:[#allocation2 + $0x198] sm:$0xff]  ;;  %v11129_v38 = vcombine.high %v343_v31, %v359_v32 }
  0xb0   : > { %v11131_v39 = vcombine.high %v344_v34, %v360_v35 }
  0xb2   : > { %6561 = vmatpush1.bf16.msra.mxu0 %v11924_v43  ;;  %6643 = vmatpush1.bf16.msra.mxu1 %v11926_v44  ;;  %v392_v43 = vld [vmem:[#allocation2 + $0x298] sm:$0xff]  ;;  %v11130_v44 = vcombine.low %v344_v34, %v360_v35 }
  0xb3   : > { %6562 = vmatprep.subr.bf16.mxu0 %v11957_v45  ;;  %6644 = vmatprep.subr.bf16.mxu1 %v11959_v47  ;;  %v11161_v45 = vcombine.high %v375_v40, %v391_v41  ;;  %v11163_v46 = vcombine.high %v376_v42, %v392_v43  ;;  %v407_v47 = vld [vmem:[#allocation2 + $0x310] sm:$0xff] }
  0xb4   : > { %v11192_v61 = vcombine.low %v407_v47, %v423_v48 }
  0xb6   : > { %6563 = vmatpush1.bf16.msra.mxu0 %v11956_v52  ;;  %6645 = vmatpush1.bf16.msra.mxu1 %v11958_v54  ;;  %v11162_v52 = vcombine.low %v376_v42, %v392_v43  ;;  %v11193_v54 = vcombine.high %v407_v47, %v423_v48 }
  0xb7   : > { %6564 = vmatprep.subr.bf16.mxu0 %v11989_v55  ;;  %6646 = vmatprep.subr.bf16.mxu1 %v11991_v58  ;;  %v11195_v55 = vcombine.high %v408_v49, %v424_v50  ;;  %v455_v58 = vld [vmem:[#allocation2 + $0x490] sm:$0xff] }
  0xb8   : > { %v11224_v5 = vcombine.low %v439_v56, %v455_v58 }
  0xba   : > { %6565 = vmatpush1.bf16.msra.mxu0 %v11988_v63  ;;  %6647 = vmatpush1.bf16.msra.mxu1 %v11990_v0  ;;  %v11225_v63 = vcombine.high %v439_v56, %v455_v58  ;;  %v11227_v0 = vcombine.high %v440_v59, %v456_v60 }
  0xbb   : > { %6566 = vmatprep.subr.bf16.mxu0 %v12021_v1  ;;  %6648 = vmatprep.subr.bf16.mxu1 %v12023_v4  ;;  %v471_v1 = vld [vmem:[#allocation2 + $0x510] sm:$0xff]  ;;  %v488_v4 = vld [vmem:[#allocation2 + $0x598] sm:$0xff] }
  0xbc   : > { %v11257_v7 = vcombine.high %v471_v1, %v487_v2  ;;  %v11259_v8 = vcombine.high %v472_v3, %v488_v4  ;;  %v11256_v14 = vcombine.low %v471_v1, %v487_v2  ;;  %v11258_v16 = vcombine.low %v472_v3, %v488_v4 }
  0xbe   : > { %6567 = vmatpush1.bf16.msra.mxu0 %v12020_v9  ;;  %6649 = vmatpush1.bf16.msra.mxu1 %v12022_v10  ;;  %v503_v9 = vld [vmem:[#allocation2 + $0x610] sm:$0xff] }
  0xbf   : > { %6568 = vmatprep.subr.bf16.mxu0 %v12053_v11  ;;  %6650 = vmatprep.subr.bf16.mxu1 %v12055_v13  ;;  %v519_v10 = vld [vmem:[#allocation2 + $0x690] sm:$0xff]  ;;  %v504_v11 = vld [vmem:[#allocation2 + $0x618] sm:$0xff] }
  0xc0   : > { %v520_v13 = vld [vmem:[#allocation2 + $0x698] sm:$0xff]  ;;  %v11289_v17 = vcombine.high %v503_v9, %v519_v10  ;;  %v11288_v23 = vcombine.low %v503_v9, %v519_v10 }
  0xc1   : > { %v11291_v18 = vcombine.high %v504_v11, %v520_v13  ;;  %v11290_v24 = vcombine.low %v504_v11, %v520_v13 }
  0xc2   : > { %6569 = vmatpush1.bf16.msra.mxu0 %v12052_v19  ;;  %6651 = vmatpush1.bf16.msra.mxu1 %v12054_v20  ;;  %v535_v19 = vld [vmem:[#allocation2 + $0x710] sm:$0xff] }
  0xc3   : > { %6570 = vmatprep.subr.bf16.mxu0 %v12085_v21  ;;  %6652 = vmatprep.subr.bf16.mxu1 %v12087_v53  ;;  %v551_v20 = vld [vmem:[#allocation2 + $0x790] sm:$0xff]  ;;  %v536_v21 = vld [vmem:[#allocation2 + $0x718] sm:$0xff] }
  0xc4   : > { %v552_v53 = vld [vmem:[#allocation2 + $0x798] sm:$0xff]  ;;  %v11321_v25 = vcombine.high %v535_v19, %v551_v20  ;;  %v11320_v31 = vcombine.low %v535_v19, %v551_v20 }
  0xc5   : > { %v11323_v26 = vcombine.high %v536_v21, %v552_v53  ;;  %v11322_v32 = vcombine.low %v536_v21, %v552_v53 }
  0xc6   : > { %6571 = vmatpush1.bf16.msra.mxu0 %v12084_v27  ;;  %6653 = vmatpush1.bf16.msra.mxu1 %v12086_v28  ;;  %v567_v27 = vld [vmem:[#allocation2 + $0x810] sm:$0xff] }
  0xc7   : > { %6663 = vmatprep.subr.bf16.mxu0 %v11097_v29  ;;  %6745 = vmatprep.subr.bf16.mxu1 %v11099_v30  ;;  %v583_v28 = vld [vmem:[#allocation2 + $0x890] sm:$0xff]  ;;  %v568_v29 = vld [vmem:[#allocation2 + $0x818] sm:$0xff] }
  0xc8   : > { %v584_v30 = vld [vmem:[#allocation2 + $0x898] sm:$0xff]  ;;  %v11353_v34 = vcombine.high %v567_v27, %v583_v28  ;;  %v11352_v40 = vcombine.low %v567_v27, %v583_v28 }
  0xc9   : > { %6573 = vmatmul.mubr.bf16.vlgmr.msra.gmra.mrb[0].mxu0 %v13007_v33  ;;  %6655 = vmatmul.mubr.bf16.vlgmr.msra.gmra.mrb[0].mxu1 %v13007_v33  ;;  %v11355_v35 = vcombine.high %v568_v29, %v584_v30  ;;  %v11354_v41 = vcombine.low %v568_v29, %v584_v30 }
  0xca   : > { %6664 = vmatpush1.bf16.msra.mxu0 %v11096_v36  ;;  %6746 = vmatpush1.bf16.msra.mxu1 %v11098_v37  ;;  %v599_v36 = vld [vmem:[#allocation2 + $0x910] sm:$0xff] }
  0xcb   : > { %6665 = vmatprep.subr.bf16.mxu0 %v11129_v38  ;;  %6747 = vmatprep.subr.bf16.mxu1 %v11131_v39  ;;  %v615_v37 = vld [vmem:[#allocation2 + $0x990] sm:$0xff]  ;;  %v600_v38 = vld [vmem:[#allocation2 + $0x918] sm:$0xff] }
  0xcc   : > { %6695 = vmatprep.mubr.bf16.mxu0 %v12956_v57  ;;  %6777 = vmatprep.mubr.bf16.mxu1 %v12956_v57  ;;  %v616_v39 = vld [vmem:[#allocation2 + $0x998] sm:$0xff]  ;;  %v11385_v42 = vcombine.high %v599_v36, %v615_v37  ;;  %v11384_v47 = vcombine.low %v599_v36, %v615_v37 }
  0xcd   : > { %v11387_v43 = vcombine.high %v600_v38, %v616_v39  ;;  %v11386_v48 = vcombine.low %v600_v38, %v616_v39 }
  0xce   : > { %6666 = vmatpush1.bf16.msra.mxu0 %v11128_v15  ;;  %6748 = vmatpush1.bf16.msra.mxu1 %v11130_v44  ;;  %v631_v15 = vld [vmem:[#allocation2 + $0xa10] sm:$0xff] }
  0xcf   : > { %6667 = vmatprep.subr.bf16.mxu0 %v11161_v45  ;;  %6749 = vmatprep.subr.bf16.mxu1 %v11163_v46  ;;  %v647_v44 = vld [vmem:[#allocation2 + $0xa90] sm:$0xff]  ;;  %v632_v45 = vld [vmem:[#allocation2 + $0xa18] sm:$0xff] }
  0xd0   : > { %v648_v46 = vld [vmem:[#allocation2 + $0xa98] sm:$0xff]  ;;  %v11417_v49 = vcombine.high %v631_v15, %v647_v44  ;;  %v11416_v56 = vcombine.low %v631_v15, %v647_v44 }
  0xd1   : > { %v11419_v50 = vcombine.high %v632_v45, %v648_v46  ;;  %v11418_v58 = vcombine.low %v632_v45, %v648_v46 }
  0xd2   : > { %6668 = vmatpush1.bf16.msra.mxu0 %v11160_v51  ;;  %6750 = vmatpush1.bf16.msra.mxu1 %v11162_v52  ;;  %v663_v51 = vld [vmem:[#allocation2 + $0xb10] sm:$0xff] }
  0xd3   : > { %6669 = vmatprep.subr.bf16.mxu0 %v11193_v54  ;;  %6751 = vmatprep.subr.bf16.mxu1 %v11195_v55  ;;  %v679_v52 = vld [vmem:[#allocation2 + $0xb90] sm:$0xff]  ;;  %v664_v54 = vld [vmem:[#allocation2 + $0xb18] sm:$0xff] }
  0xd4   : > { %v680_v55 = vld [vmem:[#allocation2 + $0xb98] sm:$0xff]  ;;  %v11449_v59 = vcombine.high %v663_v51, %v679_v52  ;;  %v11448_v1 = vcombine.low %v663_v51, %v679_v52 }
  0xd5   : > { %v11451_v60 = vcombine.high %v664_v54, %v680_v55  ;;  %v11450_v2 = vcombine.low %v664_v54, %v680_v55 }
  0xd6   : > { %6670 = vmatpush1.bf16.msra.mxu0 %v11192_v61  ;;  %6752 = vmatpush1.bf16.msra.mxu1 %v11194_v62  ;;  %v695_v61 = vld [vmem:[#allocation2 + $0xc10] sm:$0xff] }
  0xd7   : > { %6671 = vmatprep.subr.bf16.mxu0 %v11225_v63  ;;  %6753 = vmatprep.subr.bf16.mxu1 %v11227_v0  ;;  %v711_v62 = vld [vmem:[#allocation2 + $0xc90] sm:$0xff]  ;;  %v696_v63 = vld [vmem:[#allocation2 + $0xc18] sm:$0xff] }
  0xd8   : > { %v712_v0 = vld [vmem:[#allocation2 + $0xc98] sm:$0xff]  ;;  %v11481_v3 = vcombine.high %v695_v61, %v711_v62  ;;  %v11480_v9 = vcombine.low %v695_v61, %v711_v62 }
  0xd9   : > { %v11483_v4 = vcombine.high %v696_v63, %v712_v0  ;;  %v11482_v10 = vcombine.low %v696_v63, %v712_v0 }
  0xda   : > { %6672 = vmatpush1.bf16.msra.mxu0 %v11224_v5  ;;  %6754 = vmatpush1.bf16.msra.mxu1 %v11226_v6  ;;  %v727_v5 = vld [vmem:[#allocation2 + $0xd10] sm:$0xff] }
  0xdb   : > { %6673 = vmatprep.subr.bf16.mxu0 %v11257_v7  ;;  %6755 = vmatprep.subr.bf16.mxu1 %v11259_v8  ;;  %v743_v6 = vld [vmem:[#allocation2 + $0xd90] sm:$0xff]  ;;  %v728_v7 = vld [vmem:[#allocation2 + $0xd18] sm:$0xff] }
  0xdc   : > { %v744_v8 = vld [vmem:[#allocation2 + $0xd98] sm:$0xff]  ;;  %v11513_v11 = vcombine.high %v727_v5, %v743_v6  ;;  %v11512_v19 = vcombine.low %v727_v5, %v743_v6 }
  0xdd   : > { %v11515_v13 = vcombine.high %v728_v7, %v744_v8  ;;  %v11514_v20 = vcombine.low %v728_v7, %v744_v8 }
  0xde   : > { %6674 = vmatpush1.bf16.msra.mxu0 %v11256_v14  ;;  %6756 = vmatpush1.bf16.msra.mxu1 %v11258_v16  ;;  %v759_v14 = vld [vmem:[#allocation2 + $0xe10] sm:$0xff] }
  0xdf   : > { %6675 = vmatprep.subr.bf16.mxu0 %v11289_v17  ;;  %6757 = vmatprep.subr.bf16.mxu1 %v11291_v18  ;;  %v775_v16 = vld [vmem:[#allocation2 + $0xe90] sm:$0xff]  ;;  %v760_v17 = vld [vmem:[#allocation2 + $0xe18] sm:$0xff] }
  0xe0   : > { %v776_v18 = vld [vmem:[#allocation2 + $0xe98] sm:$0xff]  ;;  %v11545_v21 = vcombine.high %v759_v14, %v775_v16  ;;  %v11544_v27 = vcombine.low %v759_v14, %v775_v16 }
  0xe1   : > { %v11547_v53 = vcombine.high %v760_v17, %v776_v18  ;;  %v11546_v28 = vcombine.low %v760_v17, %v776_v18 }
  0xe2   : > { %6676 = vmatpush1.bf16.msra.mxu0 %v11288_v23  ;;  %6758 = vmatpush1.bf16.msra.mxu1 %v11290_v24  ;;  %v791_v23 = vld [vmem:[#allocation2 + $0xf10] sm:$0xff] }
  0xe3   : > { %6677 = vmatprep.subr.bf16.mxu0 %v11321_v25  ;;  %6759 = vmatprep.subr.bf16.mxu1 %v11323_v26  ;;  %v807_v24 = vld [vmem:[#allocation2 + $0xf90] sm:$0xff]  ;;  %v792_v25 = vld [vmem:[#allocation2 + $0xf18] sm:$0xff] }
  0xe4   : > { %v808_v26 = vld [vmem:[#allocation2 + $0xf98] sm:$0xff]  ;;  %v11577_v29 = vcombine.high %v791_v23, %v807_v24  ;;  %v11576_v36 = vcombine.low %v791_v23, %v807_v24 }
  0xe5   : > { %v11579_v30 = vcombine.high %v792_v25, %v808_v26  ;;  %v11578_v37 = vcombine.low %v792_v25, %v808_v26 }
  0xe6   : > { %6678 = vmatpush1.bf16.msra.mxu0 %v11320_v31  ;;  %6760 = vmatpush1.bf16.msra.mxu1 %v11322_v32  ;;  %v823_v31 = vld [vmem:[#allocation2 + $0x1010] sm:$0xff] }
  0xe7   : > { %6679 = vmatprep.subr.bf16.mxu0 %v11353_v34  ;;  %6761 = vmatprep.subr.bf16.mxu1 %v11355_v35  ;;  %v839_v32 = vld [vmem:[#allocation2 + $0x1090] sm:$0xff]  ;;  %v824_v34 = vld [vmem:[#allocation2 + $0x1018] sm:$0xff] }
  0xe8   : > { %v840_v35 = vld [vmem:[#allocation2 + $0x1098] sm:$0xff]  ;;  %v11609_v38 = vcombine.high %v823_v31, %v839_v32  ;;  %v11608_v15 = vcombine.low %v823_v31, %v839_v32 }
  0xe9   : > { %v11611_v39 = vcombine.high %v824_v34, %v840_v35  ;;  %v11610_v44 = vcombine.low %v824_v34, %v840_v35 }
  0xea   : > { %6680 = vmatpush1.bf16.msra.mxu0 %v11352_v40  ;;  %6762 = vmatpush1.bf16.msra.mxu1 %v11354_v41  ;;  %v855_v40 = vld [vmem:[#allocation2 + $0x1110] sm:$0xff] }
  0xeb   : > { %6681 = vmatprep.subr.bf16.mxu0 %v11385_v42  ;;  %6763 = vmatprep.subr.bf16.mxu1 %v11387_v43  ;;  %v871_v41 = vld [vmem:[#allocation2 + $0x1190] sm:$0xff]  ;;  %v856_v42 = vld [vmem:[#allocation2 + $0x1118] sm:$0xff] }
  0xec   : > { %v872_v43 = vld [vmem:[#allocation2 + $0x1198] sm:$0xff]  ;;  %v11641_v45 = vcombine.high %v855_v40, %v871_v41  ;;  %v11640_v51 = vcombine.low %v855_v40, %v871_v41 }
  0xed   : > { %v11643_v46 = vcombine.high %v856_v42, %v872_v43  ;;  %v11642_v52 = vcombine.low %v856_v42, %v872_v43 }
  0xee   : > { %6682 = vmatpush1.bf16.msra.mxu0 %v11384_v47  ;;  %6764 = vmatpush1.bf16.msra.mxu1 %v11386_v48  ;;  %v887_v47 = vld [vmem:[#allocation2 + $0x1210] sm:$0xff] }
  0xef   : > { %6683 = vmatprep.subr.bf16.mxu0 %v11417_v49  ;;  %6765 = vmatprep.subr.bf16.mxu1 %v11419_v50  ;;  %v903_v48 = vld [vmem:[#allocation2 + $0x1290] sm:$0xff]  ;;  %v888_v49 = vld [vmem:[#allocation2 + $0x1218] sm:$0xff] }
  0xf0   : > { %v904_v50 = vld [vmem:[#allocation2 + $0x1298] sm:$0xff]  ;;  %v11673_v54 = vcombine.high %v887_v47, %v903_v48  ;;  %v11672_v61 = vcombine.low %v887_v47, %v903_v48 }
  0xf1   : > { %v11675_v55 = vcombine.high %v888_v49, %v904_v50  ;;  %v11674_v62 = vcombine.low %v888_v49, %v904_v50 }
  0xf2   : > { %6684 = vmatpush1.bf16.msra.mxu0 %v11416_v56  ;;  %6766 = vmatpush1.bf16.msra.mxu1 %v11418_v58  ;;  %v919_v56 = vld [vmem:[#allocation2 + $0x1310] sm:$0xff] }
  0xf3   : > { %6685 = vmatprep.subr.bf16.mxu0 %v11449_v59  ;;  %6767 = vmatprep.subr.bf16.mxu1 %v11451_v60  ;;  %v935_v58 = vld [vmem:[#allocation2 + $0x1390] sm:$0xff]  ;;  %v920_v59 = vld [vmem:[#allocation2 + $0x1318] sm:$0xff] }
  0xf4   : > { %v936_v60 = vld [vmem:[#allocation2 + $0x1398] sm:$0xff]  ;;  %v11705_v63 = vcombine.high %v919_v56, %v935_v58  ;;  %v11704_v5 = vcombine.low %v919_v56, %v935_v58 }
  0xf5   : > { %v11707_v0 = vcombine.high %v920_v59, %v936_v60  ;;  %v11706_v6 = vcombine.low %v920_v59, %v936_v60 }
  0xf6   : > { %6686 = vmatpush1.bf16.msra.mxu0 %v11448_v1  ;;  %6768 = vmatpush1.bf16.msra.mxu1 %v11450_v2  ;;  %v951_v1 = vld [vmem:[#allocation2 + $0x1410] sm:$0xff] }
  0xf7   : > { %6687 = vmatprep.subr.bf16.mxu0 %v11481_v3  ;;  %6769 = vmatprep.subr.bf16.mxu1 %v11483_v4  ;;  %v967_v2 = vld [vmem:[#allocation2 + $0x1490] sm:$0xff]  ;;  %v952_v3 = vld [vmem:[#allocation2 + $0x1418] sm:$0xff] }
  0xf8   : > { %v968_v4 = vld [vmem:[#allocation2 + $0x1498] sm:$0xff]  ;;  %v11737_v7 = vcombine.high %v951_v1, %v967_v2  ;;  %v11736_v14 = vcombine.low %v951_v1, %v967_v2 }
  0xf9   : > { %v11739_v8 = vcombine.high %v952_v3, %v968_v4  ;;  %v11738_v16 = vcombine.low %v952_v3, %v968_v4 }
  0xfa   : > { %6688 = vmatpush1.bf16.msra.mxu0 %v11480_v9  ;;  %6770 = vmatpush1.bf16.msra.mxu1 %v11482_v10  ;;  %v983_v9 = vld [vmem:[#allocation2 + $0x1510] sm:$0xff] }
  0xfb   : > { %6689 = vmatprep.subr.bf16.mxu0 %v11513_v11  ;;  %6771 = vmatprep.subr.bf16.mxu1 %v11515_v13  ;;  %v999_v10 = vld [vmem:[#allocation2 + $0x1590] sm:$0xff]  ;;  %v984_v11 = vld [vmem:[#allocation2 + $0x1518] sm:$0xff] }
  0xfc   : > { %v1000_v13 = vld [vmem:[#allocation2 + $0x1598] sm:$0xff]  ;;  %v11769_v17 = vcombine.high %v983_v9, %v999_v10  ;;  %v11768_v23 = vcombine.low %v983_v9, %v999_v10 }
  0xfd   : > { %v11771_v18 = vcombine.high %v984_v11, %v1000_v13  ;;  %v11770_v24 = vcombine.low %v984_v11, %v1000_v13 }
  0xfe   : > { %6690 = vmatpush1.bf16.msra.mxu0 %v11512_v19  ;;  %6772 = vmatpush1.bf16.msra.mxu1 %v11514_v20  ;;  %v1015_v19 = vld [vmem:[#allocation2 + $0x1610] sm:$0xff] }
  0xff   : > { %6691 = vmatprep.subr.bf16.mxu0 %v11545_v21  ;;  %6773 = vmatprep.subr.bf16.mxu1 %v11547_v53  ;;  %v1031_v20 = vld [vmem:[#allocation2 + $0x1690] sm:$0xff]  ;;  %v1016_v21 = vld [vmem:[#allocation2 + $0x1618] sm:$0xff] }
 0x100   : > { %v1032_v53 = vld [vmem:[#allocation2 + $0x1698] sm:$0xff]  ;;  %v11801_v25 = vcombine.high %v1015_v19, %v1031_v20  ;;  %v11800_v31 = vcombine.low %v1015_v19, %v1031_v20 }
 0x101   : > { %v11803_v26 = vcombine.high %v1016_v21, %v1032_v53  ;;  %v11802_v32 = vcombine.low %v1016_v21, %v1032_v53 }
 0x102   : > { %6692 = vmatpush1.bf16.msra.mxu0 %v11544_v27  ;;  %6774 = vmatpush1.bf16.msra.mxu1 %v11546_v28  ;;  %v1047_v27 = vld [vmem:[#allocation2 + $0x1710] sm:$0xff] }
 0x103   : > { %6693 = vmatprep.subr.bf16.mxu0 %v11577_v29  ;;  %6775 = vmatprep.subr.bf16.mxu1 %v11579_v30  ;;  %v1063_v28 = vld [vmem:[#allocation2 + $0x1790] sm:$0xff]  ;;  %v1048_v29 = vld [vmem:[#allocation2 + $0x1718] sm:$0xff] }
 0x104   : > { %v1064_v30 = vld [vmem:[#allocation2 + $0x1798] sm:$0xff]  ;;  %v11833_v34 = vcombine.high %v1047_v27, %v1063_v28  ;;  %v11832_v40 = vcombine.low %v1047_v27, %v1063_v28 }
 0x105   : > { %v11835_v35 = vcombine.high %v1048_v29, %v1064_v30  ;;  %v11834_v41 = vcombine.low %v1048_v29, %v1064_v30 }
 0x106   : > { %6694 = vmatpush1.bf16.msra.mxu0 %v11576_v36  ;;  %6776 = vmatpush1.bf16.msra.mxu1 %v11578_v37  ;;  %v1079_v36 = vld [vmem:[#allocation2 + $0x1810] sm:$0xff] }
 0x107   : > { %6704 = vmatprep.subr.bf16.mxu0 %v11609_v38  ;;  %6786 = vmatprep.subr.bf16.mxu1 %v11611_v39  ;;  %v1095_v37 = vld [vmem:[#allocation2 + $0x1890] sm:$0xff]  ;;  %v1080_v38 = vld [vmem:[#allocation2 + $0x1818] sm:$0xff] }
 0x108   : > { %v1096_v39 = vld [vmem:[#allocation2 + $0x1898] sm:$0xff]  ;;  %v11865_v42 = vcombine.high %v1079_v36, %v1095_v37  ;;  %v11864_v47 = vcombine.low %v1079_v36, %v1095_v37 }
 0x109   : > { %6696 = vmatmul.mubr.bf16.vlgmr.msra.gmra.mrb[4].mxu0 %v12962_v12  ;;  %6778 = vmatmul.mubr.bf16.vlgmr.msra.gmra.mrb[4].mxu1 %v12962_v12  ;;  %v11867_v43 = vcombine.high %v1080_v38, %v1096_v39  ;;  %v11866_v48 = vcombine.low %v1080_v38, %v1096_v39 }
 0x10a   : > { %6705 = vmatpush1.bf16.msra.mxu0 %v11608_v15  ;;  %6787 = vmatpush1.bf16.msra.mxu1 %v11610_v44  ;;  %v1111_v15 = vld [vmem:[#allocation2 + $0x1910] sm:$0xff] }
 0x10b   : > { %6706 = vmatprep.subr.bf16.mxu0 %v11641_v45  ;;  %6788 = vmatprep.subr.bf16.mxu1 %v11643_v46  ;;  %v1127_v44 = vld [vmem:[#allocation2 + $0x1990] sm:$0xff]  ;;  %v1112_v45 = vld [vmem:[#allocation2 + $0x1918] sm:$0xff] }
 0x10c   : > { %6736 = vmatprep.mubr.bf16.mxu0 %v12969_v22  ;;  %6818 = vmatprep.mubr.bf16.mxu1 %v12969_v22  ;;  %v1128_v46 = vld [vmem:[#allocation2 + $0x1998] sm:$0xff]  ;;  %v11897_v49 = vcombine.high %v1111_v15, %v1127_v44  ;;  %v11896_v56 = vcombine.low %v1111_v15, %v1127_v44 }
 0x10d   : > { %v11899_v50 = vcombine.high %v1112_v45, %v1128_v46  ;;  %v11898_v58 = vcombine.low %v1112_v45, %v1128_v46 }
 0x10e   : > { %6707 = vmatpush1.bf16.msra.mxu0 %v11640_v51  ;;  %6789 = vmatpush1.bf16.msra.mxu1 %v11642_v52  ;;  %v1143_v51 = vld [vmem:[#allocation2 + $0x1a10] sm:$0xff] }
 0x10f   : > { %6708 = vmatprep.subr.bf16.mxu0 %v11673_v54  ;;  %6790 = vmatprep.subr.bf16.mxu1 %v11675_v55  ;;  %v1159_v52 = vld [vmem:[#allocation2 + $0x1a90] sm:$0xff]  ;;  %v1144_v54 = vld [vmem:[#allocation2 + $0x1a18] sm:$0xff] }
 0x110   : > { %v1160_v55 = vld [vmem:[#allocation2 + $0x1a98] sm:$0xff]  ;;  %v11929_v59 = vcombine.high %v1143_v51, %v1159_v52  ;;  %v11928_v1 = vcombine.low %v1143_v51, %v1159_v52 }
 0x111   : > { %v11931_v60 = vcombine.high %v1144_v54, %v1160_v55  ;;  %v11930_v2 = vcombine.low %v1144_v54, %v1160_v55 }
 0x112   : > { %6709 = vmatpush1.bf16.msra.mxu0 %v11672_v61  ;;  %6791 = vmatpush1.bf16.msra.mxu1 %v11674_v62  ;;  %v1175_v61 = vld [vmem:[#allocation2 + $0x1b10] sm:$0xff] }
 0x113   : > { %6710 = vmatprep.subr.bf16.mxu0 %v11705_v63  ;;  %6792 = vmatprep.subr.bf16.mxu1 %v11707_v0  ;;  %v1191_v62 = vld [vmem:[#allocation2 + $0x1b90] sm:$0xff]  ;;  %v1176_v63 = vld [vmem:[#allocation2 + $0x1b18] sm:$0xff] }
 0x114   : > { %v1192_v0 = vld [vmem:[#allocation2 + $0x1b98] sm:$0xff]  ;;  %v11961_v3 = vcombine.high %v1175_v61, %v1191_v62  ;;  %v11960_v9 = vcombine.low %v1175_v61, %v1191_v62 }
 0x115   : > { %v11963_v4 = vcombine.high %v1176_v63, %v1192_v0  ;;  %v11962_v10 = vcombine.low %v1176_v63, %v1192_v0 }
 0x116   : > { %6711 = vmatpush1.bf16.msra.mxu0 %v11704_v5  ;;  %6793 = vmatpush1.bf16.msra.mxu1 %v11706_v6  ;;  %v1207_v5 = vld [vmem:[#allocation2 + $0x1c10] sm:$0xff] }
 0x117   : > { %6712 = vmatprep.subr.bf16.mxu0 %v11737_v7  ;;  %6794 = vmatprep.subr.bf16.mxu1 %v11739_v8  ;;  %v1223_v6 = vld [vmem:[#allocation2 + $0x1c90] sm:$0xff]  ;;  %v1208_v7 = vld [vmem:[#allocation2 + $0x1c18] sm:$0xff] }
 0x118   : > { %v1224_v8 = vld [vmem:[#allocation2 + $0x1c98] sm:$0xff]  ;;  %v11993_v11 = vcombine.high %v1207_v5, %v1223_v6  ;;  %v11992_v19 = vcombine.low %v1207_v5, %v1223_v6 }
 0x119   : > { %v11995_v13 = vcombine.high %v1208_v7, %v1224_v8  ;;  %v11994_v20 = vcombine.low %v1208_v7, %v1224_v8 }
 0x11a   : > { %6713 = vmatpush1.bf16.msra.mxu0 %v11736_v14  ;;  %6795 = vmatpush1.bf16.msra.mxu1 %v11738_v16  ;;  %v1239_v14 = vld [vmem:[#allocation2 + $0x1d10] sm:$0xff] }
 0x11b   : > { %6714 = vmatprep.subr.bf16.mxu0 %v11769_v17  ;;  %6796 = vmatprep.subr.bf16.mxu1 %v11771_v18  ;;  %v1255_v16 = vld [vmem:[#allocation2 + $0x1d90] sm:$0xff]  ;;  %v1240_v17 = vld [vmem:[#allocation2 + $0x1d18] sm:$0xff] }
 0x11c   : > { %v1256_v18 = vld [vmem:[#allocation2 + $0x1d98] sm:$0xff]  ;;  %v12025_v21 = vcombine.high %v1239_v14, %v1255_v16  ;;  %v12024_v27 = vcombine.low %v1239_v14, %v1255_v16 }
 0x11d   : > { %v12027_v53 = vcombine.high %v1240_v17, %v1256_v18  ;;  %v12026_v28 = vcombine.low %v1240_v17, %v1256_v18 }
 0x11e   : > { %6715 = vmatpush1.bf16.msra.mxu0 %v11768_v23  ;;  %6797 = vmatpush1.bf16.msra.mxu1 %v11770_v24  ;;  %v1271_v23 = vld [vmem:[#allocation2 + $0x1e10] sm:$0xff] }
 0x11f   : > { %6716 = vmatprep.subr.bf16.mxu0 %v11801_v25  ;;  %6798 = vmatprep.subr.bf16.mxu1 %v11803_v26  ;;  %v1287_v24 = vld [vmem:[#allocation2 + $0x1e90] sm:$0xff]  ;;  %v1272_v25 = vld [vmem:[#allocation2 + $0x1e18] sm:$0xff] }
 0x120   : > { %v1288_v26 = vld [vmem:[#allocation2 + $0x1e98] sm:$0xff]  ;;  %v12057_v29 = vcombine.high %v1271_v23, %v1287_v24  ;;  %v12056_v36 = vcombine.low %v1271_v23, %v1287_v24 }
 0x121   : > { %v12059_v30 = vcombine.high %v1272_v25, %v1288_v26  ;;  %v12058_v37 = vcombine.low %v1272_v25, %v1288_v26 }
 0x122   : > { %6717 = vmatpush1.bf16.msra.mxu0 %v11800_v31  ;;  %6799 = vmatpush1.bf16.msra.mxu1 %v11802_v32  ;;  %v1303_v31 = vld [vmem:[#allocation2 + $0x1f10] sm:$0xff] }
 0x123   : > { %6718 = vmatprep.subr.bf16.mxu0 %v11833_v34  ;;  %6800 = vmatprep.subr.bf16.mxu1 %v11835_v35  ;;  %v1319_v32 = vld [vmem:[#allocation2 + $0x1f90] sm:$0xff]  ;;  %v1304_v34 = vld [vmem:[#allocation2 + $0x1f18] sm:$0xff] }
 0x124   : > { %v1320_v35 = vld [vmem:[#allocation2 + $0x1f98] sm:$0xff]  ;;  %v12089_v38 = vcombine.high %v1303_v31, %v1319_v32  ;;  %v12088_v15 = vcombine.low %v1303_v31, %v1319_v32 }
 0x125   : > { %v12091_v39 = vcombine.high %v1304_v34, %v1320_v35  ;;  %v12090_v44 = vcombine.low %v1304_v34, %v1320_v35 }
 0x126   : > { %6719 = vmatpush1.bf16.msra.mxu0 %v11832_v40  ;;  %6801 = vmatpush1.bf16.msra.mxu1 %v11834_v41  ;;  %v313_v40 = vld [vmem:[#allocation2 + $0x20] sm:$0xff] }
 0x127   : > { %6720 = vmatprep.subr.bf16.mxu0 %v11865_v42  ;;  %6802 = vmatprep.subr.bf16.mxu1 %v11867_v43  ;;  %v329_v41 = vld [vmem:[#allocation2 + $0xa0] sm:$0xff]  ;;  %v314_v42 = vld [vmem:[#allocation2 + $0x28] sm:$0xff] }
 0x128   : > { %v330_v43 = vld [vmem:[#allocation2 + $0xa8] sm:$0xff]  ;;  %v11101_v45 = vcombine.high %v313_v40, %v329_v41  ;;  %v11100_v51 = vcombine.low %v313_v40, %v329_v41 }
 0x129   : > { %v11103_v46 = vcombine.high %v314_v42, %v330_v43  ;;  %v11102_v52 = vcombine.low %v314_v42, %v330_v43 }
 0x12a   : > { %6721 = vmatpush1.bf16.msra.mxu0 %v11864_v47  ;;  %6803 = vmatpush1.bf16.msra.mxu1 %v11866_v48  ;;  %v345_v47 = vld [vmem:[#allocation2 + $0x120] sm:$0xff] }
 0x12b   : > { %6722 = vmatprep.subr.bf16.mxu0 %v11897_v49  ;;  %6804 = vmatprep.subr.bf16.mxu1 %v11899_v50  ;;  %v361_v48 = vld [vmem:[#allocation2 + $0x1a0] sm:$0xff]  ;;  %v346_v49 = vld [vmem:[#allocation2 + $0x128] sm:$0xff] }
 0x12c   : > { %v362_v50 = vld [vmem:[#allocation2 + $0x1a8] sm:$0xff]  ;;  %v11133_v54 = vcombine.high %v345_v47, %v361_v48  ;;  %v11132_v61 = vcombine.low %v345_v47, %v361_v48 }
 0x12d   : > { %v11135_v55 = vcombine.high %v346_v49, %v362_v50  ;;  %v11134_v62 = vcombine.low %v346_v49, %v362_v50 }
 0x12e   : > { %6723 = vmatpush1.bf16.msra.mxu0 %v11896_v56  ;;  %6805 = vmatpush1.bf16.msra.mxu1 %v11898_v58  ;;  %v377_v56 = vld [vmem:[#allocation2 + $0x220] sm:$0xff] }
 0x12f   : > { %6724 = vmatprep.subr.bf16.mxu0 %v11929_v59  ;;  %6806 = vmatprep.subr.bf16.mxu1 %v11931_v60  ;;  %v393_v58 = vld [vmem:[#allocation2 + $0x2a0] sm:$0xff]  ;;  %v378_v59 = vld [vmem:[#allocation2 + $0x228] sm:$0xff] }
 0x130   : > { %v394_v60 = vld [vmem:[#allocation2 + $0x2a8] sm:$0xff]  ;;  %v11165_v63 = vcombine.high %v377_v56, %v393_v58  ;;  %v11164_v5 = vcombine.low %v377_v56, %v393_v58 }
 0x131   : > { %v11167_v0 = vcombine.high %v378_v59, %v394_v60  ;;  %v11166_v6 = vcombine.low %v378_v59, %v394_v60 }
 0x132   : > { %6725 = vmatpush1.bf16.msra.mxu0 %v11928_v1  ;;  %6807 = vmatpush1.bf16.msra.mxu1 %v11930_v2  ;;  %v409_v1 = vld [vmem:[#allocation2 + $0x320] sm:$0xff] }
 0x133   : > { %6726 = vmatprep.subr.bf16.mxu0 %v11961_v3  ;;  %6808 = vmatprep.subr.bf16.mxu1 %v11963_v4  ;;  %v425_v2 = vld [vmem:[#allocation2 + $0x3a0] sm:$0xff]  ;;  %v410_v3 = vld [vmem:[#allocation2 + $0x328] sm:$0xff] }
 0x134   : > { %v426_v4 = vld [vmem:[#allocation2 + $0x3a8] sm:$0xff]  ;;  %v11197_v7 = vcombine.high %v409_v1, %v425_v2  ;;  %v11196_v14 = vcombine.low %v409_v1, %v425_v2 }
 0x135   : > { %v11199_v8 = vcombine.high %v410_v3, %v426_v4  ;;  %v11198_v16 = vcombine.low %v410_v3, %v426_v4 }
 0x136   : > { %6727 = vmatpush1.bf16.msra.mxu0 %v11960_v9  ;;  %6809 = vmatpush1.bf16.msra.mxu1 %v11962_v10  ;;  %v441_v9 = vld [vmem:[#allocation2 + $0x420] sm:$0xff] }
 0x137   : > { %6728 = vmatprep.subr.bf16.mxu0 %v11993_v11  ;;  %6810 = vmatprep.subr.bf16.mxu1 %v11995_v13  ;;  %v457_v10 = vld [vmem:[#allocation2 + $0x4a0] sm:$0xff]  ;;  %v442_v11 = vld [vmem:[#allocation2 + $0x428] sm:$0xff] }
 0x138   : > { %v458_v13 = vld [vmem:[#allocation2 + $0x4a8] sm:$0xff]  ;;  %v11229_v17 = vcombine.high %v441_v9, %v457_v10  ;;  %v11228_v23 = vcombine.low %v441_v9, %v457_v10 }
 0x139   : > { %v11231_v18 = vcombine.high %v442_v11, %v458_v13  ;;  %v11230_v24 = vcombine.low %v442_v11, %v458_v13 }
 0x13a   : > { %6729 = vmatpush1.bf16.msra.mxu0 %v11992_v19  ;;  %6811 = vmatpush1.bf16.msra.mxu1 %v11994_v20  ;;  %v473_v19 = vld [vmem:[#allocation2 + $0x520] sm:$0xff] }
 0x13b   : > { %6730 = vmatprep.subr.bf16.mxu0 %v12025_v21  ;;  %6812 = vmatprep.subr.bf16.mxu1 %v12027_v53  ;;  %v489_v20 = vld [vmem:[#allocation2 + $0x5a0] sm:$0xff]  ;;  %v474_v21 = vld [vmem:[#allocation2 + $0x528] sm:$0xff] }
 0x13c   : > { %v490_v53 = vld [vmem:[#allocation2 + $0x5a8] sm:$0xff]  ;;  %v11261_v25 = vcombine.high %v473_v19, %v489_v20  ;;  %v11260_v31 = vcombine.low %v473_v19, %v489_v20 }
 0x13d   : > { %v11263_v26 = vcombine.high %v474_v21, %v490_v53  ;;  %v11262_v32 = vcombine.low %v474_v21, %v490_v53 }
 0x13e   : > { %6731 = vmatpush1.bf16.msra.mxu0 %v12024_v27  ;;  %6813 = vmatpush1.bf16.msra.mxu1 %v12026_v28  ;;  %v505_v27 = vld [vmem:[#allocation2 + $0x620] sm:$0xff] }
 0x13f   : > { %6732 = vmatprep.subr.bf16.mxu0 %v12057_v29  ;;  %6814 = vmatprep.subr.bf16.mxu1 %v12059_v30  ;;  %v521_v28 = vld [vmem:[#allocation2 + $0x6a0] sm:$0xff]  ;;  %v506_v29 = vld [vmem:[#allocation2 + $0x628] sm:$0xff] }
 0x140   : > { %v522_v30 = vld [vmem:[#allocation2 + $0x6a8] sm:$0xff]  ;;  %v11293_v34 = vcombine.high %v505_v27, %v521_v28  ;;  %v11292_v40 = vcombine.low %v505_v27, %v521_v28 }
 0x141   : > { %v11295_v35 = vcombine.high %v506_v29, %v522_v30  ;;  %v11294_v41 = vcombine.low %v506_v29, %v522_v30 }
 0x142   : > { %6733 = vmatpush1.bf16.msra.mxu0 %v12056_v36  ;;  %6815 = vmatpush1.bf16.msra.mxu1 %v12058_v37  ;;  %v537_v36 = vld [vmem:[#allocation2 + $0x720] sm:$0xff] }
 0x143   : > { %6734 = vmatprep.subr.bf16.mxu0 %v12089_v38  ;;  %6816 = vmatprep.subr.bf16.mxu1 %v12091_v39  ;;  %v553_v37 = vld [vmem:[#allocation2 + $0x7a0] sm:$0xff]  ;;  %v538_v38 = vld [vmem:[#allocation2 + $0x728] sm:$0xff] }
 0x144   : > { %v554_v39 = vld [vmem:[#allocation2 + $0x7a8] sm:$0xff]  ;;  %v11325_v42 = vcombine.high %v537_v36, %v553_v37  ;;  %v11324_v47 = vcombine.low %v537_v36, %v553_v37 }
 0x145   : > { %v11327_v43 = vcombine.high %v538_v38, %v554_v39  ;;  %v11326_v48 = vcombine.low %v538_v38, %v554_v39 }
 0x146   : > { %6735 = vmatpush1.bf16.msra.mxu0 %v12088_v15  ;;  %6817 = vmatpush1.bf16.msra.mxu1 %v12090_v44  ;;  %v569_v15 = vld [vmem:[#allocation2 + $0x820] sm:$0xff] }
 0x147   : > { %6827 = vmatprep.subr.bf16.mxu0 %v11101_v45  ;;  %6909 = vmatprep.subr.bf16.mxu1 %v11103_v46  ;;  %v585_v44 = vld [vmem:[#allocation2 + $0x8a0] sm:$0xff]  ;;  %v570_v45 = vld [vmem:[#allocation2 + $0x828] sm:$0xff] }
 0x148   : > { %v586_v46 = vld [vmem:[#allocation2 + $0x8a8] sm:$0xff]  ;;  %v11357_v49 = vcombine.high %v569_v15, %v585_v44  ;;  %v11356_v56 = vcombine.low %v569_v15, %v585_v44 }
 0x149   : > { %6737 = vmatmul.mubr.bf16.vlgmr.msra.gmra.mrb[4].mxu0 %v13007_v33  ;;  %6819 = vmatmul.mubr.bf16.vlgmr.msra.gmra.mrb[4].mxu1 %v13007_v33  ;;  %v11359_v50 = vcombine.high %v570_v45, %v586_v46  ;;  %v11358_v58 = vcombine.low %v570_v45, %v586_v46 }
 0x14a   : > { %6828 = vmatpush1.bf16.msra.mxu0 %v11100_v51  ;;  %6910 = vmatpush1.bf16.msra.mxu1 %v11102_v52  ;;  %v601_v51 = vld [vmem:[#allocation2 + $0x920] sm:$0xff] }
 0x14b   : > { %6829 = vmatprep.subr.bf16.mxu0 %v11133_v54  ;;  %6911 = vmatprep.subr.bf16.mxu1 %v11135_v55  ;;  %v617_v52 = vld [vmem:[#allocation2 + $0x9a0] sm:$0xff]  ;;  %v602_v54 = vld [vmem:[#allocation2 + $0x928] sm:$0xff] }
 0x14c   : > { %6859 = vmatprep.mubr.bf16.mxu0 %v12956_v57  ;;  %6941 = vmatprep.mubr.bf16.mxu1 %v12956_v57  ;;  %v618_v55 = vld [vmem:[#allocation2 + $0x9a8] sm:$0xff]  ;;  %v11389_v59 = vcombine.high %v601_v51, %v617_v52  ;;  %v11388_v1 = vcombine.low %v601_v51, %v617_v52 }
 0x14d   : > { %v11391_v60 = vcombine.high %v602_v54, %v618_v55  ;;  %v11390_v2 = vcombine.low %v602_v54, %v618_v55 }
 0x14e   : > { %6830 = vmatpush1.bf16.msra.mxu0 %v11132_v61  ;;  %6912 = vmatpush1.bf16.msra.mxu1 %v11134_v62  ;;  %v633_v61 = vld [vmem:[#allocation2 + $0xa20] sm:$0xff] }
 0x14f   : > { %6831 = vmatprep.subr.bf16.mxu0 %v11165_v63  ;;  %6913 = vmatprep.subr.bf16.mxu1 %v11167_v0  ;;  %v649_v62 = vld [vmem:[#allocation2 + $0xaa0] sm:$0xff]  ;;  %v634_v63 = vld [vmem:[#allocation2 + $0xa28] sm:$0xff] }
 0x150   : > { %v650_v0 = vld [vmem:[#allocation2 + $0xaa8] sm:$0xff]  ;;  %v11421_v3 = vcombine.high %v633_v61, %v649_v62  ;;  %v11420_v9 = vcombine.low %v633_v61, %v649_v62 }
 0x151   : > { %v11423_v4 = vcombine.high %v634_v63, %v650_v0  ;;  %v11422_v10 = vcombine.low %v634_v63, %v650_v0 }
 0x152   : > { %6832 = vmatpush1.bf16.msra.mxu0 %v11164_v5  ;;  %6914 = vmatpush1.bf16.msra.mxu1 %v11166_v6  ;;  %v665_v5 = vld [vmem:[#allocation2 + $0xb20] sm:$0xff] }
 0x153   : > { %6833 = vmatprep.subr.bf16.mxu0 %v11197_v7  ;;  %6915 = vmatprep.subr.bf16.mxu1 %v11199_v8  ;;  %v681_v6 = vld [vmem:[#allocation2 + $0xba0] sm:$0xff]  ;;  %v666_v7 = vld [vmem:[#allocation2 + $0xb28] sm:$0xff] }
 0x154   : > { %v682_v8 = vld [vmem:[#allocation2 + $0xba8] sm:$0xff]  ;;  %v11453_v11 = vcombine.high %v665_v5, %v681_v6  ;;  %v11452_v19 = vcombine.low %v665_v5, %v681_v6 }
 0x155   : > { %v11455_v13 = vcombine.high %v666_v7, %v682_v8  ;;  %v11454_v20 = vcombine.low %v666_v7, %v682_v8 }
 0x156   : > { %6834 = vmatpush1.bf16.msra.mxu0 %v11196_v14  ;;  %6916 = vmatpush1.bf16.msra.mxu1 %v11198_v16  ;;  %v697_v14 = vld [vmem:[#allocation2 + $0xc20] sm:$0xff] }
 0x157   : > { %6835 = vmatprep.subr.bf16.mxu0 %v11229_v17  ;;  %6917 = vmatprep.subr.bf16.mxu1 %v11231_v18  ;;  %v713_v16 = vld [vmem:[#allocation2 + $0xca0] sm:$0xff]  ;;  %v698_v17 = vld [vmem:[#allocation2 + $0xc28] sm:$0xff] }
 0x158   : > { %v714_v18 = vld [vmem:[#allocation2 + $0xca8] sm:$0xff]  ;;  %v11485_v21 = vcombine.high %v697_v14, %v713_v16  ;;  %v11484_v27 = vcombine.low %v697_v14, %v713_v16 }
 0x159   : > { %v11487_v53 = vcombine.high %v698_v17, %v714_v18  ;;  %v11486_v28 = vcombine.low %v698_v17, %v714_v18 }
 0x15a   : > { %6836 = vmatpush1.bf16.msra.mxu0 %v11228_v23  ;;  %6918 = vmatpush1.bf16.msra.mxu1 %v11230_v24  ;;  %v729_v23 = vld [vmem:[#allocation2 + $0xd20] sm:$0xff] }
 0x15b   : > { %6837 = vmatprep.subr.bf16.mxu0 %v11261_v25  ;;  %6919 = vmatprep.subr.bf16.mxu1 %v11263_v26  ;;  %v745_v24 = vld [vmem:[#allocation2 + $0xda0] sm:$0xff]  ;;  %v730_v25 = vld [vmem:[#allocation2 + $0xd28] sm:$0xff] }
 0x15c   : > { %v746_v26 = vld [vmem:[#allocation2 + $0xda8] sm:$0xff]  ;;  %v11517_v29 = vcombine.high %v729_v23, %v745_v24  ;;  %v11516_v36 = vcombine.low %v729_v23, %v745_v24 }
 0x15d   : > { %v11519_v30 = vcombine.high %v730_v25, %v746_v26  ;;  %v11518_v37 = vcombine.low %v730_v25, %v746_v26 }
 0x15e   : > { %6838 = vmatpush1.bf16.msra.mxu0 %v11260_v31  ;;  %6920 = vmatpush1.bf16.msra.mxu1 %v11262_v32  ;;  %v761_v31 = vld [vmem:[#allocation2 + $0xe20] sm:$0xff] }
 0x15f   : > { %6839 = vmatprep.subr.bf16.mxu0 %v11293_v34  ;;  %6921 = vmatprep.subr.bf16.mxu1 %v11295_v35  ;;  %v777_v32 = vld [vmem:[#allocation2 + $0xea0] sm:$0xff]  ;;  %v762_v34 = vld [vmem:[#allocation2 + $0xe28] sm:$0xff] }
 0x160   : > { %v778_v35 = vld [vmem:[#allocation2 + $0xea8] sm:$0xff]  ;;  %v11549_v38 = vcombine.high %v761_v31, %v777_v32  ;;  %v11548_v15 = vcombine.low %v761_v31, %v777_v32 }
 0x161   : > { %v11551_v39 = vcombine.high %v762_v34, %v778_v35  ;;  %v11550_v44 = vcombine.low %v762_v34, %v778_v35  ;;  %v1002_v31 = vld [vmem:[#allocation2 + $0x15a8] sm:$0xff] }
 0x162   : > { %6840 = vmatpush1.bf16.msra.mxu0 %v11292_v40  ;;  %6922 = vmatpush1.bf16.msra.mxu1 %v11294_v41  ;;  %v793_v40 = vld [vmem:[#allocation2 + $0xf20] sm:$0xff] }
 0x163   : > { %6841 = vmatprep.subr.bf16.mxu0 %v11325_v42  ;;  %6923 = vmatprep.subr.bf16.mxu1 %v11327_v43  ;;  %v809_v41 = vld [vmem:[#allocation2 + $0xfa0] sm:$0xff]  ;;  %v794_v42 = vld [vmem:[#allocation2 + $0xf28] sm:$0xff] }
 0x164   : > { %v810_v43 = vld [vmem:[#allocation2 + $0xfa8] sm:$0xff]  ;;  %v11581_v45 = vcombine.high %v793_v40, %v809_v41  ;;  %v11580_v51 = vcombine.low %v793_v40, %v809_v41  ;;  %v1333_v41 = vld [vmem:[#allocation4] sm:$0xff] }
 0x165   : > { %v11583_v46 = vcombine.high %v794_v42, %v810_v43  ;;  %v11582_v52 = vcombine.low %v794_v42, %v810_v43  ;;  %v1034_v40 = vld [vmem:[#allocation2 + $0x16a8] sm:$0xff]  ;;  %v1335_v43 = vld [vmem:[#allocation4 + $0x10] sm:$0xff] }
 0x166   : > { %6842 = vmatpush1.bf16.msra.mxu0 %v11324_v47  ;;  %6924 = vmatpush1.bf16.msra.mxu1 %v11326_v48  ;;  %v825_v47 = vld [vmem:[#allocation2 + $0x1020] sm:$0xff] }
 0x167   : > { %6843 = vmatprep.subr.bf16.mxu0 %v11357_v49  ;;  %6925 = vmatprep.subr.bf16.mxu1 %v11359_v50  ;;  %v841_v48 = vld [vmem:[#allocation2 + $0x10a0] sm:$0xff]  ;;  %v826_v49 = vld [vmem:[#allocation2 + $0x1028] sm:$0xff] }
 0x168   : > { %v842_v50 = vld [vmem:[#allocation2 + $0x10a8] sm:$0xff]  ;;  %v11613_v54 = vcombine.high %v825_v47, %v841_v48  ;;  %v11612_v61 = vcombine.low %v825_v47, %v841_v48  ;;  %v1336_v48 = vld [vmem:[#allocation4 + $0x18] sm:$0xff] }
 0x169   : > { %v11615_v55 = vcombine.high %v826_v49, %v842_v50  ;;  %v11614_v62 = vcombine.low %v826_v49, %v842_v50  ;;  %v13029_v50 = vpop.permute.xlu1 %7923 }
 0x16a   : > { %6844 = vmatpush1.bf16.msra.mxu0 %v11356_v56  ;;  %6926 = vmatpush1.bf16.msra.mxu1 %v11358_v58  ;;  %v857_v56 = vld [vmem:[#allocation2 + $0x1120] sm:$0xff] }
 0x16b   : > { %6845 = vmatprep.subr.bf16.mxu0 %v11389_v59  ;;  %6927 = vmatprep.subr.bf16.mxu1 %v11391_v60  ;;  %v873_v58 = vld [vmem:[#allocation2 + $0x11a0] sm:$0xff]  ;;  %v858_v59 = vld [vmem:[#allocation2 + $0x1128] sm:$0xff] }
 0x16c   : > { %v874_v60 = vld [vmem:[#allocation2 + $0x11a8] sm:$0xff]  ;;  %v11645_v63 = vcombine.high %v857_v56, %v873_v58  ;;  %v11644_v5 = vcombine.low %v857_v56, %v873_v58 }
 0x16d   : > { %v11647_v0 = vcombine.high %v858_v59, %v874_v60  ;;  %v11646_v6 = vcombine.low %v858_v59, %v874_v60  ;;  %v1050_v58 = vld [vmem:[#allocation2 + $0x1728] sm:$0xff] }
 0x16e   : > { %6846 = vmatpush1.bf16.msra.mxu0 %v11388_v1  ;;  %6928 = vmatpush1.bf16.msra.mxu1 %v11390_v2  ;;  %v889_v1 = vld [vmem:[#allocation2 + $0x1220] sm:$0xff]  ;;  %v1066_v59 = vld [vmem:[#allocation2 + $0x17a8] sm:$0xff] }
 0x16f   : > { %6847 = vmatprep.subr.bf16.mxu0 %v11421_v3  ;;  %6929 = vmatprep.subr.bf16.mxu1 %v11423_v4  ;;  %v905_v2 = vld [vmem:[#allocation2 + $0x12a0] sm:$0xff]  ;;  %v890_v3 = vld [vmem:[#allocation2 + $0x1228] sm:$0xff] }
 0x170   : > { %v906_v4 = vld [vmem:[#allocation2 + $0x12a8] sm:$0xff]  ;;  %v11677_v7 = vcombine.high %v889_v1, %v905_v2  ;;  %v11676_v14 = vcombine.low %v889_v1, %v905_v2 }
 0x171   : > { %v11679_v8 = vcombine.high %v890_v3, %v906_v4  ;;  %v11678_v16 = vcombine.low %v890_v3, %v906_v4 }
 0x172   : > { %6848 = vmatpush1.bf16.msra.mxu0 %v11420_v9  ;;  %6930 = vmatpush1.bf16.msra.mxu1 %v11422_v10  ;;  %v921_v9 = vld [vmem:[#allocation2 + $0x1320] sm:$0xff] }
 0x173   : > { %6849 = vmatprep.subr.bf16.mxu0 %v11453_v11  ;;  %6931 = vmatprep.subr.bf16.mxu1 %v11455_v13  ;;  %v937_v10 = vld [vmem:[#allocation2 + $0x13a0] sm:$0xff]  ;;  %v922_v11 = vld [vmem:[#allocation2 + $0x1328] sm:$0xff] }
 0x174   : > { %v938_v13 = vld [vmem:[#allocation2 + $0x13a8] sm:$0xff]  ;;  %v11709_v17 = vcombine.high %v921_v9, %v937_v10  ;;  %v11708_v23 = vcombine.low %v921_v9, %v937_v10  ;;  %v11839_v10 = vcombine.high %v1050_v58, %v1066_v59 }
 0x175   : > { %v11711_v18 = vcombine.high %v922_v11, %v938_v13  ;;  %v11710_v24 = vcombine.low %v922_v11, %v938_v13  ;;  %v1081_v11 = vld [vmem:[#allocation2 + $0x1820] sm:$0xff] }
 0x176   : > { %6850 = vmatpush1.bf16.msra.mxu0 %v11452_v19  ;;  %6932 = vmatpush1.bf16.msra.mxu1 %v11454_v20  ;;  %v953_v19 = vld [vmem:[#allocation2 + $0x1420] sm:$0xff] }
 0x177   : > { %6851 = vmatprep.subr.bf16.mxu0 %v11485_v21  ;;  %6933 = vmatprep.subr.bf16.mxu1 %v11487_v53  ;;  %v969_v20 = vld [vmem:[#allocation2 + $0x14a0] sm:$0xff]  ;;  %v954_v21 = vld [vmem:[#allocation2 + $0x1428] sm:$0xff] }
 0x178   : > { %v970_v53 = vld [vmem:[#allocation2 + $0x14a8] sm:$0xff]  ;;  %v11741_v25 = vcombine.high %v953_v19, %v969_v20  ;;  %v11740_v32 = vcombine.low %v953_v19, %v969_v20  ;;  %v1097_v13 = vld [vmem:[#allocation2 + $0x18a0] sm:$0xff] }
 0x179   : > { %v11743_v26 = vcombine.high %v954_v21, %v970_v53  ;;  %v11742_v34 = vcombine.low %v954_v21, %v970_v53  ;;  %v11838_v53 = vcombine.low %v1050_v58, %v1066_v59 }
 0x17a   : > { %6852 = vmatpush1.bf16.msra.mxu0 %v11484_v27  ;;  %6934 = vmatpush1.bf16.msra.mxu1 %v11486_v28  ;;  %v985_v27 = vld [vmem:[#allocation2 + $0x1520] sm:$0xff] }
 0x17b   : > { %6853 = vmatprep.subr.bf16.mxu0 %v11517_v29  ;;  %6935 = vmatprep.subr.bf16.mxu1 %v11519_v30  ;;  %v1001_v28 = vld [vmem:[#allocation2 + $0x15a0] sm:$0xff]  ;;  %v13025_v29 = vpop.permute.xlu0 %7814  ;;  %v986_v30 = vld [vmem:[#allocation2 + $0x1528] sm:$0xff] }
 0x17c   : > { %v11773_v35 = vcombine.high %v985_v27, %v1001_v28  ;;  %v11772_v42 = vcombine.low %v985_v27, %v1001_v28  ;;  %v1113_v28 = vld [vmem:[#allocation2 + $0x1920] sm:$0xff] }
 0x17e   : > { %6854 = vmatpush1.bf16.msra.mxu0 %v11516_v36  ;;  %6936 = vmatpush1.bf16.msra.mxu1 %v11518_v37  ;;  %v11775_v36 = vcombine.high %v986_v30, %v1002_v31  ;;  %v1017_v37 = vld [vmem:[#allocation2 + $0x1620] sm:$0xff] }
 0x17f   : > { %6855 = vmatprep.subr.bf16.mxu0 %v11549_v38  ;;  %6937 = vmatprep.subr.bf16.mxu1 %v11551_v39  ;;  %v1033_v38 = vld [vmem:[#allocation2 + $0x16a0] sm:$0xff]  ;;  %v1018_v39 = vld [vmem:[#allocation2 + $0x1628] sm:$0xff] }
 0x180   : > { %v11807_v49 = vcombine.high %v1018_v39, %v1034_v40 }
 0x182   : > { %6856 = vmatpush1.bf16.msra.mxu0 %v11548_v15  ;;  %6938 = vmatpush1.bf16.msra.mxu1 %v11550_v44  ;;  %v1334_v15 = vld [vmem:[#allocation4 + $0x8] sm:$0xff]  ;;  %v11774_v44 = vcombine.low %v986_v30, %v1002_v31  ;;  %v1129_v30 = vld [vmem:[#allocation2 + $0x19a0] sm:$0xff] }
 0x183   : > { %6857 = vmatprep.subr.bf16.mxu0 %v11581_v45  ;;  %6939 = vmatprep.subr.bf16.mxu1 %v11583_v46  ;;  %v13027_v45 = vpop.permute.xlu0 %7852  ;;  %v11805_v46 = vcombine.high %v1017_v37, %v1033_v38  ;;  %v11900_v59 = vcombine.low %v1113_v28, %v1129_v30 }
 0x186   : > { %6858 = vmatpush1.bf16.msra.mxu0 %v11580_v51  ;;  %6940 = vmatpush1.bf16.msra.mxu1 %v11582_v52  ;;  %v1049_v51 = vld [vmem:[#allocation2 + $0x1720] sm:$0xff] }
 0x187   : > { %6868 = vmatprep.subr.bf16.mxu0 %v11613_v54  ;;  %6950 = vmatprep.subr.bf16.mxu1 %v11615_v55  ;;  %v1065_v52 = vld [vmem:[#allocation2 + $0x17a0] sm:$0xff] }
 0x188   : > { %v11836_v19 = vcombine.low %v1049_v51, %v1065_v52 }
 0x189   : > { %6860 = vmatmul.mubr.bf16.vlgmr.msra.gmra.mrb[8].mxu0 %v12962_v12  ;;  %6942 = vmatmul.mubr.bf16.vlgmr.msra.gmra.mrb[8].mxu1 %v12962_v12 }
 0x18a   : > { %6869 = vmatpush1.bf16.msra.mxu0 %v11612_v61  ;;  %6951 = vmatpush1.bf16.msra.mxu1 %v11614_v62 }
 0x18b   : > { %6870 = vmatprep.subr.bf16.mxu0 %v11645_v63  ;;  %6952 = vmatprep.subr.bf16.mxu1 %v11647_v0  ;;  %v11804_v63 = vcombine.low %v1017_v37, %v1033_v38  ;;  %v11806_v0 = vcombine.low %v1018_v39, %v1034_v40  ;;  %v11868_v38 = vcombine.low %v1081_v11, %v1097_v13 }
 0x18c   : > { %6900 = vmatprep.mubr.bf16.mxu0 %v12969_v22  ;;  %6982 = vmatprep.mubr.bf16.mxu1 %v12969_v22 }
 0x18e   : > { %6871 = vmatpush1.bf16.msra.mxu0 %v11644_v5  ;;  %6953 = vmatpush1.bf16.msra.mxu1 %v11646_v6  ;;  %v11837_v5 = vcombine.high %v1049_v51, %v1065_v52  ;;  %v1146_v52 = vld [vmem:[#allocation2 + $0x1a28] sm:$0xff] }
 0x18f   : > { %6872 = vmatprep.subr.bf16.mxu0 %v11677_v7  ;;  %6954 = vmatprep.subr.bf16.mxu1 %v11679_v8 }
 0x192   : > { %6873 = vmatpush1.bf16.msra.mxu0 %v11676_v14  ;;  %6955 = vmatpush1.bf16.msra.mxu1 %v11678_v16  ;;  %v1082_v16 = vld [vmem:[#allocation2 + $0x1828] sm:$0xff] }
 0x193   : > { %6874 = vmatprep.subr.bf16.mxu0 %v11709_v17  ;;  %6956 = vmatprep.subr.bf16.mxu1 %v11711_v18  ;;  %v1098_v17 = vld [vmem:[#allocation2 + $0x18a8] sm:$0xff] }
 0x194   : > { %v11871_v27 = vcombine.high %v1082_v16, %v1098_v17  ;;  %v11870_v39 = vcombine.low %v1082_v16, %v1098_v17 }
 0x196   : > { %6875 = vmatpush1.bf16.msra.mxu0 %v11708_v23  ;;  %6957 = vmatpush1.bf16.msra.mxu1 %v11710_v24  ;;  %v11869_v23 = vcombine.high %v1081_v11, %v1097_v13 }
 0x197   : > { %6876 = vmatprep.subr.bf16.mxu0 %v11741_v25  ;;  %6958 = vmatprep.subr.bf16.mxu1 %v11743_v26  ;;  %v13039_v26 = vpop.permute.xlu1 %7962 }
 0x19a   : > { %6877 = vmatpush1.bf16.msra.mxu0 %v11740_v32  ;;  %6959 = vmatpush1.bf16.msra.mxu1 %v11742_v34  ;;  %v1114_v34 = vld [vmem:[#allocation2 + $0x1928] sm:$0xff] }
 0x19b   : > { %6878 = vmatprep.subr.bf16.mxu0 %v11773_v35  ;;  %6960 = vmatprep.subr.bf16.mxu1 %v11775_v36  ;;  %v1130_v35 = vld [vmem:[#allocation2 + $0x19a8] sm:$0xff]  ;;  %v13051_v58 = vpop.permute.xlu1 %8072 }
 0x19c   : > { %v6574_v47 = vpop.f32.mrb[0].mxu0  ;;  %v6656_v55 = vpop.f32.mrb[0].mxu1 }
 0x19d   : > { %v12505_v54 = vadd.f32 %v6574_v47, %v1333_v41  ;;  %v6576_v56 = vpop.f32.mrb[1].mxu0  ;;  %v12507_v60 = vadd.f32 %v6656_v55, %v1335_v43  ;;  %v6658_v62 = vpop.f32.mrb[1].mxu1  ;;  %v1145_v47 = vld [vmem:[#allocation2 + $0x1a20] sm:$0xff] }
 0x19e   : > { %v12506_v61 = vadd.f32 %v6576_v56, %v1334_v15  ;;  %6879 = vmatpush1.bf16.msra.mxu0 %v11772_v42  ;;  %v6578_v1 = vpop.f32.mrb[2].mxu0  ;;  %v12508_v3 = vadd.f32 %v6658_v62, %v1336_v48  ;;  %v6660_v4 = vpop.f32.mrb[2].mxu1  ;;  %6961 = vmatpush1.bf16.msra.mxu1 %v11774_v44  ;;  %v11901_v42 = vcombine.high %v1113_v28, %v1129_v30  ;;  %v1161_v48 = vld [vmem:[#allocation2 + $0x1aa0] sm:$0xff]  ;;  %v1210_v28 = vld [vmem:[#allocation2 + $0x1c28] sm:$0xff] }
 0x19f   : > { %v7817_v2 = vmul.f32 %v12505_v54, %v13025_v29  ;;  %6880 = vmatprep.subr.bf16.mxu0 %v11805_v46  ;;  %v6579_v6 = vpop.f32.mrb[3].mxu0  ;;  %v7819_v7 = vmul.f32 %v12507_v60, %v13025_v29  ;;  %v6661_v9 = vpop.f32.mrb[3].mxu1  ;;  %6962 = vmatprep.subr.bf16.mxu1 %v11807_v49  ;;  %v11903_v46 = vcombine.high %v1114_v34, %v1130_v35  ;;  %v1162_v54 = vld [vmem:[#allocation2 + $0x1aa8] sm:$0xff]  ;;  %v1193_v4 = vld [vmem:[#allocation2 + $0x1ba0] sm:$0xff] }
 0x1a0   : > { %v7818_v8 = vmul.f32 %v12506_v61, %v13025_v29  ;;  %v7820_v14 = vmul.f32 %v12508_v3, %v13025_v29  ;;  %v13046_v44 = vpop.permute.xlu0 %8033  ;;  %v11902_v62 = vcombine.low %v1114_v34, %v1130_v35  ;;  %v1177_v3 = vld [vmem:[#allocation2 + $0x1b20] sm:$0xff]  ;;  %v11932_v13 = vcombine.low %v1145_v47, %v1161_v48  ;;  %v1226_v30 = vld [vmem:[#allocation2 + $0x1ca8] sm:$0xff] }
 0x1a1   : > { %v7855_v18 = vadd.f32 %v13027_v45, %v7817_v2  ;;  %v7857_v21 = vadd.f32 %v13027_v45, %v7819_v7  ;;  %v11935_v2 = vcombine.high %v1146_v52, %v1162_v54  ;;  %v1178_v7 = vld [vmem:[#allocation2 + $0x1b28] sm:$0xff]  ;;  %v11934_v17 = vcombine.low %v1146_v52, %v1162_v54 }
 0x1a2   : > { %6881 = vmatpush1.bf16.msra.mxu0 %v11804_v63  ;;  %v7856_v20 = vadd.f32 %v13027_v45, %v7818_v8  ;;  %6963 = vmatpush1.bf16.msra.mxu1 %v11806_v0  ;;  %v7858_v25 = vadd.f32 %v13027_v45, %v7820_v14  ;;  %v11933_v63 = vcombine.high %v1145_v47, %v1161_v48  ;;  %v1194_v8 = vld [vmem:[#allocation2 + $0x1ba8] sm:$0xff] }
 0x1a3   : > { %6882 = vmatprep.subr.bf16.mxu0 %v11837_v5  ;;  %v7887_v24 = vmax.f32 %v7855_v18, 0.0  ;;  %6964 = vmatprep.subr.bf16.mxu1 %v11839_v10  ;;  %v7889_v32 = vmax.f32 %v7857_v21, 0.0  ;;  %v11965_v18 = vcombine.high %v1177_v3, %v1193_v4  ;;  %v13063_v21 = vpop.permute.xlu1 %8182  ;;  %v11964_v34 = vcombine.low %v1177_v3, %v1193_v4  ;;  %v1242_v48 = vld [vmem:[#allocation2 + $0x1d28] sm:$0xff]  ;;  %v1289_v3 = vld [vmem:[#allocation2 + $0x1ea0] sm:$0xff] }
 0x1a4   : > { %v7888_v31 = vmax.f32 %v7856_v20, 0.0  ;;  %v7890_v37 = vmax.f32 %v7858_v25, 0.0  ;;  %v13058_v11 = vpop.permute.xlu0 %8143  ;;  %v11966_v35 = vcombine.low %v1178_v7, %v1194_v8 }
 0x1a5   : > { %v7926_v36 = vmul.f32 %v13029_v50, %v7887_v24  ;;  %v7928_v41 = vmul.f32 %v13029_v50, %v7889_v32  ;;  %v1225_v24 = vld [vmem:[#allocation2 + $0x1ca0] sm:$0xff] }
 0x1a6   : > { %6883 = vmatpush1.bf16.msra.mxu0 %v11836_v19  ;;  %v7927_v40 = vmul.f32 %v13029_v50, %v7888_v31  ;;  %6965 = vmatpush1.bf16.msra.mxu1 %v11838_v53  ;;  %v7929_v15 = vmul.f32 %v13029_v50, %v7890_v37  ;;  %v11967_v53 = vcombine.high %v1178_v7, %v1194_v8  ;;  %v1290_v7 = vld [vmem:[#allocation2 + $0x1ea8] sm:$0xff] }
 0x1a7   : > { %6884 = vmatprep.subr.bf16.mxu0 %v11869_v23  ;;  %v7965_v43 = vadd.f32 %v13039_v26, %v7926_v36  ;;  %6966 = vmatprep.subr.bf16.mxu1 %v11871_v27  ;;  %v7967_v51 = vadd.f32 %v13039_v26, %v7928_v41  ;;  %v1209_v23 = vld [vmem:[#allocation2 + $0x1c20] sm:$0xff]  ;;  %v13075_v54 = vpop.permute.xlu1 %8292 }
 0x1a8   : > { %v7966_v49 = vadd.f32 %v13039_v26, %v7927_v40  ;;  %v7968_v56 = vadd.f32 %v13039_v26, %v7929_v15  ;;  %v13070_v41 = vpop.permute.xlu0 %8253  ;;  %v1257_v15 = vld [vmem:[#allocation2 + $0x1da0] sm:$0xff] }
 0x1a9   : > { %v7997_v55 = vmax.f32 %v7965_v43, 0.0  ;;  %v7999_v61 = vmax.f32 %v7967_v51, 0.0  ;;  %v1241_v43 = vld [vmem:[#allocation2 + $0x1d20] sm:$0xff] }
 0x1aa   : > { %6885 = vmatpush1.bf16.msra.mxu0 %v11868_v38  ;;  %v7998_v60 = vmax.f32 %v7966_v49, 0.0  ;;  %6967 = vmatpush1.bf16.msra.mxu1 %v11870_v39  ;;  %v8000_v1 = vmax.f32 %v7968_v56, 0.0  ;;  %v11997_v38 = vcombine.high %v1209_v23, %v1225_v24  ;;  %v1258_v49 = vld [vmem:[#allocation2 + $0x1da8] sm:$0xff] }
 0x1ab   : > { %6886 = vmatprep.subr.bf16.mxu0 %v11901_v42  ;;  %v8036_v0 = vmul.f32 %v13046_v44, %v7997_v55  ;;  %6968 = vmatprep.subr.bf16.mxu1 %v11903_v46  ;;  %v8038_v6 = vmul.f32 %v13046_v44, %v7999_v61  ;;  %v11999_v42 = vcombine.high %v1210_v28, %v1226_v30 }
 0x1ac   : > { %v8037_v5 = vmul.f32 %v13046_v44, %v7998_v60  ;;  %v8039_v10 = vmul.f32 %v13046_v44, %v8000_v1  ;;  %v11996_v55 = vcombine.low %v1209_v23, %v1225_v24  ;;  %v11998_v60 = vcombine.low %v1210_v28, %v1226_v30  ;;  %v1305_v23 = vld [vmem:[#allocation2 + $0x1f20] sm:$0xff]  ;;  %v1322_v28 = vld [vmem:[#allocation2 + $0x1fa8] sm:$0xff] }
 0x1ad   : > { %v8075_v9 = vadd.f32 %v13051_v58, %v8036_v0  ;;  %v8077_v16 = vadd.f32 %v13051_v58, %v8038_v6  ;;  %v12029_v61 = vcombine.high %v1241_v43, %v1257_v15  ;;  %v12031_v0 = vcombine.high %v1242_v48, %v1258_v49  ;;  %v1274_v6 = vld [vmem:[#allocation2 + $0x1e28] sm:$0xff]  ;;  %v1321_v24 = vld [vmem:[#allocation2 + $0x1fa0] sm:$0xff] }
 0x1ae   : > { %6887 = vmatpush1.bf16.msra.mxu0 %v11900_v59  ;;  %v8076_v14 = vadd.f32 %v13051_v58, %v8037_v5  ;;  %6969 = vmatpush1.bf16.msra.mxu1 %v11902_v62  ;;  %v8078_v20 = vadd.f32 %v13051_v58, %v8039_v10 }
 0x1af   : > { %6888 = vmatprep.subr.bf16.mxu0 %v11933_v63  ;;  %v8107_v19 = vmax.f32 %v8075_v9, 0.0  ;;  %6970 = vmatprep.subr.bf16.mxu1 %v11935_v2  ;;  %v8109_v27 = vmax.f32 %v8077_v16, 0.0  ;;  %v1273_v2 = vld [vmem:[#allocation2 + $0x1e20] sm:$0xff]  ;;  %v12028_v9 = vcombine.low %v1241_v43, %v1257_v15  ;;  %v12092_v43 = vcombine.low %v1305_v23, %v1321_v24 }
 0x1b0   : > { %v8108_v25 = vmax.f32 %v8076_v14, 0.0  ;;  %v8110_v32 = vmax.f32 %v8078_v20, 0.0  ;;  %v12030_v14 = vcombine.low %v1242_v48, %v1258_v49  ;;  %v12063_v20 = vcombine.high %v1274_v6, %v1290_v7  ;;  %v347_v48 = vld [vmem:[#allocation2 + $0x130] sm:$0xff] }
 0x1b1   : > { %v8146_v31 = vmul.f32 %v13058_v11, %v8107_v19  ;;  %v8148_v37 = vmul.f32 %v13058_v11, %v8109_v27  ;;  %v1306_v27 = vld [vmem:[#allocation2 + $0x1f28] sm:$0xff]  ;;  %v363_v49 = vld [vmem:[#allocation2 + $0x1b0] sm:$0xff] }
 0x1b2   : > { %6889 = vmatpush1.bf16.msra.mxu0 %v11932_v13  ;;  %v8147_v36 = vmul.f32 %v13058_v11, %v8108_v25  ;;  %6971 = vmatpush1.bf16.msra.mxu1 %v11934_v17  ;;  %v8149_v40 = vmul.f32 %v13058_v11, %v8110_v32  ;;  %v12061_v17 = vcombine.high %v1273_v2, %v1289_v3 }
 0x1b3   : > { %6890 = vmatprep.subr.bf16.mxu0 %v11965_v18  ;;  %v8185_v39 = vadd.f32 %v13063_v21, %v8146_v31  ;;  %6972 = vmatprep.subr.bf16.mxu1 %v11967_v53  ;;  %v8187_v47 = vadd.f32 %v13063_v21, %v8148_v37  ;;  %v12060_v31 = vcombine.low %v1273_v2, %v1289_v3  ;;  %v315_v37 = vld [vmem:[#allocation2 + $0x30] sm:$0xff] }
 0x1b4   : > { %v8186_v46 = vadd.f32 %v13063_v21, %v8147_v36  ;;  %v8188_v52 = vadd.f32 %v13063_v21, %v8149_v40  ;;  %v12062_v32 = vcombine.low %v1274_v6, %v1290_v7  ;;  %v12095_v36 = vcombine.high %v1306_v27, %v1322_v28  ;;  %v332_v40 = vld [vmem:[#allocation2 + $0xb8] sm:$0xff]  ;;  %v427_v6 = vld [vmem:[#allocation2 + $0x3b0] sm:$0xff] }
 0x1b5   : > { %v8217_v51 = vmax.f32 %v8185_v39, 0.0  ;;  %v8219_v59 = vmax.f32 %v8187_v47, 0.0  ;;  %v316_v39 = vld [vmem:[#allocation2 + $0x38] sm:$0xff]  ;;  %v12094_v15 = vcombine.low %v1306_v27, %v1322_v28 }
 0x1b6   : > { %6891 = vmatpush1.bf16.msra.mxu0 %v11964_v34  ;;  %v8218_v56 = vmax.f32 %v8186_v46, 0.0  ;;  %6973 = vmatpush1.bf16.msra.mxu1 %v11966_v35  ;;  %v8220_v63 = vmax.f32 %v8188_v52, 0.0  ;;  %v12093_v35 = vcombine.high %v1305_v23, %v1321_v24  ;;  %v11107_v47 = vcombine.high %v316_v39, %v332_v40  ;;  %v364_v52 = vld [vmem:[#allocation2 + $0x1b8] sm:$0xff] }
 0x1b7   : > { %6892 = vmatprep.subr.bf16.mxu0 %v11997_v38  ;;  %v8256_v62 = vmul.f32 %v13070_v41, %v8217_v51  ;;  %6974 = vmatprep.subr.bf16.mxu1 %v11999_v42  ;;  %v8258_v4 = vmul.f32 %v13070_v41, %v8219_v59  ;;  %v331_v38 = vld [vmem:[#allocation2 + $0xb0] sm:$0xff]  ;;  %v348_v51 = vld [vmem:[#allocation2 + $0x138] sm:$0xff]  ;;  %v11137_v59 = vcombine.high %v347_v48, %v363_v49 }
 0x1b8   : > { %v8257_v1 = vmul.f32 %v13070_v41, %v8218_v56  ;;  %v8259_v8 = vmul.f32 %v13070_v41, %v8220_v63  ;;  %v11105_v46 = vcombine.high %v315_v37, %v331_v38  ;;  %v11106_v56 = vcombine.low %v316_v39, %v332_v40  ;;  %v380_v63 = vld [vmem:[#allocation2 + $0x238] sm:$0xff]  ;;  %v507_v40 = vld [vmem:[#allocation2 + $0x630] sm:$0xff] }
 0x1b9   : > { %v8295_v5 = vadd.f32 %v13075_v54, %v8256_v62  ;;  %v8297_v13 = vadd.f32 %v13075_v54, %v8258_v4  ;;  %v395_v62 = vld [vmem:[#allocation2 + $0x2b0] sm:$0xff]  ;;  %v11138_v2 = vcombine.low %v348_v51, %v364_v52  ;;  %v412_v7 = vld [vmem:[#allocation2 + $0x338] sm:$0xff] }
 0x1ba   : > { %6893 = vmatpush1.bf16.msra.mxu0 %v11996_v55  ;;  %v8296_v10 = vadd.f32 %v13075_v54, %v8257_v1  ;;  %6975 = vmatpush1.bf16.msra.mxu1 %v11998_v60  ;;  %v8298_v18 = vadd.f32 %v13075_v54, %v8259_v8  ;;  %v11104_v55 = vcombine.low %v315_v37, %v331_v38  ;;  %v428_v8 = vld [vmem:[#allocation2 + $0x3b8] sm:$0xff] }
 0x1bb   : > { %6894 = vmatprep.subr.bf16.mxu0 %v12029_v61  ;;  %v13084_v16 = vmax.f32 %v8295_v5, 0.0  ;;  %6976 = vmatprep.subr.bf16.mxu1 %v12031_v0  ;;  %v13089_v53 = vmax.f32 %v8297_v13, 0.0  ;;  %v11139_v60 = vcombine.high %v348_v51, %v364_v52  ;;  %v379_v61 = vld [vmem:[#allocation2 + $0x230] sm:$0xff]  ;;  %v396_v0 = vld [vmem:[#allocation2 + $0x2b8] sm:$0xff]  ;;  %v11136_v1 = vcombine.low %v347_v48, %v363_v49 }
 0x1bc   : > { %v13087_v19 = vmax.f32 %v8296_v10, 0.0  ;;  %v13093_v25 = vmax.f32 %v8298_v18, 0.0  ;;  %v11169_v3 = vcombine.high %v379_v61, %v395_v62  ;;  %v11171_v4 = vcombine.high %v380_v63, %v396_v0  ;;  %v411_v5 = vld [vmem:[#allocation2 + $0x330] sm:$0xff]  ;;  %v460_v23 = vld [vmem:[#allocation2 + $0x4b8] sm:$0xff] }
 0x1bd   : > { %15688 = vst [vmem:[#allocation8_spill] sm:$0xff] %v13084_v16  ;;  %15689 = vst [vmem:[#allocation9_spill] sm:$0xff] %v13089_v53  ;;  %8617 = vrot.lane.b32.xlu1 %v13084_v16, %s12816_s13  ;;  %v11170_v10 = vcombine.low %v380_v63, %v396_v0  ;;  %v11201_v13 = vcombine.high %v411_v5, %v427_v6  ;;  %v459_v18 = vld [vmem:[#allocation2 + $0x4b0] sm:$0xff]  ;;  %v11200_v24 = vcombine.low %v411_v5, %v427_v6 }
 0x1be   : > { %6895 = vmatpush1.bf16.msra.mxu0 %v12028_v9  ;;  %v12639_v30 = vpack.i.bf16 %v13087_v19, %v13084_v16  ;;  %6977 = vmatpush1.bf16.msra.mxu1 %v12030_v14  ;;  %v12644_v34 = vpack.i.bf16 %v13093_v25, %v13089_v53  ;;  %v12649_v42 = vpack.i.bf16 %v13089_v53, %v13087_v19  ;;  %v539_v51 = vld [vmem:[#allocation2 + $0x730] sm:$0xff] }
 0x1bf   : > { %6896 = vmatprep.subr.bf16.mxu0 %v12061_v17  ;;  %6978 = vmatprep.subr.bf16.mxu1 %v12063_v20  ;;  %v11168_v9 = vcombine.low %v379_v61, %v395_v62  ;;  %v11203_v14 = vcombine.high %v412_v7, %v428_v8  ;;  %v443_v17 = vld [vmem:[#allocation2 + $0x430] sm:$0xff]  ;;  %v444_v20 = vld [vmem:[#allocation2 + $0x438] sm:$0xff]  ;;  %v11202_v27 = vcombine.low %v412_v7, %v428_v8 }
 0x1c0   : > { %12640 = vrot.lane.b32.xlu0 %v12639_v30, %s12817_s14  ;;  %v11233_v28 = vcombine.high %v443_v17, %v459_v18  ;;  %v11235_v30 = vcombine.high %v444_v20, %v460_v23  ;;  %v11234_v37 = vcombine.low %v444_v20, %v460_v23  ;;  %v555_v52 = vld [vmem:[#allocation2 + $0x7b0] sm:$0xff] }
 0x1c1   : > { %12645 = vrot.lane.b32.xlu1 %v12644_v34, %s12817_s14  ;;  %v476_v34 = vld [vmem:[#allocation2 + $0x538] sm:$0xff]  ;;  %v11329_v61 = vcombine.high %v539_v51, %v555_v52  ;;  %v571_v63 = vld [vmem:[#allocation2 + $0x830] sm:$0xff] }
 0x1c2   : > { %6897 = vmatpush1.bf16.msra.mxu0 %v12060_v31  ;;  %6979 = vmatpush1.bf16.msra.mxu1 %v12062_v32  ;;  %v475_v31 = vld [vmem:[#allocation2 + $0x530] sm:$0xff] }
 0x1c3   : > { %6898 = vmatprep.subr.bf16.mxu0 %v12093_v35  ;;  %6980 = vmatprep.subr.bf16.mxu1 %v12095_v36  ;;  %v491_v32 = vld [vmem:[#allocation2 + $0x5b0] sm:$0xff]  ;;  %v492_v35 = vld [vmem:[#allocation2 + $0x5b8] sm:$0xff]  ;;  %v11232_v36 = vcombine.low %v443_v17, %v459_v18 }
 0x1c4   : > { %12650 = vrot.lane.b32.xlu0 %v12649_v42, %s12816_s13  ;;  %v11265_v38 = vcombine.high %v475_v31, %v491_v32  ;;  %v11267_v39 = vcombine.high %v476_v34, %v492_v35  ;;  %v523_v42 = vld [vmem:[#allocation2 + $0x6b0] sm:$0xff] }
 0x1c5   : > { %v11297_v48 = vcombine.high %v507_v40, %v523_v42  ;;  %v587_v0 = vld [vmem:[#allocation2 + $0x8b0] sm:$0xff] }
 0x1c6   : > { %6899 = vmatpush1.bf16.msra.mxu0 %v12092_v43  ;;  %6981 = vmatpush1.bf16.msra.mxu1 %v12094_v15  ;;  %v508_v43 = vld [vmem:[#allocation2 + $0x638] sm:$0xff]  ;;  %v11361_v5 = vcombine.high %v571_v63, %v587_v0  ;;  %v603_v7 = vld [vmem:[#allocation2 + $0x930] sm:$0xff] }
 0x1c7   : > { %6991 = vmatprep.subr.bf16.mxu0 %v11105_v46  ;;  %7073 = vmatprep.subr.bf16.mxu1 %v11107_v47  ;;  %v524_v15 = vld [vmem:[#allocation2 + $0x6b8] sm:$0xff]  ;;  %v11264_v46 = vcombine.low %v475_v31, %v491_v32  ;;  %v11266_v47 = vcombine.low %v476_v34, %v492_v35  ;;  %v619_v8 = vld [vmem:[#allocation2 + $0x9b0] sm:$0xff] }
 0x1c8   : > { %v11299_v49 = vcombine.high %v508_v43, %v524_v15  ;;  %v11393_v17 = vcombine.high %v603_v7, %v619_v8  ;;  %v635_v20 = vld [vmem:[#allocation2 + $0xa30] sm:$0xff] }
 0x1c9   : > { %6901 = vmatmul.mubr.bf16.vlgmr.msra.gmra.mrb[8].mxu0 %v13007_v33  ;;  %6983 = vmatmul.mubr.bf16.vlgmr.msra.gmra.mrb[8].mxu1 %v13007_v33  ;;  %v651_v23 = vld [vmem:[#allocation2 + $0xab0] sm:$0xff] }
 0x1ca   : > { %6992 = vmatpush1.bf16.msra.mxu0 %v11104_v55  ;;  %7074 = vmatpush1.bf16.msra.mxu1 %v11106_v56  ;;  %v540_v55 = vld [vmem:[#allocation2 + $0x738] sm:$0xff]  ;;  %v11425_v31 = vcombine.high %v635_v20, %v651_v23  ;;  %v667_v34 = vld [vmem:[#allocation2 + $0xb30] sm:$0xff] }
 0x1cb   : > { %6993 = vmatprep.subr.bf16.mxu0 %v11137_v59  ;;  %7075 = vmatprep.subr.bf16.mxu1 %v11139_v60  ;;  %v556_v56 = vld [vmem:[#allocation2 + $0x7b8] sm:$0xff]  ;;  %v11296_v59 = vcombine.low %v507_v40, %v523_v42  ;;  %v11298_v60 = vcombine.low %v508_v43, %v524_v15  ;;  %v683_v35 = vld [vmem:[#allocation2 + $0xbb0] sm:$0xff] }
 0x1cc   : > { %7023 = vmatprep.mubr.bf16.mxu0 %v12956_v57  ;;  %7105 = vmatprep.mubr.bf16.mxu1 %v12956_v57  ;;  %v11331_v62 = vcombine.high %v540_v55, %v556_v56  ;;  %v11457_v40 = vcombine.high %v667_v34, %v683_v35  ;;  %v699_v43 = vld [vmem:[#allocation2 + $0xc30] sm:$0xff] }
 0x1cd   : > { %v715_v15 = vld [vmem:[#allocation2 + $0xcb0] sm:$0xff] }
 0x1ce   : > { %6994 = vmatpush1.bf16.msra.mxu0 %v11136_v1  ;;  %7076 = vmatpush1.bf16.msra.mxu1 %v11138_v2  ;;  %v572_v1 = vld [vmem:[#allocation2 + $0x838] sm:$0xff] }
 0x1cf   : > { %6995 = vmatprep.subr.bf16.mxu0 %v11169_v3  ;;  %7077 = vmatprep.subr.bf16.mxu1 %v11171_v4  ;;  %v588_v2 = vld [vmem:[#allocation2 + $0x8b8] sm:$0xff]  ;;  %v11328_v3 = vcombine.low %v539_v51, %v555_v52  ;;  %v11330_v4 = vcombine.low %v540_v55, %v556_v56  ;;  %v11489_v51 = vcombine.high %v699_v43, %v715_v15  ;;  %v731_v55 = vld [vmem:[#allocation2 + $0xd30] sm:$0xff] }
 0x1d0   : > { %v11363_v6 = vcombine.high %v572_v1, %v588_v2  ;;  %v747_v56 = vld [vmem:[#allocation2 + $0xdb0] sm:$0xff] }
 0x1d2   : > { %6996 = vmatpush1.bf16.msra.mxu0 %v11168_v9  ;;  %7078 = vmatpush1.bf16.msra.mxu1 %v11170_v10  ;;  %v604_v9 = vld [vmem:[#allocation2 + $0x938] sm:$0xff] }
 0x1d3   : > { %6997 = vmatprep.subr.bf16.mxu0 %v11201_v13  ;;  %7079 = vmatprep.subr.bf16.mxu1 %v11203_v14  ;;  %v620_v10 = vld [vmem:[#allocation2 + $0x9b8] sm:$0xff]  ;;  %v11360_v13 = vcombine.low %v571_v63, %v587_v0  ;;  %v11362_v14 = vcombine.low %v572_v1, %v588_v2  ;;  %v11521_v63 = vcombine.high %v731_v55, %v747_v56  ;;  %v763_v1 = vld [vmem:[#allocation2 + $0xe30] sm:$0xff] }
 0x1d4   : > { %v11395_v18 = vcombine.high %v604_v9, %v620_v10  ;;  %v779_v2 = vld [vmem:[#allocation2 + $0xeb0] sm:$0xff] }
 0x1d6   : > { %6998 = vmatpush1.bf16.msra.mxu0 %v11200_v24  ;;  %7080 = vmatpush1.bf16.msra.mxu1 %v11202_v27  ;;  %v636_v24 = vld [vmem:[#allocation2 + $0xa38] sm:$0xff] }
 0x1d7   : > { %6999 = vmatprep.subr.bf16.mxu0 %v11233_v28  ;;  %7081 = vmatprep.subr.bf16.mxu1 %v11235_v30  ;;  %v652_v27 = vld [vmem:[#allocation2 + $0xab8] sm:$0xff]  ;;  %v11392_v28 = vcombine.low %v603_v7, %v619_v8  ;;  %v11394_v30 = vcombine.low %v604_v9, %v620_v10  ;;  %v11553_v7 = vcombine.high %v763_v1, %v779_v2  ;;  %v795_v9 = vld [vmem:[#allocation2 + $0xf30] sm:$0xff] }
 0x1d8   : > { %v11427_v32 = vcombine.high %v636_v24, %v652_v27  ;;  %v811_v10 = vld [vmem:[#allocation2 + $0xfb0] sm:$0xff] }
 0x1da   : > { %7000 = vmatpush1.bf16.msra.mxu0 %v11232_v36  ;;  %7082 = vmatpush1.bf16.msra.mxu1 %v11234_v37  ;;  %v668_v36 = vld [vmem:[#allocation2 + $0xb38] sm:$0xff] }
 0x1db   : > { %7001 = vmatprep.subr.bf16.mxu0 %v11265_v38  ;;  %7083 = vmatprep.subr.bf16.mxu1 %v11267_v39  ;;  %v684_v37 = vld [vmem:[#allocation2 + $0xbb8] sm:$0xff]  ;;  %v11424_v38 = vcombine.low %v635_v20, %v651_v23  ;;  %v11426_v39 = vcombine.low %v636_v24, %v652_v27  ;;  %v11585_v20 = vcombine.high %v795_v9, %v811_v10  ;;  %v827_v24 = vld [vmem:[#allocation2 + $0x1030] sm:$0xff] }
 0x1dc   : > { %v11459_v42 = vcombine.high %v668_v36, %v684_v37  ;;  %v843_v27 = vld [vmem:[#allocation2 + $0x10b0] sm:$0xff] }
 0x1de   : > { %7002 = vmatpush1.bf16.msra.mxu0 %v11264_v46  ;;  %7084 = vmatpush1.bf16.msra.mxu1 %v11266_v47  ;;  %v700_v46 = vld [vmem:[#allocation2 + $0xc38] sm:$0xff] }
 0x1df   : > { %7003 = vmatprep.subr.bf16.mxu0 %v11297_v48  ;;  %7085 = vmatprep.subr.bf16.mxu1 %v11299_v49  ;;  %v716_v47 = vld [vmem:[#allocation2 + $0xcb8] sm:$0xff]  ;;  %v11456_v48 = vcombine.low %v667_v34, %v683_v35  ;;  %v11458_v49 = vcombine.low %v668_v36, %v684_v37  ;;  %v11617_v34 = vcombine.high %v827_v24, %v843_v27  ;;  %v859_v36 = vld [vmem:[#allocation2 + $0x1130] sm:$0xff] }
 0x1e0   : > { %v11491_v52 = vcombine.high %v700_v46, %v716_v47  ;;  %v875_v37 = vld [vmem:[#allocation2 + $0x11b0] sm:$0xff] }
 0x1e2   : > { %7004 = vmatpush1.bf16.msra.mxu0 %v11296_v59  ;;  %7086 = vmatpush1.bf16.msra.mxu1 %v11298_v60  ;;  %v732_v59 = vld [vmem:[#allocation2 + $0xd38] sm:$0xff] }
 0x1e3   : > { %7005 = vmatprep.subr.bf16.mxu0 %v11329_v61  ;;  %7087 = vmatprep.subr.bf16.mxu1 %v11331_v62  ;;  %v748_v60 = vld [vmem:[#allocation2 + $0xdb8] sm:$0xff]  ;;  %v11488_v61 = vcombine.low %v699_v43, %v715_v15  ;;  %v11490_v62 = vcombine.low %v700_v46, %v716_v47  ;;  %v11649_v43 = vcombine.high %v859_v36, %v875_v37  ;;  %v891_v46 = vld [vmem:[#allocation2 + $0x1230] sm:$0xff] }
 0x1e4   : > { %v11523_v0 = vcombine.high %v732_v59, %v748_v60  ;;  %v907_v47 = vld [vmem:[#allocation2 + $0x12b0] sm:$0xff] }
 0x1e6   : > { %7006 = vmatpush1.bf16.msra.mxu0 %v11328_v3  ;;  %7088 = vmatpush1.bf16.msra.mxu1 %v11330_v4  ;;  %v764_v3 = vld [vmem:[#allocation2 + $0xe38] sm:$0xff] }
 0x1e7   : > { %7007 = vmatprep.subr.bf16.mxu0 %v11361_v5  ;;  %7089 = vmatprep.subr.bf16.mxu1 %v11363_v6  ;;  %v780_v4 = vld [vmem:[#allocation2 + $0xeb8] sm:$0xff]  ;;  %v11520_v5 = vcombine.low %v731_v55, %v747_v56  ;;  %v11522_v6 = vcombine.low %v732_v59, %v748_v60  ;;  %v11681_v55 = vcombine.high %v891_v46, %v907_v47  ;;  %v923_v59 = vld [vmem:[#allocation2 + $0x1330] sm:$0xff] }
 0x1e8   : > { %v11555_v8 = vcombine.high %v764_v3, %v780_v4  ;;  %v939_v60 = vld [vmem:[#allocation2 + $0x13b0] sm:$0xff] }
 0x1ea   : > { %7008 = vmatpush1.bf16.msra.mxu0 %v11360_v13  ;;  %7090 = vmatpush1.bf16.msra.mxu1 %v11362_v14  ;;  %v796_v13 = vld [vmem:[#allocation2 + $0xf38] sm:$0xff] }
 0x1eb   : > { %7009 = vmatprep.subr.bf16.mxu0 %v11393_v17  ;;  %7091 = vmatprep.subr.bf16.mxu1 %v11395_v18  ;;  %v812_v14 = vld [vmem:[#allocation2 + $0xfb8] sm:$0xff]  ;;  %v11552_v17 = vcombine.low %v763_v1, %v779_v2  ;;  %v11554_v18 = vcombine.low %v764_v3, %v780_v4  ;;  %v11713_v1 = vcombine.high %v923_v59, %v939_v60  ;;  %v955_v3 = vld [vmem:[#allocation2 + $0x1430] sm:$0xff] }
 0x1ec   : > { %v11587_v23 = vcombine.high %v796_v13, %v812_v14  ;;  %v971_v4 = vld [vmem:[#allocation2 + $0x14b0] sm:$0xff] }
 0x1ee   : > { %7010 = vmatpush1.bf16.msra.mxu0 %v11392_v28  ;;  %7092 = vmatpush1.bf16.msra.mxu1 %v11394_v30  ;;  %v828_v28 = vld [vmem:[#allocation2 + $0x1038] sm:$0xff] }
 0x1ef   : > { %7011 = vmatprep.subr.bf16.mxu0 %v11425_v31  ;;  %7093 = vmatprep.subr.bf16.mxu1 %v11427_v32  ;;  %v844_v30 = vld [vmem:[#allocation2 + $0x10b8] sm:$0xff]  ;;  %v11584_v31 = vcombine.low %v795_v9, %v811_v10  ;;  %v11586_v32 = vcombine.low %v796_v13, %v812_v14  ;;  %v11745_v9 = vcombine.high %v955_v3, %v971_v4  ;;  %v987_v13 = vld [vmem:[#allocation2 + $0x1530] sm:$0xff] }
 0x1f0   : > { %v11619_v35 = vcombine.high %v828_v28, %v844_v30  ;;  %v1003_v14 = vld [vmem:[#allocation2 + $0x15b0] sm:$0xff] }
 0x1f2   : > { %7012 = vmatpush1.bf16.msra.mxu0 %v11424_v38  ;;  %7094 = vmatpush1.bf16.msra.mxu1 %v11426_v39  ;;  %v860_v38 = vld [vmem:[#allocation2 + $0x1138] sm:$0xff] }
 0x1f3   : > { %7013 = vmatprep.subr.bf16.mxu0 %v11457_v40  ;;  %7095 = vmatprep.subr.bf16.mxu1 %v11459_v42  ;;  %v876_v39 = vld [vmem:[#allocation2 + $0x11b8] sm:$0xff]  ;;  %v11616_v40 = vcombine.low %v827_v24, %v843_v27  ;;  %v11618_v42 = vcombine.low %v828_v28, %v844_v30  ;;  %v11777_v24 = vcombine.high %v987_v13, %v1003_v14  ;;  %v1019_v28 = vld [vmem:[#allocation2 + $0x1630] sm:$0xff] }
 0x1f4   : > { %v11651_v15 = vcombine.high %v860_v38, %v876_v39  ;;  %v1035_v30 = vld [vmem:[#allocation2 + $0x16b0] sm:$0xff] }
 0x1f6   : > { %7014 = vmatpush1.bf16.msra.mxu0 %v11456_v48  ;;  %7096 = vmatpush1.bf16.msra.mxu1 %v11458_v49  ;;  %v892_v48 = vld [vmem:[#allocation2 + $0x1238] sm:$0xff] }
 0x1f7   : > { %7015 = vmatprep.subr.bf16.mxu0 %v11489_v51  ;;  %7097 = vmatprep.subr.bf16.mxu1 %v11491_v52  ;;  %v908_v49 = vld [vmem:[#allocation2 + $0x12b8] sm:$0xff]  ;;  %v11648_v51 = vcombine.low %v859_v36, %v875_v37  ;;  %v11650_v52 = vcombine.low %v860_v38, %v876_v39  ;;  %v1338_v36 = vld [vmem:[#allocation4 + $0x28] sm:$0xff]  ;;  %v11809_v38 = vcombine.high %v1019_v28, %v1035_v30 }
 0x1f8   : > { %v11683_v56 = vcombine.high %v892_v48, %v908_v49 }
 0x1fa   : > { %7016 = vmatpush1.bf16.msra.mxu0 %v11488_v61  ;;  %7098 = vmatpush1.bf16.msra.mxu1 %v11490_v62  ;;  %v924_v61 = vld [vmem:[#allocation2 + $0x1338] sm:$0xff] }
 0x1fb   : > { %7017 = vmatprep.subr.bf16.mxu0 %v11521_v63  ;;  %7099 = vmatprep.subr.bf16.mxu1 %v11523_v0  ;;  %v940_v62 = vld [vmem:[#allocation2 + $0x13b8] sm:$0xff]  ;;  %v11680_v63 = vcombine.low %v891_v46, %v907_v47  ;;  %v11682_v0 = vcombine.low %v892_v48, %v908_v49 }
 0x1fc   : > { %v11715_v2 = vcombine.high %v924_v61, %v940_v62  ;;  %v1052_v48 = vld [vmem:[#allocation2 + $0x1738] sm:$0xff] }
 0x1fd   : > { %v1068_v49 = vld [vmem:[#allocation2 + $0x17b8] sm:$0xff] }
 0x1fe   : > { %7018 = vmatpush1.bf16.msra.mxu0 %v11520_v5  ;;  %7100 = vmatpush1.bf16.msra.mxu1 %v11522_v6  ;;  %v956_v5 = vld [vmem:[#allocation2 + $0x1438] sm:$0xff] }
 0x1ff   : > { %7019 = vmatprep.subr.bf16.mxu0 %v11553_v7  ;;  %7101 = vmatprep.subr.bf16.mxu1 %v11555_v8  ;;  %v972_v6 = vld [vmem:[#allocation2 + $0x14b8] sm:$0xff]  ;;  %v11712_v7 = vcombine.low %v923_v59, %v939_v60  ;;  %v11714_v8 = vcombine.low %v924_v61, %v940_v62 }
 0x200   : > { %v11747_v10 = vcombine.high %v956_v5, %v972_v6 }
 0x202   : > { %7020 = vmatpush1.bf16.msra.mxu0 %v11552_v17  ;;  %7102 = vmatpush1.bf16.msra.mxu1 %v11554_v18  ;;  %v988_v17 = vld [vmem:[#allocation2 + $0x1538] sm:$0xff] }
 0x203   : > { %7021 = vmatprep.subr.bf16.mxu0 %v11585_v20  ;;  %7103 = vmatprep.subr.bf16.mxu1 %v11587_v23  ;;  %v1004_v18 = vld [vmem:[#allocation2 + $0x15b8] sm:$0xff]  ;;  %v11744_v20 = vcombine.low %v955_v3, %v971_v4  ;;  %v11746_v23 = vcombine.low %v956_v5, %v972_v6  ;;  %v1083_v3 = vld [vmem:[#allocation2 + $0x1830] sm:$0xff] }
 0x204   : > { %v11779_v27 = vcombine.high %v988_v17, %v1004_v18  ;;  %v11778_v37 = vcombine.low %v988_v17, %v1004_v18  ;;  %v1099_v4 = vld [vmem:[#allocation2 + $0x18b0] sm:$0xff]  ;;  %v1084_v6 = vld [vmem:[#allocation2 + $0x1838] sm:$0xff] }
 0x206   : > { %7022 = vmatpush1.bf16.msra.mxu0 %v11584_v31  ;;  %7104 = vmatpush1.bf16.msra.mxu1 %v11586_v32  ;;  %v1020_v31 = vld [vmem:[#allocation2 + $0x1638] sm:$0xff] }
 0x207   : > { %7032 = vmatprep.subr.bf16.mxu0 %v11617_v34  ;;  %7114 = vmatprep.subr.bf16.mxu1 %v11619_v35  ;;  %v1036_v32 = vld [vmem:[#allocation2 + $0x16b8] sm:$0xff]  ;;  %v1337_v34 = vld [vmem:[#allocation4 + $0x20] sm:$0xff]  ;;  %v11776_v35 = vcombine.low %v987_v13, %v1003_v14  ;;  %v11842_v13 = vcombine.low %v1052_v48, %v1068_v49  ;;  %v11873_v14 = vcombine.high %v1083_v3, %v1099_v4 }
 0x208   : > { %v11810_v61 = vcombine.low %v1020_v31, %v1036_v32 }
 0x209   : > { %7024 = vmatmul.mubr.bf16.vlgmr.msra.gmra.mrb[12].mxu0 %v12962_v12  ;;  %7106 = vmatmul.mubr.bf16.vlgmr.msra.gmra.mrb[12].mxu1 %v12962_v12 }
 0x20a   : > { %7033 = vmatpush1.bf16.msra.mxu0 %v11616_v40  ;;  %7115 = vmatpush1.bf16.msra.mxu1 %v11618_v42  ;;  %v11811_v40 = vcombine.high %v1020_v31, %v1036_v32  ;;  %v1051_v42 = vld [vmem:[#allocation2 + $0x1730] sm:$0xff]  ;;  %v11872_v31 = vcombine.low %v1083_v3, %v1099_v4 }
 0x20b   : > { %7034 = vmatprep.subr.bf16.mxu0 %v11649_v43  ;;  %7116 = vmatprep.subr.bf16.mxu1 %v11651_v15  ;;  %v1067_v43 = vld [vmem:[#allocation2 + $0x17b0] sm:$0xff] }
 0x20c   : > { %7064 = vmatprep.mubr.bf16.mxu0 %v12969_v22  ;;  %7146 = vmatprep.mubr.bf16.mxu1 %v12969_v22  ;;  %v11841_v62 = vcombine.high %v1051_v42, %v1067_v43 }
 0x20e   : > { %7035 = vmatpush1.bf16.msra.mxu0 %v11648_v51  ;;  %7117 = vmatpush1.bf16.msra.mxu1 %v11650_v52 }
 0x20f   : > { %7036 = vmatprep.subr.bf16.mxu0 %v11681_v55  ;;  %7118 = vmatprep.subr.bf16.mxu1 %v11683_v56  ;;  %v11808_v55 = vcombine.low %v1019_v28, %v1035_v30  ;;  %v1132_v28 = vld [vmem:[#allocation2 + $0x19b8] sm:$0xff] }
 0x212   : > { %7037 = vmatpush1.bf16.msra.mxu0 %v11680_v63  ;;  %7119 = vmatpush1.bf16.msra.mxu1 %v11682_v0 }
 0x213   : > { %7038 = vmatprep.subr.bf16.mxu0 %v11713_v1  ;;  %7120 = vmatprep.subr.bf16.mxu1 %v11715_v2  ;;  %v11843_v2 = vcombine.high %v1052_v48, %v1068_v49 }
 0x216   : > { %7039 = vmatpush1.bf16.msra.mxu0 %v11712_v7  ;;  %7121 = vmatpush1.bf16.msra.mxu1 %v11714_v8  ;;  %v1100_v7 = vld [vmem:[#allocation2 + $0x18b8] sm:$0xff] }
 0x217   : > { %7040 = vmatprep.subr.bf16.mxu0 %v11745_v9  ;;  %7122 = vmatprep.subr.bf16.mxu1 %v11747_v10  ;;  %v11840_v9 = vcombine.low %v1051_v42, %v1067_v43  ;;  %v11875_v18 = vcombine.high %v1084_v6, %v1100_v7  ;;  %v1148_v42 = vld [vmem:[#allocation2 + $0x1a38] sm:$0xff] }
 0x218   : > { %v1164_v43 = vld [vmem:[#allocation2 + $0x1ab8] sm:$0xff] }
 0x21a   : > { %7041 = vmatpush1.bf16.msra.mxu0 %v11744_v20  ;;  %7123 = vmatpush1.bf16.msra.mxu1 %v11746_v23  ;;  %v1115_v20 = vld [vmem:[#allocation2 + $0x1930] sm:$0xff] }
 0x21b   : > { %7042 = vmatprep.subr.bf16.mxu0 %v11777_v24  ;;  %7124 = vmatprep.subr.bf16.mxu1 %v11779_v27  ;;  %v1131_v23 = vld [vmem:[#allocation2 + $0x19b0] sm:$0xff]  ;;  %v1116_v27 = vld [vmem:[#allocation2 + $0x1938] sm:$0xff] }
 0x21c   : > { %v6738_v39 = vpop.f32.mrb[4].mxu0  ;;  %v13112_v46 = vpop.f32.mrb[4].mxu1  ;;  %v11906_v49 = vcombine.low %v1116_v27, %v1132_v28 }
 0x21d   : > { %v12509_v15 = vadd.f32 %v6738_v39, %v1337_v34  ;;  %v6740_v47 = vpop.f32.mrb[5].mxu0  ;;  %v13114_v52 = vpop.f32.mrb[5].mxu1  ;;  %v11874_v34 = vcombine.low %v1084_v6, %v1100_v7  ;;  %v1163_v39 = vld [vmem:[#allocation2 + $0x1ab0] sm:$0xff] }
 0x21e   : > { %v12510_v51 = vadd.f32 %v6740_v47, %v1338_v36  ;;  %7043 = vmatpush1.bf16.msra.mxu0 %v11776_v35  ;;  %v6742_v56 = vpop.f32.mrb[6].mxu0  ;;  %v6824_v60 = vpop.f32.mrb[6].mxu1  ;;  %7125 = vmatpush1.bf16.msra.mxu1 %v11778_v37  ;;  %v11905_v35 = vcombine.high %v1115_v20, %v1131_v23  ;;  %v11907_v37 = vcombine.high %v1116_v27, %v1132_v28 }
 0x21f   : > { %v7821_v59 = vmul.f32 %v12509_v15, %v13025_v29  ;;  %7044 = vmatprep.subr.bf16.mxu0 %v11809_v38  ;;  %v6743_v63 = vpop.f32.mrb[7].mxu0  ;;  %v6825_v1 = vpop.f32.mrb[7].mxu1  ;;  %7126 = vmatprep.subr.bf16.mxu1 %v11811_v40  ;;  %v1147_v38 = vld [vmem:[#allocation2 + $0x1a30] sm:$0xff]  ;;  %v11904_v47 = vcombine.low %v1115_v20, %v1131_v23 }
 0x220   : > { %v7822_v0 = vmul.f32 %v12510_v51, %v13025_v29  ;;  %v11937_v51 = vcombine.high %v1147_v38, %v1163_v39  ;;  %v1179_v60 = vld [vmem:[#allocation2 + $0x1b30] sm:$0xff]  ;;  %v1180_v63 = vld [vmem:[#allocation2 + $0x1b38] sm:$0xff] }
 0x221   : > { %v7859_v5 = vadd.f32 %v13027_v45, %v7821_v59  ;;  %v11939_v59 = vcombine.high %v1148_v42, %v1164_v43 }
 0x222   : > { %v7860_v8 = vadd.f32 %v13027_v45, %v7822_v0  ;;  %7045 = vmatpush1.bf16.msra.mxu0 %v11808_v55  ;;  %7127 = vmatpush1.bf16.msra.mxu1 %v11810_v61  ;;  %v8359_v55 = vlaneseq  ;;  %v1195_v61 = vld [vmem:[#allocation2 + $0x1bb0] sm:$0xff]  ;;  %v1196_v0 = vld [vmem:[#allocation2 + $0x1bb8] sm:$0xff] }
 0x223   : > { %v7891_v10 = vmax.f32 %v7859_v5, 0.0  ;;  %7046 = vmatprep.subr.bf16.mxu0 %v11841_v62  ;;  %7128 = vmatprep.subr.bf16.mxu1 %v11843_v2  ;;  %v11936_v2 = vcombine.low %v1147_v38, %v1163_v39  ;;  %v11938_v5 = vcombine.low %v1148_v42, %v1164_v43  ;;  %v11969_v7 = vcombine.high %v1179_v60, %v1195_v61  ;;  %v1259_v38 = vld [vmem:[#allocation2 + $0x1db0] sm:$0xff]  ;;  %v1260_v42 = vld [vmem:[#allocation2 + $0x1db8] sm:$0xff] }
 0x224   : > { %v7892_v17 = vmax.f32 %v7860_v8, 0.0  ;;  %v13130_v6 = vand.u32 127, %v8359_v55  ;;  %v11970_v27 = vcombine.low %v1180_v63, %v1196_v0 }
 0x225   : > { %v7930_v24 = vmul.f32 %v13029_v50, %v7891_v10  ;;  %v1211_v10 = vld [vmem:[#allocation2 + $0x1c30] sm:$0xff] }
 0x226   : > { %v7931_v30 = vmul.f32 %v13029_v50, %v7892_v17  ;;  %7047 = vmatpush1.bf16.msra.mxu0 %v11840_v9  ;;  %7129 = vmatpush1.bf16.msra.mxu1 %v11842_v13  ;;  %v11971_v9 = vcombine.high %v1180_v63, %v1196_v0  ;;  %v1227_v13 = vld [vmem:[#allocation2 + $0x1cb0] sm:$0xff]  ;;  %v1212_v17 = vld [vmem:[#allocation2 + $0x1c38] sm:$0xff]  ;;  %vm8520_vm0 = vcmp.lt.s32.totalorder %v13130_v6, 1  ;;  %vm8681_vm5 = vcmp.lt.s32.totalorder %v13130_v6, 127 }
 0x227   : > { %v7969_v32 = vadd.f32 %v13039_v26, %v7930_v24  ;;  %7048 = vmatprep.subr.bf16.mxu0 %v11873_v14  ;;  %7130 = vmatprep.subr.bf16.mxu1 %v11875_v18  ;;  %v1228_v18 = vld [vmem:[#allocation2 + $0x1cb8] sm:$0xff]  ;;  %v11968_v24 = vcombine.low %v1179_v60, %v1195_v61  ;;  %v1291_v60 = vld [vmem:[#allocation2 + $0x1eb0] sm:$0xff] }
 0x228   : > { %v7970_v36 = vadd.f32 %v13039_v26, %v7931_v30  ;;  %v1292_v63 = vld [vmem:[#allocation2 + $0x1eb8] sm:$0xff] }
 0x229   : > { %v8001_v40 = vmax.f32 %v7969_v32, 0.0  ;;  %v12001_v32 = vcombine.high %v1211_v10, %v1227_v13 }
 0x22a   : > { %v8002_v15 = vmax.f32 %v7970_v36, 0.0  ;;  %7049 = vmatpush1.bf16.msra.mxu0 %v11872_v31  ;;  %7131 = vmatpush1.bf16.msra.mxu1 %v11874_v34  ;;  %v12003_v36 = vcombine.high %v1212_v17, %v1228_v18 }
 0x22b   : > { %v8040_v48 = vmul.f32 %v13046_v44, %v8001_v40  ;;  %7050 = vmatprep.subr.bf16.mxu0 %v11905_v35  ;;  %7132 = vmatprep.subr.bf16.mxu1 %v11907_v37  ;;  %v1243_v37 = vld [vmem:[#allocation2 + $0x1d30] sm:$0xff]  ;;  %v1244_v40 = vld [vmem:[#allocation2 + $0x1d38] sm:$0xff] }
 0x22c   : > { %v8041_v56 = vmul.f32 %v13046_v44, %v8002_v15  ;;  %v12035_v55 = vcombine.high %v1244_v40, %v1260_v42  ;;  %v12032_v0 = vcombine.low %v1243_v37, %v1259_v38 }
 0x22d   : > { %v8079_v62 = vadd.f32 %v13051_v58, %v8040_v48  ;;  %v12002_v48 = vcombine.low %v1212_v17, %v1228_v18 }
 0x22e   : > { %v8080_v1 = vadd.f32 %v13051_v58, %v8041_v56  ;;  %7051 = vmatpush1.bf16.msra.mxu0 %v11904_v47  ;;  %7133 = vmatpush1.bf16.msra.mxu1 %v11906_v49  ;;  %v12000_v47 = vcombine.low %v1211_v10, %v1227_v13  ;;  %v12033_v49 = vcombine.high %v1243_v37, %v1259_v38  ;;  %v1323_v10 = vld [vmem:[#allocation2 + $0x1fb0] sm:$0xff]  ;;  %v1308_v13 = vld [vmem:[#allocation2 + $0x1f38] sm:$0xff] }
 0x22f   : > { %v8111_v3 = vmax.f32 %v8079_v62, 0.0  ;;  %v13128_v4 = vpop.permute.xlu1 %8617  ;;  %7052 = vmatprep.subr.bf16.mxu0 %v11937_v51  ;;  %7134 = vmatprep.subr.bf16.mxu1 %v11939_v59  ;;  %v1275_v59 = vld [vmem:[#allocation2 + $0x1e30] sm:$0xff]  ;;  %v1276_v62 = vld [vmem:[#allocation2 + $0x1e38] sm:$0xff] }
 0x230   : > { %15690 = vst [vmem:[#allocation10_spill] sm:$0xff] %v13128_v4  ;;  %v8112_v8 = vmax.f32 %v8080_v1, 0.0  ;;  %v12064_v18 = vcombine.low %v1275_v59, %v1291_v60 }
 0x231   : > { %v8150_v14 = vmul.f32 %v13058_v11, %v8111_v3 }
 0x232   : > { %v8151_v20 = vmul.f32 %v13058_v11, %v8112_v8  ;;  %7053 = vmatpush1.bf16.msra.mxu0 %v11936_v2  ;;  %v13134_v23 = vpop.permute.xlu0 %12640  ;;  %7135 = vmatpush1.bf16.msra.mxu1 %v11938_v5  ;;  %v12034_v2 = vcombine.low %v1244_v40, %v1260_v42  ;;  %v12065_v5 = vcombine.high %v1275_v59, %v1291_v60  ;;  %v349_v42 = vld [vmem:[#allocation2 + $0x140] sm:$0xff] }
 0x233   : > { %v8189_v28 = vadd.f32 %v13063_v21, %v8150_v14  ;;  %v15662_v30 = vunpack.i.h.bf16 %v13134_v23  ;;  %v13139_v31 = vpop.permute.xlu1 %12645  ;;  %7054 = vmatprep.subr.bf16.mxu0 %v11969_v7  ;;  %7136 = vmatprep.subr.bf16.mxu1 %v11971_v9  ;;  %v12067_v8 = vcombine.high %v1276_v62, %v1292_v63  ;;  %v1307_v9 = vld [vmem:[#allocation2 + $0x1f30] sm:$0xff]  ;;  %v1324_v14 = vld [vmem:[#allocation2 + $0x1fb8] sm:$0xff]  ;;  %v381_v59 = vld [vmem:[#allocation2 + $0x240] sm:$0xff] }
 0x234   : > { %v8190_v34 = vadd.f32 %v13063_v21, %v8151_v20  ;;  %v15663_v35 = vunpack.i.l.bf16 %v13139_v31  ;;  %v12066_v20 = vcombine.low %v1276_v62, %v1292_v63  ;;  %v12096_v37 = vcombine.low %v1307_v9, %v1323_v10  ;;  %v397_v60 = vld [vmem:[#allocation2 + $0x2c0] sm:$0xff]  ;;  %v398_v62 = vld [vmem:[#allocation2 + $0x2c8] sm:$0xff] }
 0x235   : > { %v8221_v39 = vmax.f32 %v8189_v28, 0.0  ;;  %v317_v28 = vld [vmem:[#allocation2 + $0x40] sm:$0xff]  ;;  %v12098_v38 = vcombine.low %v1308_v13, %v1324_v14 }
 0x236   : > { %v8222_v43 = vmax.f32 %v8190_v34, 0.0  ;;  %v13149_v15 = vsel %vm8520_vm0, %v15662_v30, %v15663_v35  ;;  %7055 = vmatpush1.bf16.msra.mxu0 %v11968_v24  ;;  %7137 = vmatpush1.bf16.msra.mxu1 %v11970_v27  ;;  %v12097_v24 = vcombine.high %v1307_v9, %v1323_v10  ;;  %v12099_v27 = vcombine.high %v1308_v13, %v1324_v14  ;;  %v318_v34 = vld [vmem:[#allocation2 + $0x48] sm:$0xff] }
 0x237   : > { %7056 = vmatprep.subr.bf16.mxu0 %v12001_v32  ;;  %v8260_v51 = vmul.f32 %v13070_v41, %v8221_v39  ;;  %7138 = vmatprep.subr.bf16.mxu1 %v12003_v36  ;;  %v333_v32 = vld [vmem:[#allocation2 + $0xc0] sm:$0xff]  ;;  %v334_v36 = vld [vmem:[#allocation2 + $0xc8] sm:$0xff]  ;;  %v11172_v13 = vcombine.low %v381_v59, %v397_v60 }
 0x238   : > { %v8261_v56 = vmul.f32 %v13070_v41, %v8222_v43  ;;  %v11109_v39 = vcombine.high %v317_v28, %v333_v32  ;;  %v11111_v40 = vcombine.high %v318_v34, %v334_v36  ;;  %v365_v43 = vld [vmem:[#allocation2 + $0x1c0] sm:$0xff]  ;;  %v414_v9 = vld [vmem:[#allocation2 + $0x348] sm:$0xff] }
 0x239   : > { %v8299_v61 = vadd.f32 %v13075_v54, %v8260_v51  ;;  %v11110_v51 = vcombine.low %v318_v34, %v334_v36  ;;  %v11140_v63 = vcombine.low %v349_v42, %v365_v43  ;;  %v430_v10 = vld [vmem:[#allocation2 + $0x3c8] sm:$0xff] }
 0x23a   : > { %7057 = vmatpush1.bf16.msra.mxu0 %v12000_v47  ;;  %v8300_v1 = vadd.f32 %v13075_v54, %v8261_v56  ;;  %7139 = vmatpush1.bf16.msra.mxu1 %v12002_v48  ;;  %v350_v47 = vld [vmem:[#allocation2 + $0x148] sm:$0xff]  ;;  %v11206_v34 = vcombine.low %v414_v9, %v430_v10 }
 0x23b   : > { %7058 = vmatprep.subr.bf16.mxu0 %v12033_v49  ;;  %v13155_v3 = vmax.f32 %v8299_v61, 0.0  ;;  %7140 = vmatprep.subr.bf16.mxu1 %v12035_v55  ;;  %v366_v48 = vld [vmem:[#allocation2 + $0x1c8] sm:$0xff]  ;;  %v11108_v49 = vcombine.low %v317_v28, %v333_v32  ;;  %v11141_v55 = vcombine.high %v349_v42, %v365_v43 }
 0x23c   : > { %v13157_v7 = vmax.f32 %v8300_v1, 0.0  ;;  %v11143_v56 = vcombine.high %v350_v47, %v366_v48  ;;  %v382_v61 = vld [vmem:[#allocation2 + $0x248] sm:$0xff]  ;;  %v11173_v1 = vcombine.high %v381_v59, %v397_v60 }
 0x23d   : > { %15691 = vst [vmem:[#allocation11_spill] sm:$0xff] %v13155_v3  ;;  %v11174_v14 = vcombine.low %v382_v61, %v398_v62  ;;  %v462_v28 = vld [vmem:[#allocation2 + $0x4c8] sm:$0xff] }
 0x23e   : > { %7059 = vmatpush1.bf16.msra.mxu0 %v12032_v0  ;;  %v12654_v17 = vpack.i.bf16 %v13157_v7, %v13155_v3  ;;  %7141 = vmatpush1.bf16.msra.mxu1 %v12034_v2  ;;  %v11142_v0 = vcombine.low %v350_v47, %v366_v48  ;;  %v11175_v2 = vcombine.high %v382_v61, %v398_v62  ;;  %v494_v42 = vld [vmem:[#allocation2 + $0x5c8] sm:$0xff] }
 0x23f   : > { %7060 = vmatprep.subr.bf16.mxu0 %v12065_v5  ;;  %7142 = vmatprep.subr.bf16.mxu1 %v12067_v8  ;;  %v413_v5 = vld [vmem:[#allocation2 + $0x340] sm:$0xff]  ;;  %v526_v59 = vld [vmem:[#allocation2 + $0x6c8] sm:$0xff] }
 0x240   : > { %12655 = vrot.lane.b32.xlu0 %v12654_v17, %s12817_s14  ;;  %v429_v8 = vld [vmem:[#allocation2 + $0x3c0] sm:$0xff] }
 0x241   : > { %v11205_v17 = vcombine.high %v413_v5, %v429_v8  ;;  %v11204_v32 = vcombine.low %v413_v5, %v429_v8  ;;  %v558_v5 = vld [vmem:[#allocation2 + $0x7c8] sm:$0xff] }
 0x242   : > { %7061 = vmatpush1.bf16.msra.mxu0 %v12064_v18  ;;  %7143 = vmatpush1.bf16.msra.mxu1 %v12066_v20  ;;  %v11207_v18 = vcombine.high %v414_v9, %v430_v10  ;;  %v445_v20 = vld [vmem:[#allocation2 + $0x440] sm:$0xff] }
 0x243   : > { %7062 = vmatprep.subr.bf16.mxu0 %v12097_v24  ;;  %7144 = vmatprep.subr.bf16.mxu1 %v12099_v27  ;;  %v461_v24 = vld [vmem:[#allocation2 + $0x4c0] sm:$0xff]  ;;  %v446_v27 = vld [vmem:[#allocation2 + $0x448] sm:$0xff] }
 0x244   : > { %v11237_v36 = vcombine.high %v445_v20, %v461_v24  ;;  %v11236_v43 = vcombine.low %v445_v20, %v461_v24  ;;  %v11238_v47 = vcombine.low %v446_v27, %v462_v28  ;;  %v590_v20 = vld [vmem:[#allocation2 + $0x8c8] sm:$0xff] }
 0x246   : > { %7063 = vmatpush1.bf16.msra.mxu0 %v12096_v37  ;;  %7145 = vmatpush1.bf16.msra.mxu1 %v12098_v38  ;;  %v11239_v37 = vcombine.high %v446_v27, %v462_v28  ;;  %v477_v38 = vld [vmem:[#allocation2 + $0x540] sm:$0xff] }
 0x247   : > { %7155 = vmatprep.subr.bf16.mxu0 %v11109_v39  ;;  %7237 = vmatprep.subr.bf16.mxu1 %v11111_v40  ;;  %v493_v39 = vld [vmem:[#allocation2 + $0x5c0] sm:$0xff]  ;;  %v478_v40 = vld [vmem:[#allocation2 + $0x548] sm:$0xff] }
 0x248   : > { %v11269_v48 = vcombine.high %v477_v38, %v493_v39  ;;  %v11268_v60 = vcombine.low %v477_v38, %v493_v39  ;;  %v11270_v61 = vcombine.low %v478_v40, %v494_v42  ;;  %v622_v38 = vld [vmem:[#allocation2 + $0x9c8] sm:$0xff] }
 0x249   : > { %7065 = vmatmul.mubr.bf16.vlgmr.msra.gmra.mrb[12].mxu0 %v13007_v33  ;;  %7147 = vmatmul.mubr.bf16.vlgmr.msra.gmra.mrb[12].mxu1 %v13007_v33 }
 0x24a   : > { %7156 = vmatpush1.bf16.msra.mxu0 %v11108_v49  ;;  %7238 = vmatpush1.bf16.msra.mxu1 %v11110_v51  ;;  %v11271_v49 = vcombine.high %v478_v40, %v494_v42  ;;  %v509_v51 = vld [vmem:[#allocation2 + $0x640] sm:$0xff] }
 0x24b   : > { %7157 = vmatprep.subr.bf16.mxu0 %v11141_v55  ;;  %7239 = vmatprep.subr.bf16.mxu1 %v11143_v56  ;;  %v525_v55 = vld [vmem:[#allocation2 + $0x6c0] sm:$0xff]  ;;  %v510_v56 = vld [vmem:[#allocation2 + $0x648] sm:$0xff] }
 0x24c   : > { %7187 = vmatprep.mubr.bf16.mxu0 %v12956_v57  ;;  %7269 = vmatprep.mubr.bf16.mxu1 %v12956_v57  ;;  %v11301_v62 = vcombine.high %v509_v51, %v525_v55  ;;  %v11300_v8 = vcombine.low %v509_v51, %v525_v55  ;;  %v11302_v9 = vcombine.low %v510_v56, %v526_v59  ;;  %v654_v51 = vld [vmem:[#allocation2 + $0xac8] sm:$0xff] }
 0x24e   : > { %7158 = vmatpush1.bf16.msra.mxu0 %v11140_v63  ;;  %7240 = vmatpush1.bf16.msra.mxu1 %v11142_v0  ;;  %v11303_v63 = vcombine.high %v510_v56, %v526_v59  ;;  %v541_v0 = vld [vmem:[#allocation2 + $0x740] sm:$0xff] }
 0x24f   : > { %7159 = vmatprep.subr.bf16.mxu0 %v11173_v1  ;;  %7241 = vmatprep.subr.bf16.mxu1 %v11175_v2  ;;  %v557_v1 = vld [vmem:[#allocation2 + $0x7c0] sm:$0xff]  ;;  %v542_v2 = vld [vmem:[#allocation2 + $0x748] sm:$0xff] }
 0x250   : > { %v11333_v10 = vcombine.high %v541_v0, %v557_v1  ;;  %v11332_v24 = vcombine.low %v541_v0, %v557_v1  ;;  %v11334_v27 = vcombine.low %v542_v2, %v558_v5  ;;  %v686_v0 = vld [vmem:[#allocation2 + $0xbc8] sm:$0xff] }
 0x252   : > { %7160 = vmatpush1.bf16.msra.mxu0 %v11172_v13  ;;  %7242 = vmatpush1.bf16.msra.mxu1 %v11174_v14  ;;  %v11335_v13 = vcombine.high %v542_v2, %v558_v5  ;;  %v573_v14 = vld [vmem:[#allocation2 + $0x840] sm:$0xff] }
 0x253   : > { %7161 = vmatprep.subr.bf16.mxu0 %v11205_v17  ;;  %7243 = vmatprep.subr.bf16.mxu1 %v11207_v18  ;;  %v589_v17 = vld [vmem:[#allocation2 + $0x8c0] sm:$0xff]  ;;  %v574_v18 = vld [vmem:[#allocation2 + $0x848] sm:$0xff] }
 0x254   : > { %v11365_v28 = vcombine.high %v573_v14, %v589_v17  ;;  %v11364_v39 = vcombine.low %v573_v14, %v589_v17  ;;  %v11366_v40 = vcombine.low %v574_v18, %v590_v20  ;;  %v718_v14 = vld [vmem:[#allocation2 + $0xcc8] sm:$0xff] }
 0x256   : > { %7162 = vmatpush1.bf16.msra.mxu0 %v11204_v32  ;;  %7244 = vmatpush1.bf16.msra.mxu1 %v11206_v34  ;;  %v11367_v32 = vcombine.high %v574_v18, %v590_v20  ;;  %v605_v34 = vld [vmem:[#allocation2 + $0x940] sm:$0xff] }
 0x257   : > { %7163 = vmatprep.subr.bf16.mxu0 %v11237_v36  ;;  %7245 = vmatprep.subr.bf16.mxu1 %v11239_v37  ;;  %v621_v36 = vld [vmem:[#allocation2 + $0x9c0] sm:$0xff]  ;;  %v606_v37 = vld [vmem:[#allocation2 + $0x948] sm:$0xff] }
 0x258   : > { %v11397_v42 = vcombine.high %v605_v34, %v621_v36  ;;  %v11396_v55 = vcombine.low %v605_v34, %v621_v36  ;;  %v11398_v56 = vcombine.low %v606_v37, %v622_v38  ;;  %v750_v34 = vld [vmem:[#allocation2 + $0xdc8] sm:$0xff] }
 0x25a   : > { %7164 = vmatpush1.bf16.msra.mxu0 %v11236_v43  ;;  %7246 = vmatpush1.bf16.msra.mxu1 %v11238_v47  ;;  %v11399_v43 = vcombine.high %v606_v37, %v622_v38  ;;  %v637_v47 = vld [vmem:[#allocation2 + $0xa40] sm:$0xff] }
 0x25b   : > { %7165 = vmatprep.subr.bf16.mxu0 %v11269_v48  ;;  %7247 = vmatprep.subr.bf16.mxu1 %v11271_v49  ;;  %v653_v48 = vld [vmem:[#allocation2 + $0xac0] sm:$0xff]  ;;  %v638_v49 = vld [vmem:[#allocation2 + $0xa48] sm:$0xff] }
 0x25c   : > { %v11429_v59 = vcombine.high %v637_v47, %v653_v48  ;;  %v11428_v1 = vcombine.low %v637_v47, %v653_v48  ;;  %v11430_v2 = vcombine.low %v638_v49, %v654_v51  ;;  %v782_v47 = vld [vmem:[#allocation2 + $0xec8] sm:$0xff] }
 0x25e   : > { %7166 = vmatpush1.bf16.msra.mxu0 %v11268_v60  ;;  %7248 = vmatpush1.bf16.msra.mxu1 %v11270_v61  ;;  %v11431_v60 = vcombine.high %v638_v49, %v654_v51  ;;  %v669_v61 = vld [vmem:[#allocation2 + $0xb40] sm:$0xff]  ;;  %v1340_v49 = vld [vmem:[#allocation4 + $0x38] sm:$0xff] }
 0x25f   : > { %7167 = vmatprep.subr.bf16.mxu0 %v11301_v62  ;;  %7249 = vmatprep.subr.bf16.mxu1 %v11303_v63  ;;  %v685_v62 = vld [vmem:[#allocation2 + $0xbc0] sm:$0xff]  ;;  %v670_v63 = vld [vmem:[#allocation2 + $0xb48] sm:$0xff] }
 0x260   : > { %v11461_v5 = vcombine.high %v669_v61, %v685_v62  ;;  %v11460_v17 = vcombine.low %v669_v61, %v685_v62  ;;  %v11462_v18 = vcombine.low %v670_v63, %v686_v0  ;;  %v798_v61 = vld [vmem:[#allocation2 + $0xf48] sm:$0xff] }
 0x261   : > { %v814_v62 = vld [vmem:[#allocation2 + $0xfc8] sm:$0xff] }
 0x262   : > { %7168 = vmatpush1.bf16.msra.mxu0 %v11300_v8  ;;  %7250 = vmatpush1.bf16.msra.mxu1 %v11302_v9  ;;  %v11463_v8 = vcombine.high %v670_v63, %v686_v0  ;;  %v701_v9 = vld [vmem:[#allocation2 + $0xc40] sm:$0xff]  ;;  %v12512_v63 = vadd.f32 %v13114_v52, %v1340_v49  ;;  %v910_v49 = vld [vmem:[#allocation2 + $0x12c8] sm:$0xff] }
 0x263   : > { %7169 = vmatprep.subr.bf16.mxu0 %v11333_v10  ;;  %7251 = vmatprep.subr.bf16.mxu1 %v11335_v13  ;;  %v717_v10 = vld [vmem:[#allocation2 + $0xcc0] sm:$0xff]  ;;  %v702_v13 = vld [vmem:[#allocation2 + $0xc48] sm:$0xff] }
 0x264   : > { %v11493_v20 = vcombine.high %v701_v9, %v717_v10  ;;  %v11492_v36 = vcombine.low %v701_v9, %v717_v10  ;;  %v11494_v37 = vcombine.low %v702_v13, %v718_v14  ;;  %v845_v9 = vld [vmem:[#allocation2 + $0x10c0] sm:$0xff]  ;;  %v830_v10 = vld [vmem:[#allocation2 + $0x1048] sm:$0xff] }
 0x266   : > { %7170 = vmatpush1.bf16.msra.mxu0 %v11332_v24  ;;  %7252 = vmatpush1.bf16.msra.mxu1 %v11334_v27  ;;  %v11495_v24 = vcombine.high %v702_v13, %v718_v14  ;;  %v733_v27 = vld [vmem:[#allocation2 + $0xd40] sm:$0xff]  ;;  %v846_v13 = vld [vmem:[#allocation2 + $0x10c8] sm:$0xff]  ;;  %v7824_v14 = vmul.f32 %v12512_v63, %v13025_v29 }
 0x267   : > { %7171 = vmatprep.subr.bf16.mxu0 %v11365_v28  ;;  %7253 = vmatprep.subr.bf16.mxu1 %v11367_v32  ;;  %v749_v28 = vld [vmem:[#allocation2 + $0xdc0] sm:$0xff]  ;;  %v734_v32 = vld [vmem:[#allocation2 + $0xd48] sm:$0xff] }
 0x268   : > { %v11525_v38 = vcombine.high %v733_v27, %v749_v28  ;;  %v11524_v48 = vcombine.low %v733_v27, %v749_v28  ;;  %v11526_v51 = vcombine.low %v734_v32, %v750_v34  ;;  %v877_v27 = vld [vmem:[#allocation2 + $0x11c0] sm:$0xff]  ;;  %v1339_v28 = vld [vmem:[#allocation4 + $0x30] sm:$0xff]  ;;  %v926_v63 = vld [vmem:[#allocation2 + $0x1348] sm:$0xff] }
 0x26a   : > { %7172 = vmatpush1.bf16.msra.mxu0 %v11364_v39  ;;  %7254 = vmatpush1.bf16.msra.mxu1 %v11366_v40  ;;  %v11527_v39 = vcombine.high %v734_v32, %v750_v34  ;;  %v765_v40 = vld [vmem:[#allocation2 + $0xe40] sm:$0xff]  ;;  %v862_v32 = vld [vmem:[#allocation2 + $0x1148] sm:$0xff] }
 0x26b   : > { %7173 = vmatprep.subr.bf16.mxu0 %v11397_v42  ;;  %7255 = vmatprep.subr.bf16.mxu1 %v11399_v43  ;;  %v781_v42 = vld [vmem:[#allocation2 + $0xec0] sm:$0xff]  ;;  %v766_v43 = vld [vmem:[#allocation2 + $0xe48] sm:$0xff] }
 0x26c   : > { %v11556_v0 = vcombine.low %v765_v40, %v781_v42  ;;  %v878_v34 = vld [vmem:[#allocation2 + $0x11c8] sm:$0xff] }
 0x26e   : > { %7174 = vmatpush1.bf16.msra.mxu0 %v11396_v55  ;;  %7256 = vmatpush1.bf16.msra.mxu1 %v11398_v56  ;;  %v11557_v55 = vcombine.high %v765_v40, %v781_v42  ;;  %v11559_v56 = vcombine.high %v766_v43, %v782_v47  ;;  %v12511_v40 = vadd.f32 %v13112_v46, %v1339_v28 }
 0x26f   : > { %7175 = vmatprep.subr.bf16.mxu0 %v11429_v59  ;;  %7257 = vmatprep.subr.bf16.mxu1 %v11431_v60  ;;  %v797_v59 = vld [vmem:[#allocation2 + $0xf40] sm:$0xff]  ;;  %v11655_v42 = vcombine.high %v862_v32, %v878_v34 }
 0x270   : > { %v813_v60 = vld [vmem:[#allocation2 + $0xfc0] sm:$0xff] }
 0x272   : > { %7176 = vmatpush1.bf16.msra.mxu0 %v11428_v1  ;;  %7258 = vmatpush1.bf16.msra.mxu1 %v11430_v2  ;;  %v11558_v1 = vcombine.low %v766_v43, %v782_v47  ;;  %v11589_v2 = vcombine.high %v797_v59, %v813_v60  ;;  %v893_v43 = vld [vmem:[#allocation2 + $0x1240] sm:$0xff] }
 0x273   : > { %7177 = vmatprep.subr.bf16.mxu0 %v11461_v5  ;;  %7259 = vmatprep.subr.bf16.mxu1 %v11463_v8  ;;  %v11591_v5 = vcombine.high %v798_v61, %v814_v62  ;;  %v829_v8 = vld [vmem:[#allocation2 + $0x1040] sm:$0xff] }
 0x274   : > { %v11621_v52 = vcombine.high %v829_v8, %v845_v9  ;;  %v909_v47 = vld [vmem:[#allocation2 + $0x12c0] sm:$0xff] }
 0x276   : > { %7178 = vmatpush1.bf16.msra.mxu0 %v11460_v17  ;;  %7260 = vmatpush1.bf16.msra.mxu1 %v11462_v18  ;;  %v11588_v17 = vcombine.low %v797_v59, %v813_v60  ;;  %v11590_v18 = vcombine.low %v798_v61, %v814_v62  ;;  %v11685_v59 = vcombine.high %v893_v43, %v909_v47  ;;  %v925_v61 = vld [vmem:[#allocation2 + $0x1340] sm:$0xff] }
 0x277   : > { %7179 = vmatprep.subr.bf16.mxu0 %v11493_v20  ;;  %7261 = vmatprep.subr.bf16.mxu1 %v11495_v24  ;;  %v11623_v20 = vcombine.high %v830_v10, %v846_v13  ;;  %v861_v24 = vld [vmem:[#allocation2 + $0x1140] sm:$0xff]  ;;  %v7823_v60 = vmul.f32 %v12511_v40, %v13025_v29 }
 0x278   : > { %v941_v62 = vld [vmem:[#allocation2 + $0x13c0] sm:$0xff] }
 0x27a   : > { %7180 = vmatpush1.bf16.msra.mxu0 %v11492_v36  ;;  %7262 = vmatpush1.bf16.msra.mxu1 %v11494_v37  ;;  %v7862_v36 = vadd.f32 %v13027_v45, %v7824_v14  ;;  %v11620_v37 = vcombine.low %v829_v8, %v845_v9  ;;  %v11717_v8 = vcombine.high %v925_v61, %v941_v62  ;;  %v973_v14 = vld [vmem:[#allocation2 + $0x14c0] sm:$0xff] }
 0x27b   : > { %7181 = vmatprep.subr.bf16.mxu0 %v11525_v38  ;;  %7263 = vmatprep.subr.bf16.mxu1 %v11527_v39  ;;  %v11622_v38 = vcombine.low %v830_v10, %v846_v13  ;;  %v11653_v39 = vcombine.high %v861_v24, %v877_v27  ;;  %v7861_v9 = vadd.f32 %v13027_v45, %v7823_v60  ;;  %v957_v13 = vld [vmem:[#allocation2 + $0x1440] sm:$0xff] }
 0x27c   : > { %v11748_v40 = vcombine.low %v957_v13, %v973_v14  ;;  %v1341_v60 = vld [vmem:[#allocation4 + $0x40] sm:$0xff] }
 0x27d   : > { %v7893_v28 = vmax.f32 %v7861_v9, 0.0  ;;  %v1053_v9 = vld [vmem:[#allocation2 + $0x1740] sm:$0xff] }
 0x27e   : > { %7182 = vmatpush1.bf16.msra.mxu0 %v11524_v48  ;;  %7264 = vmatpush1.bf16.msra.mxu1 %v11526_v51  ;;  %v894_v48 = vld [vmem:[#allocation2 + $0x1248] sm:$0xff]  ;;  %v7894_v51 = vmax.f32 %v7862_v36, 0.0  ;;  %v1005_v36 = vld [vmem:[#allocation2 + $0x15c0] sm:$0xff] }
 0x27f   : > { %7183 = vmatprep.subr.bf16.mxu0 %v11557_v55  ;;  %7265 = vmatprep.subr.bf16.mxu1 %v11559_v56  ;;  %v11652_v55 = vcombine.low %v861_v24, %v877_v27  ;;  %v11654_v56 = vcombine.low %v862_v32, %v878_v34  ;;  %v11687_v46 = vcombine.high %v894_v48, %v910_v49  ;;  %v989_v34 = vld [vmem:[#allocation2 + $0x1540] sm:$0xff] }
 0x280   : > { %v11749_v27 = vcombine.high %v957_v13, %v973_v14 }
 0x282   : > { %7184 = vmatpush1.bf16.msra.mxu0 %v11556_v0  ;;  %7266 = vmatpush1.bf16.msra.mxu1 %v11558_v1  ;;  %v942_v0 = vld [vmem:[#allocation2 + $0x13c8] sm:$0xff]  ;;  %v7933_v1 = vmul.f32 %v13029_v50, %v7894_v51  ;;  %v1037_v51 = vld [vmem:[#allocation2 + $0x16c0] sm:$0xff] }
 0x283   : > { %7185 = vmatprep.subr.bf16.mxu0 %v11589_v2  ;;  %7267 = vmatprep.subr.bf16.mxu1 %v11591_v5  ;;  %v11684_v2 = vcombine.low %v893_v43, %v909_v47  ;;  %v11686_v5 = vcombine.low %v894_v48, %v910_v49  ;;  %v11719_v10 = vcombine.high %v926_v63, %v942_v0  ;;  %v1021_v49 = vld [vmem:[#allocation2 + $0x1640] sm:$0xff] }
 0x284   : > { %v11718_v24 = vcombine.low %v926_v63, %v942_v0  ;;  %v11781_v43 = vcombine.high %v989_v34, %v1005_v36  ;;  %v7932_v47 = vmul.f32 %v13029_v50, %v7893_v28  ;;  %v11813_v0 = vcombine.high %v1021_v49, %v1037_v51 }
 0x286   : > { %7186 = vmatpush1.bf16.msra.mxu0 %v11588_v17  ;;  %7268 = vmatpush1.bf16.msra.mxu1 %v11590_v18  ;;  %v958_v17 = vld [vmem:[#allocation2 + $0x1448] sm:$0xff] }
 0x287   : > { %7196 = vmatprep.subr.bf16.mxu0 %v11621_v52  ;;  %7278 = vmatprep.subr.bf16.mxu1 %v11623_v20  ;;  %v974_v18 = vld [vmem:[#allocation2 + $0x14c8] sm:$0xff]  ;;  %v7972_v52 = vadd.f32 %v13039_v26, %v7933_v1  ;;  %v11716_v20 = vcombine.low %v925_v61, %v941_v62  ;;  %v1343_v61 = vld [vmem:[#allocation4 + $0x50] sm:$0xff]  ;;  %v7971_v1 = vadd.f32 %v13039_v26, %v7932_v47 }
 0x288   : > { %v11751_v32 = vcombine.high %v958_v17, %v974_v18  ;;  %v1342_v62 = vld [vmem:[#allocation4 + $0x48] sm:$0xff] }
 0x289   : > { %7188 = vmatmul.mubr.bf16.vlgmr.msra.gmra.mrb[16].mxu0 %v12962_v12  ;;  %7270 = vmatmul.mubr.bf16.vlgmr.msra.gmra.mrb[16].mxu1 %v12962_v12 }
 0x28a   : > { %7197 = vmatpush1.bf16.msra.mxu0 %v11620_v37  ;;  %7279 = vmatpush1.bf16.msra.mxu1 %v11622_v38  ;;  %v990_v37 = vld [vmem:[#allocation2 + $0x1548] sm:$0xff] }
 0x28b   : > { %7198 = vmatprep.subr.bf16.mxu0 %v11653_v39  ;;  %7280 = vmatprep.subr.bf16.mxu1 %v11655_v42  ;;  %v1006_v38 = vld [vmem:[#allocation2 + $0x15c8] sm:$0xff]  ;;  %v8004_v39 = vmax.f32 %v7972_v52, 0.0  ;;  %v11750_v42 = vcombine.low %v958_v17, %v974_v18  ;;  %v11812_v18 = vcombine.low %v1021_v49, %v1037_v51 }
 0x28c   : > { %7228 = vmatprep.mubr.bf16.mxu0 %v12969_v22  ;;  %7310 = vmatprep.mubr.bf16.mxu1 %v12969_v22  ;;  %v11783_v48 = vcombine.high %v990_v37, %v1006_v38  ;;  %v11782_v63 = vcombine.low %v990_v37, %v1006_v38  ;;  %v1054_v52 = vld [vmem:[#allocation2 + $0x1748] sm:$0xff] }
 0x28e   : > { %7199 = vmatpush1.bf16.msra.mxu0 %v11652_v55  ;;  %7281 = vmatpush1.bf16.msra.mxu1 %v11654_v56  ;;  %v1022_v55 = vld [vmem:[#allocation2 + $0x1648] sm:$0xff] }
 0x28f   : > { %7200 = vmatprep.subr.bf16.mxu0 %v11685_v59  ;;  %7282 = vmatprep.subr.bf16.mxu1 %v11687_v46  ;;  %v1038_v56 = vld [vmem:[#allocation2 + $0x16c8] sm:$0xff]  ;;  %v8043_v59 = vmul.f32 %v13046_v44, %v8004_v39  ;;  %v11780_v46 = vcombine.low %v989_v34, %v1005_v36 }
 0x290   : > { %v11814_v34 = vcombine.low %v1022_v55, %v1038_v56 }
 0x292   : > { %7201 = vmatpush1.bf16.msra.mxu0 %v11684_v2  ;;  %7283 = vmatpush1.bf16.msra.mxu1 %v11686_v5  ;;  %v1344_v5 = vld [vmem:[#allocation4 + $0x58] sm:$0xff] }
 0x293   : > { %7202 = vmatprep.subr.bf16.mxu0 %v11717_v8  ;;  %7284 = vmatprep.subr.bf16.mxu1 %v11719_v10  ;;  %v11815_v8 = vcombine.high %v1022_v55, %v1038_v56  ;;  %v1069_v10 = vld [vmem:[#allocation2 + $0x17c0] sm:$0xff] }
 0x296   : > { %7203 = vmatpush1.bf16.msra.mxu0 %v11716_v20  ;;  %7285 = vmatpush1.bf16.msra.mxu1 %v11718_v24  ;;  %v1070_v20 = vld [vmem:[#allocation2 + $0x17c8] sm:$0xff]  ;;  %v8082_v24 = vadd.f32 %v13051_v58, %v8043_v59  ;;  %v1085_v59 = vld [vmem:[#allocation2 + $0x1840] sm:$0xff] }
 0x297   : > { %7204 = vmatprep.subr.bf16.mxu0 %v11749_v27  ;;  %7286 = vmatprep.subr.bf16.mxu1 %v11751_v32  ;;  %v11847_v51 = vcombine.high %v1054_v52, %v1070_v20 }
 0x29a   : > { %7205 = vmatpush1.bf16.msra.mxu0 %v11748_v40  ;;  %7287 = vmatpush1.bf16.msra.mxu1 %v11750_v42  ;;  %v11845_v40 = vcombine.high %v1053_v9, %v1069_v10 }
 0x29b   : > { %7206 = vmatprep.subr.bf16.mxu0 %v11781_v43  ;;  %7288 = vmatprep.subr.bf16.mxu1 %v11783_v48  ;;  %v8003_v43 = vmax.f32 %v7971_v1, 0.0  ;;  %v11844_v1 = vcombine.low %v1053_v9, %v1069_v10  ;;  %v1134_v9 = vld [vmem:[#allocation2 + $0x19c8] sm:$0xff] }
 0x29c   : > { %v6902_v2 = vpop.f32.mrb[8].mxu0  ;;  %v6984_v14 = vpop.f32.mrb[8].mxu1 }
 0x29d   : > { %v12513_v13 = vadd.f32 %v6902_v2, %v1341_v60  ;;  %v6904_v17 = vpop.f32.mrb[9].mxu0  ;;  %v12515_v27 = vadd.f32 %v6984_v14, %v1343_v61  ;;  %v6986_v32 = vpop.f32.mrb[9].mxu1  ;;  %v1101_v60 = vld [vmem:[#allocation2 + $0x18c0] sm:$0xff]  ;;  %v1102_v61 = vld [vmem:[#allocation2 + $0x18c8] sm:$0xff]  ;;  %v8042_v14 = vmul.f32 %v13046_v44, %v8003_v43 }
 0x29e   : > { %v12514_v28 = vadd.f32 %v6904_v17, %v1342_v62  ;;  %7207 = vmatpush1.bf16.msra.mxu0 %v11780_v46  ;;  %v6906_v36 = vpop.f32.mrb[10].mxu0  ;;  %v12516_v38 = vadd.f32 %v6986_v32, %v1344_v5  ;;  %v6988_v39 = vpop.f32.mrb[10].mxu1  ;;  %7289 = vmatpush1.bf16.msra.mxu1 %v11782_v63  ;;  %v1086_v46 = vld [vmem:[#allocation2 + $0x1848] sm:$0xff]  ;;  %v8114_v62 = vmax.f32 %v8082_v24, 0.0  ;;  %v1117_v24 = vld [vmem:[#allocation2 + $0x1940] sm:$0xff] }
 0x29f   : > { %v7825_v37 = vmul.f32 %v12513_v13, %v13025_v29  ;;  %7208 = vmatprep.subr.bf16.mxu0 %v11813_v0  ;;  %v6907_v42 = vpop.f32.mrb[11].mxu0  ;;  %v7827_v47 = vmul.f32 %v12515_v27, %v13025_v29  ;;  %v6989_v49 = vpop.f32.mrb[11].mxu1  ;;  %7290 = vmatprep.subr.bf16.mxu1 %v11815_v8  ;;  %v11846_v8 = vcombine.low %v1054_v52, %v1070_v20  ;;  %v1133_v32 = vld [vmem:[#allocation2 + $0x19c0] sm:$0xff] }
 0x2a0   : > { %v7826_v48 = vmul.f32 %v12514_v28, %v13025_v29  ;;  %v7828_v56 = vmul.f32 %v12516_v38, %v13025_v29  ;;  %v11877_v13 = vcombine.high %v1085_v59, %v1101_v60  ;;  %v11879_v28 = vcombine.high %v1086_v46, %v1102_v61  ;;  %v1149_v49 = vld [vmem:[#allocation2 + $0x1a40] sm:$0xff] }
 0x2a1   : > { %v7863_v55 = vadd.f32 %v13027_v45, %v7825_v37  ;;  %v7865_v63 = vadd.f32 %v13027_v45, %v7827_v47  ;;  %v8153_v10 = vmul.f32 %v13058_v11, %v8114_v62  ;;  %v11876_v20 = vcombine.low %v1085_v59, %v1101_v60  ;;  %v1150_v59 = vld [vmem:[#allocation2 + $0x1a48] sm:$0xff] }
 0x2a2   : > { %v7864_v0 = vadd.f32 %v13027_v45, %v7826_v48  ;;  %7209 = vmatpush1.bf16.msra.mxu0 %v11812_v18  ;;  %v7866_v5 = vadd.f32 %v13027_v45, %v7828_v56  ;;  %7291 = vmatpush1.bf16.msra.mxu1 %v11814_v34  ;;  %v1118_v18 = vld [vmem:[#allocation2 + $0x1948] sm:$0xff]  ;;  %v11878_v39 = vcombine.low %v1086_v46, %v1102_v61 }
 0x2a3   : > { %v7895_v2 = vmax.f32 %v7863_v55, 0.0  ;;  %7210 = vmatprep.subr.bf16.mxu0 %v11845_v40  ;;  %v7897_v17 = vmax.f32 %v7865_v63, 0.0  ;;  %7292 = vmatprep.subr.bf16.mxu1 %v11847_v51  ;;  %v11909_v40 = vcombine.high %v1117_v24, %v1133_v32  ;;  %v8081_v42 = vadd.f32 %v13051_v58, %v8042_v14  ;;  %v1165_v51 = vld [vmem:[#allocation2 + $0x1ac0] sm:$0xff]  ;;  %v1166_v60 = vld [vmem:[#allocation2 + $0x1ac8] sm:$0xff] }
 0x2a4   : > { %v7896_v27 = vmax.f32 %v7864_v0, 0.0  ;;  %v7898_v37 = vmax.f32 %v7866_v5, 0.0  ;;  %v11911_v48 = vcombine.high %v1118_v18, %v1134_v9  ;;  %v8192_v62 = vadd.f32 %v13063_v21, %v8153_v10  ;;  %v13206_v10 = vpop.permute.xlu0 %12650 }
 0x2a5   : > { %v7934_v36 = vmul.f32 %v13029_v50, %v7895_v2  ;;  %v7936_v34 = vmul.f32 %v13029_v50, %v7897_v17  ;;  %v11908_v61 = vcombine.low %v1117_v24, %v1133_v32  ;;  %v11941_v2 = vcombine.high %v1149_v49, %v1165_v51  ;;  %v1181_v17 = vld [vmem:[#allocation2 + $0x1b40] sm:$0xff]  ;;  %v1182_v24 = vld [vmem:[#allocation2 + $0x1b48] sm:$0xff] }
 0x2a6   : > { %v7935_v52 = vmul.f32 %v13029_v50, %v7896_v27  ;;  %7211 = vmatpush1.bf16.msra.mxu0 %v11844_v1  ;;  %7293 = vmatpush1.bf16.msra.mxu1 %v11846_v8  ;;  %v7937_v56 = vmul.f32 %v13029_v50, %v7898_v37  ;;  %v11910_v1 = vcombine.low %v1118_v18, %v1134_v9  ;;  %v8113_v5 = vmax.f32 %v8081_v42, 0.0  ;;  %v1197_v27 = vld [vmem:[#allocation2 + $0x1bc0] sm:$0xff]  ;;  %v1198_v32 = vld [vmem:[#allocation2 + $0x1bc8] sm:$0xff] }
 0x2a7   : > { %v7973_v38 = vadd.f32 %v13039_v26, %v7934_v36  ;;  %7212 = vmatprep.subr.bf16.mxu0 %v11877_v13  ;;  %v7975_v43 = vadd.f32 %v13039_v26, %v7936_v34  ;;  %7294 = vmatprep.subr.bf16.mxu1 %v11879_v28  ;;  %v11943_v14 = vcombine.high %v1150_v59, %v1166_v60  ;;  %v8224_v37 = vmax.f32 %v8192_v62, 0.0 }
 0x2a8   : > { %v7974_v47 = vadd.f32 %v13039_v26, %v7935_v52  ;;  %v7976_v36 = vadd.f32 %v13039_v26, %v7937_v56  ;;  %v11940_v34 = vcombine.low %v1149_v49, %v1165_v51  ;;  %v11975_v42 = vcombine.high %v1182_v24, %v1198_v32  ;;  %v1230_v49 = vld [vmem:[#allocation2 + $0x1cc8] sm:$0xff] }
 0x2a9   : > { %v8005_v55 = vmax.f32 %v7973_v38, 0.0  ;;  %v8007_v63 = vmax.f32 %v7975_v43, 0.0  ;;  %v11973_v38 = vcombine.high %v1181_v17, %v1197_v27  ;;  %v1213_v43 = vld [vmem:[#allocation2 + $0x1c40] sm:$0xff] }
 0x2aa   : > { %v8006_v46 = vmax.f32 %v7974_v47, 0.0  ;;  %7213 = vmatpush1.bf16.msra.mxu0 %v11876_v20  ;;  %7295 = vmatpush1.bf16.msra.mxu1 %v11878_v39  ;;  %v11942_v20 = vcombine.low %v1150_v59, %v1166_v60  ;;  %v8362_v39 = vadd.s32 256, %v13130_v6  ;;  %v1229_v47 = vld [vmem:[#allocation2 + $0x1cc0] sm:$0xff]  ;;  %v8008_v62 = vmax.f32 %v7976_v36, 0.0 }
 0x2ab   : > { %v8044_v0 = vmul.f32 %v13046_v44, %v8005_v55  ;;  %7214 = vmatprep.subr.bf16.mxu0 %v11909_v40  ;;  %v8046_v8 = vmul.f32 %v13046_v44, %v8007_v63  ;;  %7296 = vmatprep.subr.bf16.mxu1 %v11911_v48  ;;  %v8152_v40 = vmul.f32 %v13058_v11, %v8113_v5  ;;  %v1214_v63 = vld [vmem:[#allocation2 + $0x1c48] sm:$0xff]  ;;  %v15664_v5 = vunpack.i.h.bf16 %v13139_v31 }
 0x2ac   : > { %v8045_v13 = vmul.f32 %v13046_v44, %v8006_v46  ;;  %v11972_v59 = vcombine.low %v1181_v17, %v1197_v27  ;;  %v11974_v60 = vcombine.low %v1182_v24, %v1198_v32  ;;  %v8263_v46 = vmul.f32 %v13070_v41, %v8224_v37  ;;  %v1246_v32 = vld [vmem:[#allocation2 + $0x1d48] sm:$0xff] }
 0x2ad   : > { %v8083_v28 = vadd.f32 %v13051_v58, %v8044_v0  ;;  %v8085_v18 = vadd.f32 %v13051_v58, %v8046_v8  ;;  %v12007_v8 = vcombine.high %v1214_v63, %v1230_v49  ;;  %v8047_v24 = vmul.f32 %v13046_v44, %v8008_v62  ;;  %v1262_v37 = vld [vmem:[#allocation2 + $0x1dc8] sm:$0xff] }
 0x2ae   : > { %v8084_v9 = vadd.f32 %v13051_v58, %v8045_v13  ;;  %7215 = vmatpush1.bf16.msra.mxu0 %v11908_v61  ;;  %7297 = vmatpush1.bf16.msra.mxu1 %v11910_v1  ;;  %v12005_v1 = vcombine.high %v1213_v43, %v1229_v47  ;;  %v1245_v13 = vld [vmem:[#allocation2 + $0x1d40] sm:$0xff]  ;;  %v1278_v62 = vld [vmem:[#allocation2 + $0x1e48] sm:$0xff] }
 0x2af   : > { %v8115_v52 = vmax.f32 %v8083_v28, 0.0  ;;  %7216 = vmatprep.subr.bf16.mxu0 %v11941_v2  ;;  %7298 = vmatprep.subr.bf16.mxu1 %v11943_v14  ;;  %v8117_v55 = vmax.f32 %v8085_v18, 0.0  ;;  %v8394_v2 = vand.u32 255, %v8362_v39  ;;  %v1261_v14 = vld [vmem:[#allocation2 + $0x1dc0] sm:$0xff]  ;;  %v8191_v28 = vadd.f32 %v13063_v21, %v8152_v40 }
 0x2b0   : > { %v8116_v56 = vmax.f32 %v8084_v9, 0.0  ;;  %v12004_v18 = vcombine.low %v1213_v43, %v1229_v47  ;;  %v12006_v9 = vcombine.low %v1214_v63, %v1230_v49  ;;  %v12039_v39 = vcombine.high %v1246_v32, %v1262_v37  ;;  %v1277_v40 = vld [vmem:[#allocation2 + $0x1e40] sm:$0xff]  ;;  %v1294_v63 = vld [vmem:[#allocation2 + $0x1ec8] sm:$0xff] }
 0x2b1   : > { %v8154_v48 = vmul.f32 %v13058_v11, %v8115_v52  ;;  %v8156_v27 = vmul.f32 %v13058_v11, %v8117_v55  ;;  %vm8426_vm1 = vcmp.eq.s32.totalorder %v8394_v2, 0  ;;  %v12036_v49 = vcombine.low %v1245_v13, %v1261_v14 }
 0x2b2   : > { %7217 = vmatpush1.bf16.msra.mxu0 %v11940_v34  ;;  %v13213_v51 = vpop.permute.xlu0 %12655  ;;  %7299 = vmatpush1.bf16.msra.mxu1 %v11942_v20  ;;  %v8155_v36 = vmul.f32 %v13058_v11, %v8116_v56  ;;  %v8302_v34 = vadd.f32 %v13075_v54, %v8263_v46  ;;  %v12037_v20 = vcombine.high %v1245_v13, %v1261_v14  ;;  %v1293_v56 = vld [vmem:[#allocation2 + $0x1ec0] sm:$0xff] }
 0x2b3   : > { %v8193_v61 = vadd.f32 %v13063_v21, %v8154_v48  ;;  %v15661_v0 = vunpack.i.l.bf16 %v13213_v51  ;;  %7218 = vmatprep.subr.bf16.mxu0 %v11973_v38  ;;  %7300 = vmatprep.subr.bf16.mxu1 %v11975_v42  ;;  %v8223_v42 = vmax.f32 %v8191_v28, 0.0  ;;  %v8195_v43 = vadd.f32 %v13063_v21, %v8156_v27 }
 0x2b4   : > { %v8194_v47 = vadd.f32 %v13063_v21, %v8155_v36  ;;  %v8086_v48 = vadd.f32 %v13051_v58, %v8047_v24  ;;  %v13241_v46 = vmax.f32 %v8302_v34, 0.0  ;;  %v12071_v2 = vcombine.high %v1278_v62, %v1294_v63  ;;  %v1325_v36 = vld [vmem:[#allocation2 + $0x1fc0] sm:$0xff]  ;;  %v1310_v24 = vld [vmem:[#allocation2 + $0x1f48] sm:$0xff] }
 0x2b5   : > { %v8225_v17 = vmax.f32 %v8193_v61, 0.0  ;;  %v13230_v52 = vsel %vm8520_vm0, %v15664_v5, %v15661_v0  ;;  %v8262_v28 = vmul.f32 %v13070_v41, %v8223_v42  ;;  %v335_v42 = vld [vmem:[#allocation2 + $0xd0] sm:$0xff]  ;;  %v1072_v0 = vld [vmem:[#allocation2 + $0x17d8] sm:$0xff] }
 0x2b6   : > { %7219 = vmatpush1.bf16.msra.mxu0 %v11972_v59  ;;  %7301 = vmatpush1.bf16.msra.mxu1 %v11974_v60  ;;  %v13239_v59 = vsel %vm8426_vm1, %v13230_v52, %v13149_v15  ;;  %v12038_v60 = vcombine.low %v1246_v32, %v1262_v37  ;;  %15692 = vst [vmem:[#allocation12_spill] sm:$0xff] %v13241_v46  ;;  %v8226_v27 = vmax.f32 %v8194_v47, 0.0  ;;  %v8118_v13 = vmax.f32 %v8086_v48, 0.0  ;;  %v336_v47 = vld [vmem:[#allocation2 + $0xd8] sm:$0xff] }
 0x2b7   : > { %7220 = vmatprep.subr.bf16.mxu0 %v12005_v1  ;;  %v8264_v38 = vmul.f32 %v13070_v41, %v8225_v17  ;;  %7302 = vmatprep.subr.bf16.mxu1 %v12007_v8  ;;  %v12069_v1 = vcombine.high %v1277_v40, %v1293_v56  ;;  %v1309_v8 = vld [vmem:[#allocation2 + $0x1f40] sm:$0xff]  ;;  %v8227_v17 = vmax.f32 %v8195_v43, 0.0  ;;  %v12068_v32 = vcombine.low %v1277_v40, %v1293_v56  ;;  %v320_v43 = vld [vmem:[#allocation2 + $0x58] sm:$0xff] }
 0x2b8   : > { %v12070_v37 = vcombine.low %v1278_v62, %v1294_v63  ;;  %v8265_v48 = vmul.f32 %v13070_v41, %v8226_v27  ;;  %v11115_v63 = vcombine.high %v320_v43, %v336_v47 }
 0x2b9   : > { %v8303_v55 = vadd.f32 %v13075_v54, %v8264_v38  ;;  %v8157_v38 = vmul.f32 %v13058_v11, %v8118_v13  ;;  %v8266_v40 = vmul.f32 %v13070_v41, %v8227_v17 }
 0x2ba   : > { %7221 = vmatpush1.bf16.msra.mxu0 %v12004_v18  ;;  %7303 = vmatpush1.bf16.msra.mxu1 %v12006_v9  ;;  %v1326_v18 = vld [vmem:[#allocation2 + $0x1fc8] sm:$0xff]  ;;  %v12101_v9 = vcombine.high %v1309_v8, %v1325_v36  ;;  %v8304_v27 = vadd.f32 %v13075_v54, %v8265_v48  ;;  %v415_v48 = vld [vmem:[#allocation2 + $0x350] sm:$0xff] }
 0x2bb   : > { %7222 = vmatprep.subr.bf16.mxu0 %v12037_v20  ;;  %v13243_v61 = vmax.f32 %v8303_v55, 0.0  ;;  %7304 = vmatprep.subr.bf16.mxu1 %v12039_v39  ;;  %v12103_v34 = vcombine.high %v1310_v24, %v1326_v18  ;;  %v319_v20 = vld [vmem:[#allocation2 + $0x50] sm:$0xff]  ;;  %v8301_v39 = vadd.f32 %v13075_v54, %v8262_v28  ;;  %v12100_v55 = vcombine.low %v1309_v8, %v1325_v36  ;;  %v368_v28 = vld [vmem:[#allocation2 + $0x1d8] sm:$0xff] }
 0x2bc   : > { %v12102_v56 = vcombine.low %v1310_v24, %v1326_v18  ;;  %v11113_v62 = vcombine.high %v319_v20, %v335_v42  ;;  %v8305_v17 = vadd.f32 %v13075_v54, %v8266_v40  ;;  %v8196_v8 = vadd.f32 %v13063_v21, %v8157_v38  ;;  %v383_v18 = vld [vmem:[#allocation2 + $0x250] sm:$0xff]  ;;  %v400_v38 = vld [vmem:[#allocation2 + $0x2d8] sm:$0xff] }
 0x2bd   : > { %v12659_v14 = vpack.i.bf16 %v13243_v61, %v13241_v46  ;;  %v11112_v13 = vcombine.low %v319_v20, %v335_v42 }
 0x2be   : > { %7223 = vmatpush1.bf16.msra.mxu0 %v12036_v49  ;;  %7305 = vmatpush1.bf16.msra.mxu1 %v12038_v60  ;;  %v351_v49 = vld [vmem:[#allocation2 + $0x150] sm:$0xff]  ;;  %v13255_v60 = vmax.f32 %v8301_v39, 0.0  ;;  %v8228_v20 = vmax.f32 %v8196_v8, 0.0 }
 0x2bf   : > { %12660 = vrot.lane.b32.xlu0 %v12659_v14, %s12817_s14  ;;  %7224 = vmatprep.subr.bf16.mxu0 %v12069_v1  ;;  %v367_v1 = vld [vmem:[#allocation2 + $0x1d0] sm:$0xff]  ;;  %v11114_v14 = vcombine.low %v320_v43, %v336_v47 }
 0x2c0   : > { %7306 = vmatprep.subr.bf16.mxu1 %v12071_v2  ;;  %v352_v2 = vld [vmem:[#allocation2 + $0x158] sm:$0xff]  ;;  %v11145_v36 = vcombine.high %v351_v49, %v367_v1  ;;  %v11144_v39 = vcombine.low %v351_v49, %v367_v1  ;;  %v463_v8 = vld [vmem:[#allocation2 + $0x4d0] sm:$0xff] }
 0x2c1   : > { %v11147_v24 = vcombine.high %v352_v2, %v368_v28  ;;  %v11146_v42 = vcombine.low %v352_v2, %v368_v28 }
 0x2c2   : > { %7225 = vmatpush1.bf16.msra.mxu0 %v12068_v32  ;;  %7307 = vmatpush1.bf16.msra.mxu1 %v12070_v37  ;;  %v13263_v32 = vmax.f32 %v8304_v27, 0.0  ;;  %v13265_v37 = vmax.f32 %v8305_v17, 0.0  ;;  %v447_v27 = vld [vmem:[#allocation2 + $0x450] sm:$0xff] }
 0x2c3   : > { %8625 = vrot.lane.b32.xlu0 %v13155_v3, %s12816_s13  ;;  %7226 = vmatprep.subr.bf16.mxu0 %v12101_v9  ;;  %v399_v9 = vld [vmem:[#allocation2 + $0x2d0] sm:$0xff] }
 0x2c4   : > { %7308 = vmatprep.subr.bf16.mxu1 %v12103_v34  ;;  %15693 = vst [vmem:[#allocation13_spill] sm:$0xff] %v13263_v32  ;;  %v384_v34 = vld [vmem:[#allocation2 + $0x258] sm:$0xff]  ;;  %v11177_v43 = vcombine.high %v383_v18, %v399_v9  ;;  %v12669_v40 = vpack.i.bf16 %v13265_v37, %v13263_v32  ;;  %v11176_v49 = vcombine.low %v383_v18, %v399_v9 }
 0x2c5   : > { %v11179_v47 = vcombine.high %v384_v34, %v400_v38  ;;  %v11178_v1 = vcombine.low %v384_v34, %v400_v38  ;;  %v11241_v18 = vcombine.high %v447_v27, %v463_v8  ;;  %v479_v34 = vld [vmem:[#allocation2 + $0x550] sm:$0xff] }
 0x2c6   : > { %7227 = vmatpush1.bf16.msra.mxu0 %v12100_v55  ;;  %7309 = vmatpush1.bf16.msra.mxu1 %v12102_v56  ;;  %v431_v55 = vld [vmem:[#allocation2 + $0x3d0] sm:$0xff]  ;;  %v416_v56 = vld [vmem:[#allocation2 + $0x358] sm:$0xff] }
 0x2c7   : > { %8629 = vrot.lane.b32.xlu0 %v13255_v60, %s12816_s13  ;;  %7319 = vmatprep.subr.bf16.mxu0 %v11113_v62  ;;  %v432_v62 = vld [vmem:[#allocation2 + $0x3d8] sm:$0xff]  ;;  %v11209_v2 = vcombine.high %v415_v48, %v431_v55  ;;  %v495_v38 = vld [vmem:[#allocation2 + $0x5d0] sm:$0xff] }
 0x2c8   : > { %7401 = vmatprep.subr.bf16.mxu1 %v11115_v63  ;;  %v8267_v63 = vmul.f32 %v13070_v41, %v8228_v20  ;;  %v11211_v28 = vcombine.high %v416_v56, %v432_v62 }
 0x2c9   : > { %7229 = vmatmul.mubr.bf16.vlgmr.msra.gmra.mrb[16].mxu0 %v13007_v33  ;;  %7311 = vmatmul.mubr.bf16.vlgmr.msra.gmra.mrb[16].mxu1 %v13007_v33 }
 0x2ca   : > { %7320 = vmatpush1.bf16.msra.mxu0 %v11112_v13  ;;  %7402 = vmatpush1.bf16.msra.mxu1 %v11114_v14  ;;  %v8306_v17 = vadd.f32 %v13075_v54, %v8267_v63  ;;  %v448_v13 = vld [vmem:[#allocation2 + $0x458] sm:$0xff] }
 0x2cb   : > { %8631 = vrot.lane.b32.xlu0 %v13241_v46, %s12816_s13  ;;  %7321 = vmatprep.subr.bf16.mxu0 %v11145_v36  ;;  %v464_v14 = vld [vmem:[#allocation2 + $0x4d8] sm:$0xff]  ;;  %v11208_v36 = vcombine.low %v415_v48, %v431_v55  ;;  %v11273_v48 = vcombine.high %v479_v34, %v495_v38  ;;  %v511_v55 = vld [vmem:[#allocation2 + $0x650] sm:$0xff] }
 0x2cc   : > { %7403 = vmatprep.subr.bf16.mxu1 %v11147_v24  ;;  %7351 = vmatprep.mubr.bf16.mxu0 %v12956_v57  ;;  %v11210_v24 = vcombine.low %v416_v56, %v432_v62  ;;  %v11243_v9 = vcombine.high %v448_v13, %v464_v14  ;;  %v13279_v20 = vmax.f32 %v8306_v17, 0.0  ;;  %v527_v56 = vld [vmem:[#allocation2 + $0x6d0] sm:$0xff]  ;;  %v512_v62 = vld [vmem:[#allocation2 + $0x658] sm:$0xff] }
 0x2cd   : > { %7433 = vmatprep.mubr.bf16.mxu1 %v12956_v57  ;;  %v528_v63 = vld [vmem:[#allocation2 + $0x6d8] sm:$0xff]  ;;  %v559_v17 = vld [vmem:[#allocation2 + $0x7d0] sm:$0xff] }
 0x2ce   : > { %7322 = vmatpush1.bf16.msra.mxu0 %v11144_v39  ;;  %7404 = vmatpush1.bf16.msra.mxu1 %v11146_v42  ;;  %v480_v39 = vld [vmem:[#allocation2 + $0x558] sm:$0xff] }
 0x2cf   : > { %12670 = vrot.lane.b32.xlu0 %v12669_v40, %s12817_s14  ;;  %7323 = vmatprep.subr.bf16.mxu0 %v11177_v43  ;;  %v496_v42 = vld [vmem:[#allocation2 + $0x5d8] sm:$0xff]  ;;  %v11240_v43 = vcombine.low %v447_v27, %v463_v8  ;;  %v543_v27 = vld [vmem:[#allocation2 + $0x750] sm:$0xff] }
 0x2d0   : > { %7405 = vmatprep.subr.bf16.mxu1 %v11179_v47  ;;  %v11242_v47 = vcombine.low %v448_v13, %v464_v14  ;;  %v11275_v40 = vcombine.high %v480_v39, %v496_v42  ;;  %v544_v8 = vld [vmem:[#allocation2 + $0x758] sm:$0xff]  ;;  %v11304_v14 = vcombine.low %v511_v55, %v527_v56 }
 0x2d1   : > { %v560_v13 = vld [vmem:[#allocation2 + $0x7d8] sm:$0xff] }
 0x2d2   : > { %7324 = vmatpush1.bf16.msra.mxu0 %v11176_v49  ;;  %7406 = vmatpush1.bf16.msra.mxu1 %v11178_v1  ;;  %v11272_v49 = vcombine.low %v479_v34, %v495_v38  ;;  %v11274_v1 = vcombine.low %v480_v39, %v496_v42  ;;  %v591_v34 = vld [vmem:[#allocation2 + $0x8d0] sm:$0xff]  ;;  %v576_v38 = vld [vmem:[#allocation2 + $0x858] sm:$0xff]  ;;  %v11336_v39 = vcombine.low %v543_v27, %v559_v17 }
 0x2d3   : > { %8635 = vrot.lane.b32.xlu0 %v13263_v32, %s12816_s13  ;;  %7325 = vmatprep.subr.bf16.mxu0 %v11209_v2  ;;  %v11305_v2 = vcombine.high %v511_v55, %v527_v56  ;;  %v11338_v42 = vcombine.low %v544_v8, %v560_v13  ;;  %v623_v55 = vld [vmem:[#allocation2 + $0x9d0] sm:$0xff]  ;;  %v608_v56 = vld [vmem:[#allocation2 + $0x958] sm:$0xff] }
 0x2d4   : > { %7407 = vmatprep.subr.bf16.mxu1 %v11211_v28  ;;  %v11307_v28 = vcombine.high %v512_v62, %v528_v63 }
 0x2d6   : > { %7326 = vmatpush1.bf16.msra.mxu0 %v11208_v36  ;;  %7408 = vmatpush1.bf16.msra.mxu1 %v11210_v24  ;;  %v11306_v36 = vcombine.low %v512_v62, %v528_v63  ;;  %v11337_v24 = vcombine.high %v543_v27, %v559_v17  ;;  %v655_v27 = vld [vmem:[#allocation2 + $0xad0] sm:$0xff]  ;;  %v640_v17 = vld [vmem:[#allocation2 + $0xa58] sm:$0xff] }
 0x2d7   : > { %8639 = vrot.lane.b32.xlu0 %v13279_v20, %s12816_s13  ;;  %7327 = vmatprep.subr.bf16.mxu0 %v11241_v18  ;;  %v11339_v18 = vcombine.high %v544_v8, %v560_v13 }
 0x2d8   : > { %7409 = vmatprep.subr.bf16.mxu1 %v11243_v9  ;;  %v575_v9 = vld [vmem:[#allocation2 + $0x850] sm:$0xff] }
 0x2d9   : > { %v11368_v62 = vcombine.low %v575_v9, %v591_v34 }
 0x2da   : > { %7328 = vmatpush1.bf16.msra.mxu0 %v11240_v43  ;;  %7410 = vmatpush1.bf16.msra.mxu1 %v11242_v47  ;;  %v592_v43 = vld [vmem:[#allocation2 + $0x8d8] sm:$0xff]  ;;  %v11369_v47 = vcombine.high %v575_v9, %v591_v34  ;;  %v687_v9 = vld [vmem:[#allocation2 + $0xbd0] sm:$0xff] }
 0x2db   : > { %7329 = vmatprep.subr.bf16.mxu0 %v11273_v48  ;;  %7411 = vmatprep.subr.bf16.mxu1 %v11275_v40  ;;  %v11371_v48 = vcombine.high %v576_v38, %v592_v43  ;;  %v607_v40 = vld [vmem:[#allocation2 + $0x950] sm:$0xff]  ;;  %v11370_v63 = vcombine.low %v576_v38, %v592_v43  ;;  %v672_v34 = vld [vmem:[#allocation2 + $0xb58] sm:$0xff] }
 0x2dc   : > { %v11400_v8 = vcombine.low %v607_v40, %v623_v55 }
 0x2de   : > { %7330 = vmatpush1.bf16.msra.mxu0 %v11272_v49  ;;  %7412 = vmatpush1.bf16.msra.mxu1 %v11274_v1  ;;  %v624_v49 = vld [vmem:[#allocation2 + $0x9d8] sm:$0xff]  ;;  %v11401_v1 = vcombine.high %v607_v40, %v623_v55  ;;  %v719_v40 = vld [vmem:[#allocation2 + $0xcd0] sm:$0xff] }
 0x2df   : > { %7331 = vmatprep.subr.bf16.mxu0 %v11305_v2  ;;  %7413 = vmatprep.subr.bf16.mxu1 %v11307_v28  ;;  %v11403_v2 = vcombine.high %v608_v56, %v624_v49  ;;  %v639_v28 = vld [vmem:[#allocation2 + $0xa50] sm:$0xff]  ;;  %v11402_v13 = vcombine.low %v608_v56, %v624_v49  ;;  %v704_v55 = vld [vmem:[#allocation2 + $0xc58] sm:$0xff] }
 0x2e0   : > { %v11432_v38 = vcombine.low %v639_v28, %v655_v27 }
 0x2e2   : > { %7332 = vmatpush1.bf16.msra.mxu0 %v11304_v14  ;;  %7414 = vmatpush1.bf16.msra.mxu1 %v11306_v36  ;;  %v656_v14 = vld [vmem:[#allocation2 + $0xad8] sm:$0xff]  ;;  %v11433_v36 = vcombine.high %v639_v28, %v655_v27  ;;  %v751_v28 = vld [vmem:[#allocation2 + $0xdd0] sm:$0xff] }
 0x2e3   : > { %7333 = vmatprep.subr.bf16.mxu0 %v11337_v24  ;;  %7415 = vmatprep.subr.bf16.mxu1 %v11339_v18  ;;  %v11435_v24 = vcombine.high %v640_v17, %v656_v14  ;;  %v671_v18 = vld [vmem:[#allocation2 + $0xb50] sm:$0xff]  ;;  %v11434_v43 = vcombine.low %v640_v17, %v656_v14  ;;  %v736_v27 = vld [vmem:[#allocation2 + $0xd58] sm:$0xff] }
 0x2e4   : > { %v11464_v56 = vcombine.low %v671_v18, %v687_v9 }
 0x2e6   : > { %7334 = vmatpush1.bf16.msra.mxu0 %v11336_v39  ;;  %7416 = vmatpush1.bf16.msra.mxu1 %v11338_v42  ;;  %v688_v39 = vld [vmem:[#allocation2 + $0xbd8] sm:$0xff]  ;;  %v11465_v42 = vcombine.high %v671_v18, %v687_v9  ;;  %v783_v18 = vld [vmem:[#allocation2 + $0xed0] sm:$0xff] }
 0x2e7   : > { %7335 = vmatprep.subr.bf16.mxu0 %v11369_v47  ;;  %7417 = vmatprep.subr.bf16.mxu1 %v11371_v48  ;;  %v11467_v47 = vcombine.high %v672_v34, %v688_v39  ;;  %v703_v48 = vld [vmem:[#allocation2 + $0xc50] sm:$0xff]  ;;  %v11466_v49 = vcombine.low %v672_v34, %v688_v39  ;;  %v768_v9 = vld [vmem:[#allocation2 + $0xe58] sm:$0xff] }
 0x2e8   : > { %v11496_v17 = vcombine.low %v703_v48, %v719_v40 }
 0x2ea   : > { %7336 = vmatpush1.bf16.msra.mxu0 %v11368_v62  ;;  %7418 = vmatpush1.bf16.msra.mxu1 %v11370_v63  ;;  %v720_v62 = vld [vmem:[#allocation2 + $0xcd8] sm:$0xff]  ;;  %v11497_v63 = vcombine.high %v703_v48, %v719_v40  ;;  %v815_v48 = vld [vmem:[#allocation2 + $0xfd0] sm:$0xff] }
 0x2eb   : > { %7337 = vmatprep.subr.bf16.mxu0 %v11401_v1  ;;  %7419 = vmatprep.subr.bf16.mxu1 %v11403_v2  ;;  %v11499_v1 = vcombine.high %v704_v55, %v720_v62  ;;  %v735_v2 = vld [vmem:[#allocation2 + $0xd50] sm:$0xff]  ;;  %v11498_v14 = vcombine.low %v704_v55, %v720_v62  ;;  %v800_v40 = vld [vmem:[#allocation2 + $0xf58] sm:$0xff] }
 0x2ec   : > { %v11528_v34 = vcombine.low %v735_v2, %v751_v28 }
 0x2ee   : > { %7338 = vmatpush1.bf16.msra.mxu0 %v11400_v8  ;;  %7420 = vmatpush1.bf16.msra.mxu1 %v11402_v13  ;;  %v752_v8 = vld [vmem:[#allocation2 + $0xdd8] sm:$0xff]  ;;  %v11529_v13 = vcombine.high %v735_v2, %v751_v28  ;;  %v847_v2 = vld [vmem:[#allocation2 + $0x10d0] sm:$0xff] }
 0x2ef   : > { %7339 = vmatprep.subr.bf16.mxu0 %v11433_v36  ;;  %7421 = vmatprep.subr.bf16.mxu1 %v11435_v24  ;;  %v11531_v36 = vcombine.high %v736_v27, %v752_v8  ;;  %v767_v24 = vld [vmem:[#allocation2 + $0xe50] sm:$0xff]  ;;  %v11530_v39 = vcombine.low %v736_v27, %v752_v8  ;;  %v832_v28 = vld [vmem:[#allocation2 + $0x1058] sm:$0xff] }
 0x2f0   : > { %v11560_v55 = vcombine.low %v767_v24, %v783_v18 }
 0x2f2   : > { %7340 = vmatpush1.bf16.msra.mxu0 %v11432_v38  ;;  %7422 = vmatpush1.bf16.msra.mxu1 %v11434_v43  ;;  %v784_v38 = vld [vmem:[#allocation2 + $0xed8] sm:$0xff]  ;;  %v11561_v43 = vcombine.high %v767_v24, %v783_v18  ;;  %v879_v24 = vld [vmem:[#allocation2 + $0x11d0] sm:$0xff] }
 0x2f3   : > { %7341 = vmatprep.subr.bf16.mxu0 %v11465_v42  ;;  %7423 = vmatprep.subr.bf16.mxu1 %v11467_v47  ;;  %v11563_v42 = vcombine.high %v768_v9, %v784_v38  ;;  %v799_v47 = vld [vmem:[#allocation2 + $0xf50] sm:$0xff]  ;;  %v11562_v62 = vcombine.low %v768_v9, %v784_v38  ;;  %v864_v18 = vld [vmem:[#allocation2 + $0x1158] sm:$0xff] }
 0x2f4   : > { %v11592_v27 = vcombine.low %v799_v47, %v815_v48 }
 0x2f6   : > { %7342 = vmatpush1.bf16.msra.mxu0 %v11464_v56  ;;  %7424 = vmatpush1.bf16.msra.mxu1 %v11466_v49  ;;  %v816_v56 = vld [vmem:[#allocation2 + $0xfd8] sm:$0xff]  ;;  %v11593_v49 = vcombine.high %v799_v47, %v815_v48  ;;  %v911_v47 = vld [vmem:[#allocation2 + $0x12d0] sm:$0xff] }
 0x2f7   : > { %7343 = vmatprep.subr.bf16.mxu0 %v11497_v63  ;;  %7425 = vmatprep.subr.bf16.mxu1 %v11499_v1  ;;  %v11595_v63 = vcombine.high %v800_v40, %v816_v56  ;;  %v831_v1 = vld [vmem:[#allocation2 + $0x1050] sm:$0xff]  ;;  %v11594_v8 = vcombine.low %v800_v40, %v816_v56  ;;  %v896_v48 = vld [vmem:[#allocation2 + $0x1258] sm:$0xff] }
 0x2f8   : > { %v11624_v9 = vcombine.low %v831_v1, %v847_v2  ;;  %v912_v40 = vld [vmem:[#allocation2 + $0x12d8] sm:$0xff] }
 0x2fa   : > { %7344 = vmatpush1.bf16.msra.mxu0 %v11496_v17  ;;  %7426 = vmatpush1.bf16.msra.mxu1 %v11498_v14  ;;  %v848_v17 = vld [vmem:[#allocation2 + $0x10d8] sm:$0xff]  ;;  %v11625_v14 = vcombine.high %v831_v1, %v847_v2  ;;  %v943_v1 = vld [vmem:[#allocation2 + $0x13d0] sm:$0xff] }
 0x2fb   : > { %7345 = vmatprep.subr.bf16.mxu0 %v11529_v13  ;;  %7427 = vmatprep.subr.bf16.mxu1 %v11531_v36  ;;  %v11627_v13 = vcombine.high %v832_v28, %v848_v17  ;;  %v863_v36 = vld [vmem:[#allocation2 + $0x1150] sm:$0xff]  ;;  %v11626_v38 = vcombine.low %v832_v28, %v848_v17  ;;  %v928_v2 = vld [vmem:[#allocation2 + $0x1358] sm:$0xff] }
 0x2fc   : > { %v11656_v56 = vcombine.low %v863_v36, %v879_v24  ;;  %v944_v28 = vld [vmem:[#allocation2 + $0x13d8] sm:$0xff] }
 0x2fe   : > { %7346 = vmatpush1.bf16.msra.mxu0 %v11528_v34  ;;  %7428 = vmatpush1.bf16.msra.mxu1 %v11530_v39  ;;  %v880_v34 = vld [vmem:[#allocation2 + $0x11d8] sm:$0xff]  ;;  %v11657_v39 = vcombine.high %v863_v36, %v879_v24  ;;  %v975_v36 = vld [vmem:[#allocation2 + $0x14d0] sm:$0xff] }
 0x2ff   : > { %7347 = vmatprep.subr.bf16.mxu0 %v11561_v43  ;;  %7429 = vmatprep.subr.bf16.mxu1 %v11563_v42  ;;  %v11659_v43 = vcombine.high %v864_v18, %v880_v34  ;;  %v895_v42 = vld [vmem:[#allocation2 + $0x1250] sm:$0xff]  ;;  %v960_v24 = vld [vmem:[#allocation2 + $0x1458] sm:$0xff] }
 0x300   : > { %v11688_v17 = vcombine.low %v895_v42, %v911_v47 }
 0x302   : > { %7348 = vmatpush1.bf16.msra.mxu0 %v11560_v55  ;;  %7430 = vmatpush1.bf16.msra.mxu1 %v11562_v62  ;;  %v11658_v55 = vcombine.low %v864_v18, %v880_v34  ;;  %v11689_v62 = vcombine.high %v895_v42, %v911_v47  ;;  %v976_v18 = vld [vmem:[#allocation2 + $0x14d8] sm:$0xff]  ;;  %v1007_v42 = vld [vmem:[#allocation2 + $0x15d0] sm:$0xff] }
 0x303   : > { %7349 = vmatprep.subr.bf16.mxu0 %v11593_v49  ;;  %7431 = vmatprep.subr.bf16.mxu1 %v11595_v63  ;;  %v11691_v49 = vcombine.high %v896_v48, %v912_v40  ;;  %v927_v63 = vld [vmem:[#allocation2 + $0x1350] sm:$0xff]  ;;  %v992_v47 = vld [vmem:[#allocation2 + $0x1558] sm:$0xff] }
 0x304   : > { %v11720_v34 = vcombine.low %v927_v63, %v943_v1 }
 0x306   : > { %7350 = vmatpush1.bf16.msra.mxu0 %v11592_v27  ;;  %7432 = vmatpush1.bf16.msra.mxu1 %v11594_v8  ;;  %v11690_v27 = vcombine.low %v896_v48, %v912_v40  ;;  %v11721_v8 = vcombine.high %v927_v63, %v943_v1  ;;  %v11754_v40 = vcombine.low %v960_v24, %v976_v18  ;;  %v1039_v63 = vld [vmem:[#allocation2 + $0x16d0] sm:$0xff]  ;;  %v1024_v1 = vld [vmem:[#allocation2 + $0x1658] sm:$0xff] }
 0x307   : > { %7360 = vmatprep.subr.bf16.mxu0 %v11625_v14  ;;  %7442 = vmatprep.subr.bf16.mxu1 %v11627_v13  ;;  %v11723_v14 = vcombine.high %v928_v2, %v944_v28  ;;  %v959_v13 = vld [vmem:[#allocation2 + $0x1450] sm:$0xff] }
 0x308   : > { %v11752_v48 = vcombine.low %v959_v13, %v975_v36 }
 0x309   : > { %7352 = vmatmul.mubr.bf16.vlgmr.msra.gmra.mrb[20].mxu0 %v12962_v12  ;;  %7434 = vmatmul.mubr.bf16.vlgmr.msra.gmra.mrb[20].mxu1 %v12962_v12 }
 0x30a   : > { %7361 = vmatpush1.bf16.msra.mxu0 %v11624_v9  ;;  %7443 = vmatpush1.bf16.msra.mxu1 %v11626_v38  ;;  %v11722_v9 = vcombine.low %v928_v2, %v944_v28  ;;  %v11753_v38 = vcombine.high %v959_v13, %v975_v36  ;;  %v1347_v28 = vld [vmem:[#allocation4 + $0x70] sm:$0xff]  ;;  %v1348_v13 = vld [vmem:[#allocation4 + $0x78] sm:$0xff] }
 0x30b   : > { %7362 = vmatprep.subr.bf16.mxu0 %v11657_v39  ;;  %7444 = vmatprep.subr.bf16.mxu1 %v11659_v43  ;;  %v11755_v39 = vcombine.high %v960_v24, %v976_v18  ;;  %v991_v43 = vld [vmem:[#allocation2 + $0x1550] sm:$0xff] }
 0x30c   : > { %7392 = vmatprep.mubr.bf16.mxu0 %v12969_v22  ;;  %7474 = vmatprep.mubr.bf16.mxu1 %v12969_v22  ;;  %v11784_v2 = vcombine.low %v991_v43, %v1007_v42  ;;  %v1055_v24 = vld [vmem:[#allocation2 + $0x1750] sm:$0xff] }
 0x30d   : > { %v1071_v18 = vld [vmem:[#allocation2 + $0x17d0] sm:$0xff] }
 0x30e   : > { %7363 = vmatpush1.bf16.msra.mxu0 %v11656_v56  ;;  %7445 = vmatpush1.bf16.msra.mxu1 %v11658_v55  ;;  %v1008_v56 = vld [vmem:[#allocation2 + $0x15d8] sm:$0xff]  ;;  %v11785_v55 = vcombine.high %v991_v43, %v1007_v42  ;;  %v11849_v35 = vcombine.high %v1055_v24, %v1071_v18 }
 0x30f   : > { %7364 = vmatprep.subr.bf16.mxu0 %v11689_v62  ;;  %7446 = vmatprep.subr.bf16.mxu1 %v11691_v49  ;;  %v11787_v62 = vcombine.high %v992_v47, %v1008_v56  ;;  %v1023_v49 = vld [vmem:[#allocation2 + $0x1650] sm:$0xff] }
 0x310   : > { %v11816_v42 = vcombine.low %v1023_v49, %v1039_v63 }
 0x312   : > { %7365 = vmatpush1.bf16.msra.mxu0 %v11688_v17  ;;  %7447 = vmatpush1.bf16.msra.mxu1 %v11690_v27  ;;  %v1040_v17 = vld [vmem:[#allocation2 + $0x16d8] sm:$0xff]  ;;  %v1346_v27 = vld [vmem:[#allocation4 + $0x68] sm:$0xff] }
 0x313   : > { %7366 = vmatprep.subr.bf16.mxu0 %v11721_v8  ;;  %7448 = vmatprep.subr.bf16.mxu1 %v11723_v14  ;;  %v11786_v8 = vcombine.low %v992_v47, %v1008_v56  ;;  %v11817_v14 = vcombine.high %v1023_v49, %v1039_v63  ;;  %v11819_v36 = vcombine.high %v1024_v1, %v1040_v17  ;;  %v1088_v49 = vld [vmem:[#allocation2 + $0x1858] sm:$0xff] }
 0x314   : > { %v11818_v56 = vcombine.low %v1024_v1, %v1040_v17  ;;  %v1104_v63 = vld [vmem:[#allocation2 + $0x18d8] sm:$0xff]  ;;  %v11848_v1 = vcombine.low %v1055_v24, %v1071_v18 }
 0x316   : > { %7367 = vmatpush1.bf16.msra.mxu0 %v11720_v34  ;;  %7449 = vmatpush1.bf16.msra.mxu1 %v11722_v9 }
 0x317   : > { %7368 = vmatprep.subr.bf16.mxu0 %v11753_v38  ;;  %7450 = vmatprep.subr.bf16.mxu1 %v11755_v39  ;;  %v1056_v39 = vld [vmem:[#allocation2 + $0x1758] sm:$0xff] }
 0x318   : > { %v11851_v3 = vcombine.high %v1056_v39, %v1072_v0 }
 0x31a   : > { %7369 = vmatpush1.bf16.msra.mxu0 %v11752_v48  ;;  %7451 = vmatpush1.bf16.msra.mxu1 %v11754_v40 }
 0x31b   : > { %7370 = vmatprep.subr.bf16.mxu0 %v11785_v55  ;;  %7452 = vmatprep.subr.bf16.mxu1 %v11787_v62 }
 0x31c   : > { %v13287_v34 = vpop.f32.mrb[12].mxu0  ;;  %v7148_v9 = vpop.f32.mrb[12].mxu1 }
 0x31d   : > { %v7068_v38 = vpop.f32.mrb[13].mxu0  ;;  %v12519_v30 = vadd.f32 %v7148_v9, %v1347_v28  ;;  %v7150_v43 = vpop.f32.mrb[13].mxu1  ;;  %v1087_v28 = vld [vmem:[#allocation2 + $0x1850] sm:$0xff]  ;;  %v11883_v9 = vcombine.high %v1088_v49, %v1104_v63 }
 0x31e   : > { %v12518_v48 = vadd.f32 %v7068_v38, %v1346_v27  ;;  %7371 = vmatpush1.bf16.msra.mxu0 %v11784_v2  ;;  %v7070_v40 = vpop.f32.mrb[14].mxu0  ;;  %v12520_v55 = vadd.f32 %v7150_v43, %v1348_v13  ;;  %v7152_v47 = vpop.f32.mrb[14].mxu1  ;;  %7453 = vmatpush1.bf16.msra.mxu1 %v11786_v8  ;;  %v1103_v27 = vld [vmem:[#allocation2 + $0x18d0] sm:$0xff] }
 0x31f   : > { %7372 = vmatprep.subr.bf16.mxu0 %v11817_v14  ;;  %v7071_v62 = vpop.f32.mrb[15].mxu0  ;;  %v7831_v5 = vmul.f32 %v12519_v30, %v13025_v29  ;;  %v7153_v4 = vpop.f32.mrb[15].mxu1  ;;  %7454 = vmatprep.subr.bf16.mxu1 %v11819_v36  ;;  %v11850_v30 = vcombine.low %v1056_v39, %v1072_v0  ;;  %v1119_v38 = vld [vmem:[#allocation2 + $0x1950] sm:$0xff]  ;;  %v1120_v40 = vld [vmem:[#allocation2 + $0x1958] sm:$0xff]  ;;  %v11880_v24 = vcombine.low %v1087_v28, %v1103_v27 }
 0x320   : > { %v7830_v32 = vmul.f32 %v12518_v48, %v13025_v29  ;;  %v7832_v2 = vmul.f32 %v12520_v55, %v13025_v29  ;;  %v11881_v4 = vcombine.high %v1087_v28, %v1103_v27  ;;  %v1135_v48 = vld [vmem:[#allocation2 + $0x19d0] sm:$0xff]  ;;  %v1136_v55 = vld [vmem:[#allocation2 + $0x19d8] sm:$0xff] }
 0x321   : > { %v7869_v13 = vadd.f32 %v13027_v45, %v7831_v5  ;;  %v11913_v0 = vcombine.high %v1119_v38, %v1135_v48  ;;  %v1151_v47 = vld [vmem:[#allocation2 + $0x1a50] sm:$0xff]  ;;  %v11912_v27 = vcombine.low %v1119_v38, %v1135_v48 }
 0x322   : > { %v7868_v8 = vadd.f32 %v13027_v45, %v7830_v32  ;;  %7373 = vmatpush1.bf16.msra.mxu0 %v11816_v42  ;;  %v7870_v17 = vadd.f32 %v13027_v45, %v7832_v2  ;;  %7455 = vmatpush1.bf16.msra.mxu1 %v11818_v56  ;;  %v11915_v42 = vcombine.high %v1120_v40, %v1136_v55  ;;  %v1167_v56 = vld [vmem:[#allocation2 + $0x1ad0] sm:$0xff]  ;;  %v1152_v2 = vld [vmem:[#allocation2 + $0x1a58] sm:$0xff] }
 0x323   : > { %7374 = vmatprep.subr.bf16.mxu0 %v11849_v35  ;;  %v7901_v14 = vmax.f32 %v7869_v13, 0.0  ;;  %7456 = vmatprep.subr.bf16.mxu1 %v11851_v3  ;;  %v11882_v35 = vcombine.low %v1088_v49, %v1104_v63  ;;  %v1168_v13 = vld [vmem:[#allocation2 + $0x1ad8] sm:$0xff]  ;;  %v11914_v49 = vcombine.low %v1120_v40, %v1136_v55  ;;  %v11945_v63 = vcombine.high %v1151_v47, %v1167_v56 }
 0x324   : > { %v7900_v36 = vmax.f32 %v7868_v8, 0.0  ;;  %v7902_v43 = vmax.f32 %v7870_v17, 0.0  ;;  %v11944_v48 = vcombine.low %v1151_v47, %v1167_v56  ;;  %v11946_v55 = vcombine.low %v1152_v2, %v1168_v13 }
 0x325   : > { %v7940_v5 = vmul.f32 %v13029_v50, %v7901_v14  ;;  %v1183_v14 = vld [vmem:[#allocation2 + $0x1b50] sm:$0xff] }
 0x326   : > { %v7939_v32 = vmul.f32 %v13029_v50, %v7900_v36  ;;  %7375 = vmatpush1.bf16.msra.mxu0 %v11848_v1  ;;  %v7941_v18 = vmul.f32 %v13029_v50, %v7902_v43  ;;  %7457 = vmatpush1.bf16.msra.mxu1 %v11850_v30  ;;  %v1199_v36 = vld [vmem:[#allocation2 + $0x1bd0] sm:$0xff]  ;;  %v1184_v43 = vld [vmem:[#allocation2 + $0x1b58] sm:$0xff] }
 0x327   : > { %7376 = vmatprep.subr.bf16.mxu0 %v11881_v4  ;;  %v7979_v3 = vadd.f32 %v13039_v26, %v7940_v5  ;;  %7458 = vmatprep.subr.bf16.mxu1 %v11883_v9  ;;  %v11947_v4 = vcombine.high %v1152_v2, %v1168_v13  ;;  %v1200_v5 = vld [vmem:[#allocation2 + $0x1bd8] sm:$0xff]  ;;  %v11976_v47 = vcombine.low %v1183_v14, %v1199_v36 }
 0x328   : > { %v7978_v39 = vadd.f32 %v13039_v26, %v7939_v32  ;;  %v7980_v62 = vadd.f32 %v13039_v26, %v7941_v18  ;;  %v11978_v2 = vcombine.low %v1184_v43, %v1200_v5 }
 0x329   : > { %v8011_v8 = vmax.f32 %v7979_v3, 0.0  ;;  %v1215_v3 = vld [vmem:[#allocation2 + $0x1c50] sm:$0xff] }
 0x32a   : > { %v8010_v28 = vmax.f32 %v7978_v39, 0.0  ;;  %7377 = vmatpush1.bf16.msra.mxu0 %v11880_v24  ;;  %v8012_v1 = vmax.f32 %v7980_v62, 0.0  ;;  %7459 = vmatpush1.bf16.msra.mxu1 %v11882_v35  ;;  %v11977_v24 = vcombine.high %v1183_v14, %v1199_v36  ;;  %v1231_v39 = vld [vmem:[#allocation2 + $0x1cd0] sm:$0xff]  ;;  %v1216_v62 = vld [vmem:[#allocation2 + $0x1c58] sm:$0xff] }
 0x32b   : > { %7378 = vmatprep.subr.bf16.mxu0 %v11913_v0  ;;  %v8050_v17 = vmul.f32 %v13046_v44, %v8011_v8  ;;  %7460 = vmatprep.subr.bf16.mxu1 %v11915_v42  ;;  %v11979_v0 = vcombine.high %v1184_v43, %v1200_v5  ;;  %v1232_v8 = vld [vmem:[#allocation2 + $0x1cd8] sm:$0xff]  ;;  %v12009_v13 = vcombine.high %v1215_v3, %v1231_v39 }
 0x32c   : > { %v8049_v30 = vmul.f32 %v13046_v44, %v8010_v28  ;;  %v8051_v9 = vmul.f32 %v13046_v44, %v8012_v1  ;;  %v12008_v14 = vcombine.low %v1215_v3, %v1231_v39  ;;  %v12010_v43 = vcombine.low %v1216_v62, %v1232_v8 }
 0x32d   : > { %v8089_v32 = vadd.f32 %v13051_v58, %v8050_v17  ;;  %v1247_v17 = vld [vmem:[#allocation2 + $0x1d50] sm:$0xff] }
 0x32e   : > { %v8088_v38 = vadd.f32 %v13051_v58, %v8049_v30  ;;  %7379 = vmatpush1.bf16.msra.mxu0 %v11912_v27  ;;  %v8090_v40 = vadd.f32 %v13051_v58, %v8051_v9  ;;  %7461 = vmatpush1.bf16.msra.mxu1 %v11914_v49  ;;  %v1263_v30 = vld [vmem:[#allocation2 + $0x1dd0] sm:$0xff]  ;;  %v1264_v9 = vld [vmem:[#allocation2 + $0x1dd8] sm:$0xff] }
 0x32f   : > { %7380 = vmatprep.subr.bf16.mxu0 %v11945_v63  ;;  %v8121_v18 = vmax.f32 %v8089_v32, 0.0  ;;  %7462 = vmatprep.subr.bf16.mxu1 %v11947_v4  ;;  %v12011_v63 = vcombine.high %v1216_v62, %v1232_v8  ;;  %v1248_v4 = vld [vmem:[#allocation2 + $0x1d58] sm:$0xff]  ;;  %v12041_v5 = vcombine.high %v1247_v17, %v1263_v30 }
 0x330   : > { %v8120_v35 = vmax.f32 %v8088_v38, 0.0  ;;  %v8122_v42 = vmax.f32 %v8090_v40, 0.0  ;;  %v12042_v62 = vcombine.low %v1248_v4, %v1264_v9 }
 0x331   : > { %v8160_v28 = vmul.f32 %v13058_v11, %v8121_v18  ;;  %v1295_v18 = vld [vmem:[#allocation2 + $0x1ed0] sm:$0xff] }
 0x332   : > { %v8159_v27 = vmul.f32 %v13058_v11, %v8120_v35  ;;  %7381 = vmatpush1.bf16.msra.mxu0 %v11944_v48  ;;  %v8161_v56 = vmul.f32 %v13058_v11, %v8122_v42  ;;  %7463 = vmatpush1.bf16.msra.mxu1 %v11946_v55  ;;  %v12043_v48 = vcombine.high %v1248_v4, %v1264_v9  ;;  %v1280_v35 = vld [vmem:[#allocation2 + $0x1e58] sm:$0xff] }
 0x333   : > { %7382 = vmatprep.subr.bf16.mxu0 %v11977_v24  ;;  %v8199_v1 = vadd.f32 %v13063_v21, %v8160_v28  ;;  %7464 = vmatprep.subr.bf16.mxu1 %v11979_v0  ;;  %v1279_v24 = vld [vmem:[#allocation2 + $0x1e50] sm:$0xff]  ;;  %v1296_v0 = vld [vmem:[#allocation2 + $0x1ed8] sm:$0xff]  ;;  %v12040_v42 = vcombine.low %v1247_v17, %v1263_v30 }
 0x334   : > { %v8198_v49 = vadd.f32 %v13063_v21, %v8159_v27  ;;  %v8200_v36 = vadd.f32 %v13063_v21, %v8161_v56  ;;  %v12073_v8 = vcombine.high %v1279_v24, %v1295_v18  ;;  %v12075_v56 = vcombine.high %v1280_v35, %v1296_v0 }
 0x335   : > { %v8231_v32 = vmax.f32 %v8199_v1, 0.0  ;;  %v1312_v1 = vld [vmem:[#allocation2 + $0x1f58] sm:$0xff]  ;;  %v12072_v17 = vcombine.low %v1279_v24, %v1295_v18  ;;  %v12074_v4 = vcombine.low %v1280_v35, %v1296_v0  ;;  %v353_v18 = vld [vmem:[#allocation2 + $0x160] sm:$0xff]  ;;  %v354_v0 = vld [vmem:[#allocation2 + $0x168] sm:$0xff] }
 0x336   : > { %v8230_v38 = vmax.f32 %v8198_v49, 0.0  ;;  %7383 = vmatpush1.bf16.msra.mxu0 %v11976_v47  ;;  %7465 = vmatpush1.bf16.msra.mxu1 %v11978_v2  ;;  %v8232_v28 = vmax.f32 %v8200_v36, 0.0  ;;  %v1311_v2 = vld [vmem:[#allocation2 + $0x1f50] sm:$0xff]  ;;  %v1328_v49 = vld [vmem:[#allocation2 + $0x1fd8] sm:$0xff]  ;;  %v322_v36 = vld [vmem:[#allocation2 + $0x68] sm:$0xff] }
 0x337   : > { %7384 = vmatprep.subr.bf16.mxu0 %v12009_v13  ;;  %7466 = vmatprep.subr.bf16.mxu1 %v12011_v63  ;;  %v8270_v55 = vmul.f32 %v13070_v41, %v8231_v32  ;;  %v1327_v13 = vld [vmem:[#allocation2 + $0x1fd0] sm:$0xff]  ;;  %v12107_v32 = vcombine.high %v1312_v1, %v1328_v49  ;;  %v369_v35 = vld [vmem:[#allocation2 + $0x1e0] sm:$0xff] }
 0x338   : > { %v8269_v40 = vmul.f32 %v13070_v41, %v8230_v38  ;;  %v8271_v30 = vmul.f32 %v13070_v41, %v8232_v28  ;;  %v12105_v9 = vcombine.high %v1311_v2, %v1327_v13  ;;  %v321_v38 = vld [vmem:[#allocation2 + $0x60] sm:$0xff] }
 0x339   : > { %v8309_v39 = vadd.f32 %v13075_v54, %v8270_v55 }
 0x33a   : > { %7385 = vmatpush1.bf16.msra.mxu0 %v12008_v14  ;;  %v8308_v3 = vadd.f32 %v13075_v54, %v8269_v40  ;;  %7467 = vmatpush1.bf16.msra.mxu1 %v12010_v43  ;;  %v337_v14 = vld [vmem:[#allocation2 + $0xe0] sm:$0xff]  ;;  %v338_v43 = vld [vmem:[#allocation2 + $0xe8] sm:$0xff]  ;;  %v12106_v40 = vcombine.low %v1312_v1, %v1328_v49  ;;  %v11148_v49 = vcombine.low %v353_v18, %v369_v35 }
 0x33b   : > { %7386 = vmatprep.subr.bf16.mxu0 %v12041_v5  ;;  %7468 = vmatprep.subr.bf16.mxu1 %v12043_v48  ;;  %v13319_v47 = vmax.f32 %v8309_v39, 0.0  ;;  %v12104_v5 = vcombine.low %v1311_v2, %v1327_v13  ;;  %v8310_v48 = vadd.f32 %v13075_v54, %v8271_v30  ;;  %v11117_v55 = vcombine.high %v321_v38, %v337_v14  ;;  %v401_v2 = vld [vmem:[#allocation2 + $0x2e0] sm:$0xff]  ;;  %v386_v13 = vld [vmem:[#allocation2 + $0x268] sm:$0xff] }
 0x33c   : > { %v13317_v27 = vmax.f32 %v8308_v3, 0.0  ;;  %v11119_v24 = vcombine.high %v322_v36, %v338_v43  ;;  %v11116_v39 = vcombine.low %v321_v38, %v337_v14  ;;  %v11118_v28 = vcombine.low %v322_v36, %v338_v43  ;;  %v402_v1 = vld [vmem:[#allocation2 + $0x2e8] sm:$0xff] }
 0x33d   : > { %v13328_v3 = vmax.f32 %v8310_v48, 0.0  ;;  %v11183_v30 = vcombine.high %v386_v13, %v402_v1  ;;  %v434_v38 = vld [vmem:[#allocation2 + $0x3e8] sm:$0xff]  ;;  %v11182_v36 = vcombine.low %v386_v13, %v402_v1  ;;  %v449_v48 = vld [vmem:[#allocation2 + $0x460] sm:$0xff] }
 0x33e   : > { %15694 = vst [vmem:[#allocation14_spill] sm:$0xff] %v13317_v27  ;;  %7387 = vmatpush1.bf16.msra.mxu0 %v12040_v42  ;;  %v12679_v63 = vpack.i.bf16 %v13319_v47, %v13317_v27  ;;  %7469 = vmatpush1.bf16.msra.mxu1 %v12042_v62  ;;  %v370_v42 = vld [vmem:[#allocation2 + $0x1e8] sm:$0xff]  ;;  %v11149_v62 = vcombine.high %v353_v18, %v369_v35 }
 0x33f   : > { %7388 = vmatprep.subr.bf16.mxu0 %v12073_v8  ;;  %7470 = vmatprep.subr.bf16.mxu1 %v12075_v56  ;;  %v11151_v8 = vcombine.high %v354_v0, %v370_v42  ;;  %v385_v56 = vld [vmem:[#allocation2 + $0x260] sm:$0xff] }
 0x340   : > { %12680 = vrot.lane.b32.xlu0 %v12679_v63, %s12817_s14  ;;  %v11150_v63 = vcombine.low %v354_v0, %v370_v42  ;;  %v11180_v14 = vcombine.low %v385_v56, %v401_v2 }
 0x342   : > { %7389 = vmatpush1.bf16.msra.mxu0 %v12072_v17  ;;  %7471 = vmatpush1.bf16.msra.mxu1 %v12074_v4  ;;  %v11181_v17 = vcombine.high %v385_v56, %v401_v2  ;;  %v417_v4 = vld [vmem:[#allocation2 + $0x360] sm:$0xff] }
 0x343   : > { %7390 = vmatprep.subr.bf16.mxu0 %v12105_v9  ;;  %7472 = vmatprep.subr.bf16.mxu1 %v12107_v32  ;;  %v433_v9 = vld [vmem:[#allocation2 + $0x3e0] sm:$0xff]  ;;  %v418_v32 = vld [vmem:[#allocation2 + $0x368] sm:$0xff] }
 0x344   : > { %8643 = vrot.lane.b32.xlu0 %v13317_v27, %s12816_s13  ;;  %v11213_v43 = vcombine.high %v417_v4, %v433_v9  ;;  %v11212_v18 = vcombine.low %v417_v4, %v433_v9  ;;  %v11214_v35 = vcombine.low %v418_v32, %v434_v38 }
 0x346   : > { %7391 = vmatpush1.bf16.msra.mxu0 %v12104_v5  ;;  %7473 = vmatpush1.bf16.msra.mxu1 %v12106_v40  ;;  %v11215_v5 = vcombine.high %v418_v32, %v434_v38  ;;  %v465_v40 = vld [vmem:[#allocation2 + $0x4e0] sm:$0xff] }
 0x347   : > { %7483 = vmatprep.subr.bf16.mxu0 %v11117_v55  ;;  %7565 = vmatprep.subr.bf16.mxu1 %v11119_v24  ;;  %v450_v55 = vld [vmem:[#allocation2 + $0x468] sm:$0xff]  ;;  %v11245_v0 = vcombine.high %v449_v48, %v465_v40  ;;  %v11244_v56 = vcombine.low %v449_v48, %v465_v40 }
 0x348   : > { %8647 = vrot.lane.b32.xlu0 %v13328_v3, %s12816_s13  ;;  %v466_v24 = vld [vmem:[#allocation2 + $0x4e8] sm:$0xff] }
 0x349   : > { %7393 = vmatmul.mubr.bf16.vlgmr.msra.gmra.mrb[20].mxu0 %v13007_v33  ;;  %7475 = vmatmul.mubr.bf16.vlgmr.msra.gmra.mrb[20].mxu1 %v13007_v33  ;;  %v11247_v42 = vcombine.high %v450_v55, %v466_v24  ;;  %v11246_v2 = vcombine.low %v450_v55, %v466_v24 }
 0x34a   : > { %7484 = vmatpush1.bf16.msra.mxu0 %v11116_v39  ;;  %7566 = vmatpush1.bf16.msra.mxu1 %v11118_v28  ;;  %v481_v39 = vld [vmem:[#allocation2 + $0x560] sm:$0xff] }
 0x34b   : > { %7485 = vmatprep.subr.bf16.mxu0 %v11149_v62  ;;  %7567 = vmatprep.subr.bf16.mxu1 %v11151_v8  ;;  %v497_v28 = vld [vmem:[#allocation2 + $0x5e0] sm:$0xff]  ;;  %v482_v62 = vld [vmem:[#allocation2 + $0x568] sm:$0xff] }
 0x34c   : > { %7515 = vmatprep.mubr.bf16.mxu0 %v12956_v57  ;;  %7597 = vmatprep.mubr.bf16.mxu1 %v12956_v57  ;;  %v498_v8 = vld [vmem:[#allocation2 + $0x5e8] sm:$0xff]  ;;  %v11277_v13 = vcombine.high %v481_v39, %v497_v28  ;;  %v11276_v4 = vcombine.low %v481_v39, %v497_v28 }
 0x34d   : > { %v11279_v1 = vcombine.high %v482_v62, %v498_v8  ;;  %v11278_v9 = vcombine.low %v482_v62, %v498_v8 }
 0x34e   : > { %7486 = vmatpush1.bf16.msra.mxu0 %v11148_v49  ;;  %7568 = vmatpush1.bf16.msra.mxu1 %v11150_v63  ;;  %v513_v49 = vld [vmem:[#allocation2 + $0x660] sm:$0xff] }
 0x34f   : > { %7487 = vmatprep.subr.bf16.mxu0 %v11181_v17  ;;  %7569 = vmatprep.subr.bf16.mxu1 %v11183_v30  ;;  %v529_v63 = vld [vmem:[#allocation2 + $0x6e0] sm:$0xff]  ;;  %v514_v17 = vld [vmem:[#allocation2 + $0x668] sm:$0xff] }
 0x350   : > { %v530_v30 = vld [vmem:[#allocation2 + $0x6e8] sm:$0xff]  ;;  %v11309_v32 = vcombine.high %v513_v49, %v529_v63  ;;  %v11308_v48 = vcombine.low %v513_v49, %v529_v63 }
 0x351   : > { %v11311_v38 = vcombine.high %v514_v17, %v530_v30  ;;  %v11310_v40 = vcombine.low %v514_v17, %v530_v30 }
 0x352   : > { %7488 = vmatpush1.bf16.msra.mxu0 %v11180_v14  ;;  %7570 = vmatpush1.bf16.msra.mxu1 %v11182_v36  ;;  %v545_v14 = vld [vmem:[#allocation2 + $0x760] sm:$0xff] }
 0x353   : > { %7489 = vmatprep.subr.bf16.mxu0 %v11213_v43  ;;  %7571 = vmatprep.subr.bf16.mxu1 %v11215_v5  ;;  %v561_v36 = vld [vmem:[#allocation2 + $0x7e0] sm:$0xff]  ;;  %v546_v43 = vld [vmem:[#allocation2 + $0x768] sm:$0xff] }
 0x354   : > { %v562_v5 = vld [vmem:[#allocation2 + $0x7e8] sm:$0xff]  ;;  %v11341_v55 = vcombine.high %v545_v14, %v561_v36  ;;  %v11340_v39 = vcombine.low %v545_v14, %v561_v36 }
 0x355   : > { %v11343_v24 = vcombine.high %v546_v43, %v562_v5  ;;  %v11342_v28 = vcombine.low %v546_v43, %v562_v5 }
 0x356   : > { %7490 = vmatpush1.bf16.msra.mxu0 %v11212_v18  ;;  %7572 = vmatpush1.bf16.msra.mxu1 %v11214_v35  ;;  %v577_v18 = vld [vmem:[#allocation2 + $0x860] sm:$0xff] }
 0x357   : > { %7491 = vmatprep.subr.bf16.mxu0 %v11245_v0  ;;  %7573 = vmatprep.subr.bf16.mxu1 %v11247_v42  ;;  %v593_v35 = vld [vmem:[#allocation2 + $0x8e0] sm:$0xff]  ;;  %v578_v0 = vld [vmem:[#allocation2 + $0x868] sm:$0xff] }
 0x358   : > { %v594_v42 = vld [vmem:[#allocation2 + $0x8e8] sm:$0xff]  ;;  %v11373_v62 = vcombine.high %v577_v18, %v593_v35  ;;  %v11372_v49 = vcombine.low %v577_v18, %v593_v35 }
 0x359   : > { %v11375_v8 = vcombine.high %v578_v0, %v594_v42  ;;  %v11374_v63 = vcombine.low %v578_v0, %v594_v42 }
 0x35a   : > { %7492 = vmatpush1.bf16.msra.mxu0 %v11244_v56  ;;  %7574 = vmatpush1.bf16.msra.mxu1 %v11246_v2  ;;  %v609_v56 = vld [vmem:[#allocation2 + $0x960] sm:$0xff] }
 0x35b   : > { %7493 = vmatprep.subr.bf16.mxu0 %v11277_v13  ;;  %7575 = vmatprep.subr.bf16.mxu1 %v11279_v1  ;;  %v625_v2 = vld [vmem:[#allocation2 + $0x9e0] sm:$0xff]  ;;  %v610_v13 = vld [vmem:[#allocation2 + $0x968] sm:$0xff] }
 0x35c   : > { %v626_v1 = vld [vmem:[#allocation2 + $0x9e8] sm:$0xff]  ;;  %v11405_v17 = vcombine.high %v609_v56, %v625_v2  ;;  %v11404_v14 = vcombine.low %v609_v56, %v625_v2 }
 0x35d   : > { %v11407_v30 = vcombine.high %v610_v13, %v626_v1  ;;  %v11406_v36 = vcombine.low %v610_v13, %v626_v1 }
 0x35e   : > { %7494 = vmatpush1.bf16.msra.mxu0 %v11276_v4  ;;  %7576 = vmatpush1.bf16.msra.mxu1 %v11278_v9  ;;  %v641_v4 = vld [vmem:[#allocation2 + $0xa60] sm:$0xff] }
 0x35f   : > { %7495 = vmatprep.subr.bf16.mxu0 %v11309_v32  ;;  %7577 = vmatprep.subr.bf16.mxu1 %v11311_v38  ;;  %v657_v9 = vld [vmem:[#allocation2 + $0xae0] sm:$0xff]  ;;  %v642_v32 = vld [vmem:[#allocation2 + $0xa68] sm:$0xff] }
 0x360   : > { %v658_v38 = vld [vmem:[#allocation2 + $0xae8] sm:$0xff]  ;;  %v11437_v43 = vcombine.high %v641_v4, %v657_v9  ;;  %v11436_v18 = vcombine.low %v641_v4, %v657_v9 }
 0x361   : > { %v11439_v5 = vcombine.high %v642_v32, %v658_v38  ;;  %v11438_v35 = vcombine.low %v642_v32, %v658_v38 }
 0x362   : > { %7496 = vmatpush1.bf16.msra.mxu0 %v11308_v48  ;;  %7578 = vmatpush1.bf16.msra.mxu1 %v11310_v40  ;;  %v673_v48 = vld [vmem:[#allocation2 + $0xb60] sm:$0xff] }
 0x363   : > { %7497 = vmatprep.subr.bf16.mxu0 %v11341_v55  ;;  %7579 = vmatprep.subr.bf16.mxu1 %v11343_v24  ;;  %v689_v40 = vld [vmem:[#allocation2 + $0xbe0] sm:$0xff]  ;;  %v674_v55 = vld [vmem:[#allocation2 + $0xb68] sm:$0xff] }
 0x364   : > { %v690_v24 = vld [vmem:[#allocation2 + $0xbe8] sm:$0xff]  ;;  %v11469_v0 = vcombine.high %v673_v48, %v689_v40  ;;  %v11468_v56 = vcombine.low %v673_v48, %v689_v40 }
 0x365   : > { %v11471_v42 = vcombine.high %v674_v55, %v690_v24  ;;  %v11470_v2 = vcombine.low %v674_v55, %v690_v24 }
 0x366   : > { %7498 = vmatpush1.bf16.msra.mxu0 %v11340_v39  ;;  %7580 = vmatpush1.bf16.msra.mxu1 %v11342_v28  ;;  %v705_v39 = vld [vmem:[#allocation2 + $0xc60] sm:$0xff] }
 0x367   : > { %7499 = vmatprep.subr.bf16.mxu0 %v11373_v62  ;;  %7581 = vmatprep.subr.bf16.mxu1 %v11375_v8  ;;  %v721_v28 = vld [vmem:[#allocation2 + $0xce0] sm:$0xff]  ;;  %v706_v62 = vld [vmem:[#allocation2 + $0xc68] sm:$0xff] }
 0x368   : > { %v722_v8 = vld [vmem:[#allocation2 + $0xce8] sm:$0xff]  ;;  %v11501_v13 = vcombine.high %v705_v39, %v721_v28  ;;  %v11500_v4 = vcombine.low %v705_v39, %v721_v28 }
 0x369   : > { %v11503_v1 = vcombine.high %v706_v62, %v722_v8  ;;  %v11502_v9 = vcombine.low %v706_v62, %v722_v8 }
 0x36a   : > { %7500 = vmatpush1.bf16.msra.mxu0 %v11372_v49  ;;  %7582 = vmatpush1.bf16.msra.mxu1 %v11374_v63  ;;  %v737_v49 = vld [vmem:[#allocation2 + $0xd60] sm:$0xff] }
 0x36b   : > { %7501 = vmatprep.subr.bf16.mxu0 %v11405_v17  ;;  %7583 = vmatprep.subr.bf16.mxu1 %v11407_v30  ;;  %v753_v63 = vld [vmem:[#allocation2 + $0xde0] sm:$0xff]  ;;  %v738_v17 = vld [vmem:[#allocation2 + $0xd68] sm:$0xff] }
 0x36c   : > { %v754_v30 = vld [vmem:[#allocation2 + $0xde8] sm:$0xff]  ;;  %v11533_v32 = vcombine.high %v737_v49, %v753_v63  ;;  %v11532_v48 = vcombine.low %v737_v49, %v753_v63 }
 0x36d   : > { %v11535_v38 = vcombine.high %v738_v17, %v754_v30  ;;  %v11534_v40 = vcombine.low %v738_v17, %v754_v30 }
 0x36e   : > { %7502 = vmatpush1.bf16.msra.mxu0 %v11404_v14  ;;  %7584 = vmatpush1.bf16.msra.mxu1 %v11406_v36  ;;  %v769_v14 = vld [vmem:[#allocation2 + $0xe60] sm:$0xff] }
 0x36f   : > { %7503 = vmatprep.subr.bf16.mxu0 %v11437_v43  ;;  %7585 = vmatprep.subr.bf16.mxu1 %v11439_v5  ;;  %v785_v36 = vld [vmem:[#allocation2 + $0xee0] sm:$0xff]  ;;  %v770_v43 = vld [vmem:[#allocation2 + $0xe68] sm:$0xff] }
 0x370   : > { %v786_v5 = vld [vmem:[#allocation2 + $0xee8] sm:$0xff]  ;;  %v11565_v55 = vcombine.high %v769_v14, %v785_v36  ;;  %v11564_v39 = vcombine.low %v769_v14, %v785_v36 }
 0x371   : > { %v11567_v24 = vcombine.high %v770_v43, %v786_v5  ;;  %v11566_v28 = vcombine.low %v770_v43, %v786_v5 }
 0x372   : > { %7504 = vmatpush1.bf16.msra.mxu0 %v11436_v18  ;;  %7586 = vmatpush1.bf16.msra.mxu1 %v11438_v35  ;;  %v801_v18 = vld [vmem:[#allocation2 + $0xf60] sm:$0xff] }
 0x373   : > { %7505 = vmatprep.subr.bf16.mxu0 %v11469_v0  ;;  %7587 = vmatprep.subr.bf16.mxu1 %v11471_v42  ;;  %v817_v35 = vld [vmem:[#allocation2 + $0xfe0] sm:$0xff]  ;;  %v802_v0 = vld [vmem:[#allocation2 + $0xf68] sm:$0xff] }
 0x374   : > { %v818_v42 = vld [vmem:[#allocation2 + $0xfe8] sm:$0xff]  ;;  %v11597_v62 = vcombine.high %v801_v18, %v817_v35  ;;  %v11596_v49 = vcombine.low %v801_v18, %v817_v35 }
 0x375   : > { %v11599_v8 = vcombine.high %v802_v0, %v818_v42  ;;  %v11598_v63 = vcombine.low %v802_v0, %v818_v42 }
 0x376   : > { %7506 = vmatpush1.bf16.msra.mxu0 %v11468_v56  ;;  %7588 = vmatpush1.bf16.msra.mxu1 %v11470_v2  ;;  %v833_v56 = vld [vmem:[#allocation2 + $0x1060] sm:$0xff] }
 0x377   : > { %7507 = vmatprep.subr.bf16.mxu0 %v11501_v13  ;;  %7589 = vmatprep.subr.bf16.mxu1 %v11503_v1  ;;  %v849_v2 = vld [vmem:[#allocation2 + $0x10e0] sm:$0xff]  ;;  %v834_v13 = vld [vmem:[#allocation2 + $0x1068] sm:$0xff] }
 0x378   : > { %v850_v1 = vld [vmem:[#allocation2 + $0x10e8] sm:$0xff]  ;;  %v11629_v17 = vcombine.high %v833_v56, %v849_v2  ;;  %v11628_v14 = vcombine.low %v833_v56, %v849_v2 }
 0x379   : > { %v11631_v30 = vcombine.high %v834_v13, %v850_v1  ;;  %v11630_v36 = vcombine.low %v834_v13, %v850_v1 }
 0x37a   : > { %7508 = vmatpush1.bf16.msra.mxu0 %v11500_v4  ;;  %7590 = vmatpush1.bf16.msra.mxu1 %v11502_v9  ;;  %v865_v4 = vld [vmem:[#allocation2 + $0x1160] sm:$0xff] }
 0x37b   : > { %7509 = vmatprep.subr.bf16.mxu0 %v11533_v32  ;;  %7591 = vmatprep.subr.bf16.mxu1 %v11535_v38  ;;  %v881_v9 = vld [vmem:[#allocation2 + $0x11e0] sm:$0xff]  ;;  %v866_v32 = vld [vmem:[#allocation2 + $0x1168] sm:$0xff] }
 0x37c   : > { %v882_v38 = vld [vmem:[#allocation2 + $0x11e8] sm:$0xff]  ;;  %v11661_v43 = vcombine.high %v865_v4, %v881_v9  ;;  %v11660_v18 = vcombine.low %v865_v4, %v881_v9 }
 0x37d   : > { %v11663_v5 = vcombine.high %v866_v32, %v882_v38  ;;  %v11662_v35 = vcombine.low %v866_v32, %v882_v38 }
 0x37e   : > { %7510 = vmatpush1.bf16.msra.mxu0 %v11532_v48  ;;  %7592 = vmatpush1.bf16.msra.mxu1 %v11534_v40  ;;  %v897_v48 = vld [vmem:[#allocation2 + $0x1260] sm:$0xff] }
 0x37f   : > { %7511 = vmatprep.subr.bf16.mxu0 %v11565_v55  ;;  %7593 = vmatprep.subr.bf16.mxu1 %v11567_v24  ;;  %v913_v40 = vld [vmem:[#allocation2 + $0x12e0] sm:$0xff]  ;;  %v898_v55 = vld [vmem:[#allocation2 + $0x1268] sm:$0xff] }
 0x380   : > { %v914_v24 = vld [vmem:[#allocation2 + $0x12e8] sm:$0xff]  ;;  %v11693_v0 = vcombine.high %v897_v48, %v913_v40  ;;  %v11692_v56 = vcombine.low %v897_v48, %v913_v40 }
 0x381   : > { %v11695_v42 = vcombine.high %v898_v55, %v914_v24  ;;  %v11694_v2 = vcombine.low %v898_v55, %v914_v24 }
 0x382   : > { %7512 = vmatpush1.bf16.msra.mxu0 %v11564_v39  ;;  %7594 = vmatpush1.bf16.msra.mxu1 %v11566_v28  ;;  %v929_v39 = vld [vmem:[#allocation2 + $0x1360] sm:$0xff] }
 0x383   : > { %7513 = vmatprep.subr.bf16.mxu0 %v11597_v62  ;;  %7595 = vmatprep.subr.bf16.mxu1 %v11599_v8  ;;  %v945_v28 = vld [vmem:[#allocation2 + $0x13e0] sm:$0xff]  ;;  %v930_v62 = vld [vmem:[#allocation2 + $0x1368] sm:$0xff] }
 0x384   : > { %v946_v8 = vld [vmem:[#allocation2 + $0x13e8] sm:$0xff]  ;;  %v11725_v13 = vcombine.high %v929_v39, %v945_v28  ;;  %v11724_v4 = vcombine.low %v929_v39, %v945_v28  ;;  %v1351_v28 = vld [vmem:[#allocation4 + $0x90] sm:$0xff] }
 0x385   : > { %v11727_v1 = vcombine.high %v930_v62, %v946_v8  ;;  %v11726_v9 = vcombine.low %v930_v62, %v946_v8  ;;  %v1350_v62 = vld [vmem:[#allocation4 + $0x88] sm:$0xff] }
 0x386   : > { %7514 = vmatpush1.bf16.msra.mxu0 %v11596_v49  ;;  %7596 = vmatpush1.bf16.msra.mxu1 %v11598_v63  ;;  %v961_v49 = vld [vmem:[#allocation2 + $0x1460] sm:$0xff] }
 0x387   : > { %7524 = vmatprep.subr.bf16.mxu0 %v11629_v17  ;;  %7606 = vmatprep.subr.bf16.mxu1 %v11631_v30  ;;  %v977_v63 = vld [vmem:[#allocation2 + $0x14e0] sm:$0xff]  ;;  %v962_v17 = vld [vmem:[#allocation2 + $0x1468] sm:$0xff] }
 0x388   : > { %v978_v30 = vld [vmem:[#allocation2 + $0x14e8] sm:$0xff]  ;;  %v11757_v32 = vcombine.high %v961_v49, %v977_v63  ;;  %v11756_v48 = vcombine.low %v961_v49, %v977_v63  ;;  %v1057_v49 = vld [vmem:[#allocation2 + $0x1760] sm:$0xff] }
 0x389   : > { %7516 = vmatmul.mubr.bf16.vlgmr.msra.gmra.mrb[24].mxu0 %v12962_v12  ;;  %7598 = vmatmul.mubr.bf16.vlgmr.msra.gmra.mrb[24].mxu1 %v12962_v12  ;;  %v11759_v38 = vcombine.high %v962_v17, %v978_v30  ;;  %v11758_v40 = vcombine.low %v962_v17, %v978_v30  ;;  %v1073_v63 = vld [vmem:[#allocation2 + $0x17e0] sm:$0xff] }
 0x38a   : > { %7525 = vmatpush1.bf16.msra.mxu0 %v11628_v14  ;;  %7607 = vmatpush1.bf16.msra.mxu1 %v11630_v36  ;;  %v993_v14 = vld [vmem:[#allocation2 + $0x1560] sm:$0xff] }
 0x38b   : > { %7526 = vmatprep.subr.bf16.mxu0 %v11661_v43  ;;  %7608 = vmatprep.subr.bf16.mxu1 %v11663_v5  ;;  %v1009_v36 = vld [vmem:[#allocation2 + $0x15e0] sm:$0xff]  ;;  %v994_v43 = vld [vmem:[#allocation2 + $0x1568] sm:$0xff] }
 0x38c   : > { %7556 = vmatprep.mubr.bf16.mxu0 %v12969_v22  ;;  %7638 = vmatprep.mubr.bf16.mxu1 %v12969_v22  ;;  %v1010_v5 = vld [vmem:[#allocation2 + $0x15e8] sm:$0xff]  ;;  %v11789_v55 = vcombine.high %v993_v14, %v1009_v36  ;;  %v11788_v39 = vcombine.low %v993_v14, %v1009_v36 }
 0x38d   : > { %v11791_v24 = vcombine.high %v994_v43, %v1010_v5  ;;  %v11790_v8 = vcombine.low %v994_v43, %v1010_v5 }
 0x38e   : > { %7527 = vmatpush1.bf16.msra.mxu0 %v11660_v18  ;;  %7609 = vmatpush1.bf16.msra.mxu1 %v11662_v35  ;;  %v1025_v18 = vld [vmem:[#allocation2 + $0x1660] sm:$0xff] }
 0x38f   : > { %7528 = vmatprep.subr.bf16.mxu0 %v11693_v0  ;;  %7610 = vmatprep.subr.bf16.mxu1 %v11695_v42  ;;  %v1041_v35 = vld [vmem:[#allocation2 + $0x16e0] sm:$0xff]  ;;  %v1026_v0 = vld [vmem:[#allocation2 + $0x1668] sm:$0xff] }
 0x390   : > { %v1042_v42 = vld [vmem:[#allocation2 + $0x16e8] sm:$0xff]  ;;  %v11820_v36 = vcombine.low %v1025_v18, %v1041_v35 }
 0x391   : > { %v11822_v5 = vcombine.low %v1026_v0, %v1042_v42 }
 0x392   : > { %7529 = vmatpush1.bf16.msra.mxu0 %v11692_v56  ;;  %7611 = vmatpush1.bf16.msra.mxu1 %v11694_v2  ;;  %v11821_v56 = vcombine.high %v1025_v18, %v1041_v35  ;;  %v1090_v18 = vld [vmem:[#allocation2 + $0x1868] sm:$0xff] }
 0x393   : > { %7530 = vmatprep.subr.bf16.mxu0 %v11725_v13  ;;  %7612 = vmatprep.subr.bf16.mxu1 %v11727_v1  ;;  %v1352_v13 = vld [vmem:[#allocation4 + $0x98] sm:$0xff]  ;;  %v11823_v1 = vcombine.high %v1026_v0, %v1042_v42  ;;  %v1106_v35 = vld [vmem:[#allocation2 + $0x18e8] sm:$0xff]  ;;  %v11852_v0 = vcombine.low %v1057_v49, %v1073_v63 }
 0x396   : > { %7531 = vmatpush1.bf16.msra.mxu0 %v11724_v4  ;;  %7613 = vmatpush1.bf16.msra.mxu1 %v11726_v9  ;;  %v1058_v4 = vld [vmem:[#allocation2 + $0x1768] sm:$0xff] }
 0x397   : > { %7532 = vmatprep.subr.bf16.mxu0 %v11757_v32  ;;  %7614 = vmatprep.subr.bf16.mxu1 %v11759_v38  ;;  %v1074_v9 = vld [vmem:[#allocation2 + $0x17e8] sm:$0xff] }
 0x398   : > { %v11855_v16 = vcombine.high %v1058_v4, %v1074_v9 }
 0x39a   : > { %7533 = vmatpush1.bf16.msra.mxu0 %v11756_v48  ;;  %7615 = vmatpush1.bf16.msra.mxu1 %v11758_v40 }
 0x39b   : > { %7534 = vmatprep.subr.bf16.mxu0 %v11789_v55  ;;  %7616 = vmatprep.subr.bf16.mxu1 %v11791_v24  ;;  %v11853_v55 = vcombine.high %v1057_v49, %v1073_v63 }
 0x39c   : > { %v13340_v2 = vpop.f32.mrb[16].mxu0  ;;  %v7312_v17 = vpop.f32.mrb[16].mxu1 }
 0x39d   : > { %v7232_v30 = vpop.f32.mrb[17].mxu0  ;;  %v12523_v32 = vadd.f32 %v7312_v17, %v1351_v28  ;;  %v7314_v14 = vpop.f32.mrb[17].mxu1  ;;  %v1089_v28 = vld [vmem:[#allocation2 + $0x1860] sm:$0xff] }
 0x39e   : > { %v12522_v38 = vadd.f32 %v7232_v30, %v1350_v62  ;;  %7535 = vmatpush1.bf16.msra.mxu0 %v11788_v39  ;;  %v7234_v48 = vpop.f32.mrb[18].mxu0  ;;  %v12524_v40 = vadd.f32 %v7314_v14, %v1352_v13  ;;  %v7316_v43 = vpop.f32.mrb[18].mxu1  ;;  %7617 = vmatpush1.bf16.msra.mxu1 %v11790_v8  ;;  %v1105_v62 = vld [vmem:[#allocation2 + $0x18e0] sm:$0xff]  ;;  %v11887_v30 = vcombine.high %v1090_v18, %v1106_v35 }
 0x39f   : > { %7536 = vmatprep.subr.bf16.mxu0 %v11821_v56  ;;  %v7235_v24 = vpop.f32.mrb[19].mxu0  ;;  %v7835_v27 = vmul.f32 %v12523_v32, %v13025_v29  ;;  %v7317_v53 = vpop.f32.mrb[19].mxu1  ;;  %7618 = vmatprep.subr.bf16.mxu1 %v11823_v1  ;;  %v11854_v56 = vcombine.low %v1058_v4, %v1074_v9  ;;  %v1121_v32 = vld [vmem:[#allocation2 + $0x1960] sm:$0xff]  ;;  %v1122_v48 = vld [vmem:[#allocation2 + $0x1968] sm:$0xff]  ;;  %v11884_v49 = vcombine.low %v1089_v28, %v1105_v62 }
 0x3a0   : > { %v7834_v46 = vmul.f32 %v12522_v38, %v13025_v29  ;;  %v7836_v39 = vmul.f32 %v12524_v40, %v13025_v29  ;;  %v11885_v53 = vcombine.high %v1089_v28, %v1105_v62  ;;  %v1137_v38 = vld [vmem:[#allocation2 + $0x19e0] sm:$0xff]  ;;  %v1138_v40 = vld [vmem:[#allocation2 + $0x19e8] sm:$0xff]  ;;  %v11886_v4 = vcombine.low %v1090_v18, %v1106_v35 }
 0x3a1   : > { %v7873_v13 = vadd.f32 %v13027_v45, %v7835_v27  ;;  %v11917_v9 = vcombine.high %v1121_v32, %v1137_v38  ;;  %v11919_v43 = vcombine.high %v1122_v48, %v1138_v40  ;;  %v11916_v62 = vcombine.low %v1121_v32, %v1137_v38 }
 0x3a2   : > { %v7872_v8 = vadd.f32 %v13027_v45, %v7834_v46  ;;  %7537 = vmatpush1.bf16.msra.mxu0 %v11820_v36  ;;  %v7874_v42 = vadd.f32 %v13027_v45, %v7836_v39  ;;  %7619 = vmatpush1.bf16.msra.mxu1 %v11822_v5  ;;  %v1153_v5 = vld [vmem:[#allocation2 + $0x1a60] sm:$0xff]  ;;  %v1154_v39 = vld [vmem:[#allocation2 + $0x1a68] sm:$0xff]  ;;  %v11918_v18 = vcombine.low %v1122_v48, %v1138_v40 }
 0x3a3   : > { %7538 = vmatprep.subr.bf16.mxu0 %v11853_v55  ;;  %v7905_v1 = vmax.f32 %v7873_v13, 0.0  ;;  %7620 = vmatprep.subr.bf16.mxu1 %v11855_v16  ;;  %v1169_v55 = vld [vmem:[#allocation2 + $0x1ae0] sm:$0xff]  ;;  %v1170_v13 = vld [vmem:[#allocation2 + $0x1ae8] sm:$0xff] }
 0x3a4   : > { %v7904_v17 = vmax.f32 %v7872_v8, 0.0  ;;  %v7906_v14 = vmax.f32 %v7874_v42, 0.0  ;;  %v11949_v35 = vcombine.high %v1153_v5, %v1169_v55  ;;  %v11948_v38 = vcombine.low %v1153_v5, %v1169_v55 }
 0x3a5   : > { %v7944_v27 = vmul.f32 %v13029_v50, %v7905_v1  ;;  %v1185_v1 = vld [vmem:[#allocation2 + $0x1b60] sm:$0xff]  ;;  %v11950_v40 = vcombine.low %v1154_v39, %v1170_v13 }
 0x3a6   : > { %v7943_v46 = vmul.f32 %v13029_v50, %v7904_v17  ;;  %7539 = vmatpush1.bf16.msra.mxu0 %v11852_v0  ;;  %v7945_v63 = vmul.f32 %v13029_v50, %v7906_v14  ;;  %7621 = vmatpush1.bf16.msra.mxu1 %v11854_v56  ;;  %v1201_v17 = vld [vmem:[#allocation2 + $0x1be0] sm:$0xff]  ;;  %v1186_v14 = vld [vmem:[#allocation2 + $0x1b68] sm:$0xff] }
 0x3a7   : > { %7540 = vmatprep.subr.bf16.mxu0 %v11885_v53  ;;  %v7983_v16 = vadd.f32 %v13039_v26, %v7944_v27  ;;  %7622 = vmatprep.subr.bf16.mxu1 %v11887_v30  ;;  %v11951_v53 = vcombine.high %v1154_v39, %v1170_v13  ;;  %v1202_v27 = vld [vmem:[#allocation2 + $0x1be8] sm:$0xff]  ;;  %v11980_v5 = vcombine.low %v1185_v1, %v1201_v17 }
 0x3a8   : > { %v7982_v36 = vadd.f32 %v13039_v26, %v7943_v46  ;;  %v7984_v24 = vadd.f32 %v13039_v26, %v7945_v63  ;;  %v11982_v39 = vcombine.low %v1186_v14, %v1202_v27 }
 0x3a9   : > { %v8015_v8 = vmax.f32 %v7983_v16, 0.0  ;;  %v1217_v16 = vld [vmem:[#allocation2 + $0x1c60] sm:$0xff] }
 0x3aa   : > { %v8014_v28 = vmax.f32 %v7982_v36, 0.0  ;;  %7541 = vmatpush1.bf16.msra.mxu0 %v11884_v49  ;;  %v8016_v0 = vmax.f32 %v7984_v24, 0.0  ;;  %7623 = vmatpush1.bf16.msra.mxu1 %v11886_v4  ;;  %v11981_v49 = vcombine.high %v1185_v1, %v1201_v17  ;;  %v1233_v36 = vld [vmem:[#allocation2 + $0x1ce0] sm:$0xff]  ;;  %v1218_v24 = vld [vmem:[#allocation2 + $0x1c68] sm:$0xff] }
 0x3ab   : > { %7542 = vmatprep.subr.bf16.mxu0 %v11917_v9  ;;  %v8054_v42 = vmul.f32 %v13046_v44, %v8015_v8  ;;  %7624 = vmatprep.subr.bf16.mxu1 %v11919_v43  ;;  %v11983_v9 = vcombine.high %v1186_v14, %v1202_v27  ;;  %v1234_v8 = vld [vmem:[#allocation2 + $0x1ce8] sm:$0xff]  ;;  %v12013_v13 = vcombine.high %v1217_v16, %v1233_v36 }
 0x3ac   : > { %v8053_v56 = vmul.f32 %v13046_v44, %v8014_v28  ;;  %v8055_v30 = vmul.f32 %v13046_v44, %v8016_v0  ;;  %v12012_v1 = vcombine.low %v1217_v16, %v1233_v36  ;;  %v12014_v14 = vcombine.low %v1218_v24, %v1234_v8 }
 0x3ad   : > { %v8093_v46 = vadd.f32 %v13051_v58, %v8054_v42  ;;  %v1249_v42 = vld [vmem:[#allocation2 + $0x1d60] sm:$0xff] }
 0x3ae   : > { %v8092_v32 = vadd.f32 %v13051_v58, %v8053_v56  ;;  %7543 = vmatpush1.bf16.msra.mxu0 %v11916_v62  ;;  %v8094_v48 = vadd.f32 %v13051_v58, %v8055_v30  ;;  %7625 = vmatpush1.bf16.msra.mxu1 %v11918_v18  ;;  %v1265_v56 = vld [vmem:[#allocation2 + $0x1de0] sm:$0xff]  ;;  %v1266_v30 = vld [vmem:[#allocation2 + $0x1de8] sm:$0xff] }
 0x3af   : > { %7544 = vmatprep.subr.bf16.mxu0 %v11949_v35  ;;  %v8125_v63 = vmax.f32 %v8093_v46, 0.0  ;;  %7626 = vmatprep.subr.bf16.mxu1 %v11951_v53  ;;  %v12015_v35 = vcombine.high %v1218_v24, %v1234_v8  ;;  %v1250_v53 = vld [vmem:[#allocation2 + $0x1d68] sm:$0xff]  ;;  %v12045_v27 = vcombine.high %v1249_v42, %v1265_v56 }
 0x3b0   : > { %v8124_v4 = vmax.f32 %v8092_v32, 0.0  ;;  %v8126_v43 = vmax.f32 %v8094_v48, 0.0  ;;  %v12046_v24 = vcombine.low %v1250_v53, %v1266_v30 }
 0x3b1   : > { %v8164_v28 = vmul.f32 %v13058_v11, %v8125_v63  ;;  %v1297_v63 = vld [vmem:[#allocation2 + $0x1ee0] sm:$0xff] }
 0x3b2   : > { %v8163_v62 = vmul.f32 %v13058_v11, %v8124_v4  ;;  %7545 = vmatpush1.bf16.msra.mxu0 %v11948_v38  ;;  %v8165_v55 = vmul.f32 %v13058_v11, %v8126_v43  ;;  %7627 = vmatpush1.bf16.msra.mxu1 %v11950_v40  ;;  %v12047_v38 = vcombine.high %v1250_v53, %v1266_v30  ;;  %v1282_v4 = vld [vmem:[#allocation2 + $0x1e68] sm:$0xff] }
 0x3b3   : > { %7546 = vmatprep.subr.bf16.mxu0 %v11981_v49  ;;  %v8203_v0 = vadd.f32 %v13063_v21, %v8164_v28  ;;  %7628 = vmatprep.subr.bf16.mxu1 %v11983_v9  ;;  %v1281_v49 = vld [vmem:[#allocation2 + $0x1e60] sm:$0xff]  ;;  %v1298_v9 = vld [vmem:[#allocation2 + $0x1ee8] sm:$0xff]  ;;  %v12044_v43 = vcombine.low %v1249_v42, %v1265_v56 }
 0x3b4   : > { %v8202_v18 = vadd.f32 %v13063_v21, %v8163_v62  ;;  %v8204_v17 = vadd.f32 %v13063_v21, %v8165_v55  ;;  %v12077_v8 = vcombine.high %v1281_v49, %v1297_v63  ;;  %v12079_v55 = vcombine.high %v1282_v4, %v1298_v9 }
 0x3b5   : > { %v8235_v46 = vmax.f32 %v8203_v0, 0.0  ;;  %v1314_v0 = vld [vmem:[#allocation2 + $0x1f68] sm:$0xff]  ;;  %v12076_v42 = vcombine.low %v1281_v49, %v1297_v63  ;;  %v12078_v53 = vcombine.low %v1282_v4, %v1298_v9  ;;  %v355_v63 = vld [vmem:[#allocation2 + $0x170] sm:$0xff]  ;;  %v356_v9 = vld [vmem:[#allocation2 + $0x178] sm:$0xff] }
 0x3b6   : > { %v8234_v32 = vmax.f32 %v8202_v18, 0.0  ;;  %7547 = vmatpush1.bf16.msra.mxu0 %v11980_v5  ;;  %7629 = vmatpush1.bf16.msra.mxu1 %v11982_v39  ;;  %v8236_v28 = vmax.f32 %v8204_v17, 0.0  ;;  %v1313_v39 = vld [vmem:[#allocation2 + $0x1f60] sm:$0xff]  ;;  %v1330_v18 = vld [vmem:[#allocation2 + $0x1fe8] sm:$0xff]  ;;  %v324_v17 = vld [vmem:[#allocation2 + $0x78] sm:$0xff] }
 0x3b7   : > { %7548 = vmatprep.subr.bf16.mxu0 %v12013_v13  ;;  %7630 = vmatprep.subr.bf16.mxu1 %v12015_v35  ;;  %v8274_v40 = vmul.f32 %v13070_v41, %v8235_v46  ;;  %v1329_v13 = vld [vmem:[#allocation2 + $0x1fe0] sm:$0xff]  ;;  %v12111_v46 = vcombine.high %v1314_v0, %v1330_v18  ;;  %v371_v4 = vld [vmem:[#allocation2 + $0x1f0] sm:$0xff] }
 0x3b8   : > { %v8273_v48 = vmul.f32 %v13070_v41, %v8234_v32  ;;  %v8275_v56 = vmul.f32 %v13070_v41, %v8236_v28  ;;  %v12109_v30 = vcombine.high %v1313_v39, %v1329_v13  ;;  %v323_v32 = vld [vmem:[#allocation2 + $0x70] sm:$0xff] }
 0x3b9   : > { %v8313_v36 = vadd.f32 %v13075_v54, %v8274_v40 }
 0x3ba   : > { %7549 = vmatpush1.bf16.msra.mxu0 %v12012_v1  ;;  %v8312_v16 = vadd.f32 %v13075_v54, %v8273_v48  ;;  %7631 = vmatpush1.bf16.msra.mxu1 %v12014_v14  ;;  %v339_v1 = vld [vmem:[#allocation2 + $0xf0] sm:$0xff]  ;;  %v340_v14 = vld [vmem:[#allocation2 + $0xf8] sm:$0xff]  ;;  %v12110_v48 = vcombine.low %v1314_v0, %v1330_v18  ;;  %v11152_v18 = vcombine.low %v355_v63, %v371_v4 }
 0x3bb   : > { %7550 = vmatprep.subr.bf16.mxu0 %v12045_v27  ;;  %7632 = vmatprep.subr.bf16.mxu1 %v12047_v38  ;;  %v13372_v5 = vmax.f32 %v8313_v36, 0.0  ;;  %v12108_v27 = vcombine.low %v1313_v39, %v1329_v13  ;;  %v8314_v38 = vadd.f32 %v13075_v54, %v8275_v56  ;;  %v11121_v40 = vcombine.high %v323_v32, %v339_v1  ;;  %v403_v39 = vld [vmem:[#allocation2 + $0x2f0] sm:$0xff]  ;;  %v388_v13 = vld [vmem:[#allocation2 + $0x278] sm:$0xff] }
 0x3bc   : > { %v13370_v62 = vmax.f32 %v8312_v16, 0.0  ;;  %v11123_v49 = vcombine.high %v324_v17, %v340_v14  ;;  %v11120_v36 = vcombine.low %v323_v32, %v339_v1  ;;  %v11122_v28 = vcombine.low %v324_v17, %v340_v14  ;;  %v404_v0 = vld [vmem:[#allocation2 + $0x2f8] sm:$0xff] }
 0x3bd   : > { %v13381_v16 = vmax.f32 %v8314_v38, 0.0  ;;  %v11187_v56 = vcombine.high %v388_v13, %v404_v0  ;;  %v436_v32 = vld [vmem:[#allocation2 + $0x3f8] sm:$0xff]  ;;  %v11186_v17 = vcombine.low %v388_v13, %v404_v0  ;;  %v451_v38 = vld [vmem:[#allocation2 + $0x470] sm:$0xff] }
 0x3be   : > { %15695 = vst [vmem:[#allocation15_spill] sm:$0xff] %v13370_v62  ;;  %7551 = vmatpush1.bf16.msra.mxu0 %v12044_v43  ;;  %v12689_v35 = vpack.i.bf16 %v13372_v5, %v13370_v62  ;;  %7633 = vmatpush1.bf16.msra.mxu1 %v12046_v24  ;;  %v372_v43 = vld [vmem:[#allocation2 + $0x1f8] sm:$0xff]  ;;  %v11153_v24 = vcombine.high %v355_v63, %v371_v4  ;;  %v515_v0 = vld [vmem:[#allocation2 + $0x670] sm:$0xff] }
 0x3bf   : > { %7552 = vmatprep.subr.bf16.mxu0 %v12077_v8  ;;  %7634 = vmatprep.subr.bf16.mxu1 %v12079_v55  ;;  %v11155_v8 = vcombine.high %v356_v9, %v372_v43  ;;  %v387_v55 = vld [vmem:[#allocation2 + $0x270] sm:$0xff] }
 0x3c0   : > { %12690 = vrot.lane.b32.xlu0 %v12689_v35, %s12817_s14  ;;  %v11154_v35 = vcombine.low %v356_v9, %v372_v43  ;;  %v11184_v1 = vcombine.low %v387_v55, %v403_v39  ;;  %v483_v43 = vld [vmem:[#allocation2 + $0x570] sm:$0xff] }
 0x3c2   : > { %7553 = vmatpush1.bf16.msra.mxu0 %v12076_v42  ;;  %7635 = vmatpush1.bf16.msra.mxu1 %v12078_v53  ;;  %v11185_v42 = vcombine.high %v387_v55, %v403_v39  ;;  %v419_v53 = vld [vmem:[#allocation2 + $0x370] sm:$0xff] }
 0x3c3   : > { %7554 = vmatprep.subr.bf16.mxu0 %v12109_v30  ;;  %7636 = vmatprep.subr.bf16.mxu1 %v12111_v46  ;;  %v435_v30 = vld [vmem:[#allocation2 + $0x3f0] sm:$0xff]  ;;  %v420_v46 = vld [vmem:[#allocation2 + $0x378] sm:$0xff] }
 0x3c4   : > { %8651 = vrot.lane.b32.xlu0 %v13370_v62, %s12816_s13  ;;  %v11217_v14 = vcombine.high %v419_v53, %v435_v30  ;;  %v11216_v63 = vcombine.low %v419_v53, %v435_v30  ;;  %v11218_v4 = vcombine.low %v420_v46, %v436_v32 }
 0x3c6   : > { %7555 = vmatpush1.bf16.msra.mxu0 %v12108_v27  ;;  %7637 = vmatpush1.bf16.msra.mxu1 %v12110_v48  ;;  %v11219_v27 = vcombine.high %v420_v46, %v436_v32  ;;  %v467_v48 = vld [vmem:[#allocation2 + $0x4f0] sm:$0xff] }
 0x3c7   : > { %7647 = vmatprep.subr.bf16.mxu0 %v11121_v40  ;;  %7729 = vmatprep.subr.bf16.mxu1 %v11123_v49  ;;  %v452_v40 = vld [vmem:[#allocation2 + $0x478] sm:$0xff]  ;;  %v11249_v9 = vcombine.high %v451_v38, %v467_v48  ;;  %v547_v32 = vld [vmem:[#allocation2 + $0x770] sm:$0xff] }
 0x3c8   : > { %8655 = vrot.lane.b32.xlu0 %v13381_v16, %s12816_s13  ;;  %v468_v49 = vld [vmem:[#allocation2 + $0x4f8] sm:$0xff] }
 0x3c9   : > { %7557 = vmatmul.mubr.bf16.vlgmr.msra.gmra.mrb[24].mxu0 %v13007_v33  ;;  %7639 = vmatmul.mubr.bf16.vlgmr.msra.gmra.mrb[24].mxu1 %v13007_v33  ;;  %v11250_v55 = vcombine.low %v452_v40, %v468_v49 }
 0x3ca   : > { %7648 = vmatpush1.bf16.msra.mxu0 %v11120_v36  ;;  %7730 = vmatpush1.bf16.msra.mxu1 %v11122_v28  ;;  %v499_v36 = vld [vmem:[#allocation2 + $0x5f0] sm:$0xff]  ;;  %v484_v28 = vld [vmem:[#allocation2 + $0x578] sm:$0xff] }
 0x3cb   : > { %7649 = vmatprep.subr.bf16.mxu0 %v11153_v24  ;;  %7731 = vmatprep.subr.bf16.mxu1 %v11155_v8  ;;  %v500_v24 = vld [vmem:[#allocation2 + $0x5f8] sm:$0xff]  ;;  %v11248_v8 = vcombine.low %v451_v38, %v467_v48  ;;  %v11281_v39 = vcombine.high %v483_v43, %v499_v36 }
 0x3cc   : > { %7679 = vmatprep.mubr.bf16.mxu0 %v12956_v57  ;;  %7761 = vmatprep.mubr.bf16.mxu1 %v12956_v57  ;;  %v11251_v57 = vcombine.high %v452_v40, %v468_v49  ;;  %v11283_v13 = vcombine.high %v484_v28, %v500_v24  ;;  %v11282_v53 = vcombine.low %v484_v28, %v500_v24  ;;  %v579_v49 = vld [vmem:[#allocation2 + $0x870] sm:$0xff] }
 0x3cd   : > { %v611_v24 = vld [vmem:[#allocation2 + $0x970] sm:$0xff] }
 0x3ce   : > { %7650 = vmatpush1.bf16.msra.mxu0 %v11152_v18  ;;  %7732 = vmatpush1.bf16.msra.mxu1 %v11154_v35  ;;  %v531_v18 = vld [vmem:[#allocation2 + $0x6f0] sm:$0xff]  ;;  %v516_v35 = vld [vmem:[#allocation2 + $0x678] sm:$0xff] }
 0x3cf   : > { %7651 = vmatprep.subr.bf16.mxu0 %v11185_v42  ;;  %7733 = vmatprep.subr.bf16.mxu1 %v11187_v56  ;;  %v532_v42 = vld [vmem:[#allocation2 + $0x6f8] sm:$0xff]  ;;  %v11280_v56 = vcombine.low %v483_v43, %v499_v36  ;;  %v11313_v30 = vcombine.high %v515_v0, %v531_v18 }
 0x3d0   : > { %v11315_v46 = vcombine.high %v516_v35, %v532_v42  ;;  %v11314_v38 = vcombine.low %v516_v35, %v532_v42  ;;  %v643_v42 = vld [vmem:[#allocation2 + $0xa70] sm:$0xff] }
 0x3d2   : > { %7652 = vmatpush1.bf16.msra.mxu0 %v11184_v1  ;;  %7734 = vmatpush1.bf16.msra.mxu1 %v11186_v17  ;;  %v563_v1 = vld [vmem:[#allocation2 + $0x7f0] sm:$0xff]  ;;  %v548_v17 = vld [vmem:[#allocation2 + $0x778] sm:$0xff] }
 0x3d3   : > { %7653 = vmatprep.subr.bf16.mxu0 %v11217_v14  ;;  %7735 = vmatprep.subr.bf16.mxu1 %v11219_v27  ;;  %v564_v14 = vld [vmem:[#allocation2 + $0x7f8] sm:$0xff]  ;;  %v11312_v27 = vcombine.low %v515_v0, %v531_v18  ;;  %v11345_v48 = vcombine.high %v547_v32, %v563_v1 }
 0x3d4   : > { %v11347_v40 = vcombine.high %v548_v17, %v564_v14  ;;  %v11346_v43 = vcombine.low %v548_v17, %v564_v14  ;;  %v675_v14 = vld [vmem:[#allocation2 + $0xb70] sm:$0xff] }
 0x3d6   : > { %7654 = vmatpush1.bf16.msra.mxu0 %v11216_v63  ;;  %7736 = vmatpush1.bf16.msra.mxu1 %v11218_v4  ;;  %v595_v63 = vld [vmem:[#allocation2 + $0x8f0] sm:$0xff]  ;;  %v580_v4 = vld [vmem:[#allocation2 + $0x878] sm:$0xff] }
 0x3d7   : > { %7655 = vmatprep.subr.bf16.mxu0 %v11249_v9  ;;  %7737 = vmatprep.subr.bf16.mxu1 %v11251_v57  ;;  %v596_v9 = vld [vmem:[#allocation2 + $0x8f8] sm:$0xff]  ;;  %v11344_v57 = vcombine.low %v547_v32, %v563_v1  ;;  %v11377_v36 = vcombine.high %v579_v49, %v595_v63 }
 0x3d8   : > { %v11379_v28 = vcombine.high %v580_v4, %v596_v9  ;;  %v11378_v0 = vcombine.low %v580_v4, %v596_v9  ;;  %v707_v9 = vld [vmem:[#allocation2 + $0xc70] sm:$0xff] }
 0x3da   : > { %7656 = vmatpush1.bf16.msra.mxu0 %v11248_v8  ;;  %7738 = vmatpush1.bf16.msra.mxu1 %v11250_v55  ;;  %v627_v8 = vld [vmem:[#allocation2 + $0x9f0] sm:$0xff]  ;;  %v612_v55 = vld [vmem:[#allocation2 + $0x978] sm:$0xff] }
 0x3db   : > { %7657 = vmatprep.subr.bf16.mxu0 %v11281_v39  ;;  %7739 = vmatprep.subr.bf16.mxu1 %v11283_v13  ;;  %v628_v39 = vld [vmem:[#allocation2 + $0x9f8] sm:$0xff]  ;;  %v11376_v13 = vcombine.low %v579_v49, %v595_v63  ;;  %v11409_v18 = vcombine.high %v611_v24, %v627_v8 }
 0x3dc   : > { %v11411_v35 = vcombine.high %v612_v55, %v628_v39  ;;  %v11410_v32 = vcombine.low %v612_v55, %v628_v39  ;;  %v739_v39 = vld [vmem:[#allocation2 + $0xd70] sm:$0xff] }
 0x3de   : > { %7658 = vmatpush1.bf16.msra.mxu0 %v11280_v56  ;;  %7740 = vmatpush1.bf16.msra.mxu1 %v11282_v53  ;;  %v659_v56 = vld [vmem:[#allocation2 + $0xaf0] sm:$0xff]  ;;  %v644_v53 = vld [vmem:[#allocation2 + $0xa78] sm:$0xff] }
 0x3df   : > { %7659 = vmatprep.subr.bf16.mxu0 %v11313_v30  ;;  %7741 = vmatprep.subr.bf16.mxu1 %v11315_v46  ;;  %v660_v30 = vld [vmem:[#allocation2 + $0xaf8] sm:$0xff]  ;;  %v11408_v46 = vcombine.low %v611_v24, %v627_v8  ;;  %v11441_v1 = vcombine.high %v643_v42, %v659_v56 }
 0x3e0   : > { %v11443_v17 = vcombine.high %v644_v53, %v660_v30  ;;  %v11442_v49 = vcombine.low %v644_v53, %v660_v30  ;;  %v771_v30 = vld [vmem:[#allocation2 + $0xe70] sm:$0xff] }
 0x3e2   : > { %7660 = vmatpush1.bf16.msra.mxu0 %v11312_v27  ;;  %7742 = vmatpush1.bf16.msra.mxu1 %v11314_v38  ;;  %v691_v27 = vld [vmem:[#allocation2 + $0xbf0] sm:$0xff]  ;;  %v676_v38 = vld [vmem:[#allocation2 + $0xb78] sm:$0xff] }
 0x3e3   : > { %7661 = vmatprep.subr.bf16.mxu0 %v11345_v48  ;;  %7743 = vmatprep.subr.bf16.mxu1 %v11347_v40  ;;  %v692_v48 = vld [vmem:[#allocation2 + $0xbf8] sm:$0xff]  ;;  %v11440_v40 = vcombine.low %v643_v42, %v659_v56  ;;  %v11473_v63 = vcombine.high %v675_v14, %v691_v27 }
 0x3e4   : > { %v11475_v4 = vcombine.high %v676_v38, %v692_v48  ;;  %v11474_v24 = vcombine.low %v676_v38, %v692_v48  ;;  %v803_v48 = vld [vmem:[#allocation2 + $0xf70] sm:$0xff] }
 0x3e6   : > { %7662 = vmatpush1.bf16.msra.mxu0 %v11344_v57  ;;  %7744 = vmatpush1.bf16.msra.mxu1 %v11346_v43  ;;  %v723_v57 = vld [vmem:[#allocation2 + $0xcf0] sm:$0xff]  ;;  %v708_v43 = vld [vmem:[#allocation2 + $0xc78] sm:$0xff] }
 0x3e7   : > { %7663 = vmatprep.subr.bf16.mxu0 %v11377_v36  ;;  %7745 = vmatprep.subr.bf16.mxu1 %v11379_v28  ;;  %v724_v36 = vld [vmem:[#allocation2 + $0xcf8] sm:$0xff]  ;;  %v11472_v28 = vcombine.low %v675_v14, %v691_v27  ;;  %v11505_v8 = vcombine.high %v707_v9, %v723_v57 }
 0x3e8   : > { %v11507_v55 = vcombine.high %v708_v43, %v724_v36  ;;  %v11506_v42 = vcombine.low %v708_v43, %v724_v36  ;;  %v835_v36 = vld [vmem:[#allocation2 + $0x1070] sm:$0xff] }
 0x3ea   : > { %7664 = vmatpush1.bf16.msra.mxu0 %v11376_v13  ;;  %7746 = vmatpush1.bf16.msra.mxu1 %v11378_v0  ;;  %v755_v13 = vld [vmem:[#allocation2 + $0xdf0] sm:$0xff]  ;;  %v740_v0 = vld [vmem:[#allocation2 + $0xd78] sm:$0xff] }
 0x3eb   : > { %7665 = vmatprep.subr.bf16.mxu0 %v11409_v18  ;;  %7747 = vmatprep.subr.bf16.mxu1 %v11411_v35  ;;  %v756_v18 = vld [vmem:[#allocation2 + $0xdf8] sm:$0xff]  ;;  %v11504_v35 = vcombine.low %v707_v9, %v723_v57  ;;  %v11537_v56 = vcombine.high %v739_v39, %v755_v13 }
 0x3ec   : > { %v11539_v53 = vcombine.high %v740_v0, %v756_v18  ;;  %v11538_v14 = vcombine.low %v740_v0, %v756_v18  ;;  %v867_v18 = vld [vmem:[#allocation2 + $0x1170] sm:$0xff] }
 0x3ee   : > { %7666 = vmatpush1.bf16.msra.mxu0 %v11408_v46  ;;  %7748 = vmatpush1.bf16.msra.mxu1 %v11410_v32  ;;  %v787_v46 = vld [vmem:[#allocation2 + $0xef0] sm:$0xff]  ;;  %v772_v32 = vld [vmem:[#allocation2 + $0xe78] sm:$0xff] }
 0x3ef   : > { %7667 = vmatprep.subr.bf16.mxu0 %v11441_v1  ;;  %7749 = vmatprep.subr.bf16.mxu1 %v11443_v17  ;;  %v788_v1 = vld [vmem:[#allocation2 + $0xef8] sm:$0xff]  ;;  %v11536_v17 = vcombine.low %v739_v39, %v755_v13  ;;  %v11569_v27 = vcombine.high %v771_v30, %v787_v46 }
 0x3f0   : > { %v11571_v38 = vcombine.high %v772_v32, %v788_v1  ;;  %v11570_v9 = vcombine.low %v772_v32, %v788_v1  ;;  %v899_v1 = vld [vmem:[#allocation2 + $0x1270] sm:$0xff] }
 0x3f2   : > { %7668 = vmatpush1.bf16.msra.mxu0 %v11440_v40  ;;  %7750 = vmatpush1.bf16.msra.mxu1 %v11442_v49  ;;  %v819_v40 = vld [vmem:[#allocation2 + $0xff0] sm:$0xff]  ;;  %v804_v49 = vld [vmem:[#allocation2 + $0xf78] sm:$0xff] }
 0x3f3   : > { %7669 = vmatprep.subr.bf16.mxu0 %v11473_v63  ;;  %7751 = vmatprep.subr.bf16.mxu1 %v11475_v4  ;;  %v820_v63 = vld [vmem:[#allocation2 + $0xff8] sm:$0xff]  ;;  %v11568_v4 = vcombine.low %v771_v30, %v787_v46  ;;  %v11601_v57 = vcombine.high %v803_v48, %v819_v40 }
 0x3f4   : > { %v11603_v43 = vcombine.high %v804_v49, %v820_v63  ;;  %v11602_v39 = vcombine.low %v804_v49, %v820_v63  ;;  %v931_v63 = vld [vmem:[#allocation2 + $0x1370] sm:$0xff] }
 0x3f6   : > { %7670 = vmatpush1.bf16.msra.mxu0 %v11472_v28  ;;  %7752 = vmatpush1.bf16.msra.mxu1 %v11474_v24  ;;  %v851_v28 = vld [vmem:[#allocation2 + $0x10f0] sm:$0xff]  ;;  %v836_v24 = vld [vmem:[#allocation2 + $0x1078] sm:$0xff] }
 0x3f7   : > { %7671 = vmatprep.subr.bf16.mxu0 %v11505_v8  ;;  %7753 = vmatprep.subr.bf16.mxu1 %v11507_v55  ;;  %v852_v8 = vld [vmem:[#allocation2 + $0x10f8] sm:$0xff]  ;;  %v11600_v55 = vcombine.low %v803_v48, %v819_v40  ;;  %v11633_v13 = vcombine.high %v835_v36, %v851_v28 }
 0x3f8   : > { %v11635_v0 = vcombine.high %v836_v24, %v852_v8  ;;  %v11634_v30 = vcombine.low %v836_v24, %v852_v8  ;;  %v963_v24 = vld [vmem:[#allocation2 + $0x1470] sm:$0xff] }
 0x3f9   : > { %v979_v8 = vld [vmem:[#allocation2 + $0x14f0] sm:$0xff] }
 0x3fa   : > { %7672 = vmatpush1.bf16.msra.mxu0 %v11504_v35  ;;  %7754 = vmatpush1.bf16.msra.mxu1 %v11506_v42  ;;  %v883_v35 = vld [vmem:[#allocation2 + $0x11f0] sm:$0xff]  ;;  %v868_v42 = vld [vmem:[#allocation2 + $0x1178] sm:$0xff] }
 0x3fb   : > { %7673 = vmatprep.subr.bf16.mxu0 %v11537_v56  ;;  %7755 = vmatprep.subr.bf16.mxu1 %v11539_v53  ;;  %v884_v56 = vld [vmem:[#allocation2 + $0x11f8] sm:$0xff]  ;;  %v11632_v53 = vcombine.low %v835_v36, %v851_v28  ;;  %v11665_v46 = vcombine.high %v867_v18, %v883_v35 }
 0x3fc   : > { %v11667_v32 = vcombine.high %v868_v42, %v884_v56  ;;  %v11666_v48 = vcombine.low %v868_v42, %v884_v56  ;;  %v1011_v42 = vld [vmem:[#allocation2 + $0x15f0] sm:$0xff]  ;;  %v996_v56 = vld [vmem:[#allocation2 + $0x1578] sm:$0xff] }
 0x3fe   : > { %7674 = vmatpush1.bf16.msra.mxu0 %v11536_v17  ;;  %7756 = vmatpush1.bf16.msra.mxu1 %v11538_v14  ;;  %v915_v17 = vld [vmem:[#allocation2 + $0x12f0] sm:$0xff]  ;;  %v900_v14 = vld [vmem:[#allocation2 + $0x1278] sm:$0xff] }
 0x3ff   : > { %7675 = vmatprep.subr.bf16.mxu0 %v11569_v27  ;;  %7757 = vmatprep.subr.bf16.mxu1 %v11571_v38  ;;  %v916_v27 = vld [vmem:[#allocation2 + $0x12f8] sm:$0xff]  ;;  %v11664_v38 = vcombine.low %v867_v18, %v883_v35  ;;  %v11697_v40 = vcombine.high %v899_v1, %v915_v17  ;;  %v11761_v18 = vcombine.high %v963_v24, %v979_v8  ;;  %v995_v35 = vld [vmem:[#allocation2 + $0x1570] sm:$0xff] }
 0x400   : > { %v11699_v49 = vcombine.high %v900_v14, %v916_v27 }
 0x402   : > { %7676 = vmatpush1.bf16.msra.mxu0 %v11568_v4  ;;  %7758 = vmatpush1.bf16.msra.mxu1 %v11570_v9  ;;  %v947_v4 = vld [vmem:[#allocation2 + $0x13f0] sm:$0xff]  ;;  %v932_v9 = vld [vmem:[#allocation2 + $0x1378] sm:$0xff] }
 0x403   : > { %7677 = vmatprep.subr.bf16.mxu0 %v11601_v57  ;;  %7759 = vmatprep.subr.bf16.mxu1 %v11603_v43  ;;  %v948_v57 = vld [vmem:[#allocation2 + $0x13f8] sm:$0xff]  ;;  %v11696_v43 = vcombine.low %v899_v1, %v915_v17  ;;  %v11729_v36 = vcombine.high %v931_v63, %v947_v4  ;;  %v1027_v17 = vld [vmem:[#allocation2 + $0x1670] sm:$0xff] }
 0x404   : > { %v11731_v28 = vcombine.high %v932_v9, %v948_v57 }
 0x406   : > { %7678 = vmatpush1.bf16.msra.mxu0 %v11600_v55  ;;  %7760 = vmatpush1.bf16.msra.mxu1 %v11602_v39  ;;  %v964_v55 = vld [vmem:[#allocation2 + $0x1478] sm:$0xff] }
 0x407   : > { %7688 = vmatprep.subr.bf16.mxu0 %v11633_v13  ;;  %7770 = vmatprep.subr.bf16.mxu1 %v11635_v0  ;;  %v980_v39 = vld [vmem:[#allocation2 + $0x14f8] sm:$0xff]  ;;  %v11728_v13 = vcombine.low %v931_v63, %v947_v4  ;;  %v11730_v0 = vcombine.low %v932_v9, %v948_v57 }
 0x408   : > { %v1356_v57 = vld [vmem:[#allocation4 + $0xb8] sm:$0xff] }
 0x409   : > { %7680 = vmatmul.mubr.bf16.vlgmr.msra.gmra.mrb[28].mxu0 %v12962_v12  ;;  %7762 = vmatmul.mubr.bf16.vlgmr.msra.gmra.mrb[28].mxu1 %v12962_v12  ;;  %v11698_v12 = vcombine.low %v900_v14, %v916_v27  ;;  %v1043_v14 = vld [vmem:[#allocation2 + $0x16f0] sm:$0xff]  ;;  %v1028_v27 = vld [vmem:[#allocation2 + $0x1678] sm:$0xff] }
 0x40a   : > { %7689 = vmatpush1.bf16.msra.mxu0 %v11632_v53  ;;  %7771 = vmatpush1.bf16.msra.mxu1 %v11634_v30  ;;  %v1012_v53 = vld [vmem:[#allocation2 + $0x15f8] sm:$0xff]  ;;  %v11760_v30 = vcombine.low %v963_v24, %v979_v8  ;;  %v11825_v4 = vcombine.high %v1027_v17, %v1043_v14 }
 0x40b   : > { %7690 = vmatprep.subr.bf16.mxu0 %v11665_v46  ;;  %7772 = vmatprep.subr.bf16.mxu1 %v11667_v32  ;;  %v11762_v46 = vcombine.low %v964_v55, %v980_v39  ;;  %v11793_v32 = vcombine.high %v995_v35, %v1011_v42  ;;  %v11795_v1 = vcombine.high %v996_v56, %v1012_v53  ;;  %v1060_v8 = vld [vmem:[#allocation2 + $0x1778] sm:$0xff] }
 0x40c   : > { %7720 = vmatprep.mubr.bf16.mxu0 %v12969_v22  ;;  %7802 = vmatprep.mubr.bf16.mxu1 %v12969_v22  ;;  %v11763_v22 = vcombine.high %v964_v55, %v980_v39  ;;  %v11794_v63 = vcombine.low %v996_v56, %v1012_v53  ;;  %v1076_v55 = vld [vmem:[#allocation2 + $0x17f8] sm:$0xff] }
 0x40d   : > { %v11859_v62 = vcombine.high %v1060_v8, %v1076_v55 }
 0x40e   : > { %7691 = vmatpush1.bf16.msra.mxu0 %v11664_v38  ;;  %7773 = vmatpush1.bf16.msra.mxu1 %v11666_v48  ;;  %v1044_v38 = vld [vmem:[#allocation2 + $0x16f8] sm:$0xff]  ;;  %v11792_v48 = vcombine.low %v995_v35, %v1011_v42 }
 0x40f   : > { %7692 = vmatprep.subr.bf16.mxu0 %v11697_v40  ;;  %7774 = vmatprep.subr.bf16.mxu1 %v11699_v49  ;;  %v1355_v40 = vld [vmem:[#allocation4 + $0xb0] sm:$0xff]  ;;  %v1354_v49 = vld [vmem:[#allocation4 + $0xa8] sm:$0xff]  ;;  %v11826_v56 = vcombine.low %v1028_v27, %v1044_v38 }
 0x412   : > { %7693 = vmatpush1.bf16.msra.mxu0 %v11696_v43  ;;  %7775 = vmatpush1.bf16.msra.mxu1 %v11698_v12  ;;  %v11827_v43 = vcombine.high %v1028_v27, %v1044_v38  ;;  %v1059_v12 = vld [vmem:[#allocation2 + $0x1770] sm:$0xff] }
 0x413   : > { %7694 = vmatprep.subr.bf16.mxu0 %v11729_v36  ;;  %7776 = vmatprep.subr.bf16.mxu1 %v11731_v28  ;;  %v1075_v36 = vld [vmem:[#allocation2 + $0x17f0] sm:$0xff] }
 0x414   : > { %v11857_v53 = vcombine.high %v1059_v12, %v1075_v36  ;;  %v11856_v27 = vcombine.low %v1059_v12, %v1075_v36 }
 0x416   : > { %7695 = vmatpush1.bf16.msra.mxu0 %v11728_v13  ;;  %7777 = vmatpush1.bf16.msra.mxu1 %v11730_v0 }
 0x417   : > { %7696 = vmatprep.subr.bf16.mxu0 %v11761_v18  ;;  %7778 = vmatprep.subr.bf16.mxu1 %v11763_v22  ;;  %v11824_v18 = vcombine.low %v1027_v17, %v1043_v14  ;;  %v1092_v17 = vld [vmem:[#allocation2 + $0x1878] sm:$0xff] }
 0x418   : > { %v1108_v14 = vld [vmem:[#allocation2 + $0x18f8] sm:$0xff] }
 0x41a   : > { %7697 = vmatpush1.bf16.msra.mxu0 %v11760_v30  ;;  %7779 = vmatpush1.bf16.msra.mxu1 %v11762_v46 }
 0x41b   : > { %7698 = vmatprep.subr.bf16.mxu0 %v11793_v32  ;;  %7780 = vmatprep.subr.bf16.mxu1 %v11795_v1 }
 0x41c   : > { %v13393_v9 = vpop.f32.mrb[20].mxu0  ;;  %v7476_v28 = vpop.f32.mrb[20].mxu1 }
 0x41d   : > { %v7396_v24 = vpop.f32.mrb[21].mxu0  ;;  %v12527_v39 = vadd.f32 %v7476_v28, %v1355_v40  ;;  %v7478_v0 = vpop.f32.mrb[21].mxu1  ;;  %v1091_v40 = vld [vmem:[#allocation2 + $0x1870] sm:$0xff] }
 0x41e   : > { %v12526_v13 = vadd.f32 %v7396_v24, %v1354_v49  ;;  %7699 = vmatpush1.bf16.msra.mxu0 %v11792_v48  ;;  %v7398_v22 = vpop.f32.mrb[22].mxu0  ;;  %v12528_v35 = vadd.f32 %v7478_v0, %v1356_v57  ;;  %v7480_v42 = vpop.f32.mrb[22].mxu1  ;;  %7781 = vmatpush1.bf16.msra.mxu1 %v11794_v63  ;;  %v1107_v49 = vld [vmem:[#allocation2 + $0x18f0] sm:$0xff] }
 0x41f   : > { %7700 = vmatprep.subr.bf16.mxu0 %v11825_v4  ;;  %v7399_v30 = vpop.f32.mrb[23].mxu0  ;;  %v7839_v46 = vmul.f32 %v12527_v39, %v13025_v29  ;;  %v7481_v1 = vpop.f32.mrb[23].mxu1  ;;  %7782 = vmatprep.subr.bf16.mxu1 %v11827_v43  ;;  %v11858_v4 = vcombine.low %v1060_v8, %v1076_v55  ;;  %v11889_v28 = vcombine.high %v1091_v40, %v1107_v49  ;;  %v1139_v0 = vld [vmem:[#allocation2 + $0x19f0] sm:$0xff]  ;;  %v1140_v42 = vld [vmem:[#allocation2 + $0x19f8] sm:$0xff] }
 0x420   : > { %v7838_v32 = vmul.f32 %v12526_v13, %v13025_v29  ;;  %v7840_v48 = vmul.f32 %v12528_v35, %v13025_v29  ;;  %v11891_v39 = vcombine.high %v1092_v17, %v1108_v14  ;;  %v1123_v13 = vld [vmem:[#allocation2 + $0x1970] sm:$0xff]  ;;  %v1124_v35 = vld [vmem:[#allocation2 + $0x1978] sm:$0xff]  ;;  %v11888_v12 = vcombine.low %v1091_v40, %v1107_v49 }
 0x421   : > { %v7877_v57 = vadd.f32 %v13027_v45, %v7839_v46  ;;  %v11890_v8 = vcombine.low %v1092_v17, %v1108_v14  ;;  %v11921_v55 = vcombine.high %v1123_v13, %v1139_v0  ;;  %v1155_v46 = vld [vmem:[#allocation2 + $0x1a70] sm:$0xff]  ;;  %v11920_v49 = vcombine.low %v1123_v13, %v1139_v0 }
 0x422   : > { %v7876_v63 = vadd.f32 %v13027_v45, %v7838_v32  ;;  %7701 = vmatpush1.bf16.msra.mxu0 %v11824_v18  ;;  %v7878_v38 = vadd.f32 %v13027_v45, %v7840_v48  ;;  %7783 = vmatpush1.bf16.msra.mxu1 %v11826_v56  ;;  %v1171_v32 = vld [vmem:[#allocation2 + $0x1af0] sm:$0xff]  ;;  %v1156_v48 = vld [vmem:[#allocation2 + $0x1a78] sm:$0xff]  ;;  %v11922_v17 = vcombine.low %v1124_v35, %v1140_v42 }
 0x423   : > { %7702 = vmatprep.subr.bf16.mxu0 %v11857_v53  ;;  %v7909_v43 = vmax.f32 %v7877_v57, 0.0  ;;  %7784 = vmatprep.subr.bf16.mxu1 %v11859_v62  ;;  %v11923_v53 = vcombine.high %v1124_v35, %v1140_v42  ;;  %v1172_v57 = vld [vmem:[#allocation2 + $0x1af8] sm:$0xff]  ;;  %v11953_v14 = vcombine.high %v1155_v46, %v1171_v32  ;;  %v11952_v0 = vcombine.low %v1155_v46, %v1171_v32 }
 0x424   : > { %v7908_v24 = vmax.f32 %v7876_v63, 0.0  ;;  %v7910_v22 = vmax.f32 %v7878_v38, 0.0  ;;  %v11954_v42 = vcombine.low %v1156_v48, %v1172_v57 }
 0x425   : > { %v7948_v30 = vmul.f32 %v13029_v50, %v7909_v43  ;;  %v1187_v43 = vld [vmem:[#allocation2 + $0x1b70] sm:$0xff] }
 0x426   : > { %v7947_v18 = vmul.f32 %v13029_v50, %v7908_v24  ;;  %7703 = vmatpush1.bf16.msra.mxu0 %v11856_v27  ;;  %v7949_v36 = vmul.f32 %v13029_v50, %v7910_v22  ;;  %7785 = vmatpush1.bf16.msra.mxu1 %v11858_v4  ;;  %v1203_v24 = vld [vmem:[#allocation2 + $0x1bf0] sm:$0xff]  ;;  %v1188_v22 = vld [vmem:[#allocation2 + $0x1b78] sm:$0xff] }
 0x427   : > { %7704 = vmatprep.subr.bf16.mxu0 %v11889_v28  ;;  %v7987_v62 = vadd.f32 %v13039_v26, %v7948_v30  ;;  %7786 = vmatprep.subr.bf16.mxu1 %v11891_v39  ;;  %v11955_v28 = vcombine.high %v1156_v48, %v1172_v57  ;;  %v1204_v30 = vld [vmem:[#allocation2 + $0x1bf8] sm:$0xff]  ;;  %v11984_v46 = vcombine.low %v1187_v43, %v1203_v24 }
 0x428   : > { %v7986_v56 = vadd.f32 %v13039_v26, %v7947_v18  ;;  %v7988_v1 = vadd.f32 %v13039_v26, %v7949_v36  ;;  %v11986_v48 = vcombine.low %v1188_v22, %v1204_v30 }
 0x429   : > { %v8019_v63 = vmax.f32 %v7987_v62, 0.0  ;;  %v1219_v62 = vld [vmem:[#allocation2 + $0x1c70] sm:$0xff] }
 0x42a   : > { %v8018_v40 = vmax.f32 %v7986_v56, 0.0  ;;  %7705 = vmatpush1.bf16.msra.mxu0 %v11888_v12  ;;  %v8020_v27 = vmax.f32 %v7988_v1, 0.0  ;;  %7787 = vmatpush1.bf16.msra.mxu1 %v11890_v8  ;;  %v11985_v12 = vcombine.high %v1187_v43, %v1203_v24  ;;  %v1235_v56 = vld [vmem:[#allocation2 + $0x1cf0] sm:$0xff]  ;;  %v1220_v1 = vld [vmem:[#allocation2 + $0x1c78] sm:$0xff] }
 0x42b   : > { %7706 = vmatprep.subr.bf16.mxu0 %v11921_v55  ;;  %v8058_v38 = vmul.f32 %v13046_v44, %v8019_v63  ;;  %7788 = vmatprep.subr.bf16.mxu1 %v11923_v53  ;;  %v11987_v55 = vcombine.high %v1188_v22, %v1204_v30  ;;  %v1236_v63 = vld [vmem:[#allocation2 + $0x1cf8] sm:$0xff]  ;;  %v12017_v57 = vcombine.high %v1219_v62, %v1235_v56 }
 0x42c   : > { %v8057_v4 = vmul.f32 %v13046_v44, %v8018_v40  ;;  %v8059_v39 = vmul.f32 %v13046_v44, %v8020_v27  ;;  %v12016_v43 = vcombine.low %v1219_v62, %v1235_v56  ;;  %v12018_v22 = vcombine.low %v1220_v1, %v1236_v63 }
 0x42d   : > { %v8097_v18 = vadd.f32 %v13051_v58, %v8058_v38  ;;  %v1251_v38 = vld [vmem:[#allocation2 + $0x1d70] sm:$0xff] }
 0x42e   : > { %v8096_v13 = vadd.f32 %v13051_v58, %v8057_v4  ;;  %7707 = vmatpush1.bf16.msra.mxu0 %v11920_v49  ;;  %v8098_v35 = vadd.f32 %v13051_v58, %v8059_v39  ;;  %7789 = vmatpush1.bf16.msra.mxu1 %v11922_v17  ;;  %v1267_v4 = vld [vmem:[#allocation2 + $0x1df0] sm:$0xff]  ;;  %v1268_v39 = vld [vmem:[#allocation2 + $0x1df8] sm:$0xff] }
 0x42f   : > { %7708 = vmatprep.subr.bf16.mxu0 %v11953_v14  ;;  %v8129_v36 = vmax.f32 %v8097_v18, 0.0  ;;  %7790 = vmatprep.subr.bf16.mxu1 %v11955_v28  ;;  %v12019_v14 = vcombine.high %v1220_v1, %v1236_v63  ;;  %v1252_v28 = vld [vmem:[#allocation2 + $0x1d78] sm:$0xff]  ;;  %v12049_v30 = vcombine.high %v1251_v38, %v1267_v4 }
 0x430   : > { %v8128_v8 = vmax.f32 %v8096_v13, 0.0  ;;  %v8130_v53 = vmax.f32 %v8098_v35, 0.0  ;;  %v12050_v1 = vcombine.low %v1252_v28, %v1268_v39 }
 0x431   : > { %v8168_v40 = vmul.f32 %v13058_v11, %v8129_v36  ;;  %v1299_v36 = vld [vmem:[#allocation2 + $0x1ef0] sm:$0xff] }
 0x432   : > { %v8167_v49 = vmul.f32 %v13058_v11, %v8128_v8  ;;  %7709 = vmatpush1.bf16.msra.mxu0 %v11952_v0  ;;  %v8169_v32 = vmul.f32 %v13058_v11, %v8130_v53  ;;  %7791 = vmatpush1.bf16.msra.mxu1 %v11954_v42  ;;  %v12051_v0 = vcombine.high %v1252_v28, %v1268_v39  ;;  %v1284_v8 = vld [vmem:[#allocation2 + $0x1e78] sm:$0xff]  ;;  %v12658_v39 = vunpack.i.h.bf16 %v13213_v51 }
 0x433   : > { %7710 = vmatprep.subr.bf16.mxu0 %v11985_v12  ;;  %v8207_v27 = vadd.f32 %v13063_v21, %v8168_v40  ;;  %7792 = vmatprep.subr.bf16.mxu1 %v11987_v55  ;;  %v1283_v12 = vld [vmem:[#allocation2 + $0x1e70] sm:$0xff]  ;;  %v1300_v55 = vld [vmem:[#allocation2 + $0x1ef8] sm:$0xff]  ;;  %v12048_v53 = vcombine.low %v1251_v38, %v1267_v4 }
 0x434   : > { %v8206_v17 = vadd.f32 %v13063_v21, %v8167_v49  ;;  %v8208_v24 = vadd.f32 %v13063_v21, %v8169_v32  ;;  %v12081_v63 = vcombine.high %v1283_v12, %v1299_v36  ;;  %v12083_v32 = vcombine.high %v1284_v8, %v1300_v55 }
 0x435   : > { %v8239_v18 = vmax.f32 %v8207_v27, 0.0  ;;  %v1316_v27 = vld [vmem:[#allocation2 + $0x1f78] sm:$0xff]  ;;  %v12080_v4 = vcombine.low %v1283_v12, %v1299_v36 }
 0x436   : > { %v8238_v13 = vmax.f32 %v8206_v17, 0.0  ;;  %7711 = vmatpush1.bf16.msra.mxu0 %v11984_v46  ;;  %7793 = vmatpush1.bf16.msra.mxu1 %v11986_v48  ;;  %v8240_v40 = vmax.f32 %v8208_v24, 0.0  ;;  %v1315_v48 = vld [vmem:[#allocation2 + $0x1f70] sm:$0xff]  ;;  %v1332_v17 = vld [vmem:[#allocation2 + $0x1ff8] sm:$0xff] }
 0x437   : > { %7712 = vmatprep.subr.bf16.mxu0 %v12017_v57  ;;  %7794 = vmatprep.subr.bf16.mxu1 %v12019_v14  ;;  %v8278_v42 = vmul.f32 %v13070_v41, %v8239_v18  ;;  %v1331_v57 = vld [vmem:[#allocation2 + $0x1ff0] sm:$0xff]  ;;  %v12642_v14 = vunpack.i.l.bf16 %v13134_v23  ;;  %v12082_v18 = vcombine.low %v1284_v8, %v1300_v55  ;;  %v12114_v36 = vcombine.low %v1316_v27, %v1332_v17 }
 0x438   : > { %v8277_v35 = vmul.f32 %v13070_v41, %v8238_v13  ;;  %v8279_v28 = vmul.f32 %v13070_v41, %v8240_v40  ;;  %v12113_v13 = vcombine.high %v1315_v48, %v1331_v57  ;;  %v12112_v24 = vcombine.low %v1315_v48, %v1331_v57  ;;  %v1358_v40 = vld [vmem:[#allocation4 + $0xc8] sm:$0xff] }
 0x439   : > { %v8317_v56 = vadd.f32 %v13075_v54, %v8278_v42  ;;  %v15699_v8 = vunpack.i.l.bf16 %v13213_v51 }
 0x43a   : > { %7713 = vmatpush1.bf16.msra.mxu0 %v12016_v43  ;;  %v8316_v62 = vadd.f32 %v13075_v54, %v8277_v35  ;;  %7795 = vmatpush1.bf16.msra.mxu1 %v12018_v22  ;;  %v12115_v43 = vcombine.high %v1316_v27, %v1332_v17  ;;  %v15696_v22 = vunpack.i.h.bf16 %v13139_v31  ;;  %v15698_v35 = vunpack.i.h.bf16 %v13134_v23 }
 0x43b   : > { %7714 = vmatprep.subr.bf16.mxu0 %v12049_v30  ;;  %7796 = vmatprep.subr.bf16.mxu1 %v12051_v0  ;;  %v13425_v46 = vmax.f32 %v8317_v56, 0.0  ;;  %v15697_v30 = vunpack.i.l.bf16 %v13139_v31  ;;  %v8318_v12 = vadd.f32 %v13075_v54, %v8279_v28  ;;  %v13452_v31 = vsel %vm8520_vm0, %v15699_v8, %v12658_v39  ;;  %v1359_v56 = vld [vmem:[#allocation4 + $0xd0] sm:$0xff] }
 0x43c   : > { %v13423_v49 = vmax.f32 %v8316_v62, 0.0  ;;  %v8551_v42 = vsel %vm8520_vm0, %v12642_v14, %v15698_v35 }
 0x43d   : > { %v8549_v0 = vsel %vm8520_vm0, %v15697_v30, %v15696_v22  ;;  %v13457_v62 = vmax.f32 %v8318_v12, 0.0 }
 0x43e   : > { %7715 = vmatpush1.bf16.msra.mxu0 %v12048_v53  ;;  %v12699_v38 = vpack.i.bf16 %v13425_v46, %v13423_v49  ;;  %7797 = vmatpush1.bf16.msra.mxu1 %v12050_v1  ;;  %v12281_v55 = vpack.c.bf16 %v8549_v0, %v8551_v42  ;;  %v12297_v53 = vpack.c.bf16 %v13452_v31, %v8549_v0 }
 0x43f   : > { %7716 = vmatprep.subr.bf16.mxu0 %v12081_v63  ;;  %7798 = vmatprep.subr.bf16.mxu1 %v12083_v32  ;;  %v1360_v63 = vld [vmem:[#allocation4 + $0xd8] sm:$0xff] }
 0x440   : > { %12700 = vrot.lane.b32.xlu0 %v12699_v38, %s12817_s14 }
 0x442   : > { %7717 = vmatpush1.bf16.msra.mxu0 %v12080_v4  ;;  %7799 = vmatpush1.bf16.msra.mxu1 %v12082_v18 }
 0x443   : > { %7718 = vmatprep.subr.bf16.mxu0 %v12113_v13  ;;  %7800 = vmatprep.subr.bf16.mxu1 %v12115_v43 }
 0x444   : > { %8659 = vrot.lane.b32.xlu0 %v13423_v49, %s12816_s13 }
 0x446   : > { %7719 = vmatpush1.bf16.msra.mxu0 %v12112_v24  ;;  %7801 = vmatpush1.bf16.msra.mxu1 %v12114_v36 }
 0x447   : > { %12282 = vmatprep.subr.bf16.mxu0 %v12281_v55  ;;  %12298 = vmatprep.subr.bf16.mxu1 %v12297_v53 }
 0x448   : > { %8663 = vrot.lane.b32.xlu0 %v13457_v62, %s12816_s13 }
 0x449   : > { %7721 = vmatmul.mubr.bf16.vlgmr.msra.gmra.mrb[28].mxu0 %v13007_v33  ;;  %7803 = vmatmul.mubr.bf16.vlgmr.msra.gmra.mrb[28].mxu1 %v13007_v33 }
 0x49c   : > { %v13463_v1 = vpop.f32.mrb[24].mxu0  ;;  %v7640_v32 = vpop.f32.mrb[24].mxu1 }
 0x49d   : > { %v7560_v48 = vpop.f32.mrb[25].mxu0  ;;  %v12531_v57 = vadd.f32 %v7640_v32, %v1359_v56  ;;  %v7642_v17 = vpop.f32.mrb[25].mxu1 }
 0x49e   : > { %v12530_v27 = vadd.f32 %v7560_v48, %v1358_v40  ;;  %v7562_v38 = vpop.f32.mrb[26].mxu0  ;;  %v12532_v4 = vadd.f32 %v7642_v17, %v1360_v63  ;;  %v7644_v28 = vpop.f32.mrb[26].mxu1 }
 0x49f   : > { %v7563_v18 = vpop.f32.mrb[27].mxu0  ;;  %v7843_v13 = vmul.f32 %v12531_v57, %v13025_v29  ;;  %v7645_v24 = vpop.f32.mrb[27].mxu1 }
 0x4a0   : > { %v7842_v43 = vmul.f32 %v12530_v27, %v13025_v29  ;;  %v7844_v33 = vmul.f32 %v12532_v4, %v13025_v29 }
 0x4a1   : > { %v7881_v22 = vadd.f32 %v13027_v45, %v7843_v13 }
 0x4a2   : > { %v7880_v30 = vadd.f32 %v13027_v45, %v7842_v43  ;;  %v7882_v0 = vadd.f32 %v13027_v45, %v7844_v33 }
 0x4a3   : > { %v7913_v35 = vmax.f32 %v7881_v22, 0.0 }
 0x4a4   : > { %v7912_v42 = vmax.f32 %v7880_v30, 0.0  ;;  %v7914_v12 = vmax.f32 %v7882_v0, 0.0 }
 0x4a5   : > { %v7952_v36 = vmul.f32 %v13029_v50, %v7913_v35 }
 0x4a6   : > { %v7951_v8 = vmul.f32 %v13029_v50, %v7912_v42  ;;  %v7953_v55 = vmul.f32 %v13029_v50, %v7914_v12 }
 0x4a7   : > { %v7991_v53 = vadd.f32 %v13039_v26, %v7952_v36 }
 0x4a8   : > { %v7990_v56 = vadd.f32 %v13039_v26, %v7951_v8  ;;  %v7992_v40 = vadd.f32 %v13039_v26, %v7953_v55 }
 0x4a9   : > { %v8023_v63 = vmax.f32 %v7991_v53, 0.0 }
 0x4aa   : > { %v8022_v32 = vmax.f32 %v7990_v56, 0.0  ;;  %v8024_v48 = vmax.f32 %v7992_v40, 0.0 }
 0x4ab   : > { %v8062_v57 = vmul.f32 %v13046_v44, %v8023_v63 }
 0x4ac   : > { %v8061_v27 = vmul.f32 %v13046_v44, %v8022_v32  ;;  %v8063_v17 = vmul.f32 %v13046_v44, %v8024_v48 }
 0x4ad   : > { %v8101_v38 = vadd.f32 %v13051_v58, %v8062_v57 }
 0x4ae   : > { %v8100_v4 = vadd.f32 %v13051_v58, %v8061_v27  ;;  %v8102_v28 = vadd.f32 %v13051_v58, %v8063_v17  ;;  %v1345_v17 = vld [vmem:[#allocation4 + $0x60] sm:$0xff] }
 0x4af   : > { %v8133_v18 = vmax.f32 %v8101_v38, 0.0  ;;  %v12517_v38 = vadd.f32 %v13287_v34, %v1345_v17 }
 0x4b0   : > { %v8132_v13 = vmax.f32 %v8100_v4, 0.0  ;;  %v8134_v43 = vmax.f32 %v8102_v28, 0.0 }
 0x4b1   : > { %v8172_v24 = vmul.f32 %v13058_v11, %v8133_v18  ;;  %v7829_v4 = vmul.f32 %v12517_v38, %v13025_v29  ;;  %v1349_v18 = vld [vmem:[#allocation4 + $0x80] sm:$0xff] }
 0x4b2   : > { %v8171_v33 = vmul.f32 %v13058_v11, %v8132_v13  ;;  %v8173_v22 = vmul.f32 %v13058_v11, %v8134_v43  ;;  %v1363_v13 = vld [vmem:[#allocation4 + $0xf0] sm:$0xff]  ;;  %v1362_v43 = vld [vmem:[#allocation4 + $0xe8] sm:$0xff] }
 0x4b3   : > { %v8211_v30 = vadd.f32 %v13063_v21, %v8172_v24  ;;  %v7867_v28 = vadd.f32 %v13027_v45, %v7829_v4 }
 0x4b4   : > { %v8210_v0 = vadd.f32 %v13063_v21, %v8171_v33  ;;  %v8212_v12 = vadd.f32 %v13063_v21, %v8173_v22  ;;  %v1364_v33 = vld [vmem:[#allocation4 + $0xf8] sm:$0xff] }
 0x4b5   : > { %v8243_v35 = vmax.f32 %v8211_v30, 0.0 }
 0x4b6   : > { %v8242_v42 = vmax.f32 %v8210_v0, 0.0  ;;  %v8244_v56 = vmax.f32 %v8212_v12, 0.0  ;;  %v7899_v0 = vmax.f32 %v7867_v28, 0.0 }
 0x4b7   : > { %v8282_v8 = vmul.f32 %v13070_v41, %v8243_v35  ;;  %v12521_v35 = vadd.f32 %v13340_v2, %v1349_v18 }
 0x4b8   : > { %v8281_v36 = vmul.f32 %v13070_v41, %v8242_v42  ;;  %v8283_v48 = vmul.f32 %v13070_v41, %v8244_v56  ;;  %v7938_v17 = vmul.f32 %v13029_v50, %v7899_v0 }
 0x4b9   : > { %v8321_v53 = vadd.f32 %v13075_v54, %v8282_v8  ;;  %v7833_v38 = vmul.f32 %v12521_v35, %v13025_v29  ;;  %v1353_v35 = vld [vmem:[#allocation4 + $0xa0] sm:$0xff] }
 0x4ba   : > { %v8320_v55 = vadd.f32 %v13075_v54, %v8281_v36  ;;  %v8322_v57 = vadd.f32 %v13075_v54, %v8283_v48 }
 0x4bb   : > { %v13495_v63 = vmax.f32 %v8321_v53, 0.0 }
 0x4bc   : > { %v13493_v40 = vmax.f32 %v8320_v55, 0.0  ;;  %v13504_v27 = vmax.f32 %v8322_v57, 0.0 }
 0x4be   : > { %v12709_v32 = vpack.i.bf16 %v13495_v63, %v13493_v40 }
 0x4c0   : > { %12710 = vrot.lane.b32.xlu0 %v12709_v32, %s12817_s14 }
 0x4c4   : > { %8667 = vrot.lane.b32.xlu0 %v13493_v40, %s12816_s13 }
 0x4c8   : > { %8671 = vrot.lane.b32.xlu0 %v13504_v27, %s12816_s13 }
 0x51c   : > { %v13511_v24 = vpop.f32.mrb[28].mxu0  ;;  %v7804_v22 = vpop.f32.mrb[28].mxu1 }
 0x51d   : > { %v7724_v30 = vpop.f32.mrb[29].mxu0  ;;  %v12535_v42 = vadd.f32 %v7804_v22, %v1363_v13  ;;  %v7806_v36 = vpop.f32.mrb[29].mxu1  ;;  %v7871_v22 = vadd.f32 %v13027_v45, %v7833_v38 }
 0x51e   : > { %v12534_v12 = vadd.f32 %v7724_v30, %v1362_v43  ;;  %v7726_v8 = vpop.f32.mrb[30].mxu0  ;;  %v12536_v34 = vadd.f32 %v7806_v36, %v1364_v33  ;;  %v7808_v55 = vpop.f32.mrb[30].mxu1  ;;  %v7977_v33 = vadd.f32 %v13039_v26, %v7938_v17 }
 0x51f   : > { %v7727_v53 = vpop.f32.mrb[31].mxu0  ;;  %v7847_v56 = vmul.f32 %v12535_v42, %v13025_v29  ;;  %v7809_v48 = vpop.f32.mrb[31].mxu1  ;;  %v7903_v55 = vmax.f32 %v7871_v22, 0.0 }
 0x520   : > { %v7846_v32 = vmul.f32 %v12534_v12, %v13025_v29  ;;  %v7848_v57 = vmul.f32 %v12536_v34, %v13025_v29  ;;  %v8009_v34 = vmax.f32 %v7977_v33, 0.0 }
 0x521   : > { %v7885_v2 = vadd.f32 %v13027_v45, %v7847_v56 }
 0x522   : > { %v7884_v4 = vadd.f32 %v13027_v45, %v7846_v32  ;;  %v7886_v28 = vadd.f32 %v13027_v45, %v7848_v57  ;;  %v12525_v32 = vadd.f32 %v13393_v9, %v1353_v35 }
 0x523   : > { %v7917_v18 = vmax.f32 %v7885_v2, 0.0  ;;  %v8048_v2 = vmul.f32 %v13046_v44, %v8009_v34 }
 0x524   : > { %v7916_v13 = vmax.f32 %v7884_v4, 0.0  ;;  %v7918_v43 = vmax.f32 %v7886_v28, 0.0  ;;  %v7942_v4 = vmul.f32 %v13029_v50, %v7903_v55 }
 0x525   : > { %v7956_v30 = vmul.f32 %v13029_v50, %v7917_v18 }
 0x526   : > { %v7955_v42 = vmul.f32 %v13029_v50, %v7916_v13  ;;  %v7957_v0 = vmul.f32 %v13029_v50, %v7918_v43  ;;  %v7837_v13 = vmul.f32 %v12525_v32, %v13025_v29 }
 0x527   : > { %v7995_v12 = vadd.f32 %v13039_v26, %v7956_v30  ;;  %v8087_v30 = vadd.f32 %v13051_v58, %v8048_v2 }
 0x528   : > { %v7994_v36 = vadd.f32 %v13039_v26, %v7955_v42  ;;  %v7996_v8 = vadd.f32 %v13039_v26, %v7957_v0  ;;  %v7981_v42 = vadd.f32 %v13039_v26, %v7942_v4 }
 0x529   : > { %v8027_v53 = vmax.f32 %v7995_v12, 0.0  ;;  %v7875_v12 = vadd.f32 %v13027_v45, %v7837_v13 }
 0x52a   : > { %v8026_v56 = vmax.f32 %v7994_v36, 0.0  ;;  %v8028_v48 = vmax.f32 %v7996_v8, 0.0  ;;  %v1357_v8 = vld [vmem:[#allocation4 + $0xc0] sm:$0xff]  ;;  %v8013_v32 = vmax.f32 %v7981_v42, 0.0 }
 0x52b   : > { %v8066_v57 = vmul.f32 %v13046_v44, %v8027_v53 }
 0x52c   : > { %v8065_v17 = vmul.f32 %v13046_v44, %v8026_v56  ;;  %v8067_v38 = vmul.f32 %v13046_v44, %v8028_v48  ;;  %v8119_v56 = vmax.f32 %v8087_v30, 0.0 }
 0x52d   : > { %v8105_v28 = vadd.f32 %v13051_v58, %v8066_v57 }
 0x52e   : > { %v8104_v18 = vadd.f32 %v13051_v58, %v8065_v17  ;;  %v8106_v43 = vadd.f32 %v13051_v58, %v8067_v38  ;;  %v7907_v17 = vmax.f32 %v7875_v12, 0.0  ;;  %v12529_v38 = vadd.f32 %v13463_v1, %v1357_v8 }
 0x52f   : > { %v8137_v9 = vmax.f32 %v8105_v28, 0.0  ;;  %v8158_v13 = vmul.f32 %v13058_v11, %v8119_v56  ;;  %v1361_v56 = vld [vmem:[#allocation4 + $0xe0] sm:$0xff] }
 0x530   : > { %v8136_v33 = vmax.f32 %v8104_v18, 0.0  ;;  %v8138_v22 = vmax.f32 %v8106_v43, 0.0  ;;  %v8052_v43 = vmul.f32 %v13046_v44, %v8013_v32  ;;  %v7841_v30 = vmul.f32 %v12529_v38, %v13025_v29 }
 0x531   : > { %v8176_v35 = vmul.f32 %v13058_v11, %v8137_v9  ;;  %v8197_v12 = vadd.f32 %v13063_v21, %v8158_v13  ;;  %v12533_v38 = vadd.f32 %v13511_v24, %v1361_v56 }
 0x532   : > { %v8175_v0 = vmul.f32 %v13058_v11, %v8136_v33  ;;  %v8177_v36 = vmul.f32 %v13058_v11, %v8138_v22  ;;  %v7946_v22 = vmul.f32 %v13029_v50, %v7907_v17 }
 0x533   : > { %v8215_v55 = vadd.f32 %v13063_v21, %v8176_v35  ;;  %v8229_v32 = vmax.f32 %v8197_v12, 0.0  ;;  %v7845_v24 = vmul.f32 %v12533_v38, %v13025_v29  ;;  %v12818_v29 = vmov 0.0   ;;  %v8762_v12 = vld [vmem:[%s15657_s6 + $0x28] sm:$0xff] }
 0x534   : > { %v8214_v34 = vadd.f32 %v13063_v21, %v8175_v0  ;;  %v8216_v53 = vadd.f32 %v13063_v21, %v8177_v36  ;;  %v8091_v36 = vadd.f32 %v13051_v58, %v8052_v43  ;;  %v8760_v43 = vld [vmem:[%s15657_s6 + $0x18] sm:$0xff]  ;;  %8921 = vmatprep.mubr.f32.mxu0 %v12818_v29  ;;  %9052 = vmatprep.mubr.f32.mxu1 %v12818_v29  ;;  %v8766_v38 = vld [vmem:[%s15657_s6 + $0x48] sm:$0xff] }
 0x535   : > { %v8247_v57 = vmax.f32 %v8215_v55, 0.0  ;;  %v7879_v55 = vadd.f32 %v13027_v45, %v7841_v30 }
 0x536   : > { %v8246_v48 = vmax.f32 %v8214_v34, 0.0  ;;  %v8248_v2 = vmax.f32 %v8216_v53, 0.0  ;;  %v7985_v34 = vadd.f32 %v13039_v26, %v7946_v22 }
 0x537   : > { %v8286_v28 = vmul.f32 %v13070_v41, %v8247_v57  ;;  %v7911_v17 = vmax.f32 %v7879_v55, 0.0 }
 0x538   : > { %v8285_v4 = vmul.f32 %v13070_v41, %v8246_v48  ;;  %v8287_v18 = vmul.f32 %v13070_v41, %v8248_v2  ;;  %v8123_v48 = vmax.f32 %v8091_v36, 0.0  ;;  %v8017_v57 = vmax.f32 %v7985_v34, 0.0  ;;  %v8758_v2 = vld [vmem:[%s15657_s6 + $0x8] sm:$0xff] }
 0x539   : > { %v8325_v33 = vadd.f32 %v13075_v54, %v8286_v28  ;;  %v8268_v28 = vmul.f32 %v13070_v41, %v8229_v32  ;;  %v7950_v13 = vmul.f32 %v13029_v50, %v7911_v17 }
 0x53a   : > { %v8324_v9 = vadd.f32 %v13075_v54, %v8285_v4  ;;  %v8326_v1 = vadd.f32 %v13075_v54, %v8287_v18  ;;  %v8162_v4 = vmul.f32 %v13058_v11, %v8123_v48  ;;  %v8056_v18 = vmul.f32 %v13046_v44, %v8017_v57 }
 0x53b   : > { %v13562_v0 = vmax.f32 %v8325_v33, 0.0  ;;  %v8307_v33 = vadd.f32 %v13075_v54, %v8268_v28  ;;  %v7989_v30 = vadd.f32 %v13039_v26, %v7950_v13 }
 0x53c   : > { %v13560_v42 = vmax.f32 %v8324_v9, 0.0  ;;  %v13564_v35 = vmax.f32 %v8326_v1, 0.0  ;;  %v8201_v9 = vadd.f32 %v13063_v21, %v8162_v4  ;;  %v8095_v22 = vadd.f32 %v13051_v58, %v8056_v18 }
 0x53d   : > { %v7883_v1 = vadd.f32 %v13027_v45, %v7845_v24  ;;  %v13606_v36 = vmax.f32 %v8307_v33, 0.0  ;;  %v8021_v55 = vmax.f32 %v7989_v30, 0.0  ;;  %v8764_v45 = vld [vmem:[%s15657_s6 + $0x38] sm:$0xff] }
 0x53e   : > { %v12719_v8 = vpack.i.bf16 %v13562_v0, %v13560_v42  ;;  %v12664_v53 = vpack.i.bf16 %v13564_v35, %v13255_v60  ;;  %v8127_v34 = vmax.f32 %v8095_v22, 0.0 }
 0x53f   : > { %v12674_v56 = vpack.i.bf16 %v13606_v36, %v13279_v20  ;;  %v8060_v48 = vmul.f32 %v13046_v44, %v8021_v55 }
 0x540   : > { %12720 = vrot.lane.b32.xlu0 %v12719_v8, %s12817_s14  ;;  %12665 = vrot.lane.b32.xlu1 %v12664_v53, %s12817_s14  ;;  %v8233_v8 = vmax.f32 %v8201_v9, 0.0  ;;  %v7915_v53 = vmax.f32 %v7883_v1, 0.0  ;;  %v8166_v32 = vmul.f32 %v13058_v11, %v8127_v34 }
 0x541   : > { %v8099_v4 = vadd.f32 %v13051_v58, %v8060_v48 }
 0x542   : > { %v7954_v57 = vmul.f32 %v13029_v50, %v7915_v53  ;;  %v8272_v17 = vmul.f32 %v13070_v41, %v8233_v8 }
 0x543   : > { %v8131_v13 = vmax.f32 %v8099_v4, 0.0  ;;  %v8763_v4 = vld [vmem:[%s15657_s6 + $0x30] sm:$0xff] }
 0x544   : > { %8677 = vrot.lane.b32.xlu0 %v13562_v0, %s12816_s13  ;;  %8623 = vrot.lane.b32.xlu1 %v13093_v25, %s12816_s13  ;;  %v7993_v28 = vadd.f32 %v13039_v26, %v7954_v57  ;;  %v8311_v18 = vadd.f32 %v13075_v54, %v8272_v17 }
 0x545   : > { %v8170_v9 = vmul.f32 %v13058_v11, %v8131_v13  ;;  %v8364_v13 = vadd.s32 512, %v13130_v6 }
 0x546   : > { %v8025_v24 = vmax.f32 %v7993_v28, 0.0  ;;  %v8765_v28 = vld [vmem:[%s15657_s6 + $0x40] sm:$0xff] }
 0x547   : > { %v8209_v30 = vadd.f32 %v13063_v21, %v8170_v9  ;;  %v8366_v9 = vadd.s32 768, %v13130_v6 }
 0x548   : > { %8775 = vperm.xlu0 %12637, %v8758_v2   ;;  %8627 = vrot.lane.b32.xlu1 %v13157_v7, %s12816_s13  ;;  %v8205_v2 = vadd.f32 %v13063_v21, %v8166_v32  ;;  %v8064_v33 = vmul.f32 %v13046_v44, %v8025_v24 }
 0x549   : > { %v8241_v8 = vmax.f32 %v8209_v30, 0.0 }
 0x54a   : > { %v8237_v50 = vmax.f32 %v8205_v2, 0.0  ;;  %v8103_v1 = vadd.f32 %v13051_v58, %v8064_v33  ;;  %v8761_v2 = vld [vmem:[%s15657_s6 + $0x20] sm:$0xff]  ;;  %v8396_v33 = vand.u32 255, %v8364_v13 }
 0x54c   : > { %8785 = vperm.xlu0 %12637, %v8760_v43   ;;  %8679 = vrot.lane.b32.xlu1 %v13564_v35, %s12816_s13  ;;  %v13629_v43 = vmax.f32 %v8311_v18, 0.0  ;;  %v8276_v22 = vmul.f32 %v13070_v41, %v8237_v50  ;;  %v8135_v34 = vmax.f32 %v8103_v1, 0.0  ;;  %v8767_v18 = vld [vmem:[%s15657_s6 + $0x50] sm:$0x3]  ;;  %v13699_v50 = vpop.permute.xlu0 %12660  ;;  %vm8428_vm2 = vcmp.eq.s32.totalorder %v8396_v33, 0  ;;  %v15700_v33 = vld [vmem:[#allocation8_spill] sm:$0xff] }
 0x54d   : > { %v12663_v30 = vunpack.i.h.bf16 %v13699_v50  ;;  %v12662_v1 = vunpack.i.l.bf16 %v13699_v50 }
 0x54e   : > { %v12684_v26 = vpack.i.bf16 %v13629_v43, %v13328_v3  ;;  %v8174_v44 = vmul.f32 %v13058_v11, %v8135_v34  ;;  %v8365_v34 = vadd.s32 640, %v13130_v6 }
 0x54f   : > { %v13742_v51 = vsel %vm8520_vm0, %v12662_v1, %v12663_v30 }
 0x550   : > { %8795 = vperm.xlu0 %12637, %v8762_v12   ;;  %8633 = vrot.lane.b32.xlu1 %v13243_v61, %s12816_s13  ;;  %v8315_v12 = vadd.f32 %v13075_v54, %v8276_v22  ;;  %v13702_v24 = vpop.permute.xlu0 %8625  ;;  %v8398_v22 = vand.u32 255, %v8366_v9 }
 0x552   : > { %v13644_v55 = vmax.f32 %v8315_v12, 0.0  ;;  %vm8430_vm4 = vcmp.eq.s32.totalorder %v8398_v22, 0  ;;  %v15701_v22 = vld [vmem:[#allocation9_spill] sm:$0xff] }
 0x554   : > { %8805 = vperm.xlu0 %12637, %v8764_v45   ;;  %12675 = vrot.lane.b32.xlu1 %v12674_v56, %s12817_s14  ;;  %v12694_v53 = vpack.i.bf16 %v13644_v55, %v13381_v16  ;;  %v8280_v45 = vmul.f32 %v13070_v41, %v8241_v8  ;;  %v8213_v56 = vadd.f32 %v13063_v21, %v8174_v44  ;;  %v13708_v12 = vpop.permute.xlu0 %8629 }
 0x556   : > { %v8319_v58 = vadd.f32 %v13075_v54, %v8280_v45  ;;  %v8245_v48 = vmax.f32 %v8213_v56, 0.0  ;;  %v8363_v45 = vadd.s32 384, %v13130_v6 }
 0x558   : > { %8815 = vperm.xlu0 %12637, %v8766_v38   ;;  %8637 = vrot.lane.b32.xlu1 %v13265_v37, %s12816_s13  ;;  %v13657_v32 = vmax.f32 %v8319_v58, 0.0  ;;  %v8284_v57 = vmul.f32 %v13070_v41, %v8245_v48  ;;  %v8757_v41 = vld [vmem:[%s15657_s6] sm:$0xff] }
 0x55a   : > { %v12704_v11 = vpack.i.bf16 %v13657_v32, %v13457_v62  ;;  %v8323_v17 = vadd.f32 %v13075_v54, %v8284_v57  ;;  %v8759_v54 = vld [vmem:[%s15657_s6 + $0x10] sm:$0xff] }
 0x55c   : > { %8641 = vrot.lane.b32.xlu1 %v13606_v36, %s12816_s13  ;;  %v13668_v21 = vmax.f32 %v8323_v17, 0.0 }
 0x55e   : > { %v12714_v38 = vpack.i.bf16 %v13668_v21, %v13504_v27 }
 0x560   : > { %12685 = vrot.lane.b32.xlu1 %v12684_v26, %s12817_s14  ;;  %v8392_v26 = vand.u32 255, %v13130_v6 }
 0x562   : > { %vm8424_vm3 = vcmp.eq.s32.totalorder %v8392_v26, 0 }
 0x564   : > { %8645 = vrot.lane.b32.xlu1 %v13319_v47, %s12816_s13 }
 0x568   : > { %8649 = vrot.lane.b32.xlu1 %v13629_v43, %s12816_s13 }
 0x56c   : > { %12695 = vrot.lane.b32.xlu1 %v12694_v53, %s12817_s14 }
 0x570   : > { %8653 = vrot.lane.b32.xlu1 %v13372_v5, %s12816_s13 }
 0x574   : > { %8657 = vrot.lane.b32.xlu1 %v13644_v55, %s12816_s13 }
 0x578   : > { %12705 = vrot.lane.b32.xlu1 %v12704_v11, %s12817_s14  ;;  %v8361_v11 = vadd.s32 128, %v13130_v6 }
 0x57c   : > { %8661 = vrot.lane.b32.xlu1 %v13425_v46, %s12816_s13 }
 0x580   : > { %8665 = vrot.lane.b32.xlu1 %v13657_v32, %s12816_s13 }
 0x584   : > { %12715 = vrot.lane.b32.xlu1 %v12714_v38, %s12817_s14 }
 0x588   : > { %8669 = vrot.lane.b32.xlu1 %v13495_v63, %s12816_s13 }
 0x58c   : > { %8673 = vrot.lane.b32.xlu1 %v13668_v21, %s12816_s13 }
 0x590   : > { %8675 = vrot.lane.b32.xlu1 %v13560_v42, %s12816_s13 }
 0x594   : > { %8770 = vperm.xlu1 %12638, %v8757_v41   ;;  %v13747_v41 = vpop.permute.xlu0 %8631 }
 0x598   : > { %8780 = vperm.xlu1 %12638, %v8759_v54   ;;  %v8395_v54 = vand.u32 255, %v8363_v45  ;;  %v15704_v45 = vld [vmem:[#allocation12_spill] sm:$0xff] }
 0x59a   : > { %vm13768_vm7 = vcmp.eq.s32.totalorder %v8395_v54, 255 }
 0x59c   : > { %8790 = vperm.xlu1 %12638, %v8761_v2  }
 0x5a0   : > { %8800 = vperm.xlu1 %12638, %v8763_v4   ;;  %v8393_v4 = vand.u32 255, %v8361_v11 }
 0x5a2   : > { %vm13781_vm8 = vcmp.eq.s32.totalorder %v8393_v4, 255 }
 0x5a4   : > { %8810 = vperm.xlu1 %12638, %v8765_v28   ;;  %v8367_v28 = vadd.s32 896, %v13130_v6 }
 0x5a8   : > { %8820 = vperm.xlu1 %12638, %v8767_v18   ;;  %v12653_v18 = vunpack.i.h.bf16 %v13206_v10 }
 0x5b2   : > { %v13710_v8 = vpop.permute.xlu1 %12665 }
 0x5b3   : > { %v15679_v44 = vunpack.i.h.bf16 %v13710_v8  ;;  %v12667_v53 = vunpack.i.l.bf16 %v13710_v8 }
 0x5b5   : > { %v13722_v58 = vsel %vm8520_vm0, %v15679_v44, %v12642_v14  ;;  %v8546_v56 = vsel %vm8520_vm0, %v12658_v39, %v12667_v53  ;;  %v13730_v48 = vsel %vm8520_vm0, %v12667_v53, %v12662_v1  ;;  %v8397_v14 = vand.u32 255, %v8365_v34 }
 0x5b6   : > { %v13734_v57 = vsel %vm8428_vm2, %v8546_v56, %v13230_v52  ;;  %v8624_v23 = vpop.permute.xlu1 %8623  ;;  %v8553_v17 = vsel %vm8424_vm3, %v13149_v15, %v13722_v58  ;;  %v13750_v52 = vsel %vm8430_vm4, %v13742_v51, %v8546_v56  ;;  %v12285_v15 = vpack.c.bf16 %v13087_v19, %v13452_v31 }
 0x5b7   : > { %v12283_v39 = vpack.c.bf16 %v13239_v59, %v8553_v17  ;;  %v12299_v38 = vpack.c.bf16 %v13734_v57, %v13239_v59  ;;  %v12301_v2 = vpack.c.bf16 %v13093_v25, %v13730_v48  ;;  %v12652_v59 = vunpack.i.l.bf16 %v13206_v10 }
 0x5b8   : > { %vm8590_vm6 = vcmp.eq.s32.totalorder %v8397_v14, 255  ;;  %v8368_v19 = vadd.s32 1024, %v13130_v6  ;;  %v12287_v26 = vpack.c.bf16 %v15700_v33, %v13734_v57  ;;  %v12303_v1 = vpack.c.bf16 %v15701_v22, %v13750_v52 }
 0x5b9   : > { %12284 = vmatpush1.bf16.msra.mxu0 %v12283_v39  ;;  %12300 = vmatpush1.bf16.msra.mxu1 %v12299_v38  ;;  %v8709_v34 = vsel %vm8681_vm5, %v8624_v23, %v13702_v24  ;;  %v12289_v53 = vpack.c.bf16 %v13157_v7, %v13093_v25  ;;  %v12305_v56 = vpack.c.bf16 %v15704_v45, %v13157_v7  ;;  %v8399_v14 = vand.u32 255, %v8367_v28  ;;  %v12671_v39 = vpop.permute.xlu0 %12670  ;;  %v15707_v25 = vld [vmem:[#allocation11_spill] sm:$0xff] }
 0x5ba   : > { %v8628_v13 = vpop.permute.xlu1 %8627  ;;  %12286 = vmatprep.subr.bf16.mxu0 %v12285_v15  ;;  %12302 = vmatprep.subr.bf16.mxu1 %v12301_v2  ;;  %v8711_v38 = vsel %vm8681_vm5, %v12652_v59, %v12653_v18  ;;  %v12291_v15 = vpack.c.bf16 %v15707_v25, %v15701_v22  ;;  %v12307_v2 = vpack.c.bf16 %v13255_v60, %v15707_v25  ;;  %v8400_v33 = vand.u32 255, %v8368_v19 }
 0x5bb   : > { %v8707_v9 = vsel %vm8681_vm5, %v8628_v13, %v13708_v12  ;;  %v8717_v4 = vsel %vm13768_vm7, %v8711_v38, %v8709_v34  ;;  %v13807_v22 = vsel %vm8681_vm5, %v13702_v24, %v8628_v13  ;;  %vm8592_vm9 = vcmp.eq.s32.totalorder %v8399_v14, 255 }
 0x5bc   : > { %v13779_v11 = vsel %vm8590_vm6, %v8709_v34, %v8707_v9  ;;  %v12673_v34 = vunpack.i.h.bf16 %v12671_v39  ;;  %vm8432_vm10 = vcmp.eq.s32.totalorder %v8400_v33, 0  ;;  %v13843_v33 = vld [vmem:[%s15656_s5] sm:$0xff] }
 0x5bd   : > { %12288 = vmatpush1.bf16.msra.mxu0 %v12287_v26  ;;  %12304 = vmatpush1.bf16.msra.mxu1 %v12303_v1  ;;  %v15708_v26 = vld [vmem:[#allocation10_spill] sm:$0xff]  ;;  %v8370_v1 = vadd.s32 1280, %v13130_v6  ;;  %v12309_v10 = vpack.c.bf16 %v13779_v11, %v8717_v4 }
 0x5be   : > { %v13787_v54 = vpop.permute.xlu1 %8679  ;;  %12290 = vmatprep.subr.bf16.mxu0 %v12289_v53  ;;  %12306 = vmatprep.subr.bf16.mxu1 %v12305_v56  ;;  %v8710_v53 = vsel %vm8681_vm5, %v12653_v18, %v8624_v23  ;;  %v12672_v56 = vunpack.i.l.bf16 %v12671_v39  ;;  %v8712_v23 = vsel %vm8681_vm5, %v15708_v26, %v12652_v59  ;;  %v8369_v59 = vadd.s32 1152, %v13130_v6 }
 0x5bf   : > { %v13799_v28 = vsel %vm8681_vm5, %v13787_v54, %v15708_v26  ;;  %v12295_v24 = vpack.c.bf16 %v8710_v53, %v8712_v23  ;;  %v12311_v13 = vpack.c.bf16 %v13807_v22, %v8710_v53  ;;  %v8402_v39 = vand.u32 255, %v8370_v1  ;;  %v8636_v1 = vpop.permute.xlu0 %8635 }
 0x5c0   : > { %v8715_v19 = vsel %vm13781_vm8, %v13799_v28, %v8711_v38  ;;  %v8542_v14 = vsel %vm8520_vm0, %v12672_v56, %v12673_v34  ;;  %v8401_v53 = vand.u32 255, %v8369_v59  ;;  %v8371_v23 = vadd.s32 1408, %v13130_v6 }
 0x5c1   : > { %12292 = vmatpush1.bf16.msra.mxu0 %v12291_v15  ;;  %12308 = vmatpush1.bf16.msra.mxu1 %v12307_v2  ;;  %v12293_v44 = vpack.c.bf16 %v8717_v4, %v8715_v19  ;;  %v13846_v4 = vsel %vm8432_vm10, %v8542_v14, %v13742_v51  ;;  %vm13848_vm12 = vcmp.eq.s32.totalorder %v8402_v39, 0  ;;  %v12315_v19 = vpack.c.bf16 %v13750_v52, %v13734_v57  ;;  %v13896_v57 = vld [vmem:[%s15656_s5 + $0x8] sm:$0xff] }
 0x5c2   : > { %v13816_v18 = vpop.permute.xlu1 %8633  ;;  %12310 = vmatprep.subr.bf16.mxu1 %v12309_v10  ;;  %v12331_v10 = vpack.c.bf16 %v13846_v4, %v13750_v52  ;;  %vm8594_vm13 = vcmp.eq.s32.totalorder %v8401_v53, 255  ;;  %v15711_v39 = vld [vmem:[#allocation13_spill] sm:$0xff]  ;;  %v8403_v26 = vand.u32 255, %v8371_v23  ;;  %v14041_v23 = vld [vmem:[%s15656_s5 + $0x40] sm:$0xff] }
 0x5c3   : > { %v8705_v17 = vsel %vm8681_vm5, %v13747_v41, %v13816_v18  ;;  %12294 = vmatprep.subr.bf16.mxu0 %v12293_v44  ;;  %v13836_v44 = vsel %vm8681_vm5, %v13708_v12, %v13747_v41  ;;  %v12313_v12 = vpack.c.bf16 %v13730_v48, %v13452_v31  ;;  %v13858_v41 = vsel %vm8520_vm0, %v12663_v30, %v12672_v56 }
 0x5c4   : > { %v13823_v38 = vsel %vm8592_vm9, %v8707_v9, %v8705_v17  ;;  %v12329_v31 = vpack.c.bf16 %v13858_v41, %v13730_v48  ;;  %v12317_v56 = vpack.c.bf16 %v13157_v7, %v13858_v41  ;;  %v12319_v7 = vpack.c.bf16 %v15707_v25, %v13846_v4  ;;  %v13921_v25 = vld [vmem:[%s15656_s5 + $0x10] sm:$0xff] }
 0x5c5   : > { %12296 = vmatpush1.bf16.msra.mxu0 %v12295_v24  ;;  %12312 = vmatpush1.bf16.msra.mxu1 %v12311_v13  ;;  %v8640_v13 = vpop.permute.xlu0 %8639  ;;  %v12337_v59 = vpack.c.bf16 %v13279_v20, %v15711_v39  ;;  %vm8596_vm14 = vcmp.eq.s32.totalorder %v8403_v26, 255 }
 0x5c6   : > { %v13828_v15 = vpop.permute.xlu1 %12675  ;;  %8873 = vmatprep.subr.mxu0 %v13779_v11  ;;  %9004 = vmatprep.subr.mxu1 %v13823_v38 }
 0x5c7   : > { %v12678_v9 = vunpack.i.h.bf16 %v13828_v15  ;;  %v12677_v2 = vunpack.i.l.bf16 %v13828_v15 }
 0x5c9   : > { %v13864_v51 = vsel %vm8520_vm0, %v12677_v2, %v12678_v9  ;;  %8874 = vmatpush1.msra.mxu0 %v13807_v22  ;;  %9005 = vmatpush1.msra.mxu1 %v13836_v44  ;;  %v13872_v50 = vsel %vm8520_vm0, %v12673_v34, %v12677_v2  ;;  %v13931_v53 = vpop.permute.xlu0 %12680 }
 0x5ca   : > { %v13874_v30 = vpop.permute.xlu1 %8637  ;;  %12124 = vmatmul.mubr.msk.f32.vlgmr.msra.gmra.mrb[32].mxu0 %vm8823_vm11, %v13843_v33  ;;  %12135 = vmatmul.mubr.msk.f32.vlgmr.msra.gmra.mrb[32].mxu1 %vm8823_vm11, %v13843_v33  ;;  %v12333_v48 = vpack.c.bf16 %v15704_v45, %v13872_v50  ;;  %v13889_v34 = vsel %vm13848_vm12, %v13864_v51, %v8542_v14  ;;  %v12321_v14 = vpack.c.bf16 %v15711_v39, %v15704_v45 }
 0x5cb   : > { %12314 = vmatprep.subr.bf16.mxu0 %v12313_v12  ;;  %12330 = vmatprep.subr.bf16.mxu1 %v12329_v31  ;;  %v8703_v52 = vsel %vm8681_vm5, %v8636_v1, %v13874_v30  ;;  %v12335_v24 = vpack.c.bf16 %v13255_v60, %v13889_v34  ;;  %v12323_v45 = vpack.c.bf16 %v13243_v61, %v13255_v60 }
 0x5cc   : > { %12316 = vmatpush1.bf16.msra.mxu0 %v12315_v19  ;;  %12332 = vmatpush1.bf16.msra.mxu1 %v12331_v10  ;;  %v13916_v2 = vsel %vm8594_vm13, %v8705_v17, %v8703_v52  ;;  %v12339_v17 = vpack.c.bf16 %v13265_v37, %v13243_v61  ;;  %v13936_v31 = vsel %vm8681_vm5, %v13816_v18, %v8636_v1  ;;  %v13949_v10 = vld [vmem:[%s15656_s5 + $0x18] sm:$0xff] }
 0x5cd   : > { %12318 = vmatprep.subr.bf16.mxu0 %v12317_v56  ;;  %12334 = vmatprep.subr.bf16.mxu1 %v12333_v48  ;;  %v12325_v19 = vpack.c.bf16 %v13823_v38, %v13779_v11  ;;  %v12341_v60 = vpack.c.bf16 %v13916_v2, %v13823_v38  ;;  %v12682_v11 = vunpack.i.l.bf16 %v13931_v53  ;;  %v12327_v38 = vpack.c.bf16 %v13836_v44, %v13807_v22  ;;  %v13973_v22 = vld [vmem:[%s15656_s5 + $0x20] sm:$0xff] }
 0x5ce   : > { %8927 = vmatprep.mubr.f32.mxu0 %v12818_v29  ;;  %9058 = vmatprep.mubr.f32.mxu1 %v12818_v29  ;;  %v13923_v12 = vpop.permute.xlu1 %8641  ;;  %v12343_v1 = vpack.c.bf16 %v13936_v31, %v13836_v44  ;;  %v13990_v56 = vsel %vm8681_vm5, %v13874_v30, %v8640_v13  ;;  %v12345_v15 = vpack.c.bf16 %v13872_v50, %v13858_v41  ;;  %v14005_v30 = vld [vmem:[%s15656_s5 + $0x28] sm:$0xff]  ;;  %v14018_v41 = vld [vmem:[%s15656_s5 + $0x30] sm:$0xff] }
 0x5cf   : > { %12125 = vmatmul.mubr.msk.f32.gmra.mrb[34].mxu0 %vm8823_vm11, %v13896_v57  ;;  %12136 = vmatmul.mubr.msk.f32.gmra.mrb[34].mxu1 %vm8823_vm11, %v13896_v57  ;;  %v13954_v18 = vsel %vm8681_vm5, %v8640_v13, %v13923_v12  ;;  %v13981_v44 = vsel %vm8520_vm0, %v12678_v9, %v12682_v11  ;;  %v14053_v13 = vld [vmem:[%s15656_s5 + $0x48] sm:$0xff] }
 0x5d0   : > { %12320 = vmatpush1.bf16.msra.mxu0 %v12319_v7  ;;  %12336 = vmatpush1.bf16.msra.mxu1 %v12335_v24  ;;  %v13968_v48 = vsel %vm8596_vm14, %v8703_v52, %v13954_v18  ;;  %v12361_v9 = vpack.c.bf16 %v13981_v44, %v13872_v50  ;;  %v14029_v50 = vld [vmem:[%s15656_s5 + $0x38] sm:$0xff]  ;;  %v8372_v52 = vadd.s32 1536, %v13130_v6  ;;  %v8374_v24 = vadd.s32 1792, %v13130_v6 }
 0x5d1   : > { %12322 = vmatprep.subr.bf16.mxu0 %v12321_v14  ;;  %12338 = vmatprep.subr.bf16.mxu1 %v12337_v59  ;;  %v12683_v59 = vunpack.i.h.bf16 %v13931_v53  ;;  %v8644_v53 = vpop.permute.xlu0 %8643 }
 0x5d2   : > { %8933 = vmatprep.mubr.f32.mxu0 %v12818_v29  ;;  %9064 = vmatprep.mubr.f32.mxu1 %v12818_v29  ;;  %v8404_v7 = vand.u32 255, %v8372_v52  ;;  %v14055_v14 = vpop.permute.xlu1 %12685  ;;  %v8406_v26 = vand.u32 255, %v8374_v24  ;;  %v12347_v52 = vpack.c.bf16 %v13889_v34, %v13846_v4 }
 0x5d3   : > { %12126 = vmatmul.mubr.msk.f32.gmra.mrb[36].mxu0 %vm8823_vm11, %v13921_v25  ;;  %12137 = vmatmul.mubr.msk.f32.gmra.mrb[36].mxu1 %vm8823_vm11, %v13921_v25 }
 0x5d4   : > { %12324 = vmatpush1.bf16.msra.mxu0 %v12323_v45  ;;  %12340 = vmatpush1.bf16.msra.mxu1 %v12339_v17  ;;  %vm8436_vm15 = vcmp.eq.s32.totalorder %v8404_v7, 0  ;;  %v15680_v45 = vunpack.i.h.bf16 %v14055_v14  ;;  %v12687_v17 = vunpack.i.l.bf16 %v14055_v14  ;;  %vm8438_vm1 = vcmp.eq.s32.totalorder %v8406_v26, 0 }
 0x5d5   : > { %12326 = vmatprep.subr.bf16.mxu0 %v12325_v19  ;;  %12342 = vmatprep.subr.bf16.mxu1 %v12341_v60  ;;  %v14069_v19 = vld [vmem:[%s15656_s5 + $0x50] sm:$0x3]  ;;  %v8373_v60 = vadd.s32 1664, %v13130_v6 }
 0x5d6   : > { %8939 = vmatprep.mubr.f32.mxu0 %v12818_v29  ;;  %9070 = vmatprep.mubr.f32.mxu1 %v12818_v29 }
 0x5d7   : > { %12127 = vmatmul.mubr.msk.f32.gmra.mrb[38].mxu0 %vm8823_vm11, %v13949_v10  ;;  %12138 = vmatmul.mubr.msk.f32.gmra.mrb[38].mxu1 %vm8823_vm11, %v13949_v10 }
 0x5d8   : > { %12328 = vmatpush1.bf16.msra.mxu0 %v12327_v38  ;;  %12344 = vmatpush1.bf16.msra.mxu1 %v12343_v1  ;;  %v8538_v38 = vsel %vm8520_vm0, %v12682_v11, %v12683_v59  ;;  %v8405_v11 = vand.u32 255, %v8373_v60  ;;  %v8648_v60 = vpop.permute.xlu0 %8647 }
 0x5d9   : > { %9135 = vmatprep.subr.mxu0 %v13916_v2  ;;  %9266 = vmatprep.subr.mxu1 %v13968_v48  ;;  %v14077_v1 = vsel %vm8436_vm15, %v8538_v38, %v13864_v51  ;;  %v14093_v51 = vsel %vm8520_vm0, %v12683_v59, %v12687_v17  ;;  %v12349_v59 = vpack.c.bf16 %v15711_v39, %v13981_v44 }
 0x5da   : > { %8945 = vmatprep.mubr.f32.mxu0 %v12818_v29  ;;  %9076 = vmatprep.mubr.f32.mxu1 %v12818_v29  ;;  %v12363_v7 = vpack.c.bf16 %v14077_v1, %v13889_v34  ;;  %v12365_v26 = vpack.c.bf16 %v13279_v20, %v14093_v51  ;;  %vm8598_vm2 = vcmp.eq.s32.totalorder %v8405_v11, 255  ;;  %v8375_v34 = vadd.s32 1920, %v13130_v6 }
 0x5db   : > { %12128 = vmatmul.mubr.msk.f32.gmra.mrb[40].mxu0 %vm8823_vm11, %v13973_v22  ;;  %12139 = vmatmul.mubr.msk.f32.gmra.mrb[40].mxu1 %vm8823_vm11, %v13973_v22  ;;  %v12351_v39 = vpack.c.bf16 %v13243_v61, %v14077_v1 }
 0x5dc   : > { %9136 = vmatpush1.msra.mxu0 %v13936_v31  ;;  %9267 = vmatpush1.msra.mxu1 %v13990_v56  ;;  %v8407_v61 = vand.u32 255, %v8375_v34  ;;  %v12357_v34 = vpack.c.bf16 %v13968_v48, %v13916_v2 }
 0x5dd   : > { %12346 = vmatprep.subr.bf16.mxu0 %v12345_v15  ;;  %12362 = vmatprep.subr.bf16.mxu1 %v12361_v9  ;;  %v14087_v15 = vsel %vm8520_vm0, %v12687_v17, %v15680_v45  ;;  %v14095_v9 = vpop.permute.xlu1 %8645  ;;  %v14141_v45 = vpop.permute.xlu0 %12690 }
 0x5de   : > { %8951 = vmatprep.mubr.f32.mxu0 %v12818_v29  ;;  %9082 = vmatprep.mubr.f32.mxu1 %v12818_v29  ;;  %v14102_v24 = vsel %vm8438_vm1, %v14087_v15, %v8538_v38  ;;  %v8699_v4 = vsel %vm8681_vm5, %v8644_v53, %v14095_v9  ;;  %v15712_v38 = vld [vmem:[#allocation14_spill] sm:$0xff]  ;;  %vm8600_vm3 = vcmp.eq.s32.totalorder %v8407_v61, 255 }
 0x5df   : > { %12129 = vmatmul.mubr.msk.f32.gmra.mrb[42].mxu0 %vm8823_vm11, %v14005_v30  ;;  %12140 = vmatmul.mubr.msk.f32.gmra.mrb[42].mxu1 %vm8823_vm11, %v14005_v30  ;;  %v12367_v17 = vpack.c.bf16 %v13265_v37, %v14102_v24  ;;  %v12353_v11 = vpack.c.bf16 %v15712_v38, %v13279_v20  ;;  %v12355_v20 = vpack.c.bf16 %v13606_v36, %v13265_v37 }
 0x5e0   : > { %8957 = vmatprep.mubr.f32.mxu0 %v12818_v29  ;;  %9088 = vmatprep.mubr.f32.mxu1 %v12818_v29 }
 0x5e3   : > { %12130 = vmatmul.mubr.msk.f32.gmra.mrb[44].mxu0 %vm8823_vm11, %v14018_v41  ;;  %12141 = vmatmul.mubr.msk.f32.gmra.mrb[44].mxu1 %vm8823_vm11, %v14018_v41 }
 0x5e4   : > { %8963 = vmatprep.mubr.f32.mxu0 %v12818_v29  ;;  %9094 = vmatprep.mubr.f32.mxu1 %v12818_v29 }
 0x5e7   : > { %12131 = vmatmul.mubr.msk.f32.gmra.mrb[46].mxu0 %vm8823_vm11, %v14029_v50  ;;  %12142 = vmatmul.mubr.msk.f32.gmra.mrb[46].mxu1 %vm8823_vm11, %v14029_v50 }
 0x5e8   : > { %8969 = vmatprep.mubr.f32.mxu0 %v12818_v29  ;;  %9100 = vmatprep.mubr.f32.mxu1 %v12818_v29 }
 0x5eb   : > { %12132 = vmatmul.mubr.msk.f32.gmra.mrb[48].mxu0 %vm8823_vm11, %v14041_v23  ;;  %12143 = vmatmul.mubr.msk.f32.gmra.mrb[48].mxu1 %vm8823_vm11, %v14041_v23 }
 0x5ec   : > { %8975 = vmatprep.mubr.f32.mxu0 %v12818_v29  ;;  %9106 = vmatprep.mubr.f32.mxu1 %v12818_v29 }
 0x5ef   : > { %12133 = vmatmul.mubr.msk.f32.gmra.mrb[50].mxu0 %vm8823_vm11, %v14053_v13  ;;  %12144 = vmatmul.mubr.msk.f32.gmra.mrb[50].mxu1 %vm8823_vm11, %v14053_v13 }
 0x5f0   : > { %8981 = vmatprep.mubr.f32.mxu0 %v12818_v29  ;;  %9112 = vmatprep.mubr.f32.mxu1 %v12818_v29 }
 0x5f3   : > { %12134 = vmatmul.mubr.msk.f32.gmra.mrb[52].mxu0 %vm8823_vm11, %v14069_v19  ;;  %12145 = vmatmul.mubr.msk.f32.gmra.mrb[52].mxu1 %vm8823_vm11, %v14069_v19 }
 0x5f4   : > { %9183 = vmatprep.mubr.f32.mxu0 %v12818_v29  ;;  %9314 = vmatprep.mubr.f32.mxu1 %v12818_v29 }
 0x5f7   : > { %12146 = vmatmul.mubr.msk.f32.vlgmr.msra.gmra.mrb[54].mxu0 %vm8823_vm11, %v13843_v33  ;;  %12157 = vmatmul.mubr.msk.f32.vlgmr.msra.gmra.mrb[54].mxu1 %vm8823_vm11, %v13843_v33 }
 0x5f8   : > { %12348 = vmatpush1.bf16.msra.mxu0 %v12347_v52  ;;  %12364 = vmatpush1.bf16.msra.mxu1 %v12363_v7  ;;  %v12369_v52 = vpack.c.bf16 %v13328_v3, %v15712_v38  ;;  %v14131_v7 = vsel %vm8598_vm2, %v13954_v18, %v8699_v4  ;;  %v14146_v18 = vsel %vm8681_vm5, %v13923_v12, %v8644_v53  ;;  %v12692_v12 = vunpack.i.l.bf16 %v14141_v45 }
 0x5f9   : > { %12350 = vmatprep.subr.bf16.mxu0 %v12349_v59  ;;  %12366 = vmatprep.subr.bf16.mxu1 %v12365_v26  ;;  %v14133_v59 = vpop.permute.xlu1 %8649  ;;  %v12371_v26 = vpack.c.bf16 %v13319_v47, %v13606_v36  ;;  %v12373_v37 = vpack.c.bf16 %v14131_v7, %v13968_v48  ;;  %v12359_v53 = vpack.c.bf16 %v13990_v56, %v13936_v31  ;;  %v15713_v31 = vunpack.i.h.bf16 %v14055_v14 }
 0x5fa   : > { %9189 = vmatprep.mubr.f32.mxu0 %v12818_v29  ;;  %9320 = vmatprep.mubr.f32.mxu1 %v12818_v29  ;;  %v12375_v2 = vpack.c.bf16 %v14146_v18, %v13990_v56  ;;  %v12377_v14 = vpack.c.bf16 %v14093_v51, %v13981_v44  ;;  %v8376_v44 = vadd.s32 2048, %v13130_v6 }
 0x5fb   : > { %12147 = vmatmul.mubr.msk.f32.gmra.mrb[56].mxu0 %vm8823_vm11, %v13896_v57  ;;  %12158 = vmatmul.mubr.msk.f32.gmra.mrb[56].mxu1 %vm8823_vm11, %v13896_v57  ;;  %v14179_v56 = vsel %vm8520_vm0, %v15713_v31, %v12692_v12  ;;  %v12379_v31 = vpack.c.bf16 %v14102_v24, %v14077_v1 }
 0x5fc   : > { %12352 = vmatpush1.bf16.msra.mxu0 %v12351_v39  ;;  %12368 = vmatpush1.bf16.msra.mxu1 %v12367_v17  ;;  %v14159_v39 = vsel %vm8681_vm5, %v8648_v60, %v14133_v59  ;;  %v14188_v17 = vsel %vm8681_vm5, %v14095_v9, %v8648_v60  ;;  %v8378_v9 = vadd.s32 2304, %v13130_v6 }
 0x5fd   : > { %12354 = vmatprep.subr.bf16.mxu0 %v12353_v11  ;;  %12370 = vmatprep.subr.bf16.mxu1 %v12369_v52  ;;  %v14173_v48 = vsel %vm8600_vm3, %v8699_v4, %v14159_v39  ;;  %v12393_v4 = vpack.c.bf16 %v14179_v56, %v14093_v51  ;;  %v8408_v51 = vand.u32 255, %v8376_v44  ;;  %v14228_v60 = vpop.permute.xlu1 %12695  ;;  %v12693_v11 = vunpack.i.h.bf16 %v14141_v45 }
 0x5fe   : > { %9195 = vmatprep.mubr.f32.mxu0 %v12818_v29  ;;  %9326 = vmatprep.mubr.f32.mxu1 %v12818_v29  ;;  %v8410_v52 = vand.u32 255, %v8378_v9  ;;  %v12698_v61 = vunpack.i.h.bf16 %v14228_v60  ;;  %v12381_v44 = vpack.c.bf16 %v15712_v38, %v14179_v56 }
 0x5ff   : > { %12148 = vmatmul.mubr.msk.f32.gmra.mrb[58].mxu0 %vm8823_vm11, %v13921_v25  ;;  %12159 = vmatmul.mubr.msk.f32.gmra.mrb[58].mxu1 %vm8823_vm11, %v13921_v25  ;;  %vm8440_vm4 = vcmp.eq.s32.totalorder %v8408_v51, 0  ;;  %v8534_v45 = vsel %vm8520_vm0, %v12692_v12, %v12693_v11  ;;  %v8652_v12 = vpop.permute.xlu0 %8651 }
 0x600   : > { %12356 = vmatpush1.bf16.msra.mxu0 %v12355_v20  ;;  %12372 = vmatpush1.bf16.msra.mxu1 %v12371_v26  ;;  %v12697_v20 = vunpack.i.l.bf16 %v14228_v60  ;;  %v8377_v26 = vadd.s32 2176, %v13130_v6  ;;  %vm8442_vm6 = vcmp.eq.s32.totalorder %v8410_v52, 0  ;;  %v15714_v52 = vld [vmem:[#allocation15_spill] sm:$0xff] }
 0x601   : > { %12358 = vmatprep.subr.bf16.mxu0 %v12357_v34  ;;  %12374 = vmatprep.subr.bf16.mxu1 %v12373_v37  ;;  %v14243_v34 = vsel %vm8440_vm4, %v8534_v45, %v14087_v15 }
 0x602   : > { %9201 = vmatprep.mubr.f32.mxu0 %v12818_v29  ;;  %9332 = vmatprep.mubr.f32.mxu1 %v12818_v29  ;;  %v14253_v37 = vsel %vm8520_vm0, %v12697_v20, %v12698_v61  ;;  %v14259_v15 = vsel %vm8520_vm0, %v12693_v11, %v12697_v20  ;;  %v12383_v38 = vpack.c.bf16 %v13606_v36, %v14243_v34 }
 0x603   : > { %12149 = vmatmul.mubr.msk.f32.gmra.mrb[60].mxu0 %vm8823_vm11, %v13949_v10  ;;  %12160 = vmatmul.mubr.msk.f32.gmra.mrb[60].mxu1 %vm8823_vm11, %v13949_v10  ;;  %v12397_v51 = vpack.c.bf16 %v13328_v3, %v14259_v15  ;;  %v8656_v11 = vpop.permute.xlu0 %8655  ;;  %v12385_v20 = vpack.c.bf16 %v15714_v52, %v13328_v3  ;;  %v12387_v3 = vpack.c.bf16 %v13629_v43, %v13319_v47 }
 0x604   : > { %12360 = vmatpush1.bf16.msra.mxu0 %v12359_v53  ;;  %12376 = vmatpush1.bf16.msra.mxu1 %v12375_v2  ;;  %v8409_v53 = vand.u32 255, %v8377_v26  ;;  %v14261_v2 = vpop.permute.xlu1 %8653  ;;  %v12401_v26 = vpack.c.bf16 %v13381_v16, %v15714_v52  ;;  %v12409_v60 = vpack.c.bf16 %v14259_v15, %v14179_v56  ;;  %v8380_v56 = vadd.s32 2560, %v13130_v6 }
 0x605   : > { %9397 = vmatprep.subr.mxu0 %v14131_v7  ;;  %9528 = vmatprep.subr.mxu1 %v14173_v48  ;;  %v8695_v1 = vsel %vm8681_vm5, %v8652_v12, %v14261_v2 }
 0x606   : > { %9207 = vmatprep.mubr.f32.mxu0 %v12818_v29  ;;  %9338 = vmatprep.mubr.f32.mxu1 %v12818_v29  ;;  %vm8602_vm7 = vcmp.eq.s32.totalorder %v8409_v53, 255 }
 0x607   : > { %12150 = vmatmul.mubr.msk.f32.gmra.mrb[62].mxu0 %vm8823_vm11, %v13973_v22  ;;  %12161 = vmatmul.mubr.msk.f32.gmra.mrb[62].mxu1 %vm8823_vm11, %v13973_v22 }
 0x608   : > { %9398 = vmatpush1.msra.mxu0 %v14146_v18  ;;  %9529 = vmatpush1.msra.mxu1 %v14188_v17  ;;  %v14299_v53 = vpop.permute.xlu1 %8657 }
 0x609   : > { %12378 = vmatprep.subr.bf16.mxu0 %v12377_v14  ;;  %12394 = vmatprep.subr.bf16.mxu1 %v12393_v4  ;;  %v12395_v14 = vpack.c.bf16 %v14243_v34, %v14102_v24  ;;  %v14268_v4 = vsel %vm8442_vm6, %v14253_v37, %v8534_v45  ;;  %v8379_v24 = vadd.s32 2432, %v13130_v6  ;;  %v14297_v45 = vsel %vm8602_vm7, %v14159_v39, %v8695_v1 }
 0x60a   : > { %9213 = vmatprep.mubr.f32.mxu0 %v12818_v29  ;;  %9344 = vmatprep.mubr.f32.mxu1 %v12818_v29  ;;  %v12399_v9 = vpack.c.bf16 %v13319_v47, %v14268_v4  ;;  %v14312_v39 = vsel %vm8681_vm5, %v14133_v59, %v8652_v12  ;;  %v12405_v47 = vpack.c.bf16 %v14297_v45, %v14173_v48 }
 0x60b   : > { %12151 = vmatmul.mubr.msk.f32.gmra.mrb[64].mxu0 %vm8823_vm11, %v14005_v30  ;;  %12162 = vmatmul.mubr.msk.f32.gmra.mrb[64].mxu1 %vm8823_vm11, %v14005_v30  ;;  %v8411_v36 = vand.u32 255, %v8379_v24  ;;  %v12391_v12 = vpack.c.bf16 %v14188_v17, %v14146_v18 }
 0x60c   : > { %9219 = vmatprep.mubr.f32.mxu0 %v12818_v29  ;;  %9350 = vmatprep.mubr.f32.mxu1 %v12818_v29 }
 0x60d   : > { %vm8604_vm8 = vcmp.eq.s32.totalorder %v8411_v36, 255 }
 0x60f   : > { %12152 = vmatmul.mubr.msk.f32.gmra.mrb[66].mxu0 %vm8823_vm11, %v14018_v41  ;;  %12163 = vmatmul.mubr.msk.f32.gmra.mrb[66].mxu1 %vm8823_vm11, %v14018_v41 }
 0x610   : > { %9225 = vmatprep.mubr.f32.mxu0 %v12818_v29  ;;  %9356 = vmatprep.mubr.f32.mxu1 %v12818_v29 }
 0x613   : > { %12153 = vmatmul.mubr.msk.f32.gmra.mrb[68].mxu0 %vm8823_vm11, %v14029_v50  ;;  %12164 = vmatmul.mubr.msk.f32.gmra.mrb[68].mxu1 %vm8823_vm11, %v14029_v50 }
 0x614   : > { %9231 = vmatprep.mubr.f32.mxu0 %v12818_v29  ;;  %9362 = vmatprep.mubr.f32.mxu1 %v12818_v29 }
 0x617   : > { %12154 = vmatmul.mubr.msk.f32.gmra.mrb[70].mxu0 %vm8823_vm11, %v14041_v23  ;;  %12165 = vmatmul.mubr.msk.f32.gmra.mrb[70].mxu1 %vm8823_vm11, %v14041_v23 }
 0x618   : > { %9237 = vmatprep.mubr.f32.mxu0 %v12818_v29  ;;  %9368 = vmatprep.mubr.f32.mxu1 %v12818_v29 }
 0x61b   : > { %12155 = vmatmul.mubr.msk.f32.gmra.mrb[72].mxu0 %vm8823_vm11, %v14053_v13  ;;  %12166 = vmatmul.mubr.msk.f32.gmra.mrb[72].mxu1 %vm8823_vm11, %v14053_v13 }
 0x61c   : > { %9243 = vmatprep.mubr.f32.mxu0 %v12818_v29  ;;  %9374 = vmatprep.mubr.f32.mxu1 %v12818_v29 }
 0x61f   : > { %12156 = vmatmul.mubr.msk.f32.gmra.mrb[74].mxu0 %vm8823_vm11, %v14069_v19  ;;  %12167 = vmatmul.mubr.msk.f32.gmra.mrb[74].mxu1 %vm8823_vm11, %v14069_v19 }
 0x620   : > { %9445 = vmatprep.mubr.f32.mxu0 %v12818_v29  ;;  %9576 = vmatprep.mubr.f32.mxu1 %v12818_v29 }
 0x623   : > { %12168 = vmatmul.mubr.msk.f32.vlgmr.msra.gmra.mrb[76].mxu0 %vm8823_vm11, %v13843_v33  ;;  %12179 = vmatmul.mubr.msk.f32.vlgmr.msra.gmra.mrb[76].mxu1 %vm8823_vm11, %v13843_v33 }
 0x624   : > { %12380 = vmatpush1.bf16.msra.mxu0 %v12379_v31  ;;  %12396 = vmatpush1.bf16.msra.mxu1 %v12395_v14  ;;  %v12403_v31 = vpack.c.bf16 %v13372_v5, %v13629_v43  ;;  %v14307_v14 = vpop.permute.xlu0 %12700 }
 0x625   : > { %12382 = vmatprep.subr.bf16.mxu0 %v12381_v44  ;;  %12398 = vmatprep.subr.bf16.mxu1 %v12397_v51  ;;  %v12389_v44 = vpack.c.bf16 %v14173_v48, %v14131_v7  ;;  %v14325_v51 = vsel %vm8681_vm5, %v8656_v11, %v14299_v53  ;;  %v12702_v59 = vunpack.i.l.bf16 %v14307_v14  ;;  %v12407_v7 = vpack.c.bf16 %v14312_v39, %v14188_v17 }
 0x626   : > { %9451 = vmatprep.mubr.f32.mxu0 %v12818_v29  ;;  %9582 = vmatprep.mubr.f32.mxu1 %v12818_v29  ;;  %v14339_v48 = vsel %vm8604_vm8, %v8695_v1, %v14325_v51  ;;  %v14354_v17 = vsel %vm8681_vm5, %v14261_v2, %v8656_v11  ;;  %v8382_v2 = vadd.s32 2816, %v13130_v6  ;;  %v14394_v1 = vpop.permute.xlu1 %12705  ;;  %v12703_v24 = vunpack.i.h.bf16 %v14307_v14 }
 0x627   : > { %12169 = vmatmul.mubr.msk.f32.gmra.mrb[78].mxu0 %vm8823_vm11, %v13896_v57  ;;  %12180 = vmatmul.mubr.msk.f32.gmra.mrb[78].mxu1 %vm8823_vm11, %v13896_v57  ;;  %v14345_v18 = vsel %vm8520_vm0, %v12698_v61, %v12702_v59  ;;  %v12707_v11 = vunpack.i.l.bf16 %v14394_v1 }
 0x628   : > { %12384 = vmatpush1.bf16.msra.mxu0 %v12383_v38  ;;  %12400 = vmatpush1.bf16.msra.mxu1 %v12399_v9  ;;  %v12425_v61 = vpack.c.bf16 %v14345_v18, %v14259_v15  ;;  %v8412_v15 = vand.u32 255, %v8380_v56  ;;  %v8414_v38 = vand.u32 255, %v8382_v2  ;;  %v12708_v9 = vunpack.i.h.bf16 %v14394_v1 }
 0x629   : > { %12386 = vmatprep.subr.bf16.mxu0 %v12385_v20  ;;  %12402 = vmatprep.subr.bf16.mxu1 %v12401_v26  ;;  %v8381_v20 = vadd.s32 2688, %v13130_v6  ;;  %v8530_v26 = vsel %vm8520_vm0, %v12702_v59, %v12703_v24  ;;  %v12433_v2 = vpack.c.bf16 %v13457_v62, %v13423_v49 }
 0x62a   : > { %9457 = vmatprep.mubr.f32.mxu0 %v12818_v29  ;;  %9588 = vmatprep.mubr.f32.mxu1 %v12818_v29  ;;  %vm8444_vm9 = vcmp.eq.s32.totalorder %v8412_v15, 0  ;;  %vm8446_vm10 = vcmp.eq.s32.totalorder %v8414_v38, 0  ;;  %v12417_v15 = vpack.c.bf16 %v13423_v49, %v13381_v16 }
 0x62b   : > { %12170 = vmatmul.mubr.msk.f32.gmra.mrb[80].mxu0 %vm8823_vm11, %v13921_v25  ;;  %12181 = vmatmul.mubr.msk.f32.gmra.mrb[80].mxu1 %vm8823_vm11, %v13921_v25  ;;  %v14409_v36 = vsel %vm8444_vm9, %v8530_v26, %v14253_v37  ;;  %v14425_v37 = vsel %vm8520_vm0, %v12703_v24, %v12707_v11  ;;  %v8413_v14 = vand.u32 255, %v8381_v20 }
 0x62c   : > { %12388 = vmatpush1.bf16.msra.mxu0 %v12387_v3  ;;  %12404 = vmatpush1.bf16.msra.mxu1 %v12403_v31  ;;  %v14419_v3 = vsel %vm8520_vm0, %v12707_v11, %v12708_v9  ;;  %v8660_v31 = vpop.permute.xlu0 %8659  ;;  %v12427_v59 = vpack.c.bf16 %v14409_v36, %v14268_v4  ;;  %v12435_v11 = vpack.c.bf16 %v13425_v46, %v13644_v55 }
 0x62d   : > { %12390 = vmatprep.subr.bf16.mxu0 %v12389_v44  ;;  %12406 = vmatprep.subr.bf16.mxu1 %v12405_v47  ;;  %v14427_v44 = vpop.permute.xlu1 %8661  ;;  %v12411_v47 = vpack.c.bf16 %v14268_v4, %v14243_v34  ;;  %vm8606_vm12 = vcmp.eq.s32.totalorder %v8413_v14, 255  ;;  %v8383_v4 = vadd.s32 2944, %v13130_v6  ;;  %v12441_v1 = vpack.c.bf16 %v14425_v37, %v14345_v18 }
 0x62e   : > { %9463 = vmatprep.mubr.f32.mxu0 %v12818_v29  ;;  %9594 = vmatprep.mubr.f32.mxu1 %v12818_v29  ;;  %v8691_v34 = vsel %vm8681_vm5, %v8660_v31, %v14427_v44 }
 0x62f   : > { %12171 = vmatmul.mubr.msk.f32.gmra.mrb[82].mxu0 %vm8823_vm11, %v13949_v10  ;;  %12182 = vmatmul.mubr.msk.f32.gmra.mrb[82].mxu1 %vm8823_vm11, %v13949_v10  ;;  %v14463_v24 = vsel %vm8606_vm12, %v14325_v51, %v8691_v34  ;;  %v14478_v51 = vsel %vm8681_vm5, %v14299_v53, %v8660_v31  ;;  %v12423_v31 = vpack.c.bf16 %v14354_v17, %v14312_v39 }
 0x630   : > { %12392 = vmatpush1.bf16.msra.mxu0 %v12391_v12  ;;  %12408 = vmatpush1.bf16.msra.mxu1 %v12407_v7  ;;  %v14434_v12 = vsel %vm8446_vm10, %v14419_v3, %v8530_v26  ;;  %v12413_v7 = vpack.c.bf16 %v15714_v52, %v14345_v18  ;;  %v12415_v52 = vpack.c.bf16 %v13629_v43, %v14409_v36  ;;  %v8664_v56 = vpop.permute.xlu0 %8663  ;;  %v8415_v43 = vand.u32 255, %v8383_v4 }
 0x631   : > { %9659 = vmatprep.subr.mxu0 %v14297_v45  ;;  %9790 = vmatprep.subr.mxu1 %v14339_v48  ;;  %v14465_v38 = vpop.permute.xlu1 %8665  ;;  %v12421_v26 = vpack.c.bf16 %v14339_v48, %v14297_v45  ;;  %v12439_v45 = vpack.c.bf16 %v14478_v51, %v14354_v17  ;;  %v8384_v18 = vadd.s32 3072, %v13130_v6  ;;  %v8385_v4 = vadd.s32 3200, %v13130_v6 }
 0x632   : > { %9469 = vmatprep.mubr.f32.mxu0 %v12818_v29  ;;  %9600 = vmatprep.mubr.f32.mxu1 %v12818_v29  ;;  %v14491_v14 = vsel %vm8681_vm5, %v8664_v56, %v14465_v38  ;;  %vm8608_vm13 = vcmp.eq.s32.totalorder %v8415_v43, 255 }
 0x633   : > { %12172 = vmatmul.mubr.msk.f32.gmra.mrb[84].mxu0 %vm8823_vm11, %v13973_v22  ;;  %12183 = vmatmul.mubr.msk.f32.gmra.mrb[84].mxu1 %vm8823_vm11, %v13973_v22 }
 0x634   : > { %9660 = vmatpush1.msra.mxu0 %v14312_v39  ;;  %9791 = vmatpush1.msra.mxu1 %v14354_v17  ;;  %v14473_v20 = vpop.permute.xlu0 %12710  ;;  %v14520_v17 = vsel %vm8681_vm5, %v14427_v44, %v8664_v56  ;;  %v8386_v44 = vadd.s32 3328, %v13130_v6 }
 0x635   : > { %12410 = vmatprep.subr.bf16.mxu0 %v12409_v60  ;;  %12426 = vmatprep.subr.bf16.mxu1 %v12425_v61  ;;  %v12429_v60 = vpack.c.bf16 %v13381_v16, %v14425_v37  ;;  %v12431_v61 = vpack.c.bf16 %v13372_v5, %v14434_v12  ;;  %v12419_v16 = vpack.c.bf16 %v13644_v55, %v13372_v5  ;;  %v12712_v53 = vunpack.i.l.bf16 %v14473_v20 }
 0x636   : > { %9475 = vmatprep.mubr.f32.mxu0 %v12818_v29  ;;  %9606 = vmatprep.mubr.f32.mxu1 %v12818_v29  ;;  %v12437_v5 = vpack.c.bf16 %v14463_v24, %v14339_v48  ;;  %v14505_v48 = vsel %vm8608_vm13, %v8691_v34, %v14491_v14 }
 0x637   : > { %12173 = vmatmul.mubr.msk.f32.gmra.mrb[86].mxu0 %vm8823_vm11, %v14005_v30  ;;  %12184 = vmatmul.mubr.msk.f32.gmra.mrb[86].mxu1 %vm8823_vm11, %v14005_v30  ;;  %v14511_v39 = vsel %vm8520_vm0, %v12708_v9, %v12712_v53 }
 0x638   : > { %9481 = vmatprep.mubr.f32.mxu0 %v12818_v29  ;;  %9612 = vmatprep.mubr.f32.mxu1 %v12818_v29  ;;  %v12457_v9 = vpack.c.bf16 %v14511_v39, %v14425_v37  ;;  %v8416_v37 = vand.u32 255, %v8384_v18 }
 0x63a   : > { %vm8448_vm14 = vcmp.eq.s32.totalorder %v8416_v37, 0  ;;  %v12453_v37 = vpack.c.bf16 %v14505_v48, %v14463_v24 }
 0x63b   : > { %12174 = vmatmul.mubr.msk.f32.gmra.mrb[88].mxu0 %vm8823_vm11, %v14018_v41  ;;  %12185 = vmatmul.mubr.msk.f32.gmra.mrb[88].mxu1 %vm8823_vm11, %v14018_v41 }
 0x63c   : > { %9487 = vmatprep.mubr.f32.mxu0 %v12818_v29  ;;  %9618 = vmatprep.mubr.f32.mxu1 %v12818_v29 }
 0x63f   : > { %12175 = vmatmul.mubr.msk.f32.gmra.mrb[90].mxu0 %vm8823_vm11, %v14029_v50  ;;  %12186 = vmatmul.mubr.msk.f32.gmra.mrb[90].mxu1 %vm8823_vm11, %v14029_v50 }
 0x640   : > { %9493 = vmatprep.mubr.f32.mxu0 %v12818_v29  ;;  %9624 = vmatprep.mubr.f32.mxu1 %v12818_v29 }
 0x643   : > { %12176 = vmatmul.mubr.msk.f32.gmra.mrb[92].mxu0 %vm8823_vm11, %v14041_v23  ;;  %12187 = vmatmul.mubr.msk.f32.gmra.mrb[92].mxu1 %vm8823_vm11, %v14041_v23 }
 0x644   : > { %9499 = vmatprep.mubr.f32.mxu0 %v12818_v29  ;;  %9630 = vmatprep.mubr.f32.mxu1 %v12818_v29 }
 0x647   : > { %12177 = vmatmul.mubr.msk.f32.gmra.mrb[94].mxu0 %vm8823_vm11, %v14053_v13  ;;  %12188 = vmatmul.mubr.msk.f32.gmra.mrb[94].mxu1 %vm8823_vm11, %v14053_v13 }
 0x648   : > { %9505 = vmatprep.mubr.f32.mxu0 %v12818_v29  ;;  %9636 = vmatprep.mubr.f32.mxu1 %v12818_v29 }
 0x64b   : > { %12178 = vmatmul.mubr.msk.f32.gmra.mrb[96].mxu0 %vm8823_vm11, %v14069_v19  ;;  %12189 = vmatmul.mubr.msk.f32.gmra.mrb[96].mxu1 %vm8823_vm11, %v14069_v19 }
 0x64c   : > { %9707 = vmatprep.mubr.f32.mxu0 %v12818_v29  ;;  %9838 = vmatprep.mubr.f32.mxu1 %v12818_v29 }
 0x64f   : > { %12190 = vmatmul.mubr.msk.f32.vlgmr.msra.gmra.mrb[98].mxu0 %vm8823_vm11, %v13843_v33  ;;  %12201 = vmatmul.mubr.msk.f32.vlgmr.msra.gmra.mrb[98].mxu1 %vm8823_vm11, %v13843_v33 }
 0x650   : > { %12412 = vmatpush1.bf16.msra.mxu0 %v12411_v47  ;;  %12428 = vmatpush1.bf16.msra.mxu1 %v12427_v59  ;;  %v14560_v47 = vpop.permute.xlu1 %12715  ;;  %v12713_v59 = vunpack.i.h.bf16 %v14473_v20 }
 0x651   : > { %12414 = vmatprep.subr.bf16.mxu0 %v12413_v7  ;;  %12430 = vmatprep.subr.bf16.mxu1 %v12429_v60  ;;  %v8418_v7 = vand.u32 255, %v8386_v44  ;;  %v12718_v60 = vunpack.i.h.bf16 %v14560_v47  ;;  %v12717_v34 = vunpack.i.l.bf16 %v14560_v47 }
 0x652   : > { %9713 = vmatprep.mubr.f32.mxu0 %v12818_v29  ;;  %9844 = vmatprep.mubr.f32.mxu1 %v12818_v29 }
 0x653   : > { %12191 = vmatmul.mubr.msk.f32.gmra.mrb[100].mxu0 %vm8823_vm11, %v13896_v57  ;;  %12202 = vmatmul.mubr.msk.f32.gmra.mrb[100].mxu1 %vm8823_vm11, %v13896_v57  ;;  %vm8450_vm15 = vcmp.eq.s32.totalorder %v8418_v7, 0  ;;  %v14585_v56 = vsel %vm8520_vm0, %v12717_v34, %v12718_v60 }
 0x654   : > { %12416 = vmatpush1.bf16.msra.mxu0 %v12415_v52  ;;  %12432 = vmatpush1.bf16.msra.mxu1 %v12431_v61  ;;  %v8526_v52 = vsel %vm8520_vm0, %v12712_v53, %v12713_v59  ;;  %v14593_v43 = vpop.permute.xlu1 %8669 }
 0x655   : > { %12418 = vmatprep.subr.bf16.mxu0 %v12417_v15  ;;  %12434 = vmatprep.subr.bf16.mxu1 %v12433_v2  ;;  %v14575_v61 = vsel %vm8448_vm14, %v8526_v52, %v14419_v3  ;;  %v14591_v3 = vsel %vm8520_vm0, %v12713_v59, %v12717_v34  ;;  %v8668_v15 = vpop.permute.xlu0 %8667  ;;  %v8417_v2 = vand.u32 255, %v8385_v4  ;;  %v14600_v20 = vsel %vm8450_vm15, %v14585_v56, %v8526_v52 }
 0x656   : > { %9719 = vmatprep.mubr.f32.mxu0 %v12818_v29  ;;  %9850 = vmatprep.mubr.f32.mxu1 %v12818_v29 }
 0x657   : > { %12192 = vmatmul.mubr.msk.f32.gmra.mrb[102].mxu0 %vm8823_vm11, %v13921_v25  ;;  %12203 = vmatmul.mubr.msk.f32.gmra.mrb[102].mxu1 %vm8823_vm11, %v13921_v25  ;;  %vm8610_vm1 = vcmp.eq.s32.totalorder %v8417_v2, 255 }
 0x658   : > { %12420 = vmatpush1.bf16.msra.mxu0 %v12419_v16  ;;  %12436 = vmatpush1.bf16.msra.mxu1 %v12435_v11  ;;  %v12443_v16 = vpack.c.bf16 %v14434_v12, %v14409_v36  ;;  %v12459_v11 = vpack.c.bf16 %v14575_v61, %v14434_v12  ;;  %v8687_v36 = vsel %vm8681_vm5, %v8668_v15, %v14593_v43  ;;  %v8387_v12 = vadd.s32 3456, %v13130_v6 }
 0x659   : > { %12422 = vmatprep.subr.bf16.mxu0 %v12421_v26  ;;  %12438 = vmatprep.subr.bf16.mxu1 %v12437_v5  ;;  %v12445_v26 = vpack.c.bf16 %v13423_v49, %v14511_v39  ;;  %v12461_v5 = vpack.c.bf16 %v13457_v62, %v14591_v3  ;;  %v12447_v49 = vpack.c.bf16 %v13644_v55, %v14575_v61  ;;  %v8672_v53 = vpop.permute.xlu0 %8671 }
 0x65a   : > { %9725 = vmatprep.mubr.f32.mxu0 %v12818_v29  ;;  %9856 = vmatprep.mubr.f32.mxu1 %v12818_v29  ;;  %v8419_v55 = vand.u32 255, %v8387_v12 }
 0x65b   : > { %12193 = vmatmul.mubr.msk.f32.gmra.mrb[104].mxu0 %vm8823_vm11, %v13949_v10  ;;  %12204 = vmatmul.mubr.msk.f32.gmra.mrb[104].mxu1 %vm8823_vm11, %v13949_v10 }
 0x65c   : > { %12424 = vmatpush1.bf16.msra.mxu0 %v12423_v31  ;;  %12440 = vmatpush1.bf16.msra.mxu1 %v12439_v45  ;;  %v12449_v31 = vpack.c.bf16 %v13493_v40, %v13457_v62  ;;  %v12465_v45 = vpack.c.bf16 %v13504_v27, %v13493_v40  ;;  %v12451_v62 = vpack.c.bf16 %v13657_v32, %v13425_v46  ;;  %vm8612_vm2 = vcmp.eq.s32.totalorder %v8419_v55, 255 }
 0x65d   : > { %9921 = vmatprep.subr.mxu0 %v14463_v24  ;;  %10052 = vmatprep.subr.mxu1 %v14505_v48  ;;  %v14639_v18 = vpop.permute.xlu0 %12720 }
 0x65e   : > { %9731 = vmatprep.mubr.f32.mxu0 %v12818_v29  ;;  %9862 = vmatprep.mubr.f32.mxu1 %v12818_v29 }
 0x65f   : > { %12194 = vmatmul.mubr.msk.f32.gmra.mrb[106].mxu0 %vm8823_vm11, %v13973_v22  ;;  %12205 = vmatmul.mubr.msk.f32.gmra.mrb[106].mxu1 %vm8823_vm11, %v13973_v22 }
 0x660   : > { %9922 = vmatpush1.msra.mxu0 %v14478_v51  ;;  %10053 = vmatpush1.msra.mxu1 %v14520_v17 }
 0x661   : > { %12442 = vmatprep.subr.bf16.mxu0 %v12441_v1  ;;  %12458 = vmatprep.subr.bf16.mxu1 %v12457_v9  ;;  %v14629_v1 = vsel %vm8610_vm1, %v14491_v14, %v8687_v36  ;;  %v14631_v9 = vpop.permute.xlu1 %8673  ;;  %v14644_v14 = vsel %vm8681_vm5, %v14465_v38, %v8668_v15  ;;  %v12722_v38 = vunpack.i.l.bf16 %v14639_v18 }
 0x662   : > { %9737 = vmatprep.mubr.f32.mxu0 %v12818_v29  ;;  %9868 = vmatprep.mubr.f32.mxu1 %v12818_v29  ;;  %v14657_v44 = vsel %vm8681_vm5, %v8672_v53, %v14631_v9  ;;  %v12471_v24 = vpack.c.bf16 %v14644_v14, %v14520_v17 }
 0x663   : > { %12195 = vmatmul.mubr.msk.f32.gmra.mrb[108].mxu0 %vm8823_vm11, %v14005_v30  ;;  %12206 = vmatmul.mubr.msk.f32.gmra.mrb[108].mxu1 %vm8823_vm11, %v14005_v30 }
 0x664   : > { %9743 = vmatprep.mubr.f32.mxu0 %v12818_v29  ;;  %9874 = vmatprep.mubr.f32.mxu1 %v12818_v29 }
 0x667   : > { %12196 = vmatmul.mubr.msk.f32.gmra.mrb[110].mxu0 %vm8823_vm11, %v14018_v41  ;;  %12207 = vmatmul.mubr.msk.f32.gmra.mrb[110].mxu1 %vm8823_vm11, %v14018_v41 }
 0x668   : > { %9749 = vmatprep.mubr.f32.mxu0 %v12818_v29  ;;  %9880 = vmatprep.mubr.f32.mxu1 %v12818_v29 }
 0x66b   : > { %12197 = vmatmul.mubr.msk.f32.gmra.mrb[112].mxu0 %vm8823_vm11, %v14029_v50  ;;  %12208 = vmatmul.mubr.msk.f32.gmra.mrb[112].mxu1 %vm8823_vm11, %v14029_v50 }
 0x66c   : > { %9755 = vmatprep.mubr.f32.mxu0 %v12818_v29  ;;  %9886 = vmatprep.mubr.f32.mxu1 %v12818_v29 }
 0x66f   : > { %12198 = vmatmul.mubr.msk.f32.gmra.mrb[114].mxu0 %vm8823_vm11, %v14041_v23  ;;  %12209 = vmatmul.mubr.msk.f32.gmra.mrb[114].mxu1 %vm8823_vm11, %v14041_v23 }
 0x670   : > { %9761 = vmatprep.mubr.f32.mxu0 %v12818_v29  ;;  %9892 = vmatprep.mubr.f32.mxu1 %v12818_v29 }
 0x673   : > { %12199 = vmatmul.mubr.msk.f32.gmra.mrb[116].mxu0 %vm8823_vm11, %v14053_v13  ;;  %12210 = vmatmul.mubr.msk.f32.gmra.mrb[116].mxu1 %vm8823_vm11, %v14053_v13 }
 0x674   : > { %9767 = vmatprep.mubr.f32.mxu0 %v12818_v29  ;;  %9898 = vmatprep.mubr.f32.mxu1 %v12818_v29 }
 0x677   : > { %12200 = vmatmul.mubr.msk.f32.gmra.mrb[118].mxu0 %vm8823_vm11, %v14069_v19  ;;  %12211 = vmatmul.mubr.msk.f32.gmra.mrb[118].mxu1 %vm8823_vm11, %v14069_v19 }
 0x678   : > { %9969 = vmatprep.mubr.f32.mxu0 %v12818_v29  ;;  %10100 = vmatprep.mubr.f32.mxu1 %v12818_v29 }
 0x67b   : > { %12212 = vmatmul.mubr.msk.f32.vlgmr.msra.gmra.mrb[120].mxu0 %vm8823_vm11, %v13843_v33  ;;  %12223 = vmatmul.mubr.msk.f32.vlgmr.msra.gmra.mrb[120].mxu1 %vm8823_vm11, %v13843_v33  ;;  %v12463_v33 = vpack.c.bf16 %v13425_v46, %v14600_v20  ;;  %v12469_v46 = vpack.c.bf16 %v14629_v1, %v14505_v48  ;;  %v14671_v48 = vsel %vm8612_vm2, %v8687_v36, %v14657_v44  ;;  %v15715_v36 = vunpack.i.h.bf16 %v13710_v8 }
 0x67c   : > { %12444 = vmatpush1.bf16.msra.mxu0 %v12443_v16  ;;  %12460 = vmatpush1.bf16.msra.mxu1 %v12459_v11  ;;  %v8389_v11 = vadd.s32 3712, %v13130_v6 }
 0x67d   : > { %12446 = vmatprep.subr.bf16.mxu0 %v12445_v26  ;;  %12462 = vmatprep.subr.bf16.mxu1 %v12461_v5 }
 0x67e   : > { %9975 = vmatprep.mubr.f32.mxu0 %v12818_v29  ;;  %10106 = vmatprep.mubr.f32.mxu1 %v12818_v29 }
 0x67f   : > { %12213 = vmatmul.mubr.msk.f32.gmra.mrb[122].mxu0 %vm8823_vm11, %v13896_v57  ;;  %12224 = vmatmul.mubr.msk.f32.gmra.mrb[122].mxu1 %vm8823_vm11, %v13896_v57  ;;  %v12467_v57 = vpack.c.bf16 %v13495_v63, %v13657_v32 }
 0x680   : > { %12448 = vmatpush1.bf16.msra.mxu0 %v12447_v49  ;;  %12464 = vmatpush1.bf16.msra.mxu1 %v12463_v33 }
 0x681   : > { %12450 = vmatprep.subr.bf16.mxu0 %v12449_v31  ;;  %12466 = vmatprep.subr.bf16.mxu1 %v12465_v45 }
 0x682   : > { %9981 = vmatprep.mubr.f32.mxu0 %v12818_v29  ;;  %10112 = vmatprep.mubr.f32.mxu1 %v12818_v29 }
 0x683   : > { %12214 = vmatmul.mubr.msk.f32.gmra.mrb[124].mxu0 %vm8823_vm11, %v13921_v25  ;;  %12225 = vmatmul.mubr.msk.f32.gmra.mrb[124].mxu1 %vm8823_vm11, %v13921_v25  ;;  %v12455_v25 = vpack.c.bf16 %v14520_v17, %v14478_v51  ;;  %v14679_v51 = vsel %vm8520_vm0, %v12718_v60, %v12722_v38  ;;  %v12473_v17 = vpack.c.bf16 %v14591_v3, %v14511_v39  ;;  %v14729_v39 = vpop.permute.xlu0 %8677  ;;  %v12723_v60 = vunpack.i.h.bf16 %v14639_v18 }
 0x684   : > { %12452 = vmatpush1.bf16.msra.mxu0 %v12451_v62  ;;  %12468 = vmatpush1.bf16.msra.mxu1 %v12467_v57  ;;  %v12489_v47 = vpack.c.bf16 %v14679_v51, %v14591_v3  ;;  %v8421_v57 = vand.u32 255, %v8389_v11  ;;  %v14837_v11 = vld [vmem:[%s15656_s5 + $0x8] sm:$0xff] }
 0x685   : > { %12454 = vmatprep.subr.bf16.mxu0 %v12453_v37  ;;  %12470 = vmatprep.subr.bf16.mxu1 %v12469_v46  ;;  %v8522_v26 = vsel %vm8520_vm0, %v12722_v38, %v12723_v60  ;;  %v8521_v12 = vsel %vm8520_vm0, %v12723_v60, %v15715_v36  ;;  %v12475_v37 = vpack.c.bf16 %v14600_v20, %v14575_v61  ;;  %v14799_v61 = vld [vmem:[%s15656_s5] sm:$0xff] }
 0x686   : > { %9987 = vmatprep.mubr.f32.mxu0 %v12818_v29  ;;  %10118 = vmatprep.mubr.f32.mxu1 %v12818_v29  ;;  %v12493_v38 = vpack.c.bf16 %v13504_v27, %v8521_v12  ;;  %vm14811_vm0 = vcmp.eq.s32.totalorder %v8421_v57, 255 }
 0x687   : > { %12215 = vmatmul.mubr.msk.f32.gmra.mrb[126].mxu0 %vm8823_vm11, %v13949_v10  ;;  %12226 = vmatmul.mubr.msk.f32.gmra.mrb[126].mxu1 %vm8823_vm11, %v13949_v10  ;;  %v14688_v10 = vsel %vm8681_vm5, %v14593_v43, %v8672_v53  ;;  %v14753_v16 = vpop.permute.xlu0 %8775 }
 0x688   : > { %12456 = vmatpush1.bf16.msra.mxu0 %v12455_v25  ;;  %12472 = vmatpush1.bf16.msra.mxu1 %v12471_v24 }
 0x689   : > { %10183 = vmatprep.subr.mxu0 %v14629_v1  ;;  %10314 = vmatprep.subr.mxu1 %v14671_v48 }
 0x68a   : > { %9993 = vmatprep.mubr.f32.mxu0 %v12818_v29  ;;  %10124 = vmatprep.mubr.f32.mxu1 %v12818_v29 }
 0x68b   : > { %12216 = vmatmul.mubr.msk.f32.gmra.mrb[128].mxu0 %vm8823_vm11, %v13973_v22  ;;  %12227 = vmatmul.mubr.msk.f32.gmra.mrb[128].mxu1 %vm8823_vm11, %v13973_v22  ;;  %v14718_v22 = vpop.permute.xlu1 %8675 }
 0x68c   : > { %10184 = vmatpush1.msra.mxu0 %v14644_v14  ;;  %10315 = vmatpush1.msra.mxu1 %v14688_v10 }
 0x68d   : > { %12474 = vmatprep.subr.bf16.mxu0 %v12473_v17  ;;  %12490 = vmatprep.subr.bf16.mxu1 %v12489_v47 }
 0x68e   : > { %9999 = vmatprep.mubr.f32.mxu0 %v12818_v29  ;;  %10130 = vmatprep.mubr.f32.mxu1 %v12818_v29 }
 0x68f   : > { %12217 = vmatmul.mubr.msk.f32.gmra.mrb[130].mxu0 %vm8823_vm11, %v14005_v30  ;;  %12228 = vmatmul.mubr.msk.f32.gmra.mrb[130].mxu1 %vm8823_vm11, %v14005_v30  ;;  %v8388_v30 = vadd.s32 3584, %v13130_v6 }
 0x690   : > { %10005 = vmatprep.mubr.f32.mxu0 %v12818_v29  ;;  %10136 = vmatprep.mubr.f32.mxu1 %v12818_v29 }
 0x691   : > { %v8420_v59 = vand.u32 255, %v8388_v30 }
 0x693   : > { %12218 = vmatmul.mubr.msk.f32.gmra.mrb[132].mxu0 %vm8823_vm11, %v14018_v41  ;;  %12229 = vmatmul.mubr.msk.f32.gmra.mrb[132].mxu1 %vm8823_vm11, %v14018_v41  ;;  %v8390_v41 = vadd.s32 3840, %v13130_v6  ;;  %vm8452_vm3 = vcmp.eq.s32.totalorder %v8420_v59, 0  ;;  %v14809_v59 = vpop.permute.xlu0 %8785 }
 0x694   : > { %10011 = vmatprep.mubr.f32.mxu0 %v12818_v29  ;;  %10142 = vmatprep.mubr.f32.mxu1 %v12818_v29  ;;  %v8581_v8 = vsel %vm8452_vm3, %v8522_v26, %v14585_v56 }
 0x695   : > { %v8422_v43 = vand.u32 255, %v8390_v41  ;;  %v12491_v46 = vpack.c.bf16 %v8581_v8, %v14600_v20 }
 0x697   : > { %12219 = vmatmul.mubr.msk.f32.gmra.mrb[134].mxu0 %vm8823_vm11, %v14029_v50  ;;  %12230 = vmatmul.mubr.msk.f32.gmra.mrb[134].mxu1 %vm8823_vm11, %v14029_v50  ;;  %v14731_v50 = vpop.permute.xlu1 %8770  ;;  %vm14773_vm4 = vcmp.eq.s32.totalorder %v8422_v43, 0 }
 0x698   : > { %10017 = vmatprep.mubr.f32.mxu0 %v12818_v29  ;;  %10148 = vmatprep.mubr.f32.mxu1 %v12818_v29  ;;  %v8583_v25 = vsel %vm14773_vm4, %v13722_v58, %v8522_v26  ;;  %v12477_v58 = vpack.c.bf16 %v13493_v40, %v14679_v51  ;;  %v8391_v40 = vadd.s32 3968, %v13130_v6 }
 0x69b   : > { %12220 = vmatmul.mubr.msk.f32.gmra.mrb[136].mxu0 %vm8823_vm11, %v14041_v23  ;;  %12231 = vmatmul.mubr.msk.f32.gmra.mrb[136].mxu1 %vm8823_vm11, %v14041_v23  ;;  %v14781_v18 = vpop.permute.xlu1 %8780 }
 0x69c   : > { %10023 = vmatprep.mubr.f32.mxu0 %v12818_v29  ;;  %10154 = vmatprep.mubr.f32.mxu1 %v12818_v29 }
 0x69d   : > { %v8923_v7 = vpop.f32.mrb[32].mxu0  ;;  %v9054_v23 = vpop.f32.mrb[32].mxu1 }
 0x69e   : > { %v8924_v34 = vadd.f32 %v8923_v7, %v14731_v50  ;;  %v9055_v4 = vadd.f32 %v9054_v23, %v14731_v50  ;;  %v8925_v52 = vpop.f32.mrb[33].mxu0  ;;  %v9056_v3 = vpop.f32.mrb[33].mxu1  ;;  %v14819_v23 = vsel %vm8681_vm5, %v14718_v22, %v14729_v39  ;;  %v14935_v7 = vld [vmem:[%s15656_s5 + $0x20] sm:$0xff] }
 0x69f   : > { %v8926_v15 = vadd.f32 %v8925_v52, %v14731_v50  ;;  %v9057_v2 = vadd.f32 %v9056_v3, %v14731_v50  ;;  %12221 = vmatmul.mubr.msk.f32.gmra.mrb[138].mxu0 %vm8823_vm11, %v14053_v13  ;;  %12232 = vmatmul.mubr.msk.f32.gmra.mrb[138].mxu1 %vm8823_vm11, %v14053_v13  ;;  %v12481_v52 = vpack.c.bf16 %v13560_v42, %v13504_v27 }
 0x6a0   : > { %10691 = vst [vmem:[%s14738_s25] sm:$0xff] %v8924_v34  ;;  %10693 = vst [vmem:[%s14738_s25 + $0x10] sm:$0xff] %v9055_v4  ;;  %10029 = vmatprep.mubr.f32.mxu0 %v12818_v29  ;;  %10160 = vmatprep.mubr.f32.mxu1 %v12818_v29  ;;  %v12479_v34 = vpack.c.bf16 %v13657_v32, %v8581_v8  ;;  %v12495_v4 = vpack.c.bf16 %v13495_v63, %v8583_v25  ;;  %v14885_v8 = vpop.permute.xlu0 %8795 }
 0x6a1   : > { %10692 = vst [vmem:[%s14738_s25 + $0x8] sm:$0xff] %v8926_v15  ;;  %10694 = vst [vmem:[%s14738_s25 + $0x18] sm:$0xff] %v9057_v2  ;;  %v12497_v27 = vpack.c.bf16 %v13564_v35, %v13560_v42  ;;  %v8743_v32 = vsel %vm14811_vm0, %v14657_v44, %v14819_v23  ;;  %v12483_v42 = vpack.c.bf16 %v13668_v21, %v13495_v63  ;;  %v8423_v35 = vand.u32 255, %v8391_v40 }
 0x6a2   : > { %v8929_v13 = vpop.f32.mrb[34].mxu0  ;;  %v9060_v5 = vpop.f32.mrb[34].mxu1  ;;  %v14861_v44 = vsel %vm8681_vm5, %v14631_v9, %v14718_v22  ;;  %v12485_v63 = vpack.c.bf16 %v14671_v48, %v14629_v1 }
 0x6a3   : > { %v8930_v49 = vadd.f32 %v8929_v13, %v14753_v16  ;;  %v9061_v33 = vadd.f32 %v9060_v5, %v14753_v16  ;;  %v8931_v53 = vpop.f32.mrb[35].mxu0  ;;  %v9062_v31 = vpop.f32.mrb[35].mxu1  ;;  %12222 = vmatmul.mubr.msk.f32.gmra.mrb[140].mxu0 %vm8823_vm11, %v14069_v19  ;;  %12233 = vmatmul.mubr.msk.f32.gmra.mrb[140].mxu1 %vm8823_vm11, %v14069_v19  ;;  %vm14889_vm6 = vcmp.eq.s32.totalorder %v8423_v35, 255  ;;  %v14978_v35 = vld [vmem:[%s15656_s5 + $0x30] sm:$0xff] }
 0x6a4   : > { %v8932_v55 = vadd.f32 %v8931_v53, %v14753_v16  ;;  %v9063_v62 = vadd.f32 %v9062_v31, %v14753_v16  ;;  %10231 = vmatprep.mubr.f32.mxu0 %v12818_v29  ;;  %10362 = vmatprep.mubr.f32.mxu1 %v12818_v29  ;;  %v14851_v5 = vpop.permute.xlu1 %8790  ;;  %v14876_v31 = vld [vmem:[%s15656_s5 + $0x10] sm:$0xff]  ;;  %v8745_v25 = vsel %vm14889_vm6, %v14819_v23, %v13799_v28 }
 0x6a5   : > { %10719 = vst [vmem:[%s14738_s25 + $0xe0] sm:$0xff] %v8930_v49  ;;  %10721 = vst [vmem:[%s14738_s25 + $0xf0] sm:$0xff] %v9061_v33  ;;  %v12499_v49 = vpack.c.bf16 %v13562_v0, %v13668_v21  ;;  %v12501_v0 = vpack.c.bf16 %v8743_v32, %v14671_v48  ;;  %v12503_v48 = vpack.c.bf16 %v14861_v44, %v14688_v10 }
 0x6a6   : > { %10720 = vst [vmem:[%s14738_s25 + $0xe8] sm:$0xff] %v8932_v55  ;;  %10722 = vst [vmem:[%s14738_s25 + $0xf8] sm:$0xff] %v9063_v62  ;;  %v8935_v19 = vpop.f32.mrb[36].mxu0  ;;  %v9066_v56 = vpop.f32.mrb[36].mxu1  ;;  %v12487_v55 = vpack.c.bf16 %v14688_v10, %v14644_v14  ;;  %v14906_v10 = vld [vmem:[%s15656_s5 + $0x18] sm:$0xff]  ;;  %v8682_v28 = vsel %vm8681_vm5, %v14729_v39, %v13787_v54 }
 0x6a7   : > { %v8936_v24 = vadd.f32 %v8935_v19, %v14781_v18  ;;  %v9067_v17 = vadd.f32 %v9066_v56, %v14781_v18  ;;  %v8937_v47 = vpop.f32.mrb[37].mxu0  ;;  %v9068_v30 = vpop.f32.mrb[37].mxu1  ;;  %12234 = vmatmul.mubr.msk.f32.vlgmr.msra.gmra.mrb[142].mxu0 %vm8823_vm11, %v14799_v61  ;;  %12245 = vmatmul.mubr.msk.f32.vlgmr.msra.gmra.mrb[142].mxu1 %vm8823_vm11, %v14799_v61 }
 0x6a8   : > { %v8938_v20 = vadd.f32 %v8937_v47, %v14781_v18  ;;  %v9069_v41 = vadd.f32 %v9068_v30, %v14781_v18  ;;  %12476 = vmatpush1.bf16.msra.mxu0 %v12475_v37  ;;  %12492 = vmatpush1.bf16.msra.mxu1 %v12491_v46  ;;  %v14944_v39 = vpop.permute.xlu0 %8805 }
 0x6a9   : > { %10747 = vst [vmem:[%s14738_s25 + $0x1c0] sm:$0xff] %v8936_v24  ;;  %10749 = vst [vmem:[%s14738_s25 + $0x1d0] sm:$0xff] %v9067_v17  ;;  %12478 = vmatprep.subr.bf16.mxu0 %v12477_v58  ;;  %12494 = vmatprep.subr.bf16.mxu1 %v12493_v38  ;;  %v14918_v24 = vpop.permute.xlu1 %8800 }
 0x6aa   : > { %10748 = vst [vmem:[%s14738_s25 + $0x1c8] sm:$0xff] %v8938_v20  ;;  %10750 = vst [vmem:[%s14738_s25 + $0x1d8] sm:$0xff] %v9069_v41  ;;  %v8941_v51 = vpop.f32.mrb[38].mxu0  ;;  %v9072_v60 = vpop.f32.mrb[38].mxu1  ;;  %10237 = vmatprep.mubr.f32.mxu0 %v12818_v29  ;;  %10368 = vmatprep.mubr.f32.mxu1 %v12818_v29 }
 0x6ab   : > { %v8942_v3 = vadd.f32 %v8941_v51, %v14809_v59  ;;  %v9073_v15 = vadd.f32 %v9072_v60, %v14809_v59  ;;  %v8943_v2 = vpop.f32.mrb[39].mxu0  ;;  %v9074_v43 = vpop.f32.mrb[39].mxu1  ;;  %12235 = vmatmul.mubr.msk.f32.gmra.mrb[144].mxu0 %vm8823_vm11, %v14837_v11  ;;  %12246 = vmatmul.mubr.msk.f32.gmra.mrb[144].mxu1 %vm8823_vm11, %v14837_v11 }
 0x6ac   : > { %v8944_v26 = vadd.f32 %v8943_v2, %v14809_v59  ;;  %v9075_v13 = vadd.f32 %v9074_v43, %v14809_v59  ;;  %12480 = vmatpush1.bf16.msra.mxu0 %v12479_v34  ;;  %12496 = vmatpush1.bf16.msra.mxu1 %v12495_v4 }
 0x6ad   : > { %10775 = vst [vmem:[%s14738_s25 + $0x2a0] sm:$0xff] %v8942_v3  ;;  %10777 = vst [vmem:[%s14738_s25 + $0x2b0] sm:$0xff] %v9073_v15  ;;  %12482 = vmatprep.subr.bf16.mxu0 %v12481_v52  ;;  %12498 = vmatprep.subr.bf16.mxu1 %v12497_v27  ;;  %v14957_v52 = vld [vmem:[%s15656_s5 + $0x28] sm:$0xff]  ;;  %v14967_v2 = vpop.permute.xlu1 %8810 }
 0x6ae   : > { %10776 = vst [vmem:[%s14738_s25 + $0x2a8] sm:$0xff] %v8944_v26  ;;  %10778 = vst [vmem:[%s14738_s25 + $0x2b8] sm:$0xff] %v9075_v13  ;;  %v8947_v36 = vpop.f32.mrb[40].mxu0  ;;  %v9078_v12 = vpop.f32.mrb[40].mxu1  ;;  %10243 = vmatprep.mubr.f32.mxu0 %v12818_v29  ;;  %10374 = vmatprep.mubr.f32.mxu1 %v12818_v29 }
 0x6af   : > { %v8948_v33 = vadd.f32 %v8947_v36, %v14851_v5  ;;  %v9079_v9 = vadd.f32 %v9078_v12, %v14851_v5  ;;  %v8949_v22 = vpop.f32.mrb[41].mxu0  ;;  %v9080_v53 = vpop.f32.mrb[41].mxu1  ;;  %12236 = vmatmul.mubr.msk.f32.gmra.mrb[146].mxu0 %vm8823_vm11, %v14876_v31  ;;  %12247 = vmatmul.mubr.msk.f32.gmra.mrb[146].mxu1 %vm8823_vm11, %v14876_v31 }
 0x6b0   : > { %v8950_v21 = vadd.f32 %v8949_v22, %v14851_v5  ;;  %v9081_v1 = vadd.f32 %v9080_v53, %v14851_v5  ;;  %12484 = vmatpush1.bf16.msra.mxu0 %v12483_v42  ;;  %12500 = vmatpush1.bf16.msra.mxu1 %v12499_v49  ;;  %v14988_v12 = vpop.permute.xlu0 %8815 }
 0x6b1   : > { %10803 = vst [vmem:[%s14738_s25 + $0x380] sm:$0xff] %v8948_v33  ;;  %10805 = vst [vmem:[%s14738_s25 + $0x390] sm:$0xff] %v9079_v9  ;;  %12486 = vmatprep.subr.bf16.mxu0 %v12485_v63  ;;  %12502 = vmatprep.subr.bf16.mxu1 %v12501_v0  ;;  %v14999_v0 = vld [vmem:[%s15656_s5 + $0x38] sm:$0xff]  ;;  %v15009_v45 = vpop.permute.xlu1 %8820 }
 0x6b2   : > { %10804 = vst [vmem:[%s14738_s25 + $0x388] sm:$0xff] %v8950_v21  ;;  %10806 = vst [vmem:[%s14738_s25 + $0x398] sm:$0xff] %v9081_v1  ;;  %v8953_v62 = vpop.f32.mrb[42].mxu0  ;;  %v9084_v57 = vpop.f32.mrb[42].mxu1  ;;  %10249 = vmatprep.mubr.f32.mxu0 %v12818_v29  ;;  %10380 = vmatprep.mubr.f32.mxu1 %v12818_v29 }
 0x6b3   : > { %v8954_v19 = vadd.f32 %v8953_v62, %v14885_v8  ;;  %v9085_v56 = vadd.f32 %v9084_v57, %v14885_v8  ;;  %v8955_v37 = vpop.f32.mrb[43].mxu0  ;;  %v9086_v14 = vpop.f32.mrb[43].mxu1  ;;  %12237 = vmatmul.mubr.msk.f32.gmra.mrb[148].mxu0 %vm8823_vm11, %v14906_v10  ;;  %12248 = vmatmul.mubr.msk.f32.gmra.mrb[148].mxu1 %vm8823_vm11, %v14906_v10 }
 0x6b4   : > { %v8956_v46 = vadd.f32 %v8955_v37, %v14885_v8  ;;  %v9087_v38 = vadd.f32 %v9086_v14, %v14885_v8  ;;  %12488 = vmatpush1.bf16.msra.mxu0 %v12487_v55  ;;  %12504 = vmatpush1.bf16.msra.mxu1 %v12503_v48  ;;  %v15020_v37 = vld [vmem:[%s15656_s5 + $0x40] sm:$0xff] }
 0x6b5   : > { %10831 = vst [vmem:[%s14738_s25 + $0x460] sm:$0xff] %v8954_v19  ;;  %10833 = vst [vmem:[%s14738_s25 + $0x470] sm:$0xff] %v9085_v56  ;;  %10445 = vmatprep.subr.mxu0 %v8743_v32  ;;  %10576 = vmatprep.subr.mxu1 %v8745_v25 }
 0x6b6   : > { %10832 = vst [vmem:[%s14738_s25 + $0x468] sm:$0xff] %v8956_v46  ;;  %10834 = vst [vmem:[%s14738_s25 + $0x478] sm:$0xff] %v9087_v38  ;;  %v8959_v17 = vpop.f32.mrb[44].mxu0  ;;  %v9090_v47 = vpop.f32.mrb[44].mxu1  ;;  %10255 = vmatprep.mubr.f32.mxu0 %v12818_v29  ;;  %10386 = vmatprep.mubr.f32.mxu1 %v12818_v29 }
 0x6b7   : > { %v8960_v30 = vadd.f32 %v8959_v17, %v14918_v24  ;;  %v9091_v58 = vadd.f32 %v9090_v47, %v14918_v24  ;;  %v8961_v20 = vpop.f32.mrb[45].mxu0  ;;  %v9092_v41 = vpop.f32.mrb[45].mxu1  ;;  %12238 = vmatmul.mubr.msk.f32.gmra.mrb[150].mxu0 %vm8823_vm11, %v14935_v7  ;;  %12249 = vmatmul.mubr.msk.f32.gmra.mrb[150].mxu1 %vm8823_vm11, %v14935_v7 }
 0x6b8   : > { %v8962_v6 = vadd.f32 %v8961_v20, %v14918_v24  ;;  %v9093_v54 = vadd.f32 %v9092_v41, %v14918_v24  ;;  %10446 = vmatpush1.msra.mxu0 %v14861_v44  ;;  %10577 = vmatpush1.msra.mxu1 %v8682_v28 }
 0x6b9   : > { %10859 = vst [vmem:[%s14738_s25 + $0x540] sm:$0xff] %v8960_v30  ;;  %10861 = vst [vmem:[%s14738_s25 + $0x550] sm:$0xff] %v9091_v58  ;;  %10261 = vmatprep.mubr.f32.mxu0 %v12818_v29  ;;  %10392 = vmatprep.mubr.f32.mxu1 %v12818_v29  ;;  %v15039_v58 = vld [vmem:[%s15656_s5 + $0x48] sm:$0xff] }
 0x6ba   : > { %10860 = vst [vmem:[%s14738_s25 + $0x548] sm:$0xff] %v8962_v6  ;;  %10862 = vst [vmem:[%s14738_s25 + $0x558] sm:$0xff] %v9093_v54  ;;  %v8965_v23 = vpop.f32.mrb[46].mxu0  ;;  %v9096_v40 = vpop.f32.mrb[46].mxu1 }
 0x6bb   : > { %v8966_v51 = vadd.f32 %v8965_v23, %v14944_v39  ;;  %v9097_v60 = vadd.f32 %v9096_v40, %v14944_v39  ;;  %v8967_v34 = vpop.f32.mrb[47].mxu0  ;;  %v9098_v4 = vpop.f32.mrb[47].mxu1  ;;  %12239 = vmatmul.mubr.msk.f32.gmra.mrb[152].mxu0 %vm8823_vm11, %v14957_v52  ;;  %12250 = vmatmul.mubr.msk.f32.gmra.mrb[152].mxu1 %vm8823_vm11, %v14957_v52 }
 0x6bc   : > { %v8968_v3 = vadd.f32 %v8967_v34, %v14944_v39  ;;  %v9099_v15 = vadd.f32 %v9098_v4, %v14944_v39  ;;  %10267 = vmatprep.mubr.f32.mxu0 %v12818_v29  ;;  %10398 = vmatprep.mubr.f32.mxu1 %v12818_v29  ;;  %v15058_v34 = vld [vmem:[%s15656_s5 + $0x50] sm:$0x3] }
 0x6bd   : > { %10887 = vst [vmem:[%s14738_s25 + $0x620] sm:$0xff] %v8966_v51  ;;  %10889 = vst [vmem:[%s14738_s25 + $0x630] sm:$0xff] %v9097_v60 }
 0x6be   : > { %10888 = vst [vmem:[%s14738_s25 + $0x628] sm:$0xff] %v8968_v3  ;;  %10890 = vst [vmem:[%s14738_s25 + $0x638] sm:$0xff] %v9099_v15  ;;  %v8971_v43 = vpop.f32.mrb[48].mxu0  ;;  %v9102_v27 = vpop.f32.mrb[48].mxu1 }
 0x6bf   : > { %v8972_v32 = vadd.f32 %v8971_v43, %v14967_v2  ;;  %v9103_v26 = vadd.f32 %v9102_v27, %v14967_v2  ;;  %v8973_v13 = vpop.f32.mrb[49].mxu0  ;;  %v9104_v42 = vpop.f32.mrb[49].mxu1  ;;  %12240 = vmatmul.mubr.msk.f32.gmra.mrb[154].mxu0 %vm8823_vm11, %v14978_v35  ;;  %12251 = vmatmul.mubr.msk.f32.gmra.mrb[154].mxu1 %vm8823_vm11, %v14978_v35 }
 0x6c0   : > { %v8974_v44 = vadd.f32 %v8973_v13, %v14967_v2  ;;  %v9105_v36 = vadd.f32 %v9104_v42, %v14967_v2  ;;  %10273 = vmatprep.mubr.f32.mxu0 %v12818_v29  ;;  %10404 = vmatprep.mubr.f32.mxu1 %v12818_v29 }
 0x6c1   : > { %10915 = vst [vmem:[%s14738_s25 + $0x700] sm:$0xff] %v8972_v32  ;;  %10917 = vst [vmem:[%s14738_s25 + $0x710] sm:$0xff] %v9103_v26 }
 0x6c2   : > { %10916 = vst [vmem:[%s14738_s25 + $0x708] sm:$0xff] %v8974_v44  ;;  %10918 = vst [vmem:[%s14738_s25 + $0x718] sm:$0xff] %v9105_v36  ;;  %v8977_v49 = vpop.f32.mrb[50].mxu0  ;;  %v9108_v63 = vpop.f32.mrb[50].mxu1 }
 0x6c3   : > { %v8978_v33 = vadd.f32 %v8977_v49, %v14988_v12  ;;  %v9109_v9 = vadd.f32 %v9108_v63, %v14988_v12  ;;  %v8979_v22 = vpop.f32.mrb[51].mxu0  ;;  %v9110_v53 = vpop.f32.mrb[51].mxu1  ;;  %12241 = vmatmul.mubr.msk.f32.gmra.mrb[156].mxu0 %vm8823_vm11, %v14999_v0  ;;  %12252 = vmatmul.mubr.msk.f32.gmra.mrb[156].mxu1 %vm8823_vm11, %v14999_v0 }
 0x6c4   : > { %v8980_v21 = vadd.f32 %v8979_v22, %v14988_v12  ;;  %v9111_v1 = vadd.f32 %v9110_v53, %v14988_v12  ;;  %10279 = vmatprep.mubr.f32.mxu0 %v12818_v29  ;;  %10410 = vmatprep.mubr.f32.mxu1 %v12818_v29 }
 0x6c5   : > { %10943 = vst [vmem:[%s14738_s25 + $0x7e0] sm:$0xff] %v8978_v33  ;;  %10945 = vst [vmem:[%s14738_s25 + $0x7f0] sm:$0xff] %v9109_v9 }
 0x6c6   : > { %10944 = vst [vmem:[%s14738_s25 + $0x7e8] sm:$0xff] %v8980_v21  ;;  %10946 = vst [vmem:[%s14738_s25 + $0x7f8] sm:$0xff] %v9111_v1  ;;  %v8983_v55 = vpop.f32.mrb[52].mxu0  ;;  %v9114_v48 = vpop.f32.mrb[52].mxu1 }
 0x6c7   : > { %v8984_v62 = vadd.f32 %v8983_v55, %v15009_v45  ;;  %v9115_v57 = vadd.f32 %v9114_v48, %v15009_v45  ;;  %v8985_v19 = vpop.f32.mrb[53].mxu0  ;;  %v9116_v56 = vpop.f32.mrb[53].mxu1  ;;  %12242 = vmatmul.mubr.msk.f32.gmra.mrb[158].mxu0 %vm8823_vm11, %v15020_v37  ;;  %12253 = vmatmul.mubr.msk.f32.gmra.mrb[158].mxu1 %vm8823_vm11, %v15020_v37 }
 0x6c8   : > { %v8986_v14 = vadd.f32 %v8985_v19, %v15009_v45  ;;  %v9117_v46 = vadd.f32 %v9116_v56, %v15009_v45  ;;  %10285 = vmatprep.mubr.f32.mxu0 %v12818_v29  ;;  %10416 = vmatprep.mubr.f32.mxu1 %v12818_v29 }
 0x6c9   : > { %10971 = vst [vmem:[%s14738_s25 + $0x8c0] sm:$0x3] %v8984_v62  ;;  %10973 = vst [vmem:[%s14738_s25 + $0x8d0] sm:$0x3] %v9115_v57 }
 0x6ca   : > { %10972 = vst [vmem:[%s14738_s25 + $0x8c8] sm:$0x3] %v8986_v14  ;;  %10974 = vst [vmem:[%s14738_s25 + $0x8d8] sm:$0x3] %v9117_v46  ;;  %v9185_v38 = vpop.f32.mrb[54].mxu0  ;;  %v9316_v25 = vpop.f32.mrb[54].mxu1 }
 0x6cb   : > { %v9186_v17 = vadd.f32 %v9185_v38, %v14731_v50  ;;  %v9317_v47 = vadd.f32 %v9316_v25, %v14731_v50  ;;  %v9187_v28 = vpop.f32.mrb[55].mxu0  ;;  %v9318_v30 = vpop.f32.mrb[55].mxu1  ;;  %12243 = vmatmul.mubr.msk.f32.gmra.mrb[160].mxu0 %vm8823_vm11, %v15039_v58  ;;  %12254 = vmatmul.mubr.msk.f32.gmra.mrb[160].mxu1 %vm8823_vm11, %v15039_v58 }
 0x6cc   : > { %v9188_v20 = vadd.f32 %v9187_v28, %v14731_v50  ;;  %v9319_v41 = vadd.f32 %v9318_v30, %v14731_v50  ;;  %10291 = vmatprep.mubr.f32.mxu0 %v12818_v29  ;;  %10422 = vmatprep.mubr.f32.mxu1 %v12818_v29 }
 0x6cd   : > { %10695 = vst [vmem:[%s14738_s25 + $0x20] sm:$0xff] %v9186_v17  ;;  %10697 = vst [vmem:[%s14738_s25 + $0x30] sm:$0xff] %v9317_v47 }
 0x6ce   : > { %10696 = vst [vmem:[%s14738_s25 + $0x28] sm:$0xff] %v9188_v20  ;;  %10698 = vst [vmem:[%s14738_s25 + $0x38] sm:$0xff] %v9319_v41  ;;  %v9191_v6 = vpop.f32.mrb[56].mxu0  ;;  %v9322_v54 = vpop.f32.mrb[56].mxu1 }
 0x6cf   : > { %v9192_v23 = vadd.f32 %v9191_v6, %v14753_v16  ;;  %v9323_v40 = vadd.f32 %v9322_v54, %v14753_v16  ;;  %v9193_v51 = vpop.f32.mrb[57].mxu0  ;;  %v9324_v60 = vpop.f32.mrb[57].mxu1  ;;  %12244 = vmatmul.mubr.msk.f32.gmra.mrb[162].mxu0 %vm8823_vm11, %v15058_v34  ;;  %12255 = vmatmul.mubr.msk.f32.gmra.mrb[162].mxu1 %vm8823_vm11, %v15058_v34 }
 0x6d0   : > { %v9194_v4 = vadd.f32 %v9193_v51, %v14753_v16  ;;  %v9325_v3 = vadd.f32 %v9324_v60, %v14753_v16  ;;  %10493 = vmatprep.mubr.f32.mxu0 %v12818_v29  ;;  %10624 = vmatprep.mubr.f32.mxu1 %v12818_v29 }
 0x6d1   : > { %10723 = vst [vmem:[%s14738_s25 + $0x100] sm:$0xff] %v9192_v23  ;;  %10725 = vst [vmem:[%s14738_s25 + $0x110] sm:$0xff] %v9323_v40 }
 0x6d2   : > { %10724 = vst [vmem:[%s14738_s25 + $0x108] sm:$0xff] %v9194_v4  ;;  %10726 = vst [vmem:[%s14738_s25 + $0x118] sm:$0xff] %v9325_v3  ;;  %v9197_v15 = vpop.f32.mrb[58].mxu0  ;;  %v9328_v43 = vpop.f32.mrb[58].mxu1 }
 0x6d3   : > { %v9198_v27 = vadd.f32 %v9197_v15, %v14781_v18  ;;  %v9329_v32 = vadd.f32 %v9328_v43, %v14781_v18  ;;  %v9199_v26 = vpop.f32.mrb[59].mxu0  ;;  %v9330_v13 = vpop.f32.mrb[59].mxu1  ;;  %12256 = vmatmul.mubr.msk.f32.vlgmr.msra.gmra.mrb[164].mxu0 %vm8823_vm11, %v14799_v61  ;;  %12267 = vmatmul.mubr.msk.f32.vlgmr.msra.gmra.mrb[164].mxu1 %vm8823_vm11, %v14799_v61 }
 0x6d4   : > { %v9200_v42 = vadd.f32 %v9199_v26, %v14781_v18  ;;  %v9331_v44 = vadd.f32 %v9330_v13, %v14781_v18  ;;  %10499 = vmatprep.mubr.f32.mxu0 %v12818_v29  ;;  %10630 = vmatprep.mubr.f32.mxu1 %v12818_v29 }
 0x6d5   : > { %10751 = vst [vmem:[%s14738_s25 + $0x1e0] sm:$0xff] %v9198_v27  ;;  %10753 = vst [vmem:[%s14738_s25 + $0x1f0] sm:$0xff] %v9329_v32 }
 0x6d6   : > { %10752 = vst [vmem:[%s14738_s25 + $0x1e8] sm:$0xff] %v9200_v42  ;;  %10754 = vst [vmem:[%s14738_s25 + $0x1f8] sm:$0xff] %v9331_v44  ;;  %v9203_v36 = vpop.f32.mrb[60].mxu0  ;;  %v9334_v49 = vpop.f32.mrb[60].mxu1 }
 0x6d7   : > { %v9204_v61 = vadd.f32 %v9203_v36, %v14809_v59  ;;  %v9335_v63 = vadd.f32 %v9334_v49, %v14809_v59  ;;  %v9205_v33 = vpop.f32.mrb[61].mxu0  ;;  %v9336_v9 = vpop.f32.mrb[61].mxu1  ;;  %12257 = vmatmul.mubr.msk.f32.gmra.mrb[166].mxu0 %vm8823_vm11, %v14837_v11  ;;  %12268 = vmatmul.mubr.msk.f32.gmra.mrb[166].mxu1 %vm8823_vm11, %v14837_v11 }
 0x6d8   : > { %v9206_v22 = vadd.f32 %v9205_v33, %v14809_v59  ;;  %v9337_v53 = vadd.f32 %v9336_v9, %v14809_v59  ;;  %10505 = vmatprep.mubr.f32.mxu0 %v12818_v29  ;;  %10636 = vmatprep.mubr.f32.mxu1 %v12818_v29 }
 0x6d9   : > { %10779 = vst [vmem:[%s14738_s25 + $0x2c0] sm:$0xff] %v9204_v61  ;;  %10781 = vst [vmem:[%s14738_s25 + $0x2d0] sm:$0xff] %v9335_v63 }
 0x6da   : > { %10780 = vst [vmem:[%s14738_s25 + $0x2c8] sm:$0xff] %v9206_v22  ;;  %10782 = vst [vmem:[%s14738_s25 + $0x2d8] sm:$0xff] %v9337_v53  ;;  %v9209_v21 = vpop.f32.mrb[62].mxu0  ;;  %v9340_v1 = vpop.f32.mrb[62].mxu1 }
 0x6db   : > { %v9210_v11 = vadd.f32 %v9209_v21, %v14851_v5  ;;  %v9341_v55 = vadd.f32 %v9340_v1, %v14851_v5  ;;  %v9211_v48 = vpop.f32.mrb[63].mxu0  ;;  %v9342_v62 = vpop.f32.mrb[63].mxu1  ;;  %12258 = vmatmul.mubr.msk.f32.gmra.mrb[168].mxu0 %vm8823_vm11, %v14876_v31  ;;  %12269 = vmatmul.mubr.msk.f32.gmra.mrb[168].mxu1 %vm8823_vm11, %v14876_v31 }
 0x6dc   : > { %v9212_v57 = vadd.f32 %v9211_v48, %v14851_v5  ;;  %v9343_v19 = vadd.f32 %v9342_v62, %v14851_v5  ;;  %10511 = vmatprep.mubr.f32.mxu0 %v12818_v29  ;;  %10642 = vmatprep.mubr.f32.mxu1 %v12818_v29 }
 0x6dd   : > { %10807 = vst [vmem:[%s14738_s25 + $0x3a0] sm:$0xff] %v9210_v11  ;;  %10809 = vst [vmem:[%s14738_s25 + $0x3b0] sm:$0xff] %v9341_v55 }
 0x6de   : > { %10808 = vst [vmem:[%s14738_s25 + $0x3a8] sm:$0xff] %v9212_v57  ;;  %10810 = vst [vmem:[%s14738_s25 + $0x3b8] sm:$0xff] %v9343_v19  ;;  %v9215_v56 = vpop.f32.mrb[64].mxu0  ;;  %v9346_v14 = vpop.f32.mrb[64].mxu1 }
 0x6df   : > { %v9216_v31 = vadd.f32 %v9215_v56, %v14885_v8  ;;  %v9347_v46 = vadd.f32 %v9346_v14, %v14885_v8  ;;  %v9217_v38 = vpop.f32.mrb[65].mxu0  ;;  %v9348_v25 = vpop.f32.mrb[65].mxu1  ;;  %12259 = vmatmul.mubr.msk.f32.gmra.mrb[170].mxu0 %vm8823_vm11, %v14906_v10  ;;  %12270 = vmatmul.mubr.msk.f32.gmra.mrb[170].mxu1 %vm8823_vm11, %v14906_v10 }
 0x6e0   : > { %v9218_v17 = vadd.f32 %v9217_v38, %v14885_v8  ;;  %v9349_v47 = vadd.f32 %v9348_v25, %v14885_v8  ;;  %10517 = vmatprep.mubr.f32.mxu0 %v12818_v29  ;;  %10648 = vmatprep.mubr.f32.mxu1 %v12818_v29 }
 0x6e1   : > { %10835 = vst [vmem:[%s14738_s25 + $0x480] sm:$0xff] %v9216_v31  ;;  %10837 = vst [vmem:[%s14738_s25 + $0x490] sm:$0xff] %v9347_v46 }
 0x6e2   : > { %10836 = vst [vmem:[%s14738_s25 + $0x488] sm:$0xff] %v9218_v17  ;;  %10838 = vst [vmem:[%s14738_s25 + $0x498] sm:$0xff] %v9349_v47  ;;  %v9221_v28 = vpop.f32.mrb[66].mxu0  ;;  %v9352_v30 = vpop.f32.mrb[66].mxu1 }
 0x6e3   : > { %v9222_v10 = vadd.f32 %v9221_v28, %v14918_v24  ;;  %v9353_v20 = vadd.f32 %v9352_v30, %v14918_v24  ;;  %v9223_v41 = vpop.f32.mrb[67].mxu0  ;;  %v9354_v6 = vpop.f32.mrb[67].mxu1  ;;  %12260 = vmatmul.mubr.msk.f32.gmra.mrb[172].mxu0 %vm8823_vm11, %v14935_v7  ;;  %12271 = vmatmul.mubr.msk.f32.gmra.mrb[172].mxu1 %vm8823_vm11, %v14935_v7 }
 0x6e4   : > { %v9224_v54 = vadd.f32 %v9223_v41, %v14918_v24  ;;  %v9355_v23 = vadd.f32 %v9354_v6, %v14918_v24  ;;  %10523 = vmatprep.mubr.f32.mxu0 %v12818_v29  ;;  %10654 = vmatprep.mubr.f32.mxu1 %v12818_v29 }
 0x6e5   : > { %10863 = vst [vmem:[%s14738_s25 + $0x560] sm:$0xff] %v9222_v10  ;;  %10865 = vst [vmem:[%s14738_s25 + $0x570] sm:$0xff] %v9353_v20 }
 0x6e6   : > { %10864 = vst [vmem:[%s14738_s25 + $0x568] sm:$0xff] %v9224_v54  ;;  %10866 = vst [vmem:[%s14738_s25 + $0x578] sm:$0xff] %v9355_v23  ;;  %v9227_v40 = vpop.f32.mrb[68].mxu0  ;;  %v9358_v51 = vpop.f32.mrb[68].mxu1 }
 0x6e7   : > { %v9228_v7 = vadd.f32 %v9227_v40, %v14944_v39  ;;  %v9359_v60 = vadd.f32 %v9358_v51, %v14944_v39  ;;  %v9229_v4 = vpop.f32.mrb[69].mxu0  ;;  %v9360_v3 = vpop.f32.mrb[69].mxu1  ;;  %12261 = vmatmul.mubr.msk.f32.gmra.mrb[174].mxu0 %vm8823_vm11, %v14957_v52  ;;  %12272 = vmatmul.mubr.msk.f32.gmra.mrb[174].mxu1 %vm8823_vm11, %v14957_v52 }
 0x6e8   : > { %v9230_v15 = vadd.f32 %v9229_v4, %v14944_v39  ;;  %v9361_v43 = vadd.f32 %v9360_v3, %v14944_v39  ;;  %10529 = vmatprep.mubr.f32.mxu0 %v12818_v29  ;;  %10660 = vmatprep.mubr.f32.mxu1 %v12818_v29 }
 0x6e9   : > { %10891 = vst [vmem:[%s14738_s25 + $0x640] sm:$0xff] %v9228_v7  ;;  %10893 = vst [vmem:[%s14738_s25 + $0x650] sm:$0xff] %v9359_v60 }
 0x6ea   : > { %10892 = vst [vmem:[%s14738_s25 + $0x648] sm:$0xff] %v9230_v15  ;;  %10894 = vst [vmem:[%s14738_s25 + $0x658] sm:$0xff] %v9361_v43  ;;  %v9233_v27 = vpop.f32.mrb[70].mxu0  ;;  %v9364_v32 = vpop.f32.mrb[70].mxu1 }
 0x6eb   : > { %v9234_v52 = vadd.f32 %v9233_v27, %v14967_v2  ;;  %v9365_v26 = vadd.f32 %v9364_v32, %v14967_v2  ;;  %v9235_v13 = vpop.f32.mrb[71].mxu0  ;;  %v9366_v42 = vpop.f32.mrb[71].mxu1  ;;  %12262 = vmatmul.mubr.msk.f32.gmra.mrb[176].mxu0 %vm8823_vm11, %v14978_v35  ;;  %12273 = vmatmul.mubr.msk.f32.gmra.mrb[176].mxu1 %vm8823_vm11, %v14978_v35 }
 0x6ec   : > { %v9236_v44 = vadd.f32 %v9235_v13, %v14967_v2  ;;  %v9367_v36 = vadd.f32 %v9366_v42, %v14967_v2  ;;  %10535 = vmatprep.mubr.f32.mxu0 %v12818_v29  ;;  %10666 = vmatprep.mubr.f32.mxu1 %v12818_v29 }
 0x6ed   : > { %10919 = vst [vmem:[%s14738_s25 + $0x720] sm:$0xff] %v9234_v52  ;;  %10921 = vst [vmem:[%s14738_s25 + $0x730] sm:$0xff] %v9365_v26 }
 0x6ee   : > { %10920 = vst [vmem:[%s14738_s25 + $0x728] sm:$0xff] %v9236_v44  ;;  %10922 = vst [vmem:[%s14738_s25 + $0x738] sm:$0xff] %v9367_v36  ;;  %v9239_v49 = vpop.f32.mrb[72].mxu0  ;;  %v9370_v61 = vpop.f32.mrb[72].mxu1 }
 0x6ef   : > { %v9240_v35 = vadd.f32 %v9239_v49, %v14988_v12  ;;  %v9371_v63 = vadd.f32 %v9370_v61, %v14988_v12  ;;  %v9241_v33 = vpop.f32.mrb[73].mxu0  ;;  %v9372_v9 = vpop.f32.mrb[73].mxu1  ;;  %12263 = vmatmul.mubr.msk.f32.gmra.mrb[178].mxu0 %vm8823_vm11, %v14999_v0  ;;  %12274 = vmatmul.mubr.msk.f32.gmra.mrb[178].mxu1 %vm8823_vm11, %v14999_v0 }
 0x6f0   : > { %v9242_v22 = vadd.f32 %v9241_v33, %v14988_v12  ;;  %v9373_v53 = vadd.f32 %v9372_v9, %v14988_v12  ;;  %10541 = vmatprep.mubr.f32.mxu0 %v12818_v29  ;;  %10672 = vmatprep.mubr.f32.mxu1 %v12818_v29 }
 0x6f1   : > { %10947 = vst [vmem:[%s14738_s25 + $0x800] sm:$0xff] %v9240_v35  ;;  %10949 = vst [vmem:[%s14738_s25 + $0x810] sm:$0xff] %v9371_v63 }
 0x6f2   : > { %10948 = vst [vmem:[%s14738_s25 + $0x808] sm:$0xff] %v9242_v22  ;;  %10950 = vst [vmem:[%s14738_s25 + $0x818] sm:$0xff] %v9373_v53  ;;  %v9245_v21 = vpop.f32.mrb[74].mxu0  ;;  %v9376_v1 = vpop.f32.mrb[74].mxu1 }
 0x6f3   : > { %v9246_v0 = vadd.f32 %v9245_v21, %v15009_v45  ;;  %v9377_v11 = vadd.f32 %v9376_v1, %v15009_v45  ;;  %v9247_v55 = vpop.f32.mrb[75].mxu0  ;;  %v9378_v48 = vpop.f32.mrb[75].mxu1  ;;  %12264 = vmatmul.mubr.msk.f32.gmra.mrb[180].mxu0 %vm8823_vm11, %v15020_v37  ;;  %12275 = vmatmul.mubr.msk.f32.gmra.mrb[180].mxu1 %vm8823_vm11, %v15020_v37 }
 0x6f4   : > { %v9248_v62 = vadd.f32 %v9247_v55, %v15009_v45  ;;  %v9379_v57 = vadd.f32 %v9378_v48, %v15009_v45  ;;  %10547 = vmatprep.mubr.f32.mxu0 %v12818_v29  ;;  %10678 = vmatprep.mubr.f32.mxu1 %v12818_v29 }
 0x6f5   : > { %10975 = vst [vmem:[%s14738_s25 + $0x8e0] sm:$0x3] %v9246_v0  ;;  %10977 = vst [vmem:[%s14738_s25 + $0x8f0] sm:$0x3] %v9377_v11 }
 0x6f6   : > { %10976 = vst [vmem:[%s14738_s25 + $0x8e8] sm:$0x3] %v9248_v62  ;;  %10978 = vst [vmem:[%s14738_s25 + $0x8f8] sm:$0x3] %v9379_v57  ;;  %v9447_v19 = vpop.f32.mrb[76].mxu0  ;;  %v9578_v56 = vpop.f32.mrb[76].mxu1 }
 0x6f7   : > { %v9448_v37 = vadd.f32 %v9447_v19, %v14731_v50  ;;  %v9579_v14 = vadd.f32 %v9578_v56, %v14731_v50  ;;  %v9449_v31 = vpop.f32.mrb[77].mxu0  ;;  %v9580_v46 = vpop.f32.mrb[77].mxu1  ;;  %12265 = vmatmul.mubr.msk.f32.gmra.mrb[182].mxu0 %vm8823_vm11, %v15039_v58  ;;  %12276 = vmatmul.mubr.msk.f32.gmra.mrb[182].mxu1 %vm8823_vm11, %v15039_v58 }
 0x6f8   : > { %v9450_v38 = vadd.f32 %v9449_v31, %v14731_v50  ;;  %v9581_v25 = vadd.f32 %v9580_v46, %v14731_v50  ;;  %10553 = vmatprep.mubr.f32.mxu0 %v12818_v29  ;;  %10684 = vmatprep.mubr.f32.mxu1 %v12818_v29 }
 0x6f9   : > { %10699 = vst [vmem:[%s14738_s25 + $0x40] sm:$0xff] %v9448_v37  ;;  %10701 = vst [vmem:[%s14738_s25 + $0x50] sm:$0xff] %v9579_v14 }
 0x6fa   : > { %10700 = vst [vmem:[%s14738_s25 + $0x48] sm:$0xff] %v9450_v38  ;;  %10702 = vst [vmem:[%s14738_s25 + $0x58] sm:$0xff] %v9581_v25  ;;  %v9453_v17 = vpop.f32.mrb[78].mxu0  ;;  %v9584_v47 = vpop.f32.mrb[78].mxu1 }
 0x6fb   : > { %v9454_v58 = vadd.f32 %v9453_v17, %v14753_v16  ;;  %v9585_v28 = vadd.f32 %v9584_v47, %v14753_v16  ;;  %v9455_v30 = vpop.f32.mrb[79].mxu0  ;;  %v9586_v10 = vpop.f32.mrb[79].mxu1  ;;  %12266 = vmatmul.mubr.msk.f32.gmra.mrb[184].mxu0 %vm8823_vm11, %v15058_v34  ;;  %12277 = vmatmul.mubr.msk.f32.gmra.mrb[184].mxu1 %vm8823_vm11, %v15058_v34 }
 0x6fc   : > { %v9456_v29 = vadd.f32 %v9455_v30, %v14753_v16  ;;  %v9587_v20 = vadd.f32 %v9586_v10, %v14753_v16 }
 0x6fd   : > { %10727 = vst [vmem:[%s14738_s25 + $0x120] sm:$0xff] %v9454_v58  ;;  %10729 = vst [vmem:[%s14738_s25 + $0x130] sm:$0xff] %v9585_v28 }
 0x6fe   : > { %10728 = vst [vmem:[%s14738_s25 + $0x128] sm:$0xff] %v9456_v29  ;;  %10730 = vst [vmem:[%s14738_s25 + $0x138] sm:$0xff] %v9587_v20  ;;  %v9459_v41 = vpop.f32.mrb[80].mxu0  ;;  %v9590_v6 = vpop.f32.mrb[80].mxu1 }
 0x6ff   : > { %v9460_v54 = vadd.f32 %v9459_v41, %v14781_v18  ;;  %v9591_v23 = vadd.f32 %v9590_v6, %v14781_v18  ;;  %v9461_v40 = vpop.f32.mrb[81].mxu0  ;;  %v9592_v34 = vpop.f32.mrb[81].mxu1 }
 0x700   : > { %v9462_v51 = vadd.f32 %v9461_v40, %v14781_v18  ;;  %v9593_v7 = vadd.f32 %v9592_v34, %v14781_v18 }
 0x701   : > { %10755 = vst [vmem:[%s14738_s25 + $0x200] sm:$0xff] %v9460_v54  ;;  %10757 = vst [vmem:[%s14738_s25 + $0x210] sm:$0xff] %v9591_v23 }
 0x702   : > { %10756 = vst [vmem:[%s14738_s25 + $0x208] sm:$0xff] %v9462_v51  ;;  %10758 = vst [vmem:[%s14738_s25 + $0x218] sm:$0xff] %v9593_v7  ;;  %v9465_v60 = vpop.f32.mrb[82].mxu0  ;;  %v9596_v4 = vpop.f32.mrb[82].mxu1 }
 0x703   : > { %v9466_v3 = vadd.f32 %v9465_v60, %v14809_v59  ;;  %v9597_v15 = vadd.f32 %v9596_v4, %v14809_v59  ;;  %v9467_v43 = vpop.f32.mrb[83].mxu0  ;;  %v9598_v27 = vpop.f32.mrb[83].mxu1 }
 0x704   : > { %v9468_v32 = vadd.f32 %v9467_v43, %v14809_v59  ;;  %v9599_v52 = vadd.f32 %v9598_v27, %v14809_v59 }
 0x705   : > { %10783 = vst [vmem:[%s14738_s25 + $0x2e0] sm:$0xff] %v9466_v3  ;;  %10785 = vst [vmem:[%s14738_s25 + $0x2f0] sm:$0xff] %v9597_v15 }
 0x706   : > { %10784 = vst [vmem:[%s14738_s25 + $0x2e8] sm:$0xff] %v9468_v32  ;;  %10786 = vst [vmem:[%s14738_s25 + $0x2f8] sm:$0xff] %v9599_v52  ;;  %v9471_v26 = vpop.f32.mrb[84].mxu0  ;;  %v9602_v13 = vpop.f32.mrb[84].mxu1 }
 0x707   : > { %v9472_v42 = vadd.f32 %v9471_v26, %v14851_v5  ;;  %v9603_v44 = vadd.f32 %v9602_v13, %v14851_v5  ;;  %v9473_v36 = vpop.f32.mrb[85].mxu0  ;;  %v9604_v49 = vpop.f32.mrb[85].mxu1 }
 0x708   : > { %v9474_v61 = vadd.f32 %v9473_v36, %v14851_v5  ;;  %v9605_v35 = vadd.f32 %v9604_v49, %v14851_v5 }
 0x709   : > { %10811 = vst [vmem:[%s14738_s25 + $0x3c0] sm:$0xff] %v9472_v42  ;;  %10813 = vst [vmem:[%s14738_s25 + $0x3d0] sm:$0xff] %v9603_v44 }
 0x70a   : > { %10812 = vst [vmem:[%s14738_s25 + $0x3c8] sm:$0xff] %v9474_v61  ;;  %10814 = vst [vmem:[%s14738_s25 + $0x3d8] sm:$0xff] %v9605_v35  ;;  %v9477_v63 = vpop.f32.mrb[86].mxu0  ;;  %v9608_v33 = vpop.f32.mrb[86].mxu1 }
 0x70b   : > { %v9478_v9 = vadd.f32 %v9477_v63, %v14885_v8  ;;  %v9609_v22 = vadd.f32 %v9608_v33, %v14885_v8  ;;  %v9479_v53 = vpop.f32.mrb[87].mxu0  ;;  %v9610_v21 = vpop.f32.mrb[87].mxu1 }
 0x70c   : > { %v9480_v1 = vadd.f32 %v9479_v53, %v14885_v8  ;;  %v9611_v0 = vadd.f32 %v9610_v21, %v14885_v8 }
 0x70d   : > { %10839 = vst [vmem:[%s14738_s25 + $0x4a0] sm:$0xff] %v9478_v9  ;;  %10841 = vst [vmem:[%s14738_s25 + $0x4b0] sm:$0xff] %v9609_v22 }
 0x70e   : > { %10840 = vst [vmem:[%s14738_s25 + $0x4a8] sm:$0xff] %v9480_v1  ;;  %10842 = vst [vmem:[%s14738_s25 + $0x4b8] sm:$0xff] %v9611_v0  ;;  %v9483_v11 = vpop.f32.mrb[88].mxu0  ;;  %v9614_v55 = vpop.f32.mrb[88].mxu1 }
 0x70f   : > { %v9484_v48 = vadd.f32 %v9483_v11, %v14918_v24  ;;  %v9615_v62 = vadd.f32 %v9614_v55, %v14918_v24  ;;  %v9485_v57 = vpop.f32.mrb[89].mxu0  ;;  %v9616_v19 = vpop.f32.mrb[89].mxu1 }
 0x710   : > { %v9486_v56 = vadd.f32 %v9485_v57, %v14918_v24  ;;  %v9617_v37 = vadd.f32 %v9616_v19, %v14918_v24 }
 0x711   : > { %10867 = vst [vmem:[%s14738_s25 + $0x580] sm:$0xff] %v9484_v48  ;;  %10869 = vst [vmem:[%s14738_s25 + $0x590] sm:$0xff] %v9615_v62 }
 0x712   : > { %10868 = vst [vmem:[%s14738_s25 + $0x588] sm:$0xff] %v9486_v56  ;;  %10870 = vst [vmem:[%s14738_s25 + $0x598] sm:$0xff] %v9617_v37  ;;  %v9489_v14 = vpop.f32.mrb[90].mxu0  ;;  %v9620_v31 = vpop.f32.mrb[90].mxu1 }
 0x713   : > { %v9490_v46 = vadd.f32 %v9489_v14, %v14944_v39  ;;  %v9621_v38 = vadd.f32 %v9620_v31, %v14944_v39  ;;  %v9491_v25 = vpop.f32.mrb[91].mxu0  ;;  %v9622_v17 = vpop.f32.mrb[91].mxu1 }
 0x714   : > { %v9492_v47 = vadd.f32 %v9491_v25, %v14944_v39  ;;  %v9623_v58 = vadd.f32 %v9622_v17, %v14944_v39 }
 0x715   : > { %10895 = vst [vmem:[%s14738_s25 + $0x660] sm:$0xff] %v9490_v46  ;;  %10897 = vst [vmem:[%s14738_s25 + $0x670] sm:$0xff] %v9621_v38 }
 0x716   : > { %10896 = vst [vmem:[%s14738_s25 + $0x668] sm:$0xff] %v9492_v47  ;;  %10898 = vst [vmem:[%s14738_s25 + $0x678] sm:$0xff] %v9623_v58  ;;  %v9495_v28 = vpop.f32.mrb[92].mxu0  ;;  %v9626_v30 = vpop.f32.mrb[92].mxu1 }
 0x717   : > { %v9496_v10 = vadd.f32 %v9495_v28, %v14967_v2  ;;  %v9627_v29 = vadd.f32 %v9626_v30, %v14967_v2  ;;  %v9497_v20 = vpop.f32.mrb[93].mxu0  ;;  %v9628_v41 = vpop.f32.mrb[93].mxu1 }
 0x718   : > { %v9498_v6 = vadd.f32 %v9497_v20, %v14967_v2  ;;  %v9629_v54 = vadd.f32 %v9628_v41, %v14967_v2 }
 0x719   : > { %10923 = vst [vmem:[%s14738_s25 + $0x740] sm:$0xff] %v9496_v10  ;;  %10925 = vst [vmem:[%s14738_s25 + $0x750] sm:$0xff] %v9627_v29 }
 0x71a   : > { %10924 = vst [vmem:[%s14738_s25 + $0x748] sm:$0xff] %v9498_v6  ;;  %10926 = vst [vmem:[%s14738_s25 + $0x758] sm:$0xff] %v9629_v54  ;;  %v9501_v23 = vpop.f32.mrb[94].mxu0  ;;  %v9632_v40 = vpop.f32.mrb[94].mxu1 }
 0x71b   : > { %v9502_v34 = vadd.f32 %v9501_v23, %v14988_v12  ;;  %v9633_v51 = vadd.f32 %v9632_v40, %v14988_v12  ;;  %v9503_v7 = vpop.f32.mrb[95].mxu0  ;;  %v9634_v60 = vpop.f32.mrb[95].mxu1 }
 0x71c   : > { %v9504_v4 = vadd.f32 %v9503_v7, %v14988_v12  ;;  %v9635_v3 = vadd.f32 %v9634_v60, %v14988_v12 }
 0x71d   : > { %10951 = vst [vmem:[%s14738_s25 + $0x820] sm:$0xff] %v9502_v34  ;;  %10953 = vst [vmem:[%s14738_s25 + $0x830] sm:$0xff] %v9633_v51 }
 0x71e   : > { %10952 = vst [vmem:[%s14738_s25 + $0x828] sm:$0xff] %v9504_v4  ;;  %10954 = vst [vmem:[%s14738_s25 + $0x838] sm:$0xff] %v9635_v3  ;;  %v9507_v15 = vpop.f32.mrb[96].mxu0  ;;  %v9638_v43 = vpop.f32.mrb[96].mxu1 }
 0x71f   : > { %v9508_v27 = vadd.f32 %v9507_v15, %v15009_v45  ;;  %v9639_v32 = vadd.f32 %v9638_v43, %v15009_v45  ;;  %v9509_v52 = vpop.f32.mrb[97].mxu0  ;;  %v9640_v26 = vpop.f32.mrb[97].mxu1 }
 0x720   : > { %v9510_v13 = vadd.f32 %v9509_v52, %v15009_v45  ;;  %v9641_v42 = vadd.f32 %v9640_v26, %v15009_v45 }
 0x721   : > { %10979 = vst [vmem:[%s14738_s25 + $0x900] sm:$0x3] %v9508_v27  ;;  %10981 = vst [vmem:[%s14738_s25 + $0x910] sm:$0x3] %v9639_v32 }
 0x722   : > { %10980 = vst [vmem:[%s14738_s25 + $0x908] sm:$0x3] %v9510_v13  ;;  %10982 = vst [vmem:[%s14738_s25 + $0x918] sm:$0x3] %v9641_v42  ;;  %v9709_v44 = vpop.f32.mrb[98].mxu0  ;;  %v9840_v36 = vpop.f32.mrb[98].mxu1 }
 0x723   : > { %v9710_v49 = vadd.f32 %v9709_v44, %v14731_v50  ;;  %v9841_v61 = vadd.f32 %v9840_v36, %v14731_v50  ;;  %v9711_v35 = vpop.f32.mrb[99].mxu0  ;;  %v9842_v63 = vpop.f32.mrb[99].mxu1 }
 0x724   : > { %v9712_v33 = vadd.f32 %v9711_v35, %v14731_v50  ;;  %v9843_v9 = vadd.f32 %v9842_v63, %v14731_v50 }
 0x725   : > { %10703 = vst [vmem:[%s14738_s25 + $0x60] sm:$0xff] %v9710_v49  ;;  %10705 = vst [vmem:[%s14738_s25 + $0x70] sm:$0xff] %v9841_v61 }
 0x726   : > { %10704 = vst [vmem:[%s14738_s25 + $0x68] sm:$0xff] %v9712_v33  ;;  %10706 = vst [vmem:[%s14738_s25 + $0x78] sm:$0xff] %v9843_v9  ;;  %v9715_v22 = vpop.f32.mrb[100].mxu0  ;;  %v9846_v53 = vpop.f32.mrb[100].mxu1 }
 0x727   : > { %v9716_v21 = vadd.f32 %v9715_v22, %v14753_v16  ;;  %v9847_v1 = vadd.f32 %v9846_v53, %v14753_v16  ;;  %v9717_v0 = vpop.f32.mrb[101].mxu0  ;;  %v9848_v11 = vpop.f32.mrb[101].mxu1 }
 0x728   : > { %v9718_v55 = vadd.f32 %v9717_v0, %v14753_v16  ;;  %v9849_v48 = vadd.f32 %v9848_v11, %v14753_v16 }
 0x729   : > { %10731 = vst [vmem:[%s14738_s25 + $0x140] sm:$0xff] %v9716_v21  ;;  %10733 = vst [vmem:[%s14738_s25 + $0x150] sm:$0xff] %v9847_v1 }
 0x72a   : > { %10732 = vst [vmem:[%s14738_s25 + $0x148] sm:$0xff] %v9718_v55  ;;  %10734 = vst [vmem:[%s14738_s25 + $0x158] sm:$0xff] %v9849_v48  ;;  %v9721_v62 = vpop.f32.mrb[102].mxu0  ;;  %v9852_v57 = vpop.f32.mrb[102].mxu1 }
 0x72b   : > { %v9722_v19 = vadd.f32 %v9721_v62, %v14781_v18  ;;  %v9853_v56 = vadd.f32 %v9852_v57, %v14781_v18  ;;  %v9723_v37 = vpop.f32.mrb[103].mxu0  ;;  %v9854_v14 = vpop.f32.mrb[103].mxu1 }
 0x72c   : > { %v9724_v31 = vadd.f32 %v9723_v37, %v14781_v18  ;;  %v9855_v46 = vadd.f32 %v9854_v14, %v14781_v18 }
 0x72d   : > { %10759 = vst [vmem:[%s14738_s25 + $0x220] sm:$0xff] %v9722_v19  ;;  %10761 = vst [vmem:[%s14738_s25 + $0x230] sm:$0xff] %v9853_v56 }
 0x72e   : > { %10760 = vst [vmem:[%s14738_s25 + $0x228] sm:$0xff] %v9724_v31  ;;  %10762 = vst [vmem:[%s14738_s25 + $0x238] sm:$0xff] %v9855_v46  ;;  %v9727_v38 = vpop.f32.mrb[104].mxu0  ;;  %v9858_v25 = vpop.f32.mrb[104].mxu1 }
 0x72f   : > { %v9728_v17 = vadd.f32 %v9727_v38, %v14809_v59  ;;  %v9859_v47 = vadd.f32 %v9858_v25, %v14809_v59  ;;  %v9729_v58 = vpop.f32.mrb[105].mxu0  ;;  %v9860_v28 = vpop.f32.mrb[105].mxu1 }
 0x730   : > { %v9730_v30 = vadd.f32 %v9729_v58, %v14809_v59  ;;  %v9861_v10 = vadd.f32 %v9860_v28, %v14809_v59 }
 0x731   : > { %10787 = vst [vmem:[%s14738_s25 + $0x300] sm:$0xff] %v9728_v17  ;;  %10789 = vst [vmem:[%s14738_s25 + $0x310] sm:$0xff] %v9859_v47 }
 0x732   : > { %10788 = vst [vmem:[%s14738_s25 + $0x308] sm:$0xff] %v9730_v30  ;;  %10790 = vst [vmem:[%s14738_s25 + $0x318] sm:$0xff] %v9861_v10  ;;  %v9733_v29 = vpop.f32.mrb[106].mxu0  ;;  %v9864_v20 = vpop.f32.mrb[106].mxu1 }
 0x733   : > { %v9734_v41 = vadd.f32 %v9733_v29, %v14851_v5  ;;  %v9865_v6 = vadd.f32 %v9864_v20, %v14851_v5  ;;  %v9735_v54 = vpop.f32.mrb[107].mxu0  ;;  %v9866_v23 = vpop.f32.mrb[107].mxu1 }
 0x734   : > { %v9736_v40 = vadd.f32 %v9735_v54, %v14851_v5  ;;  %v9867_v34 = vadd.f32 %v9866_v23, %v14851_v5 }
 0x735   : > { %10815 = vst [vmem:[%s14738_s25 + $0x3e0] sm:$0xff] %v9734_v41  ;;  %10817 = vst [vmem:[%s14738_s25 + $0x3f0] sm:$0xff] %v9865_v6 }
 0x736   : > { %10816 = vst [vmem:[%s14738_s25 + $0x3e8] sm:$0xff] %v9736_v40  ;;  %10818 = vst [vmem:[%s14738_s25 + $0x3f8] sm:$0xff] %v9867_v34  ;;  %v9739_v51 = vpop.f32.mrb[108].mxu0  ;;  %v9870_v7 = vpop.f32.mrb[108].mxu1 }
 0x737   : > { %v9740_v60 = vadd.f32 %v9739_v51, %v14885_v8  ;;  %v9871_v4 = vadd.f32 %v9870_v7, %v14885_v8  ;;  %v9741_v3 = vpop.f32.mrb[109].mxu0  ;;  %v9872_v15 = vpop.f32.mrb[109].mxu1 }
 0x738   : > { %v9742_v43 = vadd.f32 %v9741_v3, %v14885_v8  ;;  %v9873_v27 = vadd.f32 %v9872_v15, %v14885_v8 }
 0x739   : > { %10843 = vst [vmem:[%s14738_s25 + $0x4c0] sm:$0xff] %v9740_v60  ;;  %10845 = vst [vmem:[%s14738_s25 + $0x4d0] sm:$0xff] %v9871_v4 }
 0x73a   : > { %10844 = vst [vmem:[%s14738_s25 + $0x4c8] sm:$0xff] %v9742_v43  ;;  %10846 = vst [vmem:[%s14738_s25 + $0x4d8] sm:$0xff] %v9873_v27  ;;  %v9745_v32 = vpop.f32.mrb[110].mxu0  ;;  %v9876_v52 = vpop.f32.mrb[110].mxu1 }
 0x73b   : > { %v9746_v26 = vadd.f32 %v9745_v32, %v14918_v24  ;;  %v9877_v13 = vadd.f32 %v9876_v52, %v14918_v24  ;;  %v9747_v42 = vpop.f32.mrb[111].mxu0  ;;  %v9878_v44 = vpop.f32.mrb[111].mxu1 }
 0x73c   : > { %v9748_v36 = vadd.f32 %v9747_v42, %v14918_v24  ;;  %v9879_v49 = vadd.f32 %v9878_v44, %v14918_v24 }
 0x73d   : > { %10871 = vst [vmem:[%s14738_s25 + $0x5a0] sm:$0xff] %v9746_v26  ;;  %10873 = vst [vmem:[%s14738_s25 + $0x5b0] sm:$0xff] %v9877_v13 }
 0x73e   : > { %10872 = vst [vmem:[%s14738_s25 + $0x5a8] sm:$0xff] %v9748_v36  ;;  %10874 = vst [vmem:[%s14738_s25 + $0x5b8] sm:$0xff] %v9879_v49  ;;  %v9751_v61 = vpop.f32.mrb[112].mxu0  ;;  %v9882_v35 = vpop.f32.mrb[112].mxu1 }
 0x73f   : > { %v9752_v63 = vadd.f32 %v9751_v61, %v14944_v39  ;;  %v9883_v33 = vadd.f32 %v9882_v35, %v14944_v39  ;;  %v9753_v9 = vpop.f32.mrb[113].mxu0  ;;  %v9884_v22 = vpop.f32.mrb[113].mxu1 }
 0x740   : > { %v9754_v53 = vadd.f32 %v9753_v9, %v14944_v39  ;;  %v9885_v21 = vadd.f32 %v9884_v22, %v14944_v39 }
 0x741   : > { %10899 = vst [vmem:[%s14738_s25 + $0x680] sm:$0xff] %v9752_v63  ;;  %10901 = vst [vmem:[%s14738_s25 + $0x690] sm:$0xff] %v9883_v33 }
 0x742   : > { %10900 = vst [vmem:[%s14738_s25 + $0x688] sm:$0xff] %v9754_v53  ;;  %10902 = vst [vmem:[%s14738_s25 + $0x698] sm:$0xff] %v9885_v21  ;;  %v9757_v1 = vpop.f32.mrb[114].mxu0  ;;  %v9888_v0 = vpop.f32.mrb[114].mxu1 }
 0x743   : > { %v9758_v11 = vadd.f32 %v9757_v1, %v14967_v2  ;;  %v9889_v55 = vadd.f32 %v9888_v0, %v14967_v2  ;;  %v9759_v48 = vpop.f32.mrb[115].mxu0  ;;  %v9890_v62 = vpop.f32.mrb[115].mxu1 }
 0x744   : > { %v9760_v57 = vadd.f32 %v9759_v48, %v14967_v2  ;;  %v9891_v19 = vadd.f32 %v9890_v62, %v14967_v2 }
 0x745   : > { %10927 = vst [vmem:[%s14738_s25 + $0x760] sm:$0xff] %v9758_v11  ;;  %10929 = vst [vmem:[%s14738_s25 + $0x770] sm:$0xff] %v9889_v55 }
 0x746   : > { %10928 = vst [vmem:[%s14738_s25 + $0x768] sm:$0xff] %v9760_v57  ;;  %10930 = vst [vmem:[%s14738_s25 + $0x778] sm:$0xff] %v9891_v19  ;;  %v9763_v56 = vpop.f32.mrb[116].mxu0  ;;  %v9894_v37 = vpop.f32.mrb[116].mxu1 }
 0x747   : > { %v9764_v14 = vadd.f32 %v9763_v56, %v14988_v12  ;;  %v9895_v31 = vadd.f32 %v9894_v37, %v14988_v12  ;;  %v9765_v46 = vpop.f32.mrb[117].mxu0  ;;  %v9896_v38 = vpop.f32.mrb[117].mxu1 }
 0x748   : > { %v9766_v25 = vadd.f32 %v9765_v46, %v14988_v12  ;;  %v9897_v17 = vadd.f32 %v9896_v38, %v14988_v12 }
 0x749   : > { %10955 = vst [vmem:[%s14738_s25 + $0x840] sm:$0xff] %v9764_v14  ;;  %10957 = vst [vmem:[%s14738_s25 + $0x850] sm:$0xff] %v9895_v31 }
 0x74a   : > { %10956 = vst [vmem:[%s14738_s25 + $0x848] sm:$0xff] %v9766_v25  ;;  %10958 = vst [vmem:[%s14738_s25 + $0x858] sm:$0xff] %v9897_v17  ;;  %v9769_v47 = vpop.f32.mrb[118].mxu0  ;;  %v9900_v58 = vpop.f32.mrb[118].mxu1 }
 0x74b   : > { %v9770_v28 = vadd.f32 %v9769_v47, %v15009_v45  ;;  %v9901_v30 = vadd.f32 %v9900_v58, %v15009_v45  ;;  %v9771_v10 = vpop.f32.mrb[119].mxu0  ;;  %v9902_v29 = vpop.f32.mrb[119].mxu1 }
 0x74c   : > { %v9772_v20 = vadd.f32 %v9771_v10, %v15009_v45  ;;  %v9903_v41 = vadd.f32 %v9902_v29, %v15009_v45 }
 0x74d   : > { %10983 = vst [vmem:[%s14738_s25 + $0x920] sm:$0x3] %v9770_v28  ;;  %10985 = vst [vmem:[%s14738_s25 + $0x930] sm:$0x3] %v9901_v30 }
 0x74e   : > { %10984 = vst [vmem:[%s14738_s25 + $0x928] sm:$0x3] %v9772_v20  ;;  %10986 = vst [vmem:[%s14738_s25 + $0x938] sm:$0x3] %v9903_v41  ;;  %v9971_v6 = vpop.f32.mrb[120].mxu0  ;;  %v10102_v54 = vpop.f32.mrb[120].mxu1 }
 0x74f   : > { %v9972_v23 = vadd.f32 %v9971_v6, %v14731_v50  ;;  %v10103_v40 = vadd.f32 %v10102_v54, %v14731_v50  ;;  %v9973_v34 = vpop.f32.mrb[121].mxu0  ;;  %v10104_v51 = vpop.f32.mrb[121].mxu1 }
 0x750   : > { %v9974_v7 = vadd.f32 %v9973_v34, %v14731_v50  ;;  %v10105_v60 = vadd.f32 %v10104_v51, %v14731_v50 }
 0x751   : > { %10707 = vst [vmem:[%s14738_s25 + $0x80] sm:$0xff] %v9972_v23  ;;  %10709 = vst [vmem:[%s14738_s25 + $0x90] sm:$0xff] %v10103_v40 }
 0x752   : > { %10708 = vst [vmem:[%s14738_s25 + $0x88] sm:$0xff] %v9974_v7  ;;  %10710 = vst [vmem:[%s14738_s25 + $0x98] sm:$0xff] %v10105_v60  ;;  %v9977_v4 = vpop.f32.mrb[122].mxu0  ;;  %v10108_v3 = vpop.f32.mrb[122].mxu1 }
 0x753   : > { %v9978_v15 = vadd.f32 %v9977_v4, %v14753_v16  ;;  %v10109_v43 = vadd.f32 %v10108_v3, %v14753_v16  ;;  %v9979_v27 = vpop.f32.mrb[123].mxu0  ;;  %v10110_v32 = vpop.f32.mrb[123].mxu1 }
 0x754   : > { %v9980_v52 = vadd.f32 %v9979_v27, %v14753_v16  ;;  %v10111_v26 = vadd.f32 %v10110_v32, %v14753_v16 }
 0x755   : > { %10735 = vst [vmem:[%s14738_s25 + $0x160] sm:$0xff] %v9978_v15  ;;  %10737 = vst [vmem:[%s14738_s25 + $0x170] sm:$0xff] %v10109_v43 }
 0x756   : > { %10736 = vst [vmem:[%s14738_s25 + $0x168] sm:$0xff] %v9980_v52  ;;  %10738 = vst [vmem:[%s14738_s25 + $0x178] sm:$0xff] %v10111_v26  ;;  %v9983_v13 = vpop.f32.mrb[124].mxu0  ;;  %v10114_v42 = vpop.f32.mrb[124].mxu1 }
 0x757   : > { %v9984_v44 = vadd.f32 %v9983_v13, %v14781_v18  ;;  %v10115_v36 = vadd.f32 %v10114_v42, %v14781_v18  ;;  %v9985_v49 = vpop.f32.mrb[125].mxu0  ;;  %v10116_v61 = vpop.f32.mrb[125].mxu1 }
 0x758   : > { %v9986_v35 = vadd.f32 %v9985_v49, %v14781_v18  ;;  %v10117_v63 = vadd.f32 %v10116_v61, %v14781_v18 }
 0x759   : > { %10763 = vst [vmem:[%s14738_s25 + $0x240] sm:$0xff] %v9984_v44  ;;  %10765 = vst [vmem:[%s14738_s25 + $0x250] sm:$0xff] %v10115_v36 }
 0x75a   : > { %10764 = vst [vmem:[%s14738_s25 + $0x248] sm:$0xff] %v9986_v35  ;;  %10766 = vst [vmem:[%s14738_s25 + $0x258] sm:$0xff] %v10117_v63  ;;  %v9989_v33 = vpop.f32.mrb[126].mxu0  ;;  %v10120_v9 = vpop.f32.mrb[126].mxu1 }
 0x75b   : > { %v9990_v22 = vadd.f32 %v9989_v33, %v14809_v59  ;;  %v10121_v53 = vadd.f32 %v10120_v9, %v14809_v59  ;;  %v9991_v21 = vpop.f32.mrb[127].mxu0  ;;  %v10122_v1 = vpop.f32.mrb[127].mxu1 }
 0x75c   : > { %v9992_v0 = vadd.f32 %v9991_v21, %v14809_v59  ;;  %v10123_v11 = vadd.f32 %v10122_v1, %v14809_v59 }
 0x75d   : > { %10791 = vst [vmem:[%s14738_s25 + $0x320] sm:$0xff] %v9990_v22  ;;  %10793 = vst [vmem:[%s14738_s25 + $0x330] sm:$0xff] %v10121_v53 }
 0x75e   : > { %10792 = vst [vmem:[%s14738_s25 + $0x328] sm:$0xff] %v9992_v0  ;;  %10794 = vst [vmem:[%s14738_s25 + $0x338] sm:$0xff] %v10123_v11  ;;  %v9995_v55 = vpop.f32.mrb[128].mxu0  ;;  %v10126_v48 = vpop.f32.mrb[128].mxu1 }
 0x75f   : > { %v9996_v62 = vadd.f32 %v9995_v55, %v14851_v5  ;;  %v10127_v57 = vadd.f32 %v10126_v48, %v14851_v5  ;;  %v9997_v19 = vpop.f32.mrb[129].mxu0  ;;  %v10128_v56 = vpop.f32.mrb[129].mxu1 }
 0x760   : > { %v9998_v37 = vadd.f32 %v9997_v19, %v14851_v5  ;;  %v10129_v14 = vadd.f32 %v10128_v56, %v14851_v5 }
 0x761   : > { %10819 = vst [vmem:[%s14738_s25 + $0x400] sm:$0xff] %v9996_v62  ;;  %10821 = vst [vmem:[%s14738_s25 + $0x410] sm:$0xff] %v10127_v57 }
 0x762   : > { %10820 = vst [vmem:[%s14738_s25 + $0x408] sm:$0xff] %v9998_v37  ;;  %10822 = vst [vmem:[%s14738_s25 + $0x418] sm:$0xff] %v10129_v14  ;;  %v10001_v31 = vpop.f32.mrb[130].mxu0  ;;  %v10132_v46 = vpop.f32.mrb[130].mxu1 }
 0x763   : > { %v10002_v38 = vadd.f32 %v10001_v31, %v14885_v8  ;;  %v10133_v25 = vadd.f32 %v10132_v46, %v14885_v8  ;;  %v10003_v17 = vpop.f32.mrb[131].mxu0  ;;  %v10134_v47 = vpop.f32.mrb[131].mxu1 }
 0x764   : > { %v10004_v58 = vadd.f32 %v10003_v17, %v14885_v8  ;;  %v10135_v28 = vadd.f32 %v10134_v47, %v14885_v8 }
 0x765   : > { %10847 = vst [vmem:[%s14738_s25 + $0x4e0] sm:$0xff] %v10002_v38  ;;  %10849 = vst [vmem:[%s14738_s25 + $0x4f0] sm:$0xff] %v10133_v25 }
 0x766   : > { %10848 = vst [vmem:[%s14738_s25 + $0x4e8] sm:$0xff] %v10004_v58  ;;  %10850 = vst [vmem:[%s14738_s25 + $0x4f8] sm:$0xff] %v10135_v28  ;;  %v10007_v30 = vpop.f32.mrb[132].mxu0  ;;  %v10138_v10 = vpop.f32.mrb[132].mxu1 }
 0x767   : > { %v10008_v29 = vadd.f32 %v10007_v30, %v14918_v24  ;;  %v10139_v20 = vadd.f32 %v10138_v10, %v14918_v24  ;;  %v10009_v41 = vpop.f32.mrb[133].mxu0  ;;  %v10140_v6 = vpop.f32.mrb[133].mxu1 }
 0x768   : > { %v10010_v54 = vadd.f32 %v10009_v41, %v14918_v24  ;;  %v10141_v23 = vadd.f32 %v10140_v6, %v14918_v24 }
 0x769   : > { %10875 = vst [vmem:[%s14738_s25 + $0x5c0] sm:$0xff] %v10008_v29  ;;  %10877 = vst [vmem:[%s14738_s25 + $0x5d0] sm:$0xff] %v10139_v20 }
 0x76a   : > { %10876 = vst [vmem:[%s14738_s25 + $0x5c8] sm:$0xff] %v10010_v54  ;;  %10878 = vst [vmem:[%s14738_s25 + $0x5d8] sm:$0xff] %v10141_v23  ;;  %v10013_v40 = vpop.f32.mrb[134].mxu0  ;;  %v10144_v34 = vpop.f32.mrb[134].mxu1 }
 0x76b   : > { %v10014_v51 = vadd.f32 %v10013_v40, %v14944_v39  ;;  %v10145_v7 = vadd.f32 %v10144_v34, %v14944_v39  ;;  %v10015_v60 = vpop.f32.mrb[135].mxu0  ;;  %v10146_v4 = vpop.f32.mrb[135].mxu1 }
 0x76c   : > { %v10016_v3 = vadd.f32 %v10015_v60, %v14944_v39  ;;  %v10147_v15 = vadd.f32 %v10146_v4, %v14944_v39 }
 0x76d   : > { %10903 = vst [vmem:[%s14738_s25 + $0x6a0] sm:$0xff] %v10014_v51  ;;  %10905 = vst [vmem:[%s14738_s25 + $0x6b0] sm:$0xff] %v10145_v7 }
 0x76e   : > { %10904 = vst [vmem:[%s14738_s25 + $0x6a8] sm:$0xff] %v10016_v3  ;;  %10906 = vst [vmem:[%s14738_s25 + $0x6b8] sm:$0xff] %v10147_v15  ;;  %v10019_v43 = vpop.f32.mrb[136].mxu0  ;;  %v10150_v27 = vpop.f32.mrb[136].mxu1 }
 0x76f   : > { %v10020_v32 = vadd.f32 %v10019_v43, %v14967_v2  ;;  %v10151_v52 = vadd.f32 %v10150_v27, %v14967_v2  ;;  %v10021_v26 = vpop.f32.mrb[137].mxu0  ;;  %v10152_v13 = vpop.f32.mrb[137].mxu1 }
 0x770   : > { %v10022_v42 = vadd.f32 %v10021_v26, %v14967_v2  ;;  %v10153_v44 = vadd.f32 %v10152_v13, %v14967_v2 }
 0x771   : > { %10931 = vst [vmem:[%s14738_s25 + $0x780] sm:$0xff] %v10020_v32  ;;  %10933 = vst [vmem:[%s14738_s25 + $0x790] sm:$0xff] %v10151_v52 }
 0x772   : > { %10932 = vst [vmem:[%s14738_s25 + $0x788] sm:$0xff] %v10022_v42  ;;  %10934 = vst [vmem:[%s14738_s25 + $0x798] sm:$0xff] %v10153_v44  ;;  %v10025_v36 = vpop.f32.mrb[138].mxu0  ;;  %v10156_v49 = vpop.f32.mrb[138].mxu1 }
 0x773   : > { %v10026_v61 = vadd.f32 %v10025_v36, %v14988_v12  ;;  %v10157_v35 = vadd.f32 %v10156_v49, %v14988_v12  ;;  %v10027_v63 = vpop.f32.mrb[139].mxu0  ;;  %v10158_v33 = vpop.f32.mrb[139].mxu1 }
 0x774   : > { %v10028_v9 = vadd.f32 %v10027_v63, %v14988_v12  ;;  %v10159_v22 = vadd.f32 %v10158_v33, %v14988_v12 }
 0x775   : > { %10959 = vst [vmem:[%s14738_s25 + $0x860] sm:$0xff] %v10026_v61  ;;  %10961 = vst [vmem:[%s14738_s25 + $0x870] sm:$0xff] %v10157_v35 }
 0x776   : > { %10960 = vst [vmem:[%s14738_s25 + $0x868] sm:$0xff] %v10028_v9  ;;  %10962 = vst [vmem:[%s14738_s25 + $0x878] sm:$0xff] %v10159_v22  ;;  %v10031_v53 = vpop.f32.mrb[140].mxu0  ;;  %v10162_v21 = vpop.f32.mrb[140].mxu1 }
 0x777   : > { %v10032_v1 = vadd.f32 %v10031_v53, %v15009_v45  ;;  %v10163_v0 = vadd.f32 %v10162_v21, %v15009_v45  ;;  %v10033_v11 = vpop.f32.mrb[141].mxu0  ;;  %v10164_v55 = vpop.f32.mrb[141].mxu1 }
 0x778   : > { %v10034_v48 = vadd.f32 %v10033_v11, %v15009_v45  ;;  %v10165_v62 = vadd.f32 %v10164_v55, %v15009_v45 }
 0x779   : > { %10987 = vst [vmem:[%s14738_s25 + $0x940] sm:$0x3] %v10032_v1  ;;  %10989 = vst [vmem:[%s14738_s25 + $0x950] sm:$0x3] %v10163_v0 }
 0x77a   : > { %10988 = vst [vmem:[%s14738_s25 + $0x948] sm:$0x3] %v10034_v48  ;;  %10990 = vst [vmem:[%s14738_s25 + $0x958] sm:$0x3] %v10165_v62  ;;  %v10233_v57 = vpop.f32.mrb[142].mxu0  ;;  %v10364_v19 = vpop.f32.mrb[142].mxu1 }
 0x77b   : > { %v10234_v56 = vadd.f32 %v10233_v57, %v14731_v50  ;;  %v10365_v37 = vadd.f32 %v10364_v19, %v14731_v50  ;;  %v10235_v14 = vpop.f32.mrb[143].mxu0  ;;  %v10366_v31 = vpop.f32.mrb[143].mxu1 }
 0x77c   : > { %v10236_v46 = vadd.f32 %v10235_v14, %v14731_v50  ;;  %v10367_v38 = vadd.f32 %v10366_v31, %v14731_v50 }
 0x77d   : > { %10711 = vst [vmem:[%s14738_s25 + $0xa0] sm:$0xff] %v10234_v56  ;;  %10713 = vst [vmem:[%s14738_s25 + $0xb0] sm:$0xff] %v10365_v37 }
 0x77e   : > { %10712 = vst [vmem:[%s14738_s25 + $0xa8] sm:$0xff] %v10236_v46  ;;  %10714 = vst [vmem:[%s14738_s25 + $0xb8] sm:$0xff] %v10367_v38  ;;  %v10239_v25 = vpop.f32.mrb[144].mxu0  ;;  %v10370_v17 = vpop.f32.mrb[144].mxu1 }
 0x77f   : > { %v10240_v47 = vadd.f32 %v10239_v25, %v14753_v16  ;;  %v10371_v58 = vadd.f32 %v10370_v17, %v14753_v16  ;;  %v10241_v28 = vpop.f32.mrb[145].mxu0  ;;  %v10372_v30 = vpop.f32.mrb[145].mxu1 }
 0x780   : > { %v10242_v10 = vadd.f32 %v10241_v28, %v14753_v16  ;;  %v10373_v29 = vadd.f32 %v10372_v30, %v14753_v16 }
 0x781   : > { %10739 = vst [vmem:[%s14738_s25 + $0x180] sm:$0xff] %v10240_v47  ;;  %10741 = vst [vmem:[%s14738_s25 + $0x190] sm:$0xff] %v10371_v58 }
 0x782   : > { %10740 = vst [vmem:[%s14738_s25 + $0x188] sm:$0xff] %v10242_v10  ;;  %10742 = vst [vmem:[%s14738_s25 + $0x198] sm:$0xff] %v10373_v29  ;;  %v10245_v20 = vpop.f32.mrb[146].mxu0  ;;  %v10376_v41 = vpop.f32.mrb[146].mxu1 }
 0x783   : > { %v10246_v6 = vadd.f32 %v10245_v20, %v14781_v18  ;;  %v10377_v54 = vadd.f32 %v10376_v41, %v14781_v18  ;;  %v10247_v23 = vpop.f32.mrb[147].mxu0  ;;  %v10378_v40 = vpop.f32.mrb[147].mxu1 }
 0x784   : > { %v10248_v34 = vadd.f32 %v10247_v23, %v14781_v18  ;;  %v10379_v51 = vadd.f32 %v10378_v40, %v14781_v18 }
 0x785   : > { %10767 = vst [vmem:[%s14738_s25 + $0x260] sm:$0xff] %v10246_v6  ;;  %10769 = vst [vmem:[%s14738_s25 + $0x270] sm:$0xff] %v10377_v54 }
 0x786   : > { %10768 = vst [vmem:[%s14738_s25 + $0x268] sm:$0xff] %v10248_v34  ;;  %10770 = vst [vmem:[%s14738_s25 + $0x278] sm:$0xff] %v10379_v51  ;;  %v10251_v7 = vpop.f32.mrb[148].mxu0  ;;  %v10382_v60 = vpop.f32.mrb[148].mxu1 }
 0x787   : > { %v10252_v4 = vadd.f32 %v10251_v7, %v14809_v59  ;;  %v10383_v3 = vadd.f32 %v10382_v60, %v14809_v59  ;;  %v10253_v15 = vpop.f32.mrb[149].mxu0  ;;  %v10384_v43 = vpop.f32.mrb[149].mxu1 }
 0x788   : > { %v10254_v27 = vadd.f32 %v10253_v15, %v14809_v59  ;;  %v10385_v32 = vadd.f32 %v10384_v43, %v14809_v59 }
 0x789   : > { %10795 = vst [vmem:[%s14738_s25 + $0x340] sm:$0xff] %v10252_v4  ;;  %10797 = vst [vmem:[%s14738_s25 + $0x350] sm:$0xff] %v10383_v3 }
 0x78a   : > { %10796 = vst [vmem:[%s14738_s25 + $0x348] sm:$0xff] %v10254_v27  ;;  %10798 = vst [vmem:[%s14738_s25 + $0x358] sm:$0xff] %v10385_v32  ;;  %v10257_v52 = vpop.f32.mrb[150].mxu0  ;;  %v10388_v26 = vpop.f32.mrb[150].mxu1 }
 0x78b   : > { %v10258_v13 = vadd.f32 %v10257_v52, %v14851_v5  ;;  %v10389_v42 = vadd.f32 %v10388_v26, %v14851_v5  ;;  %v10259_v44 = vpop.f32.mrb[151].mxu0  ;;  %v10390_v36 = vpop.f32.mrb[151].mxu1 }
 0x78c   : > { %v10260_v49 = vadd.f32 %v10259_v44, %v14851_v5  ;;  %v10391_v61 = vadd.f32 %v10390_v36, %v14851_v5 }
 0x78d   : > { %10823 = vst [vmem:[%s14738_s25 + $0x420] sm:$0xff] %v10258_v13  ;;  %10825 = vst [vmem:[%s14738_s25 + $0x430] sm:$0xff] %v10389_v42 }
 0x78e   : > { %10824 = vst [vmem:[%s14738_s25 + $0x428] sm:$0xff] %v10260_v49  ;;  %10826 = vst [vmem:[%s14738_s25 + $0x438] sm:$0xff] %v10391_v61  ;;  %v10263_v35 = vpop.f32.mrb[152].mxu0  ;;  %v10394_v63 = vpop.f32.mrb[152].mxu1 }
 0x78f   : > { %v10264_v33 = vadd.f32 %v10263_v35, %v14885_v8  ;;  %v10395_v9 = vadd.f32 %v10394_v63, %v14885_v8  ;;  %v10265_v22 = vpop.f32.mrb[153].mxu0  ;;  %v10396_v53 = vpop.f32.mrb[153].mxu1 }
 0x790   : > { %v10266_v21 = vadd.f32 %v10265_v22, %v14885_v8  ;;  %v10397_v1 = vadd.f32 %v10396_v53, %v14885_v8 }
 0x791   : > { %10851 = vst [vmem:[%s14738_s25 + $0x500] sm:$0xff] %v10264_v33  ;;  %10853 = vst [vmem:[%s14738_s25 + $0x510] sm:$0xff] %v10395_v9 }
 0x792   : > { %10852 = vst [vmem:[%s14738_s25 + $0x508] sm:$0xff] %v10266_v21  ;;  %10854 = vst [vmem:[%s14738_s25 + $0x518] sm:$0xff] %v10397_v1  ;;  %v10269_v0 = vpop.f32.mrb[154].mxu0  ;;  %v10400_v11 = vpop.f32.mrb[154].mxu1 }
 0x793   : > { %v10270_v55 = vadd.f32 %v10269_v0, %v14918_v24  ;;  %v10401_v48 = vadd.f32 %v10400_v11, %v14918_v24  ;;  %v10271_v62 = vpop.f32.mrb[155].mxu0  ;;  %v10402_v57 = vpop.f32.mrb[155].mxu1 }
 0x794   : > { %v10272_v19 = vadd.f32 %v10271_v62, %v14918_v24  ;;  %v10403_v56 = vadd.f32 %v10402_v57, %v14918_v24 }
 0x795   : > { %10879 = vst [vmem:[%s14738_s25 + $0x5e0] sm:$0xff] %v10270_v55  ;;  %10881 = vst [vmem:[%s14738_s25 + $0x5f0] sm:$0xff] %v10401_v48 }
 0x796   : > { %10880 = vst [vmem:[%s14738_s25 + $0x5e8] sm:$0xff] %v10272_v19  ;;  %10882 = vst [vmem:[%s14738_s25 + $0x5f8] sm:$0xff] %v10403_v56  ;;  %v10275_v37 = vpop.f32.mrb[156].mxu0  ;;  %v10406_v14 = vpop.f32.mrb[156].mxu1 }
 0x797   : > { %v10276_v31 = vadd.f32 %v10275_v37, %v14944_v39  ;;  %v10407_v46 = vadd.f32 %v10406_v14, %v14944_v39  ;;  %v10277_v38 = vpop.f32.mrb[157].mxu0  ;;  %v10408_v25 = vpop.f32.mrb[157].mxu1 }
 0x798   : > { %v10278_v17 = vadd.f32 %v10277_v38, %v14944_v39  ;;  %v10409_v47 = vadd.f32 %v10408_v25, %v14944_v39 }
 0x799   : > { %10907 = vst [vmem:[%s14738_s25 + $0x6c0] sm:$0xff] %v10276_v31  ;;  %10909 = vst [vmem:[%s14738_s25 + $0x6d0] sm:$0xff] %v10407_v46 }
 0x79a   : > { %10908 = vst [vmem:[%s14738_s25 + $0x6c8] sm:$0xff] %v10278_v17  ;;  %10910 = vst [vmem:[%s14738_s25 + $0x6d8] sm:$0xff] %v10409_v47  ;;  %v10281_v58 = vpop.f32.mrb[158].mxu0  ;;  %v10412_v28 = vpop.f32.mrb[158].mxu1 }
 0x79b   : > { %v10282_v30 = vadd.f32 %v10281_v58, %v14967_v2  ;;  %v10413_v10 = vadd.f32 %v10412_v28, %v14967_v2  ;;  %v10283_v29 = vpop.f32.mrb[159].mxu0  ;;  %v10414_v20 = vpop.f32.mrb[159].mxu1 }
 0x79c   : > { %v10284_v41 = vadd.f32 %v10283_v29, %v14967_v2  ;;  %v10415_v6 = vadd.f32 %v10414_v20, %v14967_v2 }
 0x79d   : > { %10935 = vst [vmem:[%s14738_s25 + $0x7a0] sm:$0xff] %v10282_v30  ;;  %10937 = vst [vmem:[%s14738_s25 + $0x7b0] sm:$0xff] %v10413_v10 }
 0x79e   : > { %10936 = vst [vmem:[%s14738_s25 + $0x7a8] sm:$0xff] %v10284_v41  ;;  %10938 = vst [vmem:[%s14738_s25 + $0x7b8] sm:$0xff] %v10415_v6  ;;  %v10287_v54 = vpop.f32.mrb[160].mxu0  ;;  %v10418_v23 = vpop.f32.mrb[160].mxu1 }
 0x79f   : > { %v10288_v40 = vadd.f32 %v10287_v54, %v14988_v12  ;;  %v10419_v34 = vadd.f32 %v10418_v23, %v14988_v12  ;;  %v10289_v51 = vpop.f32.mrb[161].mxu0  ;;  %v10420_v7 = vpop.f32.mrb[161].mxu1 }
 0x7a0   : > { %v10290_v60 = vadd.f32 %v10289_v51, %v14988_v12  ;;  %v10421_v4 = vadd.f32 %v10420_v7, %v14988_v12 }
 0x7a1   : > { %10963 = vst [vmem:[%s14738_s25 + $0x880] sm:$0xff] %v10288_v40  ;;  %10965 = vst [vmem:[%s14738_s25 + $0x890] sm:$0xff] %v10419_v34 }
 0x7a2   : > { %10964 = vst [vmem:[%s14738_s25 + $0x888] sm:$0xff] %v10290_v60  ;;  %10966 = vst [vmem:[%s14738_s25 + $0x898] sm:$0xff] %v10421_v4  ;;  %v10293_v3 = vpop.f32.mrb[162].mxu0  ;;  %v10424_v15 = vpop.f32.mrb[162].mxu1 }
 0x7a3   : > { %v10294_v43 = vadd.f32 %v10293_v3, %v15009_v45  ;;  %v10425_v27 = vadd.f32 %v10424_v15, %v15009_v45  ;;  %v10295_v32 = vpop.f32.mrb[163].mxu0  ;;  %v10426_v52 = vpop.f32.mrb[163].mxu1 }
 0x7a4   : > { %v10296_v26 = vadd.f32 %v10295_v32, %v15009_v45  ;;  %v10427_v13 = vadd.f32 %v10426_v52, %v15009_v45 }
 0x7a5   : > { %10991 = vst [vmem:[%s14738_s25 + $0x960] sm:$0x3] %v10294_v43  ;;  %10993 = vst [vmem:[%s14738_s25 + $0x970] sm:$0x3] %v10425_v27 }
 0x7a6   : > { %10992 = vst [vmem:[%s14738_s25 + $0x968] sm:$0x3] %v10296_v26  ;;  %10994 = vst [vmem:[%s14738_s25 + $0x978] sm:$0x3] %v10427_v13  ;;  %v10495_v42 = vpop.f32.mrb[164].mxu0  ;;  %v10626_v44 = vpop.f32.mrb[164].mxu1 }
 0x7a7   : > { %v10496_v36 = vadd.f32 %v10495_v42, %v14731_v50  ;;  %v10627_v49 = vadd.f32 %v10626_v44, %v14731_v50  ;;  %v10497_v61 = vpop.f32.mrb[165].mxu0  ;;  %v10628_v35 = vpop.f32.mrb[165].mxu1 }
 0x7a8   : > { %v10498_v63 = vadd.f32 %v10497_v61, %v14731_v50  ;;  %v10629_v33 = vadd.f32 %v10628_v35, %v14731_v50 }
 0x7a9   : > { %10715 = vst [vmem:[%s14738_s25 + $0xc0] sm:$0xff] %v10496_v36  ;;  %10717 = vst [vmem:[%s14738_s25 + $0xd0] sm:$0xff] %v10627_v49 }
 0x7aa   : > { %10716 = vst [vmem:[%s14738_s25 + $0xc8] sm:$0xff] %v10498_v63  ;;  %10718 = vst [vmem:[%s14738_s25 + $0xd8] sm:$0xff] %v10629_v33  ;;  %v10501_v9 = vpop.f32.mrb[166].mxu0  ;;  %v10632_v22 = vpop.f32.mrb[166].mxu1 }
 0x7ab   : > { %v10502_v53 = vadd.f32 %v10501_v9, %v14753_v16  ;;  %v10633_v21 = vadd.f32 %v10632_v22, %v14753_v16  ;;  %v10503_v1 = vpop.f32.mrb[167].mxu0  ;;  %v10634_v0 = vpop.f32.mrb[167].mxu1 }
 0x7ac   : > { %v10504_v11 = vadd.f32 %v10503_v1, %v14753_v16  ;;  %v10635_v50 = vadd.f32 %v10634_v0, %v14753_v16 }
 0x7ad   : > { %10743 = vst [vmem:[%s14738_s25 + $0x1a0] sm:$0xff] %v10502_v53  ;;  %10745 = vst [vmem:[%s14738_s25 + $0x1b0] sm:$0xff] %v10633_v21 }
 0x7ae   : > { %10744 = vst [vmem:[%s14738_s25 + $0x1a8] sm:$0xff] %v10504_v11  ;;  %10746 = vst [vmem:[%s14738_s25 + $0x1b8] sm:$0xff] %v10635_v50  ;;  %v10507_v55 = vpop.f32.mrb[168].mxu0  ;;  %v10638_v48 = vpop.f32.mrb[168].mxu1 }
 0x7af   : > { %v10508_v62 = vadd.f32 %v10507_v55, %v14781_v18  ;;  %v10639_v57 = vadd.f32 %v10638_v48, %v14781_v18  ;;  %v10509_v19 = vpop.f32.mrb[169].mxu0  ;;  %v10640_v56 = vpop.f32.mrb[169].mxu1 }
 0x7b0   : > { %v10510_v37 = vadd.f32 %v10509_v19, %v14781_v18  ;;  %v10641_v16 = vadd.f32 %v10640_v56, %v14781_v18 }
 0x7b1   : > { %10771 = vst [vmem:[%s14738_s25 + $0x280] sm:$0xff] %v10508_v62  ;;  %10773 = vst [vmem:[%s14738_s25 + $0x290] sm:$0xff] %v10639_v57 }
 0x7b2   : > { %10772 = vst [vmem:[%s14738_s25 + $0x288] sm:$0xff] %v10510_v37  ;;  %10774 = vst [vmem:[%s14738_s25 + $0x298] sm:$0xff] %v10641_v16  ;;  %v10513_v14 = vpop.f32.mrb[170].mxu0  ;;  %v10644_v31 = vpop.f32.mrb[170].mxu1 }
 0x7b3   : > { %v10514_v46 = vadd.f32 %v10513_v14, %v14809_v59  ;;  %v10645_v38 = vadd.f32 %v10644_v31, %v14809_v59  ;;  %v10515_v25 = vpop.f32.mrb[171].mxu0  ;;  %v10646_v17 = vpop.f32.mrb[171].mxu1 }
 0x7b4   : > { %v10516_v47 = vadd.f32 %v10515_v25, %v14809_v59  ;;  %v10647_v18 = vadd.f32 %v10646_v17, %v14809_v59 }
 0x7b5   : > { %10799 = vst [vmem:[%s14738_s25 + $0x360] sm:$0xff] %v10514_v46  ;;  %10801 = vst [vmem:[%s14738_s25 + $0x370] sm:$0xff] %v10645_v38 }
 0x7b6   : > { %10800 = vst [vmem:[%s14738_s25 + $0x368] sm:$0xff] %v10516_v47  ;;  %10802 = vst [vmem:[%s14738_s25 + $0x378] sm:$0xff] %v10647_v18  ;;  %v10519_v58 = vpop.f32.mrb[172].mxu0  ;;  %v10650_v28 = vpop.f32.mrb[172].mxu1 }
 0x7b7   : > { %v10520_v30 = vadd.f32 %v10519_v58, %v14851_v5  ;;  %v10651_v10 = vadd.f32 %v10650_v28, %v14851_v5  ;;  %v10521_v29 = vpop.f32.mrb[173].mxu0  ;;  %v10652_v20 = vpop.f32.mrb[173].mxu1 }
 0x7b8   : > { %v10522_v41 = vadd.f32 %v10521_v29, %v14851_v5  ;;  %v10653_v59 = vadd.f32 %v10652_v20, %v14851_v5 }
 0x7b9   : > { %10827 = vst [vmem:[%s14738_s25 + $0x440] sm:$0xff] %v10520_v30  ;;  %10829 = vst [vmem:[%s14738_s25 + $0x450] sm:$0xff] %v10651_v10 }
 0x7ba   : > { %10828 = vst [vmem:[%s14738_s25 + $0x448] sm:$0xff] %v10522_v41  ;;  %10830 = vst [vmem:[%s14738_s25 + $0x458] sm:$0xff] %v10653_v59  ;;  %v10525_v6 = vpop.f32.mrb[174].mxu0  ;;  %v10656_v54 = vpop.f32.mrb[174].mxu1 }
 0x7bb   : > { %v10526_v23 = vadd.f32 %v10525_v6, %v14885_v8  ;;  %v10657_v40 = vadd.f32 %v10656_v54, %v14885_v8  ;;  %v10527_v34 = vpop.f32.mrb[175].mxu0  ;;  %v10658_v51 = vpop.f32.mrb[175].mxu1 }
 0x7bc   : > { %v10528_v7 = vadd.f32 %v10527_v34, %v14885_v8  ;;  %v10659_v5 = vadd.f32 %v10658_v51, %v14885_v8 }
 0x7bd   : > { %10855 = vst [vmem:[%s14738_s25 + $0x520] sm:$0xff] %v10526_v23  ;;  %10857 = vst [vmem:[%s14738_s25 + $0x530] sm:$0xff] %v10657_v40 }
 0x7be   : > { %10856 = vst [vmem:[%s14738_s25 + $0x528] sm:$0xff] %v10528_v7  ;;  %10858 = vst [vmem:[%s14738_s25 + $0x538] sm:$0xff] %v10659_v5  ;;  %v10531_v60 = vpop.f32.mrb[176].mxu0  ;;  %v10662_v4 = vpop.f32.mrb[176].mxu1 }
 0x7bf   : > { %v10532_v3 = vadd.f32 %v10531_v60, %v14918_v24  ;;  %v10663_v15 = vadd.f32 %v10662_v4, %v14918_v24  ;;  %v10533_v43 = vpop.f32.mrb[177].mxu0  ;;  %v10664_v27 = vpop.f32.mrb[177].mxu1 }
 0x7c0   : > { %v10534_v32 = vadd.f32 %v10533_v43, %v14918_v24  ;;  %v10665_v8 = vadd.f32 %v10664_v27, %v14918_v24 }
 0x7c1   : > { %10883 = vst [vmem:[%s14738_s25 + $0x600] sm:$0xff] %v10532_v3  ;;  %10885 = vst [vmem:[%s14738_s25 + $0x610] sm:$0xff] %v10663_v15 }
 0x7c2   : > { %10884 = vst [vmem:[%s14738_s25 + $0x608] sm:$0xff] %v10534_v32  ;;  %10886 = vst [vmem:[%s14738_s25 + $0x618] sm:$0xff] %v10665_v8  ;;  %v10537_v52 = vpop.f32.mrb[178].mxu0  ;;  %v10668_v26 = vpop.f32.mrb[178].mxu1 }
 0x7c3   : > { %v10538_v13 = vadd.f32 %v10537_v52, %v14944_v39  ;;  %v10669_v42 = vadd.f32 %v10668_v26, %v14944_v39  ;;  %v10539_v44 = vpop.f32.mrb[179].mxu0  ;;  %v10670_v36 = vpop.f32.mrb[179].mxu1 }
 0x7c4   : > { %v10540_v49 = vadd.f32 %v10539_v44, %v14944_v39  ;;  %v10671_v24 = vadd.f32 %v10670_v36, %v14944_v39 }
 0x7c5   : > { %10911 = vst [vmem:[%s14738_s25 + $0x6e0] sm:$0xff] %v10538_v13  ;;  %10913 = vst [vmem:[%s14738_s25 + $0x6f0] sm:$0xff] %v10669_v42 }
 0x7c6   : > { %10912 = vst [vmem:[%s14738_s25 + $0x6e8] sm:$0xff] %v10540_v49  ;;  %10914 = vst [vmem:[%s14738_s25 + $0x6f8] sm:$0xff] %v10671_v24  ;;  %v10543_v61 = vpop.f32.mrb[180].mxu0  ;;  %v10674_v35 = vpop.f32.mrb[180].mxu1 }
 0x7c7   : > { %v10544_v63 = vadd.f32 %v10543_v61, %v14967_v2  ;;  %v10675_v33 = vadd.f32 %v10674_v35, %v14967_v2  ;;  %v10545_v9 = vpop.f32.mrb[181].mxu0  ;;  %v10676_v22 = vpop.f32.mrb[181].mxu1 }
 0x7c8   : > { %v10546_v53 = vadd.f32 %v10545_v9, %v14967_v2  ;;  %v10677_v39 = vadd.f32 %v10676_v22, %v14967_v2 }
 0x7c9   : > { %10939 = vst [vmem:[%s14738_s25 + $0x7c0] sm:$0xff] %v10544_v63  ;;  %10941 = vst [vmem:[%s14738_s25 + $0x7d0] sm:$0xff] %v10675_v33 }
 0x7ca   : > { %10940 = vst [vmem:[%s14738_s25 + $0x7c8] sm:$0xff] %v10546_v53  ;;  %10942 = vst [vmem:[%s14738_s25 + $0x7d8] sm:$0xff] %v10677_v39  ;;  %v10549_v21 = vpop.f32.mrb[182].mxu0  ;;  %v10680_v1 = vpop.f32.mrb[182].mxu1 }
 0x7cb   : > { %v10550_v0 = vadd.f32 %v10549_v21, %v14988_v12  ;;  %v10681_v11 = vadd.f32 %v10680_v1, %v14988_v12  ;;  %v10551_v50 = vpop.f32.mrb[183].mxu0  ;;  %v10682_v55 = vpop.f32.mrb[183].mxu1 }
 0x7cc   : > { %v10552_v48 = vadd.f32 %v10551_v50, %v14988_v12  ;;  %v10683_v2 = vadd.f32 %v10682_v55, %v14988_v12 }
 0x7cd   : > { %10967 = vst [vmem:[%s14738_s25 + $0x8a0] sm:$0xff] %v10550_v0  ;;  %10969 = vst [vmem:[%s14738_s25 + $0x8b0] sm:$0xff] %v10681_v11 }
 0x7ce   : > { %10968 = vst [vmem:[%s14738_s25 + $0x8a8] sm:$0xff] %v10552_v48  ;;  %10970 = vst [vmem:[%s14738_s25 + $0x8b8] sm:$0xff] %v10683_v2  ;;  %v10555_v62 = vpop.f32.mrb[184].mxu0  ;;  %v10686_v57 = vpop.f32.mrb[184].mxu1 }
 0x7cf   : > { %v10556_v19 = vadd.f32 %v10555_v62, %v15009_v45  ;;  %v10687_v56 = vadd.f32 %v10686_v57, %v15009_v45  ;;  %v10557_v37 = vpop.f32.mrb[185].mxu0  ;;  %v10688_v16 = vpop.f32.mrb[185].mxu1 }
 0x7d0   : > { %v10558_v14 = vadd.f32 %v10557_v37, %v15009_v45  ;;  %v10689_v31 = vadd.f32 %v10688_v16, %v15009_v45 }
 0x7d1   : > { %10995 = vst [vmem:[%s14738_s25 + $0x980] sm:$0x3] %v10556_v19  ;;  %10997 = vst [vmem:[%s14738_s25 + $0x990] sm:$0x3] %v10687_v56 }
 0x7d2   : > { %10996 = vst [vmem:[%s14738_s25 + $0x988] sm:$0x3] %v10558_v14  ;;  %10998 = vst [vmem:[%s14738_s25 + $0x998] sm:$0x3] %v10689_v31 }
 0x7d3 PF: > { %s19_s24 = sadd.s32 1, %s12809_s24  }
 0x7d4   : > { %p16_p9 = scmp.ge.s32.totalorder %s19_s24, 4  }
 0x7d6   :  { %18 = sbr.rel (!%p16_p9) target bundleno = 2 (0x2), region = 95 }
 0x7dd   :  { %11020 = vsyncpa [#allocation3], 1 }
 0x7de   :  { %11022 = vsyncpa [#allocation3 + $0x1], 1 }
 0x7df   :  { %11023 = vsyncpa [#allocation5], 1 }

</bundles_post_ra>
